<compile_context>
chip_gen: v7x
topology: tpu7x:2x2x1
jax: 0.10.0
libtpu: 0.0.40
codegen_flags: <defaults>
</compile_context>

<pallas_src>
import math
import numpy as np
import jax
import jax.numpy as jnp
from jax import lax
from jax.experimental import pallas as pl
from jax.experimental.pallas import tpu as pltpu


_MAP_CONV_LAYER_TO_FILTER_SIZE = {
    4: [[3, 5, 5, 7], [7, 5, 5, 3]],
    3: [[5, 5, 7], [7, 5, 5]],
    2: [[5, 3], [5, 3]],
    1: [[7], [7]],
}

_RB = 8  # aligned sublane offset of the data rows inside every scratch buffer


def build_cnn_params(key, is_increasing, num_layers, filter_counts, max_len_token):
    """Deterministic, in-script parameter init matching the module's shapes."""
    decreasing = 0 if is_increasing else 1
    pool_h = int(np.floor(max_len_token / 2.0))
    layer_cfg, weights, biases = [], [], []
    for i in range(1, num_layers + 1):
        k = _MAP_CONV_LAYER_TO_FILTER_SIZE[num_layers][decreasing][i - 1]
        pad = math.floor(k / 2)
        c_in = 1 if i == 1 else filter_counts[i - 2]
        c_out = filter_counts[i - 1]
        key, kw_, kb_ = jax.random.split(key, 3)
        fan_in = c_in * k * k
        bound = 1.0 / math.sqrt(fan_in)
        w = jax.random.uniform(kw_, (c_out, c_in, k, k), jnp.float32, -bound, bound)
        b = jax.random.uniform(kb_, (c_out,), jnp.float32, -bound, bound)
        weights.append(w)
        biases.append(b)
        layer_cfg.append((c_in, c_out, k, pad))
    key, ka = jax.random.split(key)
    align_w = jax.random.normal(
        ka, (filter_counts[num_layers - 1], pool_h, pool_h), jnp.float32)
    return layer_cfg, weights, biases, align_w


def _make_kernel(layer_cfg, H, W, P, TB, SW, WROW, GB):
    """Kernel for one grid step = GB batch groups, each TB lane-packed strips."""
    L = len(layer_cfg)
    HPOOL, WPOOL = H - 1, WROW - 1
    HB = _RB + H + 8                       # scratch rows: 8 zero rows above/below
    # c_out channel tile keeping live accumulators within ~32 vregs.
    vregs_per_map = (-(-H // 8)) * (WROW // 128)
    co_tile = max(1, 32 // max(1, vregs_per_map))

    def kernel(*args):
        x_ref = args[0]                    # (GB, H+2P, WROW) packed, pre-padded input
        w_refs = args[1:1 + L]             # flattened conv weights (SMEM scalars)
        b_refs = args[1 + L:1 + 2 * L]     # conv biases (SMEM scalars)
        aw_ref = args[1 + 2 * L]           # (C_last, HPOOL, WPOOL) packed align weights
        out_ref = args[2 + 2 * L]          # (GB, 1, 128) per-step output block
        buf_refs = args[3 + 2 * L:]        # VMEM scratch, one per non-last layer

        # ---- per-step constants (hoisted out of the group loop) ------------
        col_ids = lax.broadcasted_iota(jnp.int32, (H, WROW), 1)
        data_col = col_ids < 0
        for t in range(TB):
            data_col = jnp.logical_or(
                data_col,
                (col_ids >= t * SW + P) & (col_ids < t * SW + P + W))
        lane_ids = lax.broadcasted_iota(jnp.int32, (1, 128), 1)

        # Zero only the vertical-padding row bands of the scratch buffers, once
        # per grid step (aligned full-width stores).  Data rows [RB, RB+H) are
        # fully rewritten for every group, so nothing else needs re-zeroing;
        # doing it every step keeps the kernel safe under a megacore-parallel
        # grid.
        for r in buf_refs:
            C = r.shape[0]
            r[:, 0:_RB, :] = jnp.zeros((C, _RB, WROW), jnp.float32)
            r[:, _RB + H:HB, :] = jnp.zeros((C, HB - _RB - H, WROW), jnp.float32)

        def group_body(g):
            xg = x_ref[g]                  # (H+2P, WROW) this group's packed input
            tsum = jnp.zeros((HPOOL, WPOOL), jnp.float32)

            for li, (c_in, c_out, k, p) in enumerate(layer_cfg):
                last = li == L - 1
                kk = k * k
                row0 = P if li == 0 else _RB       # sublane offset of data rows

                for co0 in range(0, c_out, co_tile):
                    co_n = min(co_tile, c_out - co0)
                    # Bias-initialised f32 accumulators (full WROW lane width).
                    accs = [jnp.full((H, WROW), b_refs[li][co0 + j], jnp.float32)
                            for j in range(co_n)]
                    for ci in range(c_in):
                        for kh in range(k):
                            r0 = row0 - p + kh
                            if li == 0:
                                slab = xg[r0:r0 + H, :]                  # (H, WROW)
                            else:
                                slab = buf_refs[li - 1][ci, r0:r0 + H, :]
                            for kw in range(k):
                                # Lane shift with wrap; wrapped junk only lands
                                # on border/dummy lanes that are masked (or
                                # carry zero align weight) downstream.
                                sh = (p - kw) % WROW
                                shifted = slab if sh == 0 else pltpu.roll(
                                    slab, shift=sh, axis=1)
                                for j in range(co_n):
                                    wscal = w_refs[li][
                                        ((co0 + j) * c_in + ci) * kk + kh * k + kw]
                                    accs[j] = accs[j] + wscal * shifted
                    if not last:
                        dst = buf_refs[li]
                        for j in range(co_n):
                            val = jnp.maximum(accs[j], 0.0)
                            val = jnp.where(data_col, val, 0.0)  # zero gaps/borders
                            # Aligned, full-width, unmasked store.
                            dst[co0 + j, _RB:_RB + H, :] = val
                    else:
                        # Fused 2x2 / stride-2 max pool + align-weight
                        # contraction via shifted maxima; aw is nonzero only at
                        # even (h, in-strip w) data positions, so garbage at
                        # border/gap/dummy lanes contributes nothing.
                        for j in range(co_n):
                            a = accs[j]
                            m = jnp.maximum(a[:, 0:WPOOL], a[:, 1:WPOOL + 1])
                            m = jnp.maximum(m[0:HPOOL, :], m[1:HPOOL + 1, :])
                            tsum = tsum + aw_ref[co0 + j] * m

            row = jnp.sum(tsum, axis=0, keepdims=True)           # (1, WPOOL)
            out_row = jnp.zeros((1, 128), jnp.float32)
            for t in range(TB):                                  # per-strip sums
                hi = min((t + 1) * SW, WPOOL)
                s_t = jnp.sum(row[:, t * SW:hi])
                out_row = out_row + jnp.where(lane_ids == t, s_t, 0.0)
            out_ref[g] = out_row                                 # lane-dense row

        if GB == 1:
            group_body(0)
        else:
            pl.loop(0, GB)(group_body)

    return kernel


def cnn_forward_pallas(x, layer_cfg, weights, biases, align_w):
    B, H, W = x.shape
    L = len(layer_cfg)
    c_last = layer_cfg[-1][1]
    P = max(cfg[3] for cfg in layer_cfg)         # widest "same" padding across layers
    SW = W + 2 * P                               # per-batch strip width along lanes
    TB = max(1, 128 // SW)                       # strips packed per group
    WROW = (-(-(TB * SW) // 128)) * 128          # lane width rounded to vreg width
    G = -(-B // TB)                              # number of batch groups
    GB_TARGET = 8                                # groups per grid step (review item 1)
    GB = 1 if G < 2 else min(GB_TARGET, -(-G // 2))   # keep >=2 steps for megacore
    GRID = -(-G // GB)
    Gp = GRID * GB
    Bp = Gp * TB
    HPOOL, WPOOL = H - 1, WROW - 1
    HB = _RB + H + 8

    # ---- wrapper-side layout plumbing: lane-pack zero-padded strips ---------
    xp = jnp.zeros((Bp, H, W), jnp.float32).at[:B].set(x.astype(jnp.float32))
    xp = jnp.pad(xp, ((0, 0), (P, P), (P, P)))                   # (Bp, H+2P, SW)
    xp = xp.reshape(Gp, TB, H + 2 * P, SW).transpose(0, 2, 1, 3)
    xp = xp.reshape(Gp, H + 2 * P, TB * SW)
    x_packed = jnp.pad(xp, ((0, 0), (0, 0), (0, WROW - TB * SW)))  # (Gp, H+2P, WROW)

    # Align weights scattered to the packed pre-pool layout: nonzero only at
    # the even (h, in-strip w) positions of each strip.
    aw_packed = jnp.zeros((c_last, HPOOL, WPOOL), jnp.float32)
    h2, w2 = H // 2, W // 2
    for t in range(TB):
        aw_packed = aw_packed.at[
            :, 0:2 * h2:2, t * SW + P:t * SW + P + 2 * w2:2].set(align_w)

    w_flats = [w.reshape(-1) for w in weights]

    in_specs = [pl.BlockSpec((GB, H + 2 * P, WROW), lambda s: (s, 0, 0))]
    in_specs += [pl.BlockSpec(memory_space=pltpu.MemorySpace.SMEM)
                 for _ in range(2 * L)]
    in_specs += [pl.BlockSpec((c_last, HPOOL, WPOOL), lambda s: (0, 0, 0))]

    scratch = [pltpu.VMEM((c_out, HB, WROW), jnp.float32)
               for (c_in, c_out, k, p) in layer_cfg[:-1]]

    out = pl.pallas_call(
        _make_kernel(layer_cfg, H, W, P, TB, SW, WROW, GB),
        out_shape=jax.ShapeDtypeStruct((Gp, 1, 128), jnp.float32),
        grid_spec=pltpu.PrefetchScalarGridSpec(
            num_scalar_prefetch=0,
            grid=(GRID,),
            in_specs=in_specs,
            out_specs=pl.BlockSpec((GB, 1, 128), lambda s: (s, 0, 0)),
            scratch_shapes=scratch,
        ),
        compiler_params=pltpu.CompilerParams(
            dimension_semantics=("parallel",)),
    )(x_packed, *w_flats, *biases, aw_packed)

    # First TB lanes of each group's output row hold the per-batch scores.
    return out[:, 0, :TB].reshape(Bp, 1)[:B]


def cnn_forward_reference(x, layer_cfg, weights, biases, align_w):
    """Pure-JAX reference mirroring the PyTorch forward (for verification)."""
    B, H, W = x.shape
    y = x[:, None, :, :]
    for li, ((c_in, c_out, k, p), w, b) in enumerate(zip(layer_cfg, weights, biases)):
        if li > 0:
            y = jnp.maximum(y, 0.0)
        y = lax.conv_general_dilated(
            y, w, window_strides=(1, 1), padding=[(p, p), (p, p)],
            dimension_numbers=("NCHW", "OIHW", "NCHW"),
            precision=lax.Precision.HIGHEST) + b[None, :, None, None]
    c_last = layer_cfg[-1][1]
    pooled = y.reshape(B, c_last, H // 2, 2, W // 2, 2).max(axis=(3, 5))
    return jnp.sum(align_w[None] * pooled, axis=(1, 2, 3))[:, None]


if __name__ == "__main__":
    key = jax.random.PRNGKey(0)
    is_increasing = True
    num_layers = 2
    filter_counts = {0: 4, 1: 8}
    max_len_token = 16

    key, kparams = jax.random.split(key)
    layer_cfg, weights, biases, align_w = build_cnn_params(
        kparams, is_increasing, num_layers, filter_counts, max_len_token)

    # B=2: single group / single grid step.  B=13: exercises the multi-group
    # blocking (GB=2), two grid steps (megacore) and batch padding.
    for B in (2, 13):
        key, kx = jax.random.split(key)
        x = jax.random.normal(kx, (B, max_len_token, max_len_token), jnp.float32)
        out = cnn_forward_pallas(x, layer_cfg, weights, biases, align_w)
        out = jax.block_until_ready(out)
        ref = cnn_forward_reference(x, layer_cfg, weights, biases, align_w)
        np.testing.assert_allclose(np.asarray(out), np.asarray(ref),
                                   rtol=1e-3, atol=1e-3)

    print("KERNEL_OK")
</pallas_src>

<mosaic_0001>
module attributes {stable_mosaic.version = 11 : i64} {
  func.func @kernel(%arg0: i32, %arg1: memref<1x20x128xf32, #tpu.memory_space<vmem>>, %arg2: memref<100xf32, #tpu.memory_space<smem>>, %arg3: memref<288xf32, #tpu.memory_space<smem>>, %arg4: memref<4xf32, #tpu.memory_space<smem>>, %arg5: memref<8xf32, #tpu.memory_space<smem>>, %arg6: memref<8x15x127xf32, #tpu.memory_space<vmem>>, %arg7: memref<1x1x128xf32, #tpu.memory_space<vmem>>, %arg8: memref<4x32x128xf32, #tpu.memory_space<vmem>>) attributes {dimension_semantics = [#tpu.dimension_semantics<parallel>], iteration_bounds = array<i64: 1>, scalar_prefetch = 0 : i64, scratch_operands = 1 : i64, tpu.core_type = #tpu.core_type<tc>, window_params = [{transform_indices = @transform_0, window_bounds = array<i64: 1, 20, 128>}, {transform_indices = @transform_1, window_bounds = array<i64: 100>}, {transform_indices = @transform_2, window_bounds = array<i64: 288>}, {transform_indices = @transform_3, window_bounds = array<i64: 4>}, {transform_indices = @transform_4, window_bounds = array<i64: 8>}, {pipeline_mode = #tpu.pipeline_mode<synchronous>, transform_indices = @transform_5, window_bounds = array<i64: 8, 15, 127>}, {transform_indices = @transform_6, window_bounds = array<i64: 1, 1, 128>}]} {
    %0 = tpu.iota {dimensions = array<i32: 1>} : vector<16x128xi32>
    %c0_i32 = arith.constant 0 : i32
    %1 = vector.broadcast %c0_i32 : i32 to vector<16x128xi32>
    %2 = arith.cmpi slt, %0, %1 : vector<16x128xi32>
    %c2_i32 = arith.constant 2 : i32
    %3 = vector.broadcast %c2_i32 : i32 to vector<16x128xi32>
    %4 = arith.cmpi sge, %0, %3 : vector<16x128xi32>
    %c18_i32 = arith.constant 18 : i32
    %5 = vector.broadcast %c18_i32 : i32 to vector<16x128xi32>
    %6 = arith.cmpi slt, %0, %5 : vector<16x128xi32>
    %7 = arith.andi %4, %6 : vector<16x128xi1>
    %8 = arith.ori %2, %7 : vector<16x128xi1>
    %c22_i32 = arith.constant 22 : i32
    %9 = vector.broadcast %c22_i32 : i32 to vector<16x128xi32>
    %10 = arith.cmpi sge, %0, %9 : vector<16x128xi32>
    %c38_i32 = arith.constant 38 : i32
    %11 = vector.broadcast %c38_i32 : i32 to vector<16x128xi32>
    %12 = arith.cmpi slt, %0, %11 : vector<16x128xi32>
    %13 = arith.andi %10, %12 : vector<16x128xi1>
    %14 = arith.ori %8, %13 : vector<16x128xi1>
    %c42_i32 = arith.constant 42 : i32
    %15 = vector.broadcast %c42_i32 : i32 to vector<16x128xi32>
    %16 = arith.cmpi sge, %0, %15 : vector<16x128xi32>
    %c58_i32 = arith.constant 58 : i32
    %17 = vector.broadcast %c58_i32 : i32 to vector<16x128xi32>
    %18 = arith.cmpi slt, %0, %17 : vector<16x128xi32>
    %19 = arith.andi %16, %18 : vector<16x128xi1>
    %20 = arith.ori %14, %19 : vector<16x128xi1>
    %c62_i32 = arith.constant 62 : i32
    %21 = vector.broadcast %c62_i32 : i32 to vector<16x128xi32>
    %22 = arith.cmpi sge, %0, %21 : vector<16x128xi32>
    %c78_i32 = arith.constant 78 : i32
    %23 = vector.broadcast %c78_i32 : i32 to vector<16x128xi32>
    %24 = arith.cmpi slt, %0, %23 : vector<16x128xi32>
    %25 = arith.andi %22, %24 : vector<16x128xi1>
    %26 = arith.ori %20, %25 : vector<16x128xi1>
    %c82_i32 = arith.constant 82 : i32
    %27 = vector.broadcast %c82_i32 : i32 to vector<16x128xi32>
    %28 = arith.cmpi sge, %0, %27 : vector<16x128xi32>
    %c98_i32 = arith.constant 98 : i32
    %29 = vector.broadcast %c98_i32 : i32 to vector<16x128xi32>
    %30 = arith.cmpi slt, %0, %29 : vector<16x128xi32>
    %31 = arith.andi %28, %30 : vector<16x128xi1>
    %32 = arith.ori %26, %31 : vector<16x128xi1>
    %c102_i32 = arith.constant 102 : i32
    %33 = vector.broadcast %c102_i32 : i32 to vector<16x128xi32>
    %34 = arith.cmpi sge, %0, %33 : vector<16x128xi32>
    %c118_i32 = arith.constant 118 : i32
    %35 = vector.broadcast %c118_i32 : i32 to vector<16x128xi32>
    %36 = arith.cmpi slt, %0, %35 : vector<16x128xi32>
    %37 = arith.andi %34, %36 : vector<16x128xi1>
    %38 = arith.ori %32, %37 : vector<16x128xi1>
    %39 = tpu.iota {dimensions = array<i32: 1>} : vector<1x128xi32>
    %cst = arith.constant 0.000000e+00 : f32
    %40 = vector.broadcast %cst : f32 to vector<4x8x128xf32>
    %c0 = arith.constant 0 : index
    %c0_0 = arith.constant 0 : index
    %c0_1 = arith.constant 0 : index
    %41 = vector.load %arg8[%c0, %c0_0, %c0_1] : memref<4x32x128xf32, #tpu.memory_space<vmem>>, vector<4x8x128xf32>
    tpu.vector_store %arg8[%c0, %c0_0, %c0_1], %40 {strides = array<i32>} : memref<4x32x128xf32, #tpu.memory_space<vmem>>, vector<4x8x128xf32>,
    %cst_2 = arith.constant 0.000000e+00 : f32
    %42 = vector.broadcast %cst_2 : f32 to vector<4x8x128xf32>
    %c0_3 = arith.constant 0 : index
    %c24 = arith.constant 24 : index
    %c0_4 = arith.constant 0 : index
    %43 = vector.load %arg8[%c0_3, %c24, %c0_4] : memref<4x32x128xf32, #tpu.memory_space<vmem>>, vector<4x8x128xf32>
    tpu.vector_store %arg8[%c0_3, %c24, %c0_4], %42 {strides = array<i32>} : memref<4x32x128xf32, #tpu.memory_space<vmem>>, vector<4x8x128xf32>,
    %c0_5 = arith.constant 0 : index
    %c0_6 = arith.constant 0 : index
    %c0_7 = arith.constant 0 : index
    %44 = vector.load %arg1[%c0_5, %c0_6, %c0_7] : memref<1x20x128xf32, #tpu.memory_space<vmem>>, vector<1x20x128xf32>
    %45 = vector.shape_cast %44 : vector<1x20x128xf32> to vector<20x128xf32>
    %cst_8 = arith.constant 0.000000e+00 : f32
    %46 = vector.broadcast %cst_8 : f32 to vector<15x127xf32>
    %c0_9 = arith.constant 0 : index
    %47 = memref.load %arg4[%c0_9] : memref<4xf32, #tpu.memory_space<smem>>
    %48 = vector.broadcast %47 : f32 to vector<16x128xf32>
    %c1 = arith.constant 1 : index
    %49 = memref.load %arg4[%c1] : memref<4xf32, #tpu.memory_space<smem>>
    %50 = vector.broadcast %49 : f32 to vector<16x128xf32>
    %c2 = arith.constant 2 : index
    %51 = memref.load %arg4[%c2] : memref<4xf32, #tpu.memory_space<smem>>
    %52 = vector.broadcast %51 : f32 to vector<16x128xf32>
    %c3 = arith.constant 3 : index
    %53 = memref.load %arg4[%c3] : memref<4xf32, #tpu.memory_space<smem>>
    %54 = vector.broadcast %53 : f32 to vector<16x128xf32>
    %55 = vector.extract_strided_slice %45 {offsets = [0, 0], sizes = [16, 128], strides = [1, 1]} : vector<20x128xf32> to vector<16x128xf32>
    %c2_i32_10 = arith.constant 2 : i32
    %56 = tpu.dynamic_rotate %55 by %c2_i32_10 dim 1 : vector<16x128xf32>, i32 -> vector<16x128xf32>
    %c0_11 = arith.constant 0 : index
    %57 = memref.load %arg2[%c0_11] : memref<100xf32, #tpu.memory_space<smem>>
    %58 = vector.broadcast %57 : f32 to vector<16x128xf32>
    %59 = arith.mulf %58, %56 : vector<16x128xf32>
    %60 = arith.addf %48, %59 : vector<16x128xf32>
    %c25 = arith.constant 25 : index
    %61 = memref.load %arg2[%c25] : memref<100xf32, #tpu.memory_space<smem>>
    %62 = vector.broadcast %61 : f32 to vector<16x128xf32>
    %63 = arith.mulf %62, %56 : vector<16x128xf32>
    %64 = arith.addf %50, %63 : vector<16x128xf32>
    %c50 = arith.constant 50 : index
    %65 = memref.load %arg2[%c50] : memref<100xf32, #tpu.memory_space<smem>>
    %66 = vector.broadcast %65 : f32 to vector<16x128xf32>
    %67 = arith.mulf %66, %56 : vector<16x128xf32>
    %68 = arith.addf %52, %67 : vector<16x128xf32>
    %c75 = arith.constant 75 : index
    %69 = memref.load %arg2[%c75] : memref<100xf32, #tpu.memory_space<smem>>
    %70 = vector.broadcast %69 : f32 to vector<16x128xf32>
    %71 = arith.mulf %70, %56 : vector<16x128xf32>
    %72 = arith.addf %54, %71 : vector<16x128xf32>
    %c1_i32 = arith.constant 1 : i32
    %73 = tpu.dynamic_rotate %55 by %c1_i32 dim 1 : vector<16x128xf32>, i32 -> vector<16x128xf32>
    %c1_12 = arith.constant 1 : index
    %74 = memref.load %arg2[%c1_12] : memref<100xf32, #tpu.memory_space<smem>>
    %75 = vector.broadcast %74 : f32 to vector<16x128xf32>
    %76 = arith.mulf %75, %73 : vector<16x128xf32>
    %77 = arith.addf %60, %76 : vector<16x128xf32>
    %c26 = arith.constant 26 : index
    %78 = memref.load %arg2[%c26] : memref<100xf32, #tpu.memory_space<smem>>
    %79 = vector.broadcast %78 : f32 to vector<16x128xf32>
    %80 = arith.mulf %79, %73 : vector<16x128xf32>
    %81 = arith.addf %64, %80 : vector<16x128xf32>
    %c51 = arith.constant 51 : index
    %82 = memref.load %arg2[%c51] : memref<100xf32, #tpu.memory_space<smem>>
    %83 = vector.broadcast %82 : f32 to vector<16x128xf32>
    %84 = arith.mulf %83, %73 : vector<16x128xf32>
    %85 = arith.addf %68, %84 : vector<16x128xf32>
    %c76 = arith.constant 76 : index
    %86 = memref.load %arg2[%c76] : memref<100xf32, #tpu.memory_space<smem>>
    %87 = vector.broadcast %86 : f32 to vector<16x128xf32>
    %88 = arith.mulf %87, %73 : vector<16x128xf32>
    %89 = arith.addf %72, %88 : vector<16x128xf32>
    %c2_13 = arith.constant 2 : index
    %90 = memref.load %arg2[%c2_13] : memref<100xf32, #tpu.memory_space<smem>>
    %91 = vector.broadcast %90 : f32 to vector<16x128xf32>
    %92 = arith.mulf %91, %55 : vector<16x128xf32>
    %93 = arith.addf %77, %92 : vector<16x128xf32>
    %c27 = arith.constant 27 : index
    %94 = memref.load %arg2[%c27] : memref<100xf32, #tpu.memory_space<smem>>
    %95 = vector.broadcast %94 : f32 to vector<16x128xf32>
    %96 = arith.mulf %95, %55 : vector<16x128xf32>
    %97 = arith.addf %81, %96 : vector<16x128xf32>
    %c52 = arith.constant 52 : index
    %98 = memref.load %arg2[%c52] : memref<100xf32, #tpu.memory_space<smem>>
    %99 = vector.broadcast %98 : f32 to vector<16x128xf32>
    %100 = arith.mulf %99, %55 : vector<16x128xf32>
    %101 = arith.addf %85, %100 : vector<16x128xf32>
    %c77 = arith.constant 77 : index
    %102 = memref.load %arg2[%c77] : memref<100xf32, #tpu.memory_space<smem>>
    %103 = vector.broadcast %102 : f32 to vector<16x128xf32>
    %104 = arith.mulf %103, %55 : vector<16x128xf32>
    %105 = arith.addf %89, %104 : vector<16x128xf32>
    %c127_i32 = arith.constant 127 : i32
    %106 = tpu.dynamic_rotate %55 by %c127_i32 dim 1 : vector<16x128xf32>, i32 -> vector<16x128xf32>
    %c3_14 = arith.constant 3 : index
    %107 = memref.load %arg2[%c3_14] : memref<100xf32, #tpu.memory_space<smem>>
    %108 = vector.broadcast %107 : f32 to vector<16x128xf32>
    %109 = arith.mulf %108, %106 : vector<16x128xf32>
    %110 = arith.addf %93, %109 : vector<16x128xf32>
    %c28 = arith.constant 28 : index
    %111 = memref.load %arg2[%c28] : memref<100xf32, #tpu.memory_space<smem>>
    %112 = vector.broadcast %111 : f32 to vector<16x128xf32>
    %113 = arith.mulf %112, %106 : vector<16x128xf32>
    %114 = arith.addf %97, %113 : vector<16x128xf32>
    %c53 = arith.constant 53 : index
    %115 = memref.load %arg2[%c53] : memref<100xf32, #tpu.memory_space<smem>>
    %116 = vector.broadcast %115 : f32 to vector<16x128xf32>
    %117 = arith.mulf %116, %106 : vector<16x128xf32>
    %118 = arith.addf %101, %117 : vector<16x128xf32>
    %c78 = arith.constant 78 : index
    %119 = memref.load %arg2[%c78] : memref<100xf32, #tpu.memory_space<smem>>
    %120 = vector.broadcast %119 : f32 to vector<16x128xf32>
    %121 = arith.mulf %120, %106 : vector<16x128xf32>
    %122 = arith.addf %105, %121 : vector<16x128xf32>
    %c126_i32 = arith.constant 126 : i32
    %123 = tpu.dynamic_rotate %55 by %c126_i32 dim 1 : vector<16x128xf32>, i32 -> vector<16x128xf32>
    %c4 = arith.constant 4 : index
    %124 = memref.load %arg2[%c4] : memref<100xf32, #tpu.memory_space<smem>>
    %125 = vector.broadcast %124 : f32 to vector<16x128xf32>
    %126 = arith.mulf %125, %123 : vector<16x128xf32>
    %127 = arith.addf %110, %126 : vector<16x128xf32>
    %c29 = arith.constant 29 : index
    %128 = memref.load %arg2[%c29] : memref<100xf32, #tpu.memory_space<smem>>
    %129 = vector.broadcast %128 : f32 to vector<16x128xf32>
    %130 = arith.mulf %129, %123 : vector<16x128xf32>
    %131 = arith.addf %114, %130 : vector<16x128xf32>
    %c54 = arith.constant 54 : index
    %132 = memref.load %arg2[%c54] : memref<100xf32, #tpu.memory_space<smem>>
    %133 = vector.broadcast %132 : f32 to vector<16x128xf32>
    %134 = arith.mulf %133, %123 : vector<16x128xf32>
    %135 = arith.addf %118, %134 : vector<16x128xf32>
    %c79 = arith.constant 79 : index
    %136 = memref.load %arg2[%c79] : memref<100xf32, #tpu.memory_space<smem>>
    %137 = vector.broadcast %136 : f32 to vector<16x128xf32>
    %138 = arith.mulf %137, %123 : vector<16x128xf32>
    %139 = arith.addf %122, %138 : vector<16x128xf32>
    %140 = vector.extract_strided_slice %45 {offsets = [1, 0], sizes = [16, 128], strides = [1, 1]} : vector<20x128xf32> to vector<16x128xf32>
    %c2_i32_15 = arith.constant 2 : i32
    %141 = tpu.dynamic_rotate %140 by %c2_i32_15 dim 1 : vector<16x128xf32>, i32 -> vector<16x128xf32>
    %c5 = arith.constant 5 : index
    %142 = memref.load %arg2[%c5] : memref<100xf32, #tpu.memory_space<smem>>
    %143 = vector.broadcast %142 : f32 to vector<16x128xf32>
    %144 = arith.mulf %143, %141 : vector<16x128xf32>
    %145 = arith.addf %127, %144 : vector<16x128xf32>
    %c30 = arith.constant 30 : index
    %146 = memref.load %arg2[%c30] : memref<100xf32, #tpu.memory_space<smem>>
    %147 = vector.broadcast %146 : f32 to vector<16x128xf32>
    %148 = arith.mulf %147, %141 : vector<16x128xf32>
    %149 = arith.addf %131, %148 : vector<16x128xf32>
    %c55 = arith.constant 55 : index
    %150 = memref.load %arg2[%c55] : memref<100xf32, #tpu.memory_space<smem>>
    %151 = vector.broadcast %150 : f32 to vector<16x128xf32>
    %152 = arith.mulf %151, %141 : vector<16x128xf32>
    %153 = arith.addf %135, %152 : vector<16x128xf32>
    %c80 = arith.constant 80 : index
    %154 = memref.load %arg2[%c80] : memref<100xf32, #tpu.memory_space<smem>>
    %155 = vector.broadcast %154 : f32 to vector<16x128xf32>
    %156 = arith.mulf %155, %141 : vector<16x128xf32>
    %157 = arith.addf %139, %156 : vector<16x128xf32>
    %c1_i32_16 = arith.constant 1 : i32
    %158 = tpu.dynamic_rotate %140 by %c1_i32_16 dim 1 : vector<16x128xf32>, i32 -> vector<16x128xf32>
    %c6 = arith.constant 6 : index
    %159 = memref.load %arg2[%c6] : memref<100xf32, #tpu.memory_space<smem>>
    %160 = vector.broadcast %159 : f32 to vector<16x128xf32>
    %161 = arith.mulf %160, %158 : vector<16x128xf32>
    %162 = arith.addf %145, %161 : vector<16x128xf32>
    %c31 = arith.constant 31 : index
    %163 = memref.load %arg2[%c31] : memref<100xf32, #tpu.memory_space<smem>>
    %164 = vector.broadcast %163 : f32 to vector<16x128xf32>
    %165 = arith.mulf %164, %158 : vector<16x128xf32>
    %166 = arith.addf %149, %165 : vector<16x128xf32>
    %c56 = arith.constant 56 : index
    %167 = memref.load %arg2[%c56] : memref<100xf32, #tpu.memory_space<smem>>
    %168 = vector.broadcast %167 : f32 to vector<16x128xf32>
    %169 = arith.mulf %168, %158 : vector<16x128xf32>
    %170 = arith.addf %153, %169 : vector<16x128xf32>
    %c81 = arith.constant 81 : index
    %171 = memref.load %arg2[%c81] : memref<100xf32, #tpu.memory_space<smem>>
    %172 = vector.broadcast %171 : f32 to vector<16x128xf32>
    %173 = arith.mulf %172, %158 : vector<16x128xf32>
    %174 = arith.addf %157, %173 : vector<16x128xf32>
    %c7 = arith.constant 7 : index
    %175 = memref.load %arg2[%c7] : memref<100xf32, #tpu.memory_space<smem>>
    %176 = vector.broadcast %175 : f32 to vector<16x128xf32>
    %177 = arith.mulf %176, %140 : vector<16x128xf32>
    %178 = arith.addf %162, %177 : vector<16x128xf32>
    %c32 = arith.constant 32 : index
    %179 = memref.load %arg2[%c32] : memref<100xf32, #tpu.memory_space<smem>>
    %180 = vector.broadcast %179 : f32 to vector<16x128xf32>
    %181 = arith.mulf %180, %140 : vector<16x128xf32>
    %182 = arith.addf %166, %181 : vector<16x128xf32>
    %c57 = arith.constant 57 : index
    %183 = memref.load %arg2[%c57] : memref<100xf32, #tpu.memory_space<smem>>
    %184 = vector.broadcast %183 : f32 to vector<16x128xf32>
    %185 = arith.mulf %184, %140 : vector<16x128xf32>
    %186 = arith.addf %170, %185 : vector<16x128xf32>
    %c82 = arith.constant 82 : index
    %187 = memref.load %arg2[%c82] : memref<100xf32, #tpu.memory_space<smem>>
    %188 = vector.broadcast %187 : f32 to vector<16x128xf32>
    %189 = arith.mulf %188, %140 : vector<16x128xf32>
    %190 = arith.addf %174, %189 : vector<16x128xf32>
    %c127_i32_17 = arith.constant 127 : i32
    %191 = tpu.dynamic_rotate %140 by %c127_i32_17 dim 1 : vector<16x128xf32>, i32 -> vector<16x128xf32>
    %c8 = arith.constant 8 : index
    %192 = memref.load %arg2[%c8] : memref<100xf32, #tpu.memory_space<smem>>
    %193 = vector.broadcast %192 : f32 to vector<16x128xf32>
    %194 = arith.mulf %193, %191 : vector<16x128xf32>
    %195 = arith.addf %178, %194 : vector<16x128xf32>
    %c33 = arith.constant 33 : index
    %196 = memref.load %arg2[%c33] : memref<100xf32, #tpu.memory_space<smem>>
    %197 = vector.broadcast %196 : f32 to vector<16x128xf32>
    %198 = arith.mulf %197, %191 : vector<16x128xf32>
    %199 = arith.addf %182, %198 : vector<16x128xf32>
    %c58 = arith.constant 58 : index
    %200 = memref.load %arg2[%c58] : memref<100xf32, #tpu.memory_space<smem>>
    %201 = vector.broadcast %200 : f32 to vector<16x128xf32>
    %202 = arith.mulf %201, %191 : vector<16x128xf32>
    %203 = arith.addf %186, %202 : vector<16x128xf32>
    %c83 = arith.constant 83 : index
    %204 = memref.load %arg2[%c83] : memref<100xf32, #tpu.memory_space<smem>>
    %205 = vector.broadcast %204 : f32 to vector<16x128xf32>
    %206 = arith.mulf %205, %191 : vector<16x128xf32>
    %207 = arith.addf %190, %206 : vector<16x128xf32>
    %c126_i32_18 = arith.constant 126 : i32
    %208 = tpu.dynamic_rotate %140 by %c126_i32_18 dim 1 : vector<16x128xf32>, i32 -> vector<16x128xf32>
    %c9 = arith.constant 9 : index
    %209 = memref.load %arg2[%c9] : memref<100xf32, #tpu.memory_space<smem>>
    %210 = vector.broadcast %209 : f32 to vector<16x128xf32>
    %211 = arith.mulf %210, %208 : vector<16x128xf32>
    %212 = arith.addf %195, %211 : vector<16x128xf32>
    %c34 = arith.constant 34 : index
    %213 = memref.load %arg2[%c34] : memref<100xf32, #tpu.memory_space<smem>>
    %214 = vector.broadcast %213 : f32 to vector<16x128xf32>
    %215 = arith.mulf %214, %208 : vector<16x128xf32>
    %216 = arith.addf %199, %215 : vector<16x128xf32>
    %c59 = arith.constant 59 : index
    %217 = memref.load %arg2[%c59] : memref<100xf32, #tpu.memory_space<smem>>
    %218 = vector.broadcast %217 : f32 to vector<16x128xf32>
    %219 = arith.mulf %218, %208 : vector<16x128xf32>
    %220 = arith.addf %203, %219 : vector<16x128xf32>
    %c84 = arith.constant 84 : index
    %221 = memref.load %arg2[%c84] : memref<100xf32, #tpu.memory_space<smem>>
    %222 = vector.broadcast %221 : f32 to vector<16x128xf32>
    %223 = arith.mulf %222, %208 : vector<16x128xf32>
    %224 = arith.addf %207, %223 : vector<16x128xf32>
    %225 = vector.extract_strided_slice %45 {offsets = [2, 0], sizes = [16, 128], strides = [1, 1]} : vector<20x128xf32> to vector<16x128xf32>
    %c2_i32_19 = arith.constant 2 : i32
    %226 = tpu.dynamic_rotate %225 by %c2_i32_19 dim 1 : vector<16x128xf32>, i32 -> vector<16x128xf32>
    %c10 = arith.constant 10 : index
    %227 = memref.load %arg2[%c10] : memref<100xf32, #tpu.memory_space<smem>>
    %228 = vector.broadcast %227 : f32 to vector<16x128xf32>
    %229 = arith.mulf %228, %226 : vector<16x128xf32>
    %230 = arith.addf %212, %229 : vector<16x128xf32>
    %c35 = arith.constant 35 : index
    %231 = memref.load %arg2[%c35] : memref<100xf32, #tpu.memory_space<smem>>
    %232 = vector.broadcast %231 : f32 to vector<16x128xf32>
    %233 = arith.mulf %232, %226 : vector<16x128xf32>
    %234 = arith.addf %216, %233 : vector<16x128xf32>
    %c60 = arith.constant 60 : index
    %235 = memref.load %arg2[%c60] : memref<100xf32, #tpu.memory_space<smem>>
    %236 = vector.broadcast %235 : f32 to vector<16x128xf32>
    %237 = arith.mulf %236, %226 : vector<16x128xf32>
    %238 = arith.addf %220, %237 : vector<16x128xf32>
    %c85 = arith.constant 85 : index
    %239 = memref.load %arg2[%c85] : memref<100xf32, #tpu.memory_space<smem>>
    %240 = vector.broadcast %239 : f32 to vector<16x128xf32>
    %241 = arith.mulf %240, %226 : vector<16x128xf32>
    %242 = arith.addf %224, %241 : vector<16x128xf32>
    %c1_i32_20 = arith.constant 1 : i32
    %243 = tpu.dynamic_rotate %225 by %c1_i32_20 dim 1 : vector<16x128xf32>, i32 -> vector<16x128xf32>
    %c11 = arith.constant 11 : index
    %244 = memref.load %arg2[%c11] : memref<100xf32, #tpu.memory_space<smem>>
    %245 = vector.broadcast %244 : f32 to vector<16x128xf32>
    %246 = arith.mulf %245, %243 : vector<16x128xf32>
    %247 = arith.addf %230, %246 : vector<16x128xf32>
    %c36 = arith.constant 36 : index
    %248 = memref.load %arg2[%c36] : memref<100xf32, #tpu.memory_space<smem>>
    %249 = vector.broadcast %248 : f32 to vector<16x128xf32>
    %250 = arith.mulf %249, %243 : vector<16x128xf32>
    %251 = arith.addf %234, %250 : vector<16x128xf32>
    %c61 = arith.constant 61 : index
    %252 = memref.load %arg2[%c61] : memref<100xf32, #tpu.memory_space<smem>>
    %253 = vector.broadcast %252 : f32 to vector<16x128xf32>
    %254 = arith.mulf %253, %243 : vector<16x128xf32>
    %255 = arith.addf %238, %254 : vector<16x128xf32>
    %c86 = arith.constant 86 : index
    %256 = memref.load %arg2[%c86] : memref<100xf32, #tpu.memory_space<smem>>
    %257 = vector.broadcast %256 : f32 to vector<16x128xf32>
    %258 = arith.mulf %257, %243 : vector<16x128xf32>
    %259 = arith.addf %242, %258 : vector<16x128xf32>
    %c12 = arith.constant 12 : index
    %260 = memref.load %arg2[%c12] : memref<100xf32, #tpu.memory_space<smem>>
    %261 = vector.broadcast %260 : f32 to vector<16x128xf32>
    %262 = arith.mulf %261, %225 : vector<16x128xf32>
    %263 = arith.addf %247, %262 : vector<16x128xf32>
    %c37 = arith.constant 37 : index
    %264 = memref.load %arg2[%c37] : memref<100xf32, #tpu.memory_space<smem>>
    %265 = vector.broadcast %264 : f32 to vector<16x128xf32>
    %266 = arith.mulf %265, %225 : vector<16x128xf32>
    %267 = arith.addf %251, %266 : vector<16x128xf32>
    %c62 = arith.constant 62 : index
    %268 = memref.load %arg2[%c62] : memref<100xf32, #tpu.memory_space<smem>>
    %269 = vector.broadcast %268 : f32 to vector<16x128xf32>
    %270 = arith.mulf %269, %225 : vector<16x128xf32>
    %271 = arith.addf %255, %270 : vector<16x128xf32>
    %c87 = arith.constant 87 : index
    %272 = memref.load %arg2[%c87] : memref<100xf32, #tpu.memory_space<smem>>
    %273 = vector.broadcast %272 : f32 to vector<16x128xf32>
    %274 = arith.mulf %273, %225 : vector<16x128xf32>
    %275 = arith.addf %259, %274 : vector<16x128xf32>
    %c127_i32_21 = arith.constant 127 : i32
    %276 = tpu.dynamic_rotate %225 by %c127_i32_21 dim 1 : vector<16x128xf32>, i32 -> vector<16x128xf32>
    %c13 = arith.constant 13 : index
    %277 = memref.load %arg2[%c13] : memref<100xf32, #tpu.memory_space<smem>>
    %278 = vector.broadcast %277 : f32 to vector<16x128xf32>
    %279 = arith.mulf %278, %276 : vector<16x128xf32>
    %280 = arith.addf %263, %279 : vector<16x128xf32>
    %c38 = arith.constant 38 : index
    %281 = memref.load %arg2[%c38] : memref<100xf32, #tpu.memory_space<smem>>
    %282 = vector.broadcast %281 : f32 to vector<16x128xf32>
    %283 = arith.mulf %282, %276 : vector<16x128xf32>
    %284 = arith.addf %267, %283 : vector<16x128xf32>
    %c63 = arith.constant 63 : index
    %285 = memref.load %arg2[%c63] : memref<100xf32, #tpu.memory_space<smem>>
    %286 = vector.broadcast %285 : f32 to vector<16x128xf32>
    %287 = arith.mulf %286, %276 : vector<16x128xf32>
    %288 = arith.addf %271, %287 : vector<16x128xf32>
    %c88 = arith.constant 88 : index
    %289 = memref.load %arg2[%c88] : memref<100xf32, #tpu.memory_space<smem>>
    %290 = vector.broadcast %289 : f32 to vector<16x128xf32>
    %291 = arith.mulf %290, %276 : vector<16x128xf32>
    %292 = arith.addf %275, %291 : vector<16x128xf32>
    %c126_i32_22 = arith.constant 126 : i32
    %293 = tpu.dynamic_rotate %225 by %c126_i32_22 dim 1 : vector<16x128xf32>, i32 -> vector<16x128xf32>
    %c14 = arith.constant 14 : index
    %294 = memref.load %arg2[%c14] : memref<100xf32, #tpu.memory_space<smem>>
    %295 = vector.broadcast %294 : f32 to vector<16x128xf32>
    %296 = arith.mulf %295, %293 : vector<16x128xf32>
    %297 = arith.addf %280, %296 : vector<16x128xf32>
    %c39 = arith.constant 39 : index
    %298 = memref.load %arg2[%c39] : memref<100xf32, #tpu.memory_space<smem>>
    %299 = vector.broadcast %298 : f32 to vector<16x128xf32>
    %300 = arith.mulf %299, %293 : vector<16x128xf32>
    %301 = arith.addf %284, %300 : vector<16x128xf32>
    %c64 = arith.constant 64 : index
    %302 = memref.load %arg2[%c64] : memref<100xf32, #tpu.memory_space<smem>>
    %303 = vector.broadcast %302 : f32 to vector<16x128xf32>
    %304 = arith.mulf %303, %293 : vector<16x128xf32>
    %305 = arith.addf %288, %304 : vector<16x128xf32>
    %c89 = arith.constant 89 : index
    %306 = memref.load %arg2[%c89] : memref<100xf32, #tpu.memory_space<smem>>
    %307 = vector.broadcast %306 : f32 to vector<16x128xf32>
    %308 = arith.mulf %307, %293 : vector<16x128xf32>
    %309 = arith.addf %292, %308 : vector<16x128xf32>
    %310 = vector.extract_strided_slice %45 {offsets = [3, 0], sizes = [16, 128], strides = [1, 1]} : vector<20x128xf32> to vector<16x128xf32>
    %c2_i32_23 = arith.constant 2 : i32
    %311 = tpu.dynamic_rotate %310 by %c2_i32_23 dim 1 : vector<16x128xf32>, i32 -> vector<16x128xf32>
    %c15 = arith.constant 15 : index
    %312 = memref.load %arg2[%c15] : memref<100xf32, #tpu.memory_space<smem>>
    %313 = vector.broadcast %312 : f32 to vector<16x128xf32>
    %314 = arith.mulf %313, %311 : vector<16x128xf32>
    %315 = arith.addf %297, %314 : vector<16x128xf32>
    %c40 = arith.constant 40 : index
    %316 = memref.load %arg2[%c40] : memref<100xf32, #tpu.memory_space<smem>>
    %317 = vector.broadcast %316 : f32 to vector<16x128xf32>
    %318 = arith.mulf %317, %311 : vector<16x128xf32>
    %319 = arith.addf %301, %318 : vector<16x128xf32>
    %c65 = arith.constant 65 : index
    %320 = memref.load %arg2[%c65] : memref<100xf32, #tpu.memory_space<smem>>
    %321 = vector.broadcast %320 : f32 to vector<16x128xf32>
    %322 = arith.mulf %321, %311 : vector<16x128xf32>
    %323 = arith.addf %305, %322 : vector<16x128xf32>
    %c90 = arith.constant 90 : index
    %324 = memref.load %arg2[%c90] : memref<100xf32, #tpu.memory_space<smem>>
    %325 = vector.broadcast %324 : f32 to vector<16x128xf32>
    %326 = arith.mulf %325, %311 : vector<16x128xf32>
    %327 = arith.addf %309, %326 : vector<16x128xf32>
    %c1_i32_24 = arith.constant 1 : i32
    %328 = tpu.dynamic_rotate %310 by %c1_i32_24 dim 1 : vector<16x128xf32>, i32 -> vector<16x128xf32>
    %c16 = arith.constant 16 : index
    %329 = memref.load %arg2[%c16] : memref<100xf32, #tpu.memory_space<smem>>
    %330 = vector.broadcast %329 : f32 to vector<16x128xf32>
    %331 = arith.mulf %330, %328 : vector<16x128xf32>
    %332 = arith.addf %315, %331 : vector<16x128xf32>
    %c41 = arith.constant 41 : index
    %333 = memref.load %arg2[%c41] : memref<100xf32, #tpu.memory_space<smem>>
    %334 = vector.broadcast %333 : f32 to vector<16x128xf32>
    %335 = arith.mulf %334, %328 : vector<16x128xf32>
    %336 = arith.addf %319, %335 : vector<16x128xf32>
    %c66 = arith.constant 66 : index
    %337 = memref.load %arg2[%c66] : memref<100xf32, #tpu.memory_space<smem>>
    %338 = vector.broadcast %337 : f32 to vector<16x128xf32>
    %339 = arith.mulf %338, %328 : vector<16x128xf32>
    %340 = arith.addf %323, %339 : vector<16x128xf32>
    %c91 = arith.constant 91 : index
    %341 = memref.load %arg2[%c91] : memref<100xf32, #tpu.memory_space<smem>>
    %342 = vector.broadcast %341 : f32 to vector<16x128xf32>
    %343 = arith.mulf %342, %328 : vector<16x128xf32>
    %344 = arith.addf %327, %343 : vector<16x128xf32>
    %c17 = arith.constant 17 : index
    %345 = memref.load %arg2[%c17] : memref<100xf32, #tpu.memory_space<smem>>
    %346 = vector.broadcast %345 : f32 to vector<16x128xf32>
    %347 = arith.mulf %346, %310 : vector<16x128xf32>
    %348 = arith.addf %332, %347 : vector<16x128xf32>
    %c42 = arith.constant 42 : index
    %349 = memref.load %arg2[%c42] : memref<100xf32, #tpu.memory_space<smem>>
    %350 = vector.broadcast %349 : f32 to vector<16x128xf32>
    %351 = arith.mulf %350, %310 : vector<16x128xf32>
    %352 = arith.addf %336, %351 : vector<16x128xf32>
    %c67 = arith.constant 67 : index
    %353 = memref.load %arg2[%c67] : memref<100xf32, #tpu.memory_space<smem>>
    %354 = vector.broadcast %353 : f32 to vector<16x128xf32>
    %355 = arith.mulf %354, %310 : vector<16x128xf32>
    %356 = arith.addf %340, %355 : vector<16x128xf32>
    %c92 = arith.constant 92 : index
    %357 = memref.load %arg2[%c92] : memref<100xf32, #tpu.memory_space<smem>>
    %358 = vector.broadcast %357 : f32 to vector<16x128xf32>
    %359 = arith.mulf %358, %310 : vector<16x128xf32>
    %360 = arith.addf %344, %359 : vector<16x128xf32>
    %c127_i32_25 = arith.constant 127 : i32
    %361 = tpu.dynamic_rotate %310 by %c127_i32_25 dim 1 : vector<16x128xf32>, i32 -> vector<16x128xf32>
    %c18 = arith.constant 18 : index
    %362 = memref.load %arg2[%c18] : memref<100xf32, #tpu.memory_space<smem>>
    %363 = vector.broadcast %362 : f32 to vector<16x128xf32>
    %364 = arith.mulf %363, %361 : vector<16x128xf32>
    %365 = arith.addf %348, %364 : vector<16x128xf32>
    %c43 = arith.constant 43 : index
    %366 = memref.load %arg2[%c43] : memref<100xf32, #tpu.memory_space<smem>>
    %367 = vector.broadcast %366 : f32 to vector<16x128xf32>
    %368 = arith.mulf %367, %361 : vector<16x128xf32>
    %369 = arith.addf %352, %368 : vector<16x128xf32>
    %c68 = arith.constant 68 : index
    %370 = memref.load %arg2[%c68] : memref<100xf32, #tpu.memory_space<smem>>
    %371 = vector.broadcast %370 : f32 to vector<16x128xf32>
    %372 = arith.mulf %371, %361 : vector<16x128xf32>
    %373 = arith.addf %356, %372 : vector<16x128xf32>
    %c93 = arith.constant 93 : index
    %374 = memref.load %arg2[%c93] : memref<100xf32, #tpu.memory_space<smem>>
    %375 = vector.broadcast %374 : f32 to vector<16x128xf32>
    %376 = arith.mulf %375, %361 : vector<16x128xf32>
    %377 = arith.addf %360, %376 : vector<16x128xf32>
    %c126_i32_26 = arith.constant 126 : i32
    %378 = tpu.dynamic_rotate %310 by %c126_i32_26 dim 1 : vector<16x128xf32>, i32 -> vector<16x128xf32>
    %c19 = arith.constant 19 : index
    %379 = memref.load %arg2[%c19] : memref<100xf32, #tpu.memory_space<smem>>
    %380 = vector.broadcast %379 : f32 to vector<16x128xf32>
    %381 = arith.mulf %380, %378 : vector<16x128xf32>
    %382 = arith.addf %365, %381 : vector<16x128xf32>
    %c44 = arith.constant 44 : index
    %383 = memref.load %arg2[%c44] : memref<100xf32, #tpu.memory_space<smem>>
    %384 = vector.broadcast %383 : f32 to vector<16x128xf32>
    %385 = arith.mulf %384, %378 : vector<16x128xf32>
    %386 = arith.addf %369, %385 : vector<16x128xf32>
    %c69 = arith.constant 69 : index
    %387 = memref.load %arg2[%c69] : memref<100xf32, #tpu.memory_space<smem>>
    %388 = vector.broadcast %387 : f32 to vector<16x128xf32>
    %389 = arith.mulf %388, %378 : vector<16x128xf32>
    %390 = arith.addf %373, %389 : vector<16x128xf32>
    %c94 = arith.constant 94 : index
    %391 = memref.load %arg2[%c94] : memref<100xf32, #tpu.memory_space<smem>>
    %392 = vector.broadcast %391 : f32 to vector<16x128xf32>
    %393 = arith.mulf %392, %378 : vector<16x128xf32>
    %394 = arith.addf %377, %393 : vector<16x128xf32>
    %395 = vector.extract_strided_slice %45 {offsets = [4, 0], sizes = [16, 128], strides = [1, 1]} : vector<20x128xf32> to vector<16x128xf32>
    %c2_i32_27 = arith.constant 2 : i32
    %396 = tpu.dynamic_rotate %395 by %c2_i32_27 dim 1 : vector<16x128xf32>, i32 -> vector<16x128xf32>
    %c20 = arith.constant 20 : index
    %397 = memref.load %arg2[%c20] : memref<100xf32, #tpu.memory_space<smem>>
    %398 = vector.broadcast %397 : f32 to vector<16x128xf32>
    %399 = arith.mulf %398, %396 : vector<16x128xf32>
    %400 = arith.addf %382, %399 : vector<16x128xf32>
    %c45 = arith.constant 45 : index
    %401 = memref.load %arg2[%c45] : memref<100xf32, #tpu.memory_space<smem>>
    %402 = vector.broadcast %401 : f32 to vector<16x128xf32>
    %403 = arith.mulf %402, %396 : vector<16x128xf32>
    %404 = arith.addf %386, %403 : vector<16x128xf32>
    %c70 = arith.constant 70 : index
    %405 = memref.load %arg2[%c70] : memref<100xf32, #tpu.memory_space<smem>>
    %406 = vector.broadcast %405 : f32 to vector<16x128xf32>
    %407 = arith.mulf %406, %396 : vector<16x128xf32>
    %408 = arith.addf %390, %407 : vector<16x128xf32>
    %c95 = arith.constant 95 : index
    %409 = memref.load %arg2[%c95] : memref<100xf32, #tpu.memory_space<smem>>
    %410 = vector.broadcast %409 : f32 to vector<16x128xf32>
    %411 = arith.mulf %410, %396 : vector<16x128xf32>
    %412 = arith.addf %394, %411 : vector<16x128xf32>
    %c1_i32_28 = arith.constant 1 : i32
    %413 = tpu.dynamic_rotate %395 by %c1_i32_28 dim 1 : vector<16x128xf32>, i32 -> vector<16x128xf32>
    %c21 = arith.constant 21 : index
    %414 = memref.load %arg2[%c21] : memref<100xf32, #tpu.memory_space<smem>>
    %415 = vector.broadcast %414 : f32 to vector<16x128xf32>
    %416 = arith.mulf %415, %413 : vector<16x128xf32>
    %417 = arith.addf %400, %416 : vector<16x128xf32>
    %c46 = arith.constant 46 : index
    %418 = memref.load %arg2[%c46] : memref<100xf32, #tpu.memory_space<smem>>
    %419 = vector.broadcast %418 : f32 to vector<16x128xf32>
    %420 = arith.mulf %419, %413 : vector<16x128xf32>
    %421 = arith.addf %404, %420 : vector<16x128xf32>
    %c71 = arith.constant 71 : index
    %422 = memref.load %arg2[%c71] : memref<100xf32, #tpu.memory_space<smem>>
    %423 = vector.broadcast %422 : f32 to vector<16x128xf32>
    %424 = arith.mulf %423, %413 : vector<16x128xf32>
    %425 = arith.addf %408, %424 : vector<16x128xf32>
    %c96 = arith.constant 96 : index
    %426 = memref.load %arg2[%c96] : memref<100xf32, #tpu.memory_space<smem>>
    %427 = vector.broadcast %426 : f32 to vector<16x128xf32>
    %428 = arith.mulf %427, %413 : vector<16x128xf32>
    %429 = arith.addf %412, %428 : vector<16x128xf32>
    %c22 = arith.constant 22 : index
    %430 = memref.load %arg2[%c22] : memref<100xf32, #tpu.memory_space<smem>>
    %431 = vector.broadcast %430 : f32 to vector<16x128xf32>
    %432 = arith.mulf %431, %395 : vector<16x128xf32>
    %433 = arith.addf %417, %432 : vector<16x128xf32>
    %c47 = arith.constant 47 : index
    %434 = memref.load %arg2[%c47] : memref<100xf32, #tpu.memory_space<smem>>
    %435 = vector.broadcast %434 : f32 to vector<16x128xf32>
    %436 = arith.mulf %435, %395 : vector<16x128xf32>
    %437 = arith.addf %421, %436 : vector<16x128xf32>
    %c72 = arith.constant 72 : index
    %438 = memref.load %arg2[%c72] : memref<100xf32, #tpu.memory_space<smem>>
    %439 = vector.broadcast %438 : f32 to vector<16x128xf32>
    %440 = arith.mulf %439, %395 : vector<16x128xf32>
    %441 = arith.addf %425, %440 : vector<16x128xf32>
    %c97 = arith.constant 97 : index
    %442 = memref.load %arg2[%c97] : memref<100xf32, #tpu.memory_space<smem>>
    %443 = vector.broadcast %442 : f32 to vector<16x128xf32>
    %444 = arith.mulf %443, %395 : vector<16x128xf32>
    %445 = arith.addf %429, %444 : vector<16x128xf32>
    %c127_i32_29 = arith.constant 127 : i32
    %446 = tpu.dynamic_rotate %395 by %c127_i32_29 dim 1 : vector<16x128xf32>, i32 -> vector<16x128xf32>
    %c23 = arith.constant 23 : index
    %447 = memref.load %arg2[%c23] : memref<100xf32, #tpu.memory_space<smem>>
    %448 = vector.broadcast %447 : f32 to vector<16x128xf32>
    %449 = arith.mulf %448, %446 : vector<16x128xf32>
    %450 = arith.addf %433, %449 : vector<16x128xf32>
    %c48 = arith.constant 48 : index
    %451 = memref.load %arg2[%c48] : memref<100xf32, #tpu.memory_space<smem>>
    %452 = vector.broadcast %451 : f32 to vector<16x128xf32>
    %453 = arith.mulf %452, %446 : vector<16x128xf32>
    %454 = arith.addf %437, %453 : vector<16x128xf32>
    %c73 = arith.constant 73 : index
    %455 = memref.load %arg2[%c73] : memref<100xf32, #tpu.memory_space<smem>>
    %456 = vector.broadcast %455 : f32 to vector<16x128xf32>
    %457 = arith.mulf %456, %446 : vector<16x128xf32>
    %458 = arith.addf %441, %457 : vector<16x128xf32>
    %c98 = arith.constant 98 : index
    %459 = memref.load %arg2[%c98] : memref<100xf32, #tpu.memory_space<smem>>
    %460 = vector.broadcast %459 : f32 to vector<16x128xf32>
    %461 = arith.mulf %460, %446 : vector<16x128xf32>
    %462 = arith.addf %445, %461 : vector<16x128xf32>
    %c126_i32_30 = arith.constant 126 : i32
    %463 = tpu.dynamic_rotate %395 by %c126_i32_30 dim 1 : vector<16x128xf32>, i32 -> vector<16x128xf32>
    %c24_31 = arith.constant 24 : index
    %464 = memref.load %arg2[%c24_31] : memref<100xf32, #tpu.memory_space<smem>>
    %465 = vector.broadcast %464 : f32 to vector<16x128xf32>
    %466 = arith.mulf %465, %463 : vector<16x128xf32>
    %467 = arith.addf %450, %466 : vector<16x128xf32>
    %c49 = arith.constant 49 : index
    %468 = memref.load %arg2[%c49] : memref<100xf32, #tpu.memory_space<smem>>
    %469 = vector.broadcast %468 : f32 to vector<16x128xf32>
    %470 = arith.mulf %469, %463 : vector<16x128xf32>
    %471 = arith.addf %454, %470 : vector<16x128xf32>
    %c74 = arith.constant 74 : index
    %472 = memref.load %arg2[%c74] : memref<100xf32, #tpu.memory_space<smem>>
    %473 = vector.broadcast %472 : f32 to vector<16x128xf32>
    %474 = arith.mulf %473, %463 : vector<16x128xf32>
    %475 = arith.addf %458, %474 : vector<16x128xf32>
    %c99 = arith.constant 99 : index
    %476 = memref.load %arg2[%c99] : memref<100xf32, #tpu.memory_space<smem>>
    %477 = vector.broadcast %476 : f32 to vector<16x128xf32>
    %478 = arith.mulf %477, %463 : vector<16x128xf32>
    %479 = arith.addf %462, %478 : vector<16x128xf32>
    %cst_32 = arith.constant 0.000000e+00 : f32
    %480 = vector.broadcast %cst_32 : f32 to vector<16x128xf32>
    %481 = arith.maximumf %467, %480 : vector<16x128xf32>
    %cst_33 = arith.constant 0.000000e+00 : f32
    %482 = vector.broadcast %cst_33 : f32 to vector<16x128xf32>
    %483 = arith.select %38, %481, %482 : vector<16x128xi1>, vector<16x128xf32>
    %c0_34 = arith.constant 0 : index
    %c8_35 = arith.constant 8 : index
    %c0_36 = arith.constant 0 : index
    %484 = vector.load %arg8[%c0_34, %c8_35, %c0_36] : memref<4x32x128xf32, #tpu.memory_space<vmem>>, vector<1x16x128xf32>
    %485 = vector.shape_cast %484 : vector<1x16x128xf32> to vector<16x128xf32>
    %486 = vector.shape_cast %483 : vector<16x128xf32> to vector<1x16x128xf32>
    tpu.vector_store %arg8[%c0_34, %c8_35, %c0_36], %486 {strides = array<i32>} : memref<4x32x128xf32, #tpu.memory_space<vmem>>, vector<1x16x128xf32>,
    %cst_37 = arith.constant 0.000000e+00 : f32
    %487 = vector.broadcast %cst_37 : f32 to vector<16x128xf32>
    %488 = arith.maximumf %471, %487 : vector<16x128xf32>
    %cst_38 = arith.constant 0.000000e+00 : f32
    %489 = vector.broadcast %cst_38 : f32 to vector<16x128xf32>
    %490 = arith.select %38, %488, %489 : vector<16x128xi1>, vector<16x128xf32>
    %c1_39 = arith.constant 1 : index
    %c8_40 = arith.constant 8 : index
    %c0_41 = arith.constant 0 : index
    %491 = vector.load %arg8[%c1_39, %c8_40, %c0_41] : memref<4x32x128xf32, #tpu.memory_space<vmem>>, vector<1x16x128xf32>
    %492 = vector.shape_cast %491 : vector<1x16x128xf32> to vector<16x128xf32>
    %493 = vector.shape_cast %490 : vector<16x128xf32> to vector<1x16x128xf32>
    tpu.vector_store %arg8[%c1_39, %c8_40, %c0_41], %493 {strides = array<i32>} : memref<4x32x128xf32, #tpu.memory_space<vmem>>, vector<1x16x128xf32>,
    %cst_42 = arith.constant 0.000000e+00 : f32
    %494 = vector.broadcast %cst_42 : f32 to vector<16x128xf32>
    %495 = arith.maximumf %475, %494 : vector<16x128xf32>
    %cst_43 = arith.constant 0.000000e+00 : f32
    %496 = vector.broadcast %cst_43 : f32 to vector<16x128xf32>
    %497 = arith.select %38, %495, %496 : vector<16x128xi1>, vector<16x128xf32>
    %c2_44 = arith.constant 2 : index
    %c8_45 = arith.constant 8 : index
    %c0_46 = arith.constant 0 : index
    %498 = vector.load %arg8[%c2_44, %c8_45, %c0_46] : memref<4x32x128xf32, #tpu.memory_space<vmem>>, vector<1x16x128xf32>
    %499 = vector.shape_cast %498 : vector<1x16x128xf32> to vector<16x128xf32>
    %500 = vector.shape_cast %497 : vector<16x128xf32> to vector<1x16x128xf32>
    tpu.vector_store %arg8[%c2_44, %c8_45, %c0_46], %500 {strides = array<i32>} : memref<4x32x128xf32, #tpu.memory_space<vmem>>, vector<1x16x128xf32>,
    %cst_47 = arith.constant 0.000000e+00 : f32
    %501 = vector.broadcast %cst_47 : f32 to vector<16x128xf32>
    %502 = arith.maximumf %479, %501 : vector<16x128xf32>
    %cst_48 = arith.constant 0.000000e+00 : f32
    %503 = vector.broadcast %cst_48 : f32 to vector<16x128xf32>
    %504 = arith.select %38, %502, %503 : vector<16x128xi1>, vector<16x128xf32>
    %c3_49 = arith.constant 3 : index
    %c8_50 = arith.constant 8 : index
    %c0_51 = arith.constant 0 : index
    %505 = vector.load %arg8[%c3_49, %c8_50, %c0_51] : memref<4x32x128xf32, #tpu.memory_space<vmem>>, vector<1x16x128xf32>
    %506 = vector.shape_cast %505 : vector<1x16x128xf32> to vector<16x128xf32>
    %507 = vector.shape_cast %504 : vector<16x128xf32> to vector<1x16x128xf32>
    tpu.vector_store %arg8[%c3_49, %c8_50, %c0_51], %507 {strides = array<i32>} : memref<4x32x128xf32, #tpu.memory_space<vmem>>, vector<1x16x128xf32>,
    %c0_52 = arith.constant 0 : index
    %508 = memref.load %arg5[%c0_52] : memref<8xf32, #tpu.memory_space<smem>>
    %509 = vector.broadcast %508 : f32 to vector<16x128xf32>
    %c1_53 = arith.constant 1 : index
    %510 = memref.load %arg5[%c1_53] : memref<8xf32, #tpu.memory_space<smem>>
    %511 = vector.broadcast %510 : f32 to vector<16x128xf32>
    %c2_54 = arith.constant 2 : index
    %512 = memref.load %arg5[%c2_54] : memref<8xf32, #tpu.memory_space<smem>>
    %513 = vector.broadcast %512 : f32 to vector<16x128xf32>
    %c3_55 = arith.constant 3 : index
    %514 = memref.load %arg5[%c3_55] : memref<8xf32, #tpu.memory_space<smem>>
    %515 = vector.broadcast %514 : f32 to vector<16x128xf32>
    %c4_56 = arith.constant 4 : index
    %516 = memref.load %arg5[%c4_56] : memref<8xf32, #tpu.memory_space<smem>>
    %517 = vector.broadcast %516 : f32 to vector<16x128xf32>
    %c5_57 = arith.constant 5 : index
    %518 = memref.load %arg5[%c5_57] : memref<8xf32, #tpu.memory_space<smem>>
    %519 = vector.broadcast %518 : f32 to vector<16x128xf32>
    %c6_58 = arith.constant 6 : index
    %520 = memref.load %arg5[%c6_58] : memref<8xf32, #tpu.memory_space<smem>>
    %521 = vector.broadcast %520 : f32 to vector<16x128xf32>
    %c7_59 = arith.constant 7 : index
    %522 = memref.load %arg5[%c7_59] : memref<8xf32, #tpu.memory_space<smem>>
    %523 = vector.broadcast %522 : f32 to vector<16x128xf32>
    %c0_60 = arith.constant 0 : index
    %c7_61 = arith.constant 7 : index
    %c0_62 = arith.constant 0 : index
    %524 = vector.load %arg8[%c0_60, %c7_61, %c0_62] : memref<4x32x128xf32, #tpu.memory_space<vmem>>, vector<1x16x128xf32>
    %525 = vector.shape_cast %524 : vector<1x16x128xf32> to vector<16x128xf32>
    %c1_i32_63 = arith.constant 1 : i32
    %526 = tpu.dynamic_rotate %525 by %c1_i32_63 dim 1 : vector<16x128xf32>, i32 -> vector<16x128xf32>
    %c0_64 = arith.constant 0 : index
    %527 = memref.load %arg3[%c0_64] : memref<288xf32, #tpu.memory_space<smem>>
    %528 = vector.broadcast %527 : f32 to vector<16x128xf32>
    %529 = arith.mulf %528, %526 : vector<16x128xf32>
    %530 = arith.addf %509, %529 : vector<16x128xf32>
    %c36_65 = arith.constant 36 : index
    %531 = memref.load %arg3[%c36_65] : memref<288xf32, #tpu.memory_space<smem>>
    %532 = vector.broadcast %531 : f32 to vector<16x128xf32>
    %533 = arith.mulf %532, %526 : vector<16x128xf32>
    %534 = arith.addf %511, %533 : vector<16x128xf32>
    %c72_66 = arith.constant 72 : index
    %535 = memref.load %arg3[%c72_66] : memref<288xf32, #tpu.memory_space<smem>>
    %536 = vector.broadcast %535 : f32 to vector<16x128xf32>
    %537 = arith.mulf %536, %526 : vector<16x128xf32>
    %538 = arith.addf %513, %537 : vector<16x128xf32>
    %c108 = arith.constant 108 : index
    %539 = memref.load %arg3[%c108] : memref<288xf32, #tpu.memory_space<smem>>
    %540 = vector.broadcast %539 : f32 to vector<16x128xf32>
    %541 = arith.mulf %540, %526 : vector<16x128xf32>
    %542 = arith.addf %515, %541 : vector<16x128xf32>
    %c144 = arith.constant 144 : index
    %543 = memref.load %arg3[%c144] : memref<288xf32, #tpu.memory_space<smem>>
    %544 = vector.broadcast %543 : f32 to vector<16x128xf32>
    %545 = arith.mulf %544, %526 : vector<16x128xf32>
    %546 = arith.addf %517, %545 : vector<16x128xf32>
    %c180 = arith.constant 180 : index
    %547 = memref.load %arg3[%c180] : memref<288xf32, #tpu.memory_space<smem>>
    %548 = vector.broadcast %547 : f32 to vector<16x128xf32>
    %549 = arith.mulf %548, %526 : vector<16x128xf32>
    %550 = arith.addf %519, %549 : vector<16x128xf32>
    %c216 = arith.constant 216 : index
    %551 = memref.load %arg3[%c216] : memref<288xf32, #tpu.memory_space<smem>>
    %552 = vector.broadcast %551 : f32 to vector<16x128xf32>
    %553 = arith.mulf %552, %526 : vector<16x128xf32>
    %554 = arith.addf %521, %553 : vector<16x128xf32>
    %c252 = arith.constant 252 : index
    %555 = memref.load %arg3[%c252] : memref<288xf32, #tpu.memory_space<smem>>
    %556 = vector.broadcast %555 : f32 to vector<16x128xf32>
    %557 = arith.mulf %556, %526 : vector<16x128xf32>
    %558 = arith.addf %523, %557 : vector<16x128xf32>
    %c1_67 = arith.constant 1 : index
    %559 = memref.load %arg3[%c1_67] : memref<288xf32, #tpu.memory_space<smem>>
    %560 = vector.broadcast %559 : f32 to vector<16x128xf32>
    %561 = arith.mulf %560, %525 : vector<16x128xf32>
    %562 = arith.addf %530, %561 : vector<16x128xf32>
    %c37_68 = arith.constant 37 : index
    %563 = memref.load %arg3[%c37_68] : memref<288xf32, #tpu.memory_space<smem>>
    %564 = vector.broadcast %563 : f32 to vector<16x128xf32>
    %565 = arith.mulf %564, %525 : vector<16x128xf32>
    %566 = arith.addf %534, %565 : vector<16x128xf32>
    %c73_69 = arith.constant 73 : index
    %567 = memref.load %arg3[%c73_69] : memref<288xf32, #tpu.memory_space<smem>>
    %568 = vector.broadcast %567 : f32 to vector<16x128xf32>
    %569 = arith.mulf %568, %525 : vector<16x128xf32>
    %570 = arith.addf %538, %569 : vector<16x128xf32>
    %c109 = arith.constant 109 : index
    %571 = memref.load %arg3[%c109] : memref<288xf32, #tpu.memory_space<smem>>
    %572 = vector.broadcast %571 : f32 to vector<16x128xf32>
    %573 = arith.mulf %572, %525 : vector<16x128xf32>
    %574 = arith.addf %542, %573 : vector<16x128xf32>
    %c145 = arith.constant 145 : index
    %575 = memref.load %arg3[%c145] : memref<288xf32, #tpu.memory_space<smem>>
    %576 = vector.broadcast %575 : f32 to vector<16x128xf32>
    %577 = arith.mulf %576, %525 : vector<16x128xf32>
    %578 = arith.addf %546, %577 : vector<16x128xf32>
    %c181 = arith.constant 181 : index
    %579 = memref.load %arg3[%c181] : memref<288xf32, #tpu.memory_space<smem>>
    %580 = vector.broadcast %579 : f32 to vector<16x128xf32>
    %581 = arith.mulf %580, %525 : vector<16x128xf32>
    %582 = arith.addf %550, %581 : vector<16x128xf32>
    %c217 = arith.constant 217 : index
    %583 = memref.load %arg3[%c217] : memref<288xf32, #tpu.memory_space<smem>>
    %584 = vector.broadcast %583 : f32 to vector<16x128xf32>
    %585 = arith.mulf %584, %525 : vector<16x128xf32>
    %586 = arith.addf %554, %585 : vector<16x128xf32>
    %c253 = arith.constant 253 : index
    %587 = memref.load %arg3[%c253] : memref<288xf32, #tpu.memory_space<smem>>
    %588 = vector.broadcast %587 : f32 to vector<16x128xf32>
    %589 = arith.mulf %588, %525 : vector<16x128xf32>
    %590 = arith.addf %558, %589 : vector<16x128xf32>
    %c127_i32_70 = arith.constant 127 : i32
    %591 = tpu.dynamic_rotate %525 by %c127_i32_70 dim 1 : vector<16x128xf32>, i32 -> vector<16x128xf32>
    %c2_71 = arith.constant 2 : index
    %592 = memref.load %arg3[%c2_71] : memref<288xf32, #tpu.memory_space<smem>>
    %593 = vector.broadcast %592 : f32 to vector<16x128xf32>
    %594 = arith.mulf %593, %591 : vector<16x128xf32>
    %595 = arith.addf %562, %594 : vector<16x128xf32>
    %c38_72 = arith.constant 38 : index
    %596 = memref.load %arg3[%c38_72] : memref<288xf32, #tpu.memory_space<smem>>
    %597 = vector.broadcast %596 : f32 to vector<16x128xf32>
    %598 = arith.mulf %597, %591 : vector<16x128xf32>
    %599 = arith.addf %566, %598 : vector<16x128xf32>
    %c74_73 = arith.constant 74 : index
    %600 = memref.load %arg3[%c74_73] : memref<288xf32, #tpu.memory_space<smem>>
    %601 = vector.broadcast %600 : f32 to vector<16x128xf32>
    %602 = arith.mulf %601, %591 : vector<16x128xf32>
    %603 = arith.addf %570, %602 : vector<16x128xf32>
    %c110 = arith.constant 110 : index
    %604 = memref.load %arg3[%c110] : memref<288xf32, #tpu.memory_space<smem>>
    %605 = vector.broadcast %604 : f32 to vector<16x128xf32>
    %606 = arith.mulf %605, %591 : vector<16x128xf32>
    %607 = arith.addf %574, %606 : vector<16x128xf32>
    %c146 = arith.constant 146 : index
    %608 = memref.load %arg3[%c146] : memref<288xf32, #tpu.memory_space<smem>>
    %609 = vector.broadcast %608 : f32 to vector<16x128xf32>
    %610 = arith.mulf %609, %591 : vector<16x128xf32>
    %611 = arith.addf %578, %610 : vector<16x128xf32>
    %c182 = arith.constant 182 : index
    %612 = memref.load %arg3[%c182] : memref<288xf32, #tpu.memory_space<smem>>
    %613 = vector.broadcast %612 : f32 to vector<16x128xf32>
    %614 = arith.mulf %613, %591 : vector<16x128xf32>
    %615 = arith.addf %582, %614 : vector<16x128xf32>
    %c218 = arith.constant 218 : index
    %616 = memref.load %arg3[%c218] : memref<288xf32, #tpu.memory_space<smem>>
    %617 = vector.broadcast %616 : f32 to vector<16x128xf32>
    %618 = arith.mulf %617, %591 : vector<16x128xf32>
    %619 = arith.addf %586, %618 : vector<16x128xf32>
    %c254 = arith.constant 254 : index
    %620 = memref.load %arg3[%c254] : memref<288xf32, #tpu.memory_space<smem>>
    %621 = vector.broadcast %620 : f32 to vector<16x128xf32>
    %622 = arith.mulf %621, %591 : vector<16x128xf32>
    %623 = arith.addf %590, %622 : vector<16x128xf32>
    %c0_74 = arith.constant 0 : index
    %c8_75 = arith.constant 8 : index
    %c0_76 = arith.constant 0 : index
    %624 = vector.load %arg8[%c0_74, %c8_75, %c0_76] : memref<4x32x128xf32, #tpu.memory_space<vmem>>, vector<1x16x128xf32>
    %625 = vector.shape_cast %624 : vector<1x16x128xf32> to vector<16x128xf32>
    %c1_i32_77 = arith.constant 1 : i32
    %626 = tpu.dynamic_rotate %625 by %c1_i32_77 dim 1 : vector<16x128xf32>, i32 -> vector<16x128xf32>
    %c3_78 = arith.constant 3 : index
    %627 = memref.load %arg3[%c3_78] : memref<288xf32, #tpu.memory_space<smem>>
    %628 = vector.broadcast %627 : f32 to vector<16x128xf32>
    %629 = arith.mulf %628, %626 : vector<16x128xf32>
    %630 = arith.addf %595, %629 : vector<16x128xf32>
    %c39_79 = arith.constant 39 : index
    %631 = memref.load %arg3[%c39_79] : memref<288xf32, #tpu.memory_space<smem>>
    %632 = vector.broadcast %631 : f32 to vector<16x128xf32>
    %633 = arith.mulf %632, %626 : vector<16x128xf32>
    %634 = arith.addf %599, %633 : vector<16x128xf32>
    %c75_80 = arith.constant 75 : index
    %635 = memref.load %arg3[%c75_80] : memref<288xf32, #tpu.memory_space<smem>>
    %636 = vector.broadcast %635 : f32 to vector<16x128xf32>
    %637 = arith.mulf %636, %626 : vector<16x128xf32>
    %638 = arith.addf %603, %637 : vector<16x128xf32>
    %c111 = arith.constant 111 : index
    %639 = memref.load %arg3[%c111] : memref<288xf32, #tpu.memory_space<smem>>
    %640 = vector.broadcast %639 : f32 to vector<16x128xf32>
    %641 = arith.mulf %640, %626 : vector<16x128xf32>
    %642 = arith.addf %607, %641 : vector<16x128xf32>
    %c147 = arith.constant 147 : index
    %643 = memref.load %arg3[%c147] : memref<288xf32, #tpu.memory_space<smem>>
    %644 = vector.broadcast %643 : f32 to vector<16x128xf32>
    %645 = arith.mulf %644, %626 : vector<16x128xf32>
    %646 = arith.addf %611, %645 : vector<16x128xf32>
    %c183 = arith.constant 183 : index
    %647 = memref.load %arg3[%c183] : memref<288xf32, #tpu.memory_space<smem>>
    %648 = vector.broadcast %647 : f32 to vector<16x128xf32>
    %649 = arith.mulf %648, %626 : vector<16x128xf32>
    %650 = arith.addf %615, %649 : vector<16x128xf32>
    %c219 = arith.constant 219 : index
    %651 = memref.load %arg3[%c219] : memref<288xf32, #tpu.memory_space<smem>>
    %652 = vector.broadcast %651 : f32 to vector<16x128xf32>
    %653 = arith.mulf %652, %626 : vector<16x128xf32>
    %654 = arith.addf %619, %653 : vector<16x128xf32>
    %c255 = arith.constant 255 : index
    %655 = memref.load %arg3[%c255] : memref<288xf32, #tpu.memory_space<smem>>
    %656 = vector.broadcast %655 : f32 to vector<16x128xf32>
    %657 = arith.mulf %656, %626 : vector<16x128xf32>
    %658 = arith.addf %623, %657 : vector<16x128xf32>
    %c4_81 = arith.constant 4 : index
    %659 = memref.load %arg3[%c4_81] : memref<288xf32, #tpu.memory_space<smem>>
    %660 = vector.broadcast %659 : f32 to vector<16x128xf32>
    %661 = arith.mulf %660, %625 : vector<16x128xf32>
    %662 = arith.addf %630, %661 : vector<16x128xf32>
    %c40_82 = arith.constant 40 : index
    %663 = memref.load %arg3[%c40_82] : memref<288xf32, #tpu.memory_space<smem>>
    %664 = vector.broadcast %663 : f32 to vector<16x128xf32>
    %665 = arith.mulf %664, %625 : vector<16x128xf32>
    %666 = arith.addf %634, %665 : vector<16x128xf32>
    %c76_83 = arith.constant 76 : index
    %667 = memref.load %arg3[%c76_83] : memref<288xf32, #tpu.memory_space<smem>>
    %668 = vector.broadcast %667 : f32 to vector<16x128xf32>
    %669 = arith.mulf %668, %625 : vector<16x128xf32>
    %670 = arith.addf %638, %669 : vector<16x128xf32>
    %c112 = arith.constant 112 : index
    %671 = memref.load %arg3[%c112] : memref<288xf32, #tpu.memory_space<smem>>
    %672 = vector.broadcast %671 : f32 to vector<16x128xf32>
    %673 = arith.mulf %672, %625 : vector<16x128xf32>
    %674 = arith.addf %642, %673 : vector<16x128xf32>
    %c148 = arith.constant 148 : index
    %675 = memref.load %arg3[%c148] : memref<288xf32, #tpu.memory_space<smem>>
    %676 = vector.broadcast %675 : f32 to vector<16x128xf32>
    %677 = arith.mulf %676, %625 : vector<16x128xf32>
    %678 = arith.addf %646, %677 : vector<16x128xf32>
    %c184 = arith.constant 184 : index
    %679 = memref.load %arg3[%c184] : memref<288xf32, #tpu.memory_space<smem>>
    %680 = vector.broadcast %679 : f32 to vector<16x128xf32>
    %681 = arith.mulf %680, %625 : vector<16x128xf32>
    %682 = arith.addf %650, %681 : vector<16x128xf32>
    %c220 = arith.constant 220 : index
    %683 = memref.load %arg3[%c220] : memref<288xf32, #tpu.memory_space<smem>>
    %684 = vector.broadcast %683 : f32 to vector<16x128xf32>
    %685 = arith.mulf %684, %625 : vector<16x128xf32>
    %686 = arith.addf %654, %685 : vector<16x128xf32>
    %c256 = arith.constant 256 : index
    %687 = memref.load %arg3[%c256] : memref<288xf32, #tpu.memory_space<smem>>
    %688 = vector.broadcast %687 : f32 to vector<16x128xf32>
    %689 = arith.mulf %688, %625 : vector<16x128xf32>
    %690 = arith.addf %658, %689 : vector<16x128xf32>
    %c127_i32_84 = arith.constant 127 : i32
    %691 = tpu.dynamic_rotate %625 by %c127_i32_84 dim 1 : vector<16x128xf32>, i32 -> vector<16x128xf32>
    %c5_85 = arith.constant 5 : index
    %692 = memref.load %arg3[%c5_85] : memref<288xf32, #tpu.memory_space<smem>>
    %693 = vector.broadcast %692 : f32 to vector<16x128xf32>
    %694 = arith.mulf %693, %691 : vector<16x128xf32>
    %695 = arith.addf %662, %694 : vector<16x128xf32>
    %c41_86 = arith.constant 41 : index
    %696 = memref.load %arg3[%c41_86] : memref<288xf32, #tpu.memory_space<smem>>
    %697 = vector.broadcast %696 : f32 to vector<16x128xf32>
    %698 = arith.mulf %697, %691 : vector<16x128xf32>
    %699 = arith.addf %666, %698 : vector<16x128xf32>
    %c77_87 = arith.constant 77 : index
    %700 = memref.load %arg3[%c77_87] : memref<288xf32, #tpu.memory_space<smem>>
    %701 = vector.broadcast %700 : f32 to vector<16x128xf32>
    %702 = arith.mulf %701, %691 : vector<16x128xf32>
    %703 = arith.addf %670, %702 : vector<16x128xf32>
    %c113 = arith.constant 113 : index
    %704 = memref.load %arg3[%c113] : memref<288xf32, #tpu.memory_space<smem>>
    %705 = vector.broadcast %704 : f32 to vector<16x128xf32>
    %706 = arith.mulf %705, %691 : vector<16x128xf32>
    %707 = arith.addf %674, %706 : vector<16x128xf32>
    %c149 = arith.constant 149 : index
    %708 = memref.load %arg3[%c149] : memref<288xf32, #tpu.memory_space<smem>>
    %709 = vector.broadcast %708 : f32 to vector<16x128xf32>
    %710 = arith.mulf %709, %691 : vector<16x128xf32>
    %711 = arith.addf %678, %710 : vector<16x128xf32>
    %c185 = arith.constant 185 : index
    %712 = memref.load %arg3[%c185] : memref<288xf32, #tpu.memory_space<smem>>
    %713 = vector.broadcast %712 : f32 to vector<16x128xf32>
    %714 = arith.mulf %713, %691 : vector<16x128xf32>
    %715 = arith.addf %682, %714 : vector<16x128xf32>
    %c221 = arith.constant 221 : index
    %716 = memref.load %arg3[%c221] : memref<288xf32, #tpu.memory_space<smem>>
    %717 = vector.broadcast %716 : f32 to vector<16x128xf32>
    %718 = arith.mulf %717, %691 : vector<16x128xf32>
    %719 = arith.addf %686, %718 : vector<16x128xf32>
    %c257 = arith.constant 257 : index
    %720 = memref.load %arg3[%c257] : memref<288xf32, #tpu.memory_space<smem>>
    %721 = vector.broadcast %720 : f32 to vector<16x128xf32>
    %722 = arith.mulf %721, %691 : vector<16x128xf32>
    %723 = arith.addf %690, %722 : vector<16x128xf32>
    %c0_88 = arith.constant 0 : index
    %c9_89 = arith.constant 9 : index
    %c0_90 = arith.constant 0 : index
    %724 = vector.load %arg8[%c0_88, %c9_89, %c0_90] : memref<4x32x128xf32, #tpu.memory_space<vmem>>, vector<1x16x128xf32>
    %725 = vector.shape_cast %724 : vector<1x16x128xf32> to vector<16x128xf32>
    %c1_i32_91 = arith.constant 1 : i32
    %726 = tpu.dynamic_rotate %725 by %c1_i32_91 dim 1 : vector<16x128xf32>, i32 -> vector<16x128xf32>
    %c6_92 = arith.constant 6 : index
    %727 = memref.load %arg3[%c6_92] : memref<288xf32, #tpu.memory_space<smem>>
    %728 = vector.broadcast %727 : f32 to vector<16x128xf32>
    %729 = arith.mulf %728, %726 : vector<16x128xf32>
    %730 = arith.addf %695, %729 : vector<16x128xf32>
    %c42_93 = arith.constant 42 : index
    %731 = memref.load %arg3[%c42_93] : memref<288xf32, #tpu.memory_space<smem>>
    %732 = vector.broadcast %731 : f32 to vector<16x128xf32>
    %733 = arith.mulf %732, %726 : vector<16x128xf32>
    %734 = arith.addf %699, %733 : vector<16x128xf32>
    %c78_94 = arith.constant 78 : index
    %735 = memref.load %arg3[%c78_94] : memref<288xf32, #tpu.memory_space<smem>>
    %736 = vector.broadcast %735 : f32 to vector<16x128xf32>
    %737 = arith.mulf %736, %726 : vector<16x128xf32>
    %738 = arith.addf %703, %737 : vector<16x128xf32>
    %c114 = arith.constant 114 : index
    %739 = memref.load %arg3[%c114] : memref<288xf32, #tpu.memory_space<smem>>
    %740 = vector.broadcast %739 : f32 to vector<16x128xf32>
    %741 = arith.mulf %740, %726 : vector<16x128xf32>
    %742 = arith.addf %707, %741 : vector<16x128xf32>
    %c150 = arith.constant 150 : index
    %743 = memref.load %arg3[%c150] : memref<288xf32, #tpu.memory_space<smem>>
    %744 = vector.broadcast %743 : f32 to vector<16x128xf32>
    %745 = arith.mulf %744, %726 : vector<16x128xf32>
    %746 = arith.addf %711, %745 : vector<16x128xf32>
    %c186 = arith.constant 186 : index
    %747 = memref.load %arg3[%c186] : memref<288xf32, #tpu.memory_space<smem>>
    %748 = vector.broadcast %747 : f32 to vector<16x128xf32>
    %749 = arith.mulf %748, %726 : vector<16x128xf32>
    %750 = arith.addf %715, %749 : vector<16x128xf32>
    %c222 = arith.constant 222 : index
    %751 = memref.load %arg3[%c222] : memref<288xf32, #tpu.memory_space<smem>>
    %752 = vector.broadcast %751 : f32 to vector<16x128xf32>
    %753 = arith.mulf %752, %726 : vector<16x128xf32>
    %754 = arith.addf %719, %753 : vector<16x128xf32>
    %c258 = arith.constant 258 : index
    %755 = memref.load %arg3[%c258] : memref<288xf32, #tpu.memory_space<smem>>
    %756 = vector.broadcast %755 : f32 to vector<16x128xf32>
    %757 = arith.mulf %756, %726 : vector<16x128xf32>
    %758 = arith.addf %723, %757 : vector<16x128xf32>
    %c7_95 = arith.constant 7 : index
    %759 = memref.load %arg3[%c7_95] : memref<288xf32, #tpu.memory_space<smem>>
    %760 = vector.broadcast %759 : f32 to vector<16x128xf32>
    %761 = arith.mulf %760, %725 : vector<16x128xf32>
    %762 = arith.addf %730, %761 : vector<16x128xf32>
    %c43_96 = arith.constant 43 : index
    %763 = memref.load %arg3[%c43_96] : memref<288xf32, #tpu.memory_space<smem>>
    %764 = vector.broadcast %763 : f32 to vector<16x128xf32>
    %765 = arith.mulf %764, %725 : vector<16x128xf32>
    %766 = arith.addf %734, %765 : vector<16x128xf32>
    %c79_97 = arith.constant 79 : index
    %767 = memref.load %arg3[%c79_97] : memref<288xf32, #tpu.memory_space<smem>>
    %768 = vector.broadcast %767 : f32 to vector<16x128xf32>
    %769 = arith.mulf %768, %725 : vector<16x128xf32>
    %770 = arith.addf %738, %769 : vector<16x128xf32>
    %c115 = arith.constant 115 : index
    %771 = memref.load %arg3[%c115] : memref<288xf32, #tpu.memory_space<smem>>
    %772 = vector.broadcast %771 : f32 to vector<16x128xf32>
    %773 = arith.mulf %772, %725 : vector<16x128xf32>
    %774 = arith.addf %742, %773 : vector<16x128xf32>
    %c151 = arith.constant 151 : index
    %775 = memref.load %arg3[%c151] : memref<288xf32, #tpu.memory_space<smem>>
    %776 = vector.broadcast %775 : f32 to vector<16x128xf32>
    %777 = arith.mulf %776, %725 : vector<16x128xf32>
    %778 = arith.addf %746, %777 : vector<16x128xf32>
    %c187 = arith.constant 187 : index
    %779 = memref.load %arg3[%c187] : memref<288xf32, #tpu.memory_space<smem>>
    %780 = vector.broadcast %779 : f32 to vector<16x128xf32>
    %781 = arith.mulf %780, %725 : vector<16x128xf32>
    %782 = arith.addf %750, %781 : vector<16x128xf32>
    %c223 = arith.constant 223 : index
    %783 = memref.load %arg3[%c223] : memref<288xf32, #tpu.memory_space<smem>>
    %784 = vector.broadcast %783 : f32 to vector<16x128xf32>
    %785 = arith.mulf %784, %725 : vector<16x128xf32>
    %786 = arith.addf %754, %785 : vector<16x128xf32>
    %c259 = arith.constant 259 : index
    %787 = memref.load %arg3[%c259] : memref<288xf32, #tpu.memory_space<smem>>
    %788 = vector.broadcast %787 : f32 to vector<16x128xf32>
    %789 = arith.mulf %788, %725 : vector<16x128xf32>
    %790 = arith.addf %758, %789 : vector<16x128xf32>
    %c127_i32_98 = arith.constant 127 : i32
    %791 = tpu.dynamic_rotate %725 by %c127_i32_98 dim 1 : vector<16x128xf32>, i32 -> vector<16x128xf32>
    %c8_99 = arith.constant 8 : index
    %792 = memref.load %arg3[%c8_99] : memref<288xf32, #tpu.memory_space<smem>>
    %793 = vector.broadcast %792 : f32 to vector<16x128xf32>
    %794 = arith.mulf %793, %791 : vector<16x128xf32>
    %795 = arith.addf %762, %794 : vector<16x128xf32>
    %c44_100 = arith.constant 44 : index
    %796 = memref.load %arg3[%c44_100] : memref<288xf32, #tpu.memory_space<smem>>
    %797 = vector.broadcast %796 : f32 to vector<16x128xf32>
    %798 = arith.mulf %797, %791 : vector<16x128xf32>
    %799 = arith.addf %766, %798 : vector<16x128xf32>
    %c80_101 = arith.constant 80 : index
    %800 = memref.load %arg3[%c80_101] : memref<288xf32, #tpu.memory_space<smem>>
    %801 = vector.broadcast %800 : f32 to vector<16x128xf32>
    %802 = arith.mulf %801, %791 : vector<16x128xf32>
    %803 = arith.addf %770, %802 : vector<16x128xf32>
    %c116 = arith.constant 116 : index
    %804 = memref.load %arg3[%c116] : memref<288xf32, #tpu.memory_space<smem>>
    %805 = vector.broadcast %804 : f32 to vector<16x128xf32>
    %806 = arith.mulf %805, %791 : vector<16x128xf32>
    %807 = arith.addf %774, %806 : vector<16x128xf32>
    %c152 = arith.constant 152 : index
    %808 = memref.load %arg3[%c152] : memref<288xf32, #tpu.memory_space<smem>>
    %809 = vector.broadcast %808 : f32 to vector<16x128xf32>
    %810 = arith.mulf %809, %791 : vector<16x128xf32>
    %811 = arith.addf %778, %810 : vector<16x128xf32>
    %c188 = arith.constant 188 : index
    %812 = memref.load %arg3[%c188] : memref<288xf32, #tpu.memory_space<smem>>
    %813 = vector.broadcast %812 : f32 to vector<16x128xf32>
    %814 = arith.mulf %813, %791 : vector<16x128xf32>
    %815 = arith.addf %782, %814 : vector<16x128xf32>
    %c224 = arith.constant 224 : index
    %816 = memref.load %arg3[%c224] : memref<288xf32, #tpu.memory_space<smem>>
    %817 = vector.broadcast %816 : f32 to vector<16x128xf32>
    %818 = arith.mulf %817, %791 : vector<16x128xf32>
    %819 = arith.addf %786, %818 : vector<16x128xf32>
    %c260 = arith.constant 260 : index
    %820 = memref.load %arg3[%c260] : memref<288xf32, #tpu.memory_space<smem>>
    %821 = vector.broadcast %820 : f32 to vector<16x128xf32>
    %822 = arith.mulf %821, %791 : vector<16x128xf32>
    %823 = arith.addf %790, %822 : vector<16x128xf32>
    %c1_102 = arith.constant 1 : index
    %c7_103 = arith.constant 7 : index
    %c0_104 = arith.constant 0 : index
    %824 = vector.load %arg8[%c1_102, %c7_103, %c0_104] : memref<4x32x128xf32, #tpu.memory_space<vmem>>, vector<1x16x128xf32>
    %825 = vector.shape_cast %824 : vector<1x16x128xf32> to vector<16x128xf32>
    %c1_i32_105 = arith.constant 1 : i32
    %826 = tpu.dynamic_rotate %825 by %c1_i32_105 dim 1 : vector<16x128xf32>, i32 -> vector<16x128xf32>
    %c9_106 = arith.constant 9 : index
    %827 = memref.load %arg3[%c9_106] : memref<288xf32, #tpu.memory_space<smem>>
    %828 = vector.broadcast %827 : f32 to vector<16x128xf32>
    %829 = arith.mulf %828, %826 : vector<16x128xf32>
    %830 = arith.addf %795, %829 : vector<16x128xf32>
    %c45_107 = arith.constant 45 : index
    %831 = memref.load %arg3[%c45_107] : memref<288xf32, #tpu.memory_space<smem>>
    %832 = vector.broadcast %831 : f32 to vector<16x128xf32>
    %833 = arith.mulf %832, %826 : vector<16x128xf32>
    %834 = arith.addf %799, %833 : vector<16x128xf32>
    %c81_108 = arith.constant 81 : index
    %835 = memref.load %arg3[%c81_108] : memref<288xf32, #tpu.memory_space<smem>>
    %836 = vector.broadcast %835 : f32 to vector<16x128xf32>
    %837 = arith.mulf %836, %826 : vector<16x128xf32>
    %838 = arith.addf %803, %837 : vector<16x128xf32>
    %c117 = arith.constant 117 : index
    %839 = memref.load %arg3[%c117] : memref<288xf32, #tpu.memory_space<smem>>
    %840 = vector.broadcast %839 : f32 to vector<16x128xf32>
    %841 = arith.mulf %840, %826 : vector<16x128xf32>
    %842 = arith.addf %807, %841 : vector<16x128xf32>
    %c153 = arith.constant 153 : index
    %843 = memref.load %arg3[%c153] : memref<288xf32, #tpu.memory_space<smem>>
    %844 = vector.broadcast %843 : f32 to vector<16x128xf32>
    %845 = arith.mulf %844, %826 : vector<16x128xf32>
    %846 = arith.addf %811, %845 : vector<16x128xf32>
    %c189 = arith.constant 189 : index
    %847 = memref.load %arg3[%c189] : memref<288xf32, #tpu.memory_space<smem>>
    %848 = vector.broadcast %847 : f32 to vector<16x128xf32>
    %849 = arith.mulf %848, %826 : vector<16x128xf32>
    %850 = arith.addf %815, %849 : vector<16x128xf32>
    %c225 = arith.constant 225 : index
    %851 = memref.load %arg3[%c225] : memref<288xf32, #tpu.memory_space<smem>>
    %852 = vector.broadcast %851 : f32 to vector<16x128xf32>
    %853 = arith.mulf %852, %826 : vector<16x128xf32>
    %854 = arith.addf %819, %853 : vector<16x128xf32>
    %c261 = arith.constant 261 : index
    %855 = memref.load %arg3[%c261] : memref<288xf32, #tpu.memory_space<smem>>
    %856 = vector.broadcast %855 : f32 to vector<16x128xf32>
    %857 = arith.mulf %856, %826 : vector<16x128xf32>
    %858 = arith.addf %823, %857 : vector<16x128xf32>
    %c10_109 = arith.constant 10 : index
    %859 = memref.load %arg3[%c10_109] : memref<288xf32, #tpu.memory_space<smem>>
    %860 = vector.broadcast %859 : f32 to vector<16x128xf32>
    %861 = arith.mulf %860, %825 : vector<16x128xf32>
    %862 = arith.addf %830, %861 : vector<16x128xf32>
    %c46_110 = arith.constant 46 : index
    %863 = memref.load %arg3[%c46_110] : memref<288xf32, #tpu.memory_space<smem>>
    %864 = vector.broadcast %863 : f32 to vector<16x128xf32>
    %865 = arith.mulf %864, %825 : vector<16x128xf32>
    %866 = arith.addf %834, %865 : vector<16x128xf32>
    %c82_111 = arith.constant 82 : index
    %867 = memref.load %arg3[%c82_111] : memref<288xf32, #tpu.memory_space<smem>>
    %868 = vector.broadcast %867 : f32 to vector<16x128xf32>
    %869 = arith.mulf %868, %825 : vector<16x128xf32>
    %870 = arith.addf %838, %869 : vector<16x128xf32>
    %c118 = arith.constant 118 : index
    %871 = memref.load %arg3[%c118] : memref<288xf32, #tpu.memory_space<smem>>
    %872 = vector.broadcast %871 : f32 to vector<16x128xf32>
    %873 = arith.mulf %872, %825 : vector<16x128xf32>
    %874 = arith.addf %842, %873 : vector<16x128xf32>
    %c154 = arith.constant 154 : index
    %875 = memref.load %arg3[%c154] : memref<288xf32, #tpu.memory_space<smem>>
    %876 = vector.broadcast %875 : f32 to vector<16x128xf32>
    %877 = arith.mulf %876, %825 : vector<16x128xf32>
    %878 = arith.addf %846, %877 : vector<16x128xf32>
    %c190 = arith.constant 190 : index
    %879 = memref.load %arg3[%c190] : memref<288xf32, #tpu.memory_space<smem>>
    %880 = vector.broadcast %879 : f32 to vector<16x128xf32>
    %881 = arith.mulf %880, %825 : vector<16x128xf32>
    %882 = arith.addf %850, %881 : vector<16x128xf32>
    %c226 = arith.constant 226 : index
    %883 = memref.load %arg3[%c226] : memref<288xf32, #tpu.memory_space<smem>>
    %884 = vector.broadcast %883 : f32 to vector<16x128xf32>
    %885 = arith.mulf %884, %825 : vector<16x128xf32>
    %886 = arith.addf %854, %885 : vector<16x128xf32>
    %c262 = arith.constant 262 : index
    %887 = memref.load %arg3[%c262] : memref<288xf32, #tpu.memory_space<smem>>
    %888 = vector.broadcast %887 : f32 to vector<16x128xf32>
    %889 = arith.mulf %888, %825 : vector<16x128xf32>
    %890 = arith.addf %858, %889 : vector<16x128xf32>
    %c127_i32_112 = arith.constant 127 : i32
    %891 = tpu.dynamic_rotate %825 by %c127_i32_112 dim 1 : vector<16x128xf32>, i32 -> vector<16x128xf32>
    %c11_113 = arith.constant 11 : index
    %892 = memref.load %arg3[%c11_113] : memref<288xf32, #tpu.memory_space<smem>>
    %893 = vector.broadcast %892 : f32 to vector<16x128xf32>
    %894 = arith.mulf %893, %891 : vector<16x128xf32>
    %895 = arith.addf %862, %894 : vector<16x128xf32>
    %c47_114 = arith.constant 47 : index
    %896 = memref.load %arg3[%c47_114] : memref<288xf32, #tpu.memory_space<smem>>
    %897 = vector.broadcast %896 : f32 to vector<16x128xf32>
    %898 = arith.mulf %897, %891 : vector<16x128xf32>
    %899 = arith.addf %866, %898 : vector<16x128xf32>
    %c83_115 = arith.constant 83 : index
    %900 = memref.load %arg3[%c83_115] : memref<288xf32, #tpu.memory_space<smem>>
    %901 = vector.broadcast %900 : f32 to vector<16x128xf32>
    %902 = arith.mulf %901, %891 : vector<16x128xf32>
    %903 = arith.addf %870, %902 : vector<16x128xf32>
    %c119 = arith.constant 119 : index
    %904 = memref.load %arg3[%c119] : memref<288xf32, #tpu.memory_space<smem>>
    %905 = vector.broadcast %904 : f32 to vector<16x128xf32>
    %906 = arith.mulf %905, %891 : vector<16x128xf32>
    %907 = arith.addf %874, %906 : vector<16x128xf32>
    %c155 = arith.constant 155 : index
    %908 = memref.load %arg3[%c155] : memref<288xf32, #tpu.memory_space<smem>>
    %909 = vector.broadcast %908 : f32 to vector<16x128xf32>
    %910 = arith.mulf %909, %891 : vector<16x128xf32>
    %911 = arith.addf %878, %910 : vector<16x128xf32>
    %c191 = arith.constant 191 : index
    %912 = memref.load %arg3[%c191] : memref<288xf32, #tpu.memory_space<smem>>
    %913 = vector.broadcast %912 : f32 to vector<16x128xf32>
    %914 = arith.mulf %913, %891 : vector<16x128xf32>
    %915 = arith.addf %882, %914 : vector<16x128xf32>
    %c227 = arith.constant 227 : index
    %916 = memref.load %arg3[%c227] : memref<288xf32, #tpu.memory_space<smem>>
    %917 = vector.broadcast %916 : f32 to vector<16x128xf32>
    %918 = arith.mulf %917, %891 : vector<16x128xf32>
    %919 = arith.addf %886, %918 : vector<16x128xf32>
    %c263 = arith.constant 263 : index
    %920 = memref.load %arg3[%c263] : memref<288xf32, #tpu.memory_space<smem>>
    %921 = vector.broadcast %920 : f32 to vector<16x128xf32>
    %922 = arith.mulf %921, %891 : vector<16x128xf32>
    %923 = arith.addf %890, %922 : vector<16x128xf32>
    %c1_116 = arith.constant 1 : index
    %c8_117 = arith.constant 8 : index
    %c0_118 = arith.constant 0 : index
    %924 = vector.load %arg8[%c1_116, %c8_117, %c0_118] : memref<4x32x128xf32, #tpu.memory_space<vmem>>, vector<1x16x128xf32>
    %925 = vector.shape_cast %924 : vector<1x16x128xf32> to vector<16x128xf32>
    %c1_i32_119 = arith.constant 1 : i32
    %926 = tpu.dynamic_rotate %925 by %c1_i32_119 dim 1 : vector<16x128xf32>, i32 -> vector<16x128xf32>
    %c12_120 = arith.constant 12 : index
    %927 = memref.load %arg3[%c12_120] : memref<288xf32, #tpu.memory_space<smem>>
    %928 = vector.broadcast %927 : f32 to vector<16x128xf32>
    %929 = arith.mulf %928, %926 : vector<16x128xf32>
    %930 = arith.addf %895, %929 : vector<16x128xf32>
    %c48_121 = arith.constant 48 : index
    %931 = memref.load %arg3[%c48_121] : memref<288xf32, #tpu.memory_space<smem>>
    %932 = vector.broadcast %931 : f32 to vector<16x128xf32>
    %933 = arith.mulf %932, %926 : vector<16x128xf32>
    %934 = arith.addf %899, %933 : vector<16x128xf32>
    %c84_122 = arith.constant 84 : index
    %935 = memref.load %arg3[%c84_122] : memref<288xf32, #tpu.memory_space<smem>>
    %936 = vector.broadcast %935 : f32 to vector<16x128xf32>
    %937 = arith.mulf %936, %926 : vector<16x128xf32>
    %938 = arith.addf %903, %937 : vector<16x128xf32>
    %c120 = arith.constant 120 : index
    %939 = memref.load %arg3[%c120] : memref<288xf32, #tpu.memory_space<smem>>
    %940 = vector.broadcast %939 : f32 to vector<16x128xf32>
    %941 = arith.mulf %940, %926 : vector<16x128xf32>
    %942 = arith.addf %907, %941 : vector<16x128xf32>
    %c156 = arith.constant 156 : index
    %943 = memref.load %arg3[%c156] : memref<288xf32, #tpu.memory_space<smem>>
    %944 = vector.broadcast %943 : f32 to vector<16x128xf32>
    %945 = arith.mulf %944, %926 : vector<16x128xf32>
    %946 = arith.addf %911, %945 : vector<16x128xf32>
    %c192 = arith.constant 192 : index
    %947 = memref.load %arg3[%c192] : memref<288xf32, #tpu.memory_space<smem>>
    %948 = vector.broadcast %947 : f32 to vector<16x128xf32>
    %949 = arith.mulf %948, %926 : vector<16x128xf32>
    %950 = arith.addf %915, %949 : vector<16x128xf32>
    %c228 = arith.constant 228 : index
    %951 = memref.load %arg3[%c228] : memref<288xf32, #tpu.memory_space<smem>>
    %952 = vector.broadcast %951 : f32 to vector<16x128xf32>
    %953 = arith.mulf %952, %926 : vector<16x128xf32>
    %954 = arith.addf %919, %953 : vector<16x128xf32>
    %c264 = arith.constant 264 : index
    %955 = memref.load %arg3[%c264] : memref<288xf32, #tpu.memory_space<smem>>
    %956 = vector.broadcast %955 : f32 to vector<16x128xf32>
    %957 = arith.mulf %956, %926 : vector<16x128xf32>
    %958 = arith.addf %923, %957 : vector<16x128xf32>
    %c13_123 = arith.constant 13 : index
    %959 = memref.load %arg3[%c13_123] : memref<288xf32, #tpu.memory_space<smem>>
    %960 = vector.broadcast %959 : f32 to vector<16x128xf32>
    %961 = arith.mulf %960, %925 : vector<16x128xf32>
    %962 = arith.addf %930, %961 : vector<16x128xf32>
    %c49_124 = arith.constant 49 : index
    %963 = memref.load %arg3[%c49_124] : memref<288xf32, #tpu.memory_space<smem>>
    %964 = vector.broadcast %963 : f32 to vector<16x128xf32>
    %965 = arith.mulf %964, %925 : vector<16x128xf32>
    %966 = arith.addf %934, %965 : vector<16x128xf32>
    %c85_125 = arith.constant 85 : index
    %967 = memref.load %arg3[%c85_125] : memref<288xf32, #tpu.memory_space<smem>>
    %968 = vector.broadcast %967 : f32 to vector<16x128xf32>
    %969 = arith.mulf %968, %925 : vector<16x128xf32>
    %970 = arith.addf %938, %969 : vector<16x128xf32>
    %c121 = arith.constant 121 : index
    %971 = memref.load %arg3[%c121] : memref<288xf32, #tpu.memory_space<smem>>
    %972 = vector.broadcast %971 : f32 to vector<16x128xf32>
    %973 = arith.mulf %972, %925 : vector<16x128xf32>
    %974 = arith.addf %942, %973 : vector<16x128xf32>
    %c157 = arith.constant 157 : index
    %975 = memref.load %arg3[%c157] : memref<288xf32, #tpu.memory_space<smem>>
    %976 = vector.broadcast %975 : f32 to vector<16x128xf32>
    %977 = arith.mulf %976, %925 : vector<16x128xf32>
    %978 = arith.addf %946, %977 : vector<16x128xf32>
    %c193 = arith.constant 193 : index
    %979 = memref.load %arg3[%c193] : memref<288xf32, #tpu.memory_space<smem>>
    %980 = vector.broadcast %979 : f32 to vector<16x128xf32>
    %981 = arith.mulf %980, %925 : vector<16x128xf32>
    %982 = arith.addf %950, %981 : vector<16x128xf32>
    %c229 = arith.constant 229 : index
    %983 = memref.load %arg3[%c229] : memref<288xf32, #tpu.memory_space<smem>>
    %984 = vector.broadcast %983 : f32 to vector<16x128xf32>
    %985 = arith.mulf %984, %925 : vector<16x128xf32>
    %986 = arith.addf %954, %985 : vector<16x128xf32>
    %c265 = arith.constant 265 : index
    %987 = memref.load %arg3[%c265] : memref<288xf32, #tpu.memory_space<smem>>
    %988 = vector.broadcast %987 : f32 to vector<16x128xf32>
    %989 = arith.mulf %988, %925 : vector<16x128xf32>
    %990 = arith.addf %958, %989 : vector<16x128xf32>
    %c127_i32_126 = arith.constant 127 : i32
    %991 = tpu.dynamic_rotate %925 by %c127_i32_126 dim 1 : vector<16x128xf32>, i32 -> vector<16x128xf32>
    %c14_127 = arith.constant 14 : index
    %992 = memref.load %arg3[%c14_127] : memref<288xf32, #tpu.memory_space<smem>>
    %993 = vector.broadcast %992 : f32 to vector<16x128xf32>
    %994 = arith.mulf %993, %991 : vector<16x128xf32>
    %995 = arith.addf %962, %994 : vector<16x128xf32>
    %c50_128 = arith.constant 50 : index
    %996 = memref.load %arg3[%c50_128] : memref<288xf32, #tpu.memory_space<smem>>
    %997 = vector.broadcast %996 : f32 to vector<16x128xf32>
    %998 = arith.mulf %997, %991 : vector<16x128xf32>
    %999 = arith.addf %966, %998 : vector<16x128xf32>
    %c86_129 = arith.constant 86 : index
    %1000 = memref.load %arg3[%c86_129] : memref<288xf32, #tpu.memory_space<smem>>
    %1001 = vector.broadcast %1000 : f32 to vector<16x128xf32>
    %1002 = arith.mulf %1001, %991 : vector<16x128xf32>
    %1003 = arith.addf %970, %1002 : vector<16x128xf32>
    %c122 = arith.constant 122 : index
    %1004 = memref.load %arg3[%c122] : memref<288xf32, #tpu.memory_space<smem>>
    %1005 = vector.broadcast %1004 : f32 to vector<16x128xf32>
    %1006 = arith.mulf %1005, %991 : vector<16x128xf32>
    %1007 = arith.addf %974, %1006 : vector<16x128xf32>
    %c158 = arith.constant 158 : index
    %1008 = memref.load %arg3[%c158] : memref<288xf32, #tpu.memory_space<smem>>
    %1009 = vector.broadcast %1008 : f32 to vector<16x128xf32>
    %1010 = arith.mulf %1009, %991 : vector<16x128xf32>
    %1011 = arith.addf %978, %1010 : vector<16x128xf32>
    %c194 = arith.constant 194 : index
    %1012 = memref.load %arg3[%c194] : memref<288xf32, #tpu.memory_space<smem>>
    %1013 = vector.broadcast %1012 : f32 to vector<16x128xf32>
    %1014 = arith.mulf %1013, %991 : vector<16x128xf32>
    %1015 = arith.addf %982, %1014 : vector<16x128xf32>
    %c230 = arith.constant 230 : index
    %1016 = memref.load %arg3[%c230] : memref<288xf32, #tpu.memory_space<smem>>
    %1017 = vector.broadcast %1016 : f32 to vector<16x128xf32>
    %1018 = arith.mulf %1017, %991 : vector<16x128xf32>
    %1019 = arith.addf %986, %1018 : vector<16x128xf32>
    %c266 = arith.constant 266 : index
    %1020 = memref.load %arg3[%c266] : memref<288xf32, #tpu.memory_space<smem>>
    %1021 = vector.broadcast %1020 : f32 to vector<16x128xf32>
    %1022 = arith.mulf %1021, %991 : vector<16x128xf32>
    %1023 = arith.addf %990, %1022 : vector<16x128xf32>
    %c1_130 = arith.constant 1 : index
    %c9_131 = arith.constant 9 : index
    %c0_132 = arith.constant 0 : index
    %1024 = vector.load %arg8[%c1_130, %c9_131, %c0_132] : memref<4x32x128xf32, #tpu.memory_space<vmem>>, vector<1x16x128xf32>
    %1025 = vector.shape_cast %1024 : vector<1x16x128xf32> to vector<16x128xf32>
    %c1_i32_133 = arith.constant 1 : i32
    %1026 = tpu.dynamic_rotate %1025 by %c1_i32_133 dim 1 : vector<16x128xf32>, i32 -> vector<16x128xf32>
    %c15_134 = arith.constant 15 : index
    %1027 = memref.load %arg3[%c15_134] : memref<288xf32, #tpu.memory_space<smem>>
    %1028 = vector.broadcast %1027 : f32 to vector<16x128xf32>
    %1029 = arith.mulf %1028, %1026 : vector<16x128xf32>
    %1030 = arith.addf %995, %1029 : vector<16x128xf32>
    %c51_135 = arith.constant 51 : index
    %1031 = memref.load %arg3[%c51_135] : memref<288xf32, #tpu.memory_space<smem>>
    %1032 = vector.broadcast %1031 : f32 to vector<16x128xf32>
    %1033 = arith.mulf %1032, %1026 : vector<16x128xf32>
    %1034 = arith.addf %999, %1033 : vector<16x128xf32>
    %c87_136 = arith.constant 87 : index
    %1035 = memref.load %arg3[%c87_136] : memref<288xf32, #tpu.memory_space<smem>>
    %1036 = vector.broadcast %1035 : f32 to vector<16x128xf32>
    %1037 = arith.mulf %1036, %1026 : vector<16x128xf32>
    %1038 = arith.addf %1003, %1037 : vector<16x128xf32>
    %c123 = arith.constant 123 : index
    %1039 = memref.load %arg3[%c123] : memref<288xf32, #tpu.memory_space<smem>>
    %1040 = vector.broadcast %1039 : f32 to vector<16x128xf32>
    %1041 = arith.mulf %1040, %1026 : vector<16x128xf32>
    %1042 = arith.addf %1007, %1041 : vector<16x128xf32>
    %c159 = arith.constant 159 : index
    %1043 = memref.load %arg3[%c159] : memref<288xf32, #tpu.memory_space<smem>>
    %1044 = vector.broadcast %1043 : f32 to vector<16x128xf32>
    %1045 = arith.mulf %1044, %1026 : vector<16x128xf32>
    %1046 = arith.addf %1011, %1045 : vector<16x128xf32>
    %c195 = arith.constant 195 : index
    %1047 = memref.load %arg3[%c195] : memref<288xf32, #tpu.memory_space<smem>>
    %1048 = vector.broadcast %1047 : f32 to vector<16x128xf32>
    %1049 = arith.mulf %1048, %1026 : vector<16x128xf32>
    %1050 = arith.addf %1015, %1049 : vector<16x128xf32>
    %c231 = arith.constant 231 : index
    %1051 = memref.load %arg3[%c231] : memref<288xf32, #tpu.memory_space<smem>>
    %1052 = vector.broadcast %1051 : f32 to vector<16x128xf32>
    %1053 = arith.mulf %1052, %1026 : vector<16x128xf32>
    %1054 = arith.addf %1019, %1053 : vector<16x128xf32>
    %c267 = arith.constant 267 : index
    %1055 = memref.load %arg3[%c267] : memref<288xf32, #tpu.memory_space<smem>>
    %1056 = vector.broadcast %1055 : f32 to vector<16x128xf32>
    %1057 = arith.mulf %1056, %1026 : vector<16x128xf32>
    %1058 = arith.addf %1023, %1057 : vector<16x128xf32>
    %c16_137 = arith.constant 16 : index
    %1059 = memref.load %arg3[%c16_137] : memref<288xf32, #tpu.memory_space<smem>>
    %1060 = vector.broadcast %1059 : f32 to vector<16x128xf32>
    %1061 = arith.mulf %1060, %1025 : vector<16x128xf32>
    %1062 = arith.addf %1030, %1061 : vector<16x128xf32>
    %c52_138 = arith.constant 52 : index
    %1063 = memref.load %arg3[%c52_138] : memref<288xf32, #tpu.memory_space<smem>>
    %1064 = vector.broadcast %1063 : f32 to vector<16x128xf32>
    %1065 = arith.mulf %1064, %1025 : vector<16x128xf32>
    %1066 = arith.addf %1034, %1065 : vector<16x128xf32>
    %c88_139 = arith.constant 88 : index
    %1067 = memref.load %arg3[%c88_139] : memref<288xf32, #tpu.memory_space<smem>>
    %1068 = vector.broadcast %1067 : f32 to vector<16x128xf32>
    %1069 = arith.mulf %1068, %1025 : vector<16x128xf32>
    %1070 = arith.addf %1038, %1069 : vector<16x128xf32>
    %c124 = arith.constant 124 : index
    %1071 = memref.load %arg3[%c124] : memref<288xf32, #tpu.memory_space<smem>>
    %1072 = vector.broadcast %1071 : f32 to vector<16x128xf32>
    %1073 = arith.mulf %1072, %1025 : vector<16x128xf32>
    %1074 = arith.addf %1042, %1073 : vector<16x128xf32>
    %c160 = arith.constant 160 : index
    %1075 = memref.load %arg3[%c160] : memref<288xf32, #tpu.memory_space<smem>>
    %1076 = vector.broadcast %1075 : f32 to vector<16x128xf32>
    %1077 = arith.mulf %1076, %1025 : vector<16x128xf32>
    %1078 = arith.addf %1046, %1077 : vector<16x128xf32>
    %c196 = arith.constant 196 : index
    %1079 = memref.load %arg3[%c196] : memref<288xf32, #tpu.memory_space<smem>>
    %1080 = vector.broadcast %1079 : f32 to vector<16x128xf32>
    %1081 = arith.mulf %1080, %1025 : vector<16x128xf32>
    %1082 = arith.addf %1050, %1081 : vector<16x128xf32>
    %c232 = arith.constant 232 : index
    %1083 = memref.load %arg3[%c232] : memref<288xf32, #tpu.memory_space<smem>>
    %1084 = vector.broadcast %1083 : f32 to vector<16x128xf32>
    %1085 = arith.mulf %1084, %1025 : vector<16x128xf32>
    %1086 = arith.addf %1054, %1085 : vector<16x128xf32>
    %c268 = arith.constant 268 : index
    %1087 = memref.load %arg3[%c268] : memref<288xf32, #tpu.memory_space<smem>>
    %1088 = vector.broadcast %1087 : f32 to vector<16x128xf32>
    %1089 = arith.mulf %1088, %1025 : vector<16x128xf32>
    %1090 = arith.addf %1058, %1089 : vector<16x128xf32>
    %c127_i32_140 = arith.constant 127 : i32
    %1091 = tpu.dynamic_rotate %1025 by %c127_i32_140 dim 1 : vector<16x128xf32>, i32 -> vector<16x128xf32>
    %c17_141 = arith.constant 17 : index
    %1092 = memref.load %arg3[%c17_141] : memref<288xf32, #tpu.memory_space<smem>>
    %1093 = vector.broadcast %1092 : f32 to vector<16x128xf32>
    %1094 = arith.mulf %1093, %1091 : vector<16x128xf32>
    %1095 = arith.addf %1062, %1094 : vector<16x128xf32>
    %c53_142 = arith.constant 53 : index
    %1096 = memref.load %arg3[%c53_142] : memref<288xf32, #tpu.memory_space<smem>>
    %1097 = vector.broadcast %1096 : f32 to vector<16x128xf32>
    %1098 = arith.mulf %1097, %1091 : vector<16x128xf32>
    %1099 = arith.addf %1066, %1098 : vector<16x128xf32>
    %c89_143 = arith.constant 89 : index
    %1100 = memref.load %arg3[%c89_143] : memref<288xf32, #tpu.memory_space<smem>>
    %1101 = vector.broadcast %1100 : f32 to vector<16x128xf32>
    %1102 = arith.mulf %1101, %1091 : vector<16x128xf32>
    %1103 = arith.addf %1070, %1102 : vector<16x128xf32>
    %c125 = arith.constant 125 : index
    %1104 = memref.load %arg3[%c125] : memref<288xf32, #tpu.memory_space<smem>>
    %1105 = vector.broadcast %1104 : f32 to vector<16x128xf32>
    %1106 = arith.mulf %1105, %1091 : vector<16x128xf32>
    %1107 = arith.addf %1074, %1106 : vector<16x128xf32>
    %c161 = arith.constant 161 : index
    %1108 = memref.load %arg3[%c161] : memref<288xf32, #tpu.memory_space<smem>>
    %1109 = vector.broadcast %1108 : f32 to vector<16x128xf32>
    %1110 = arith.mulf %1109, %1091 : vector<16x128xf32>
    %1111 = arith.addf %1078, %1110 : vector<16x128xf32>
    %c197 = arith.constant 197 : index
    %1112 = memref.load %arg3[%c197] : memref<288xf32, #tpu.memory_space<smem>>
    %1113 = vector.broadcast %1112 : f32 to vector<16x128xf32>
    %1114 = arith.mulf %1113, %1091 : vector<16x128xf32>
    %1115 = arith.addf %1082, %1114 : vector<16x128xf32>
    %c233 = arith.constant 233 : index
    %1116 = memref.load %arg3[%c233] : memref<288xf32, #tpu.memory_space<smem>>
    %1117 = vector.broadcast %1116 : f32 to vector<16x128xf32>
    %1118 = arith.mulf %1117, %1091 : vector<16x128xf32>
    %1119 = arith.addf %1086, %1118 : vector<16x128xf32>
    %c269 = arith.constant 269 : index
    %1120 = memref.load %arg3[%c269] : memref<288xf32, #tpu.memory_space<smem>>
    %1121 = vector.broadcast %1120 : f32 to vector<16x128xf32>
    %1122 = arith.mulf %1121, %1091 : vector<16x128xf32>
    %1123 = arith.addf %1090, %1122 : vector<16x128xf32>
    %c2_144 = arith.constant 2 : index
    %c7_145 = arith.constant 7 : index
    %c0_146 = arith.constant 0 : index
    %1124 = vector.load %arg8[%c2_144, %c7_145, %c0_146] : memref<4x32x128xf32, #tpu.memory_space<vmem>>, vector<1x16x128xf32>
    %1125 = vector.shape_cast %1124 : vector<1x16x128xf32> to vector<16x128xf32>
    %c1_i32_147 = arith.constant 1 : i32
    %1126 = tpu.dynamic_rotate %1125 by %c1_i32_147 dim 1 : vector<16x128xf32>, i32 -> vector<16x128xf32>
    %c18_148 = arith.constant 18 : index
    %1127 = memref.load %arg3[%c18_148] : memref<288xf32, #tpu.memory_space<smem>>
    %1128 = vector.broadcast %1127 : f32 to vector<16x128xf32>
    %1129 = arith.mulf %1128, %1126 : vector<16x128xf32>
    %1130 = arith.addf %1095, %1129 : vector<16x128xf32>
    %c54_149 = arith.constant 54 : index
    %1131 = memref.load %arg3[%c54_149] : memref<288xf32, #tpu.memory_space<smem>>
    %1132 = vector.broadcast %1131 : f32 to vector<16x128xf32>
    %1133 = arith.mulf %1132, %1126 : vector<16x128xf32>
    %1134 = arith.addf %1099, %1133 : vector<16x128xf32>
    %c90_150 = arith.constant 90 : index
    %1135 = memref.load %arg3[%c90_150] : memref<288xf32, #tpu.memory_space<smem>>
    %1136 = vector.broadcast %1135 : f32 to vector<16x128xf32>
    %1137 = arith.mulf %1136, %1126 : vector<16x128xf32>
    %1138 = arith.addf %1103, %1137 : vector<16x128xf32>
    %c126 = arith.constant 126 : index
    %1139 = memref.load %arg3[%c126] : memref<288xf32, #tpu.memory_space<smem>>
    %1140 = vector.broadcast %1139 : f32 to vector<16x128xf32>
    %1141 = arith.mulf %1140, %1126 : vector<16x128xf32>
    %1142 = arith.addf %1107, %1141 : vector<16x128xf32>
    %c162 = arith.constant 162 : index
    %1143 = memref.load %arg3[%c162] : memref<288xf32, #tpu.memory_space<smem>>
    %1144 = vector.broadcast %1143 : f32 to vector<16x128xf32>
    %1145 = arith.mulf %1144, %1126 : vector<16x128xf32>
    %1146 = arith.addf %1111, %1145 : vector<16x128xf32>
    %c198 = arith.constant 198 : index
    %1147 = memref.load %arg3[%c198] : memref<288xf32, #tpu.memory_space<smem>>
    %1148 = vector.broadcast %1147 : f32 to vector<16x128xf32>
    %1149 = arith.mulf %1148, %1126 : vector<16x128xf32>
    %1150 = arith.addf %1115, %1149 : vector<16x128xf32>
    %c234 = arith.constant 234 : index
    %1151 = memref.load %arg3[%c234] : memref<288xf32, #tpu.memory_space<smem>>
    %1152 = vector.broadcast %1151 : f32 to vector<16x128xf32>
    %1153 = arith.mulf %1152, %1126 : vector<16x128xf32>
    %1154 = arith.addf %1119, %1153 : vector<16x128xf32>
    %c270 = arith.constant 270 : index
    %1155 = memref.load %arg3[%c270] : memref<288xf32, #tpu.memory_space<smem>>
    %1156 = vector.broadcast %1155 : f32 to vector<16x128xf32>
    %1157 = arith.mulf %1156, %1126 : vector<16x128xf32>
    %1158 = arith.addf %1123, %1157 : vector<16x128xf32>
    %c19_151 = arith.constant 19 : index
    %1159 = memref.load %arg3[%c19_151] : memref<288xf32, #tpu.memory_space<smem>>
    %1160 = vector.broadcast %1159 : f32 to vector<16x128xf32>
    %1161 = arith.mulf %1160, %1125 : vector<16x128xf32>
    %1162 = arith.addf %1130, %1161 : vector<16x128xf32>
    %c55_152 = arith.constant 55 : index
    %1163 = memref.load %arg3[%c55_152] : memref<288xf32, #tpu.memory_space<smem>>
    %1164 = vector.broadcast %1163 : f32 to vector<16x128xf32>
    %1165 = arith.mulf %1164, %1125 : vector<16x128xf32>
    %1166 = arith.addf %1134, %1165 : vector<16x128xf32>
    %c91_153 = arith.constant 91 : index
    %1167 = memref.load %arg3[%c91_153] : memref<288xf32, #tpu.memory_space<smem>>
    %1168 = vector.broadcast %1167 : f32 to vector<16x128xf32>
    %1169 = arith.mulf %1168, %1125 : vector<16x128xf32>
    %1170 = arith.addf %1138, %1169 : vector<16x128xf32>
    %c127 = arith.constant 127 : index
    %1171 = memref.load %arg3[%c127] : memref<288xf32, #tpu.memory_space<smem>>
    %1172 = vector.broadcast %1171 : f32 to vector<16x128xf32>
    %1173 = arith.mulf %1172, %1125 : vector<16x128xf32>
    %1174 = arith.addf %1142, %1173 : vector<16x128xf32>
    %c163 = arith.constant 163 : index
    %1175 = memref.load %arg3[%c163] : memref<288xf32, #tpu.memory_space<smem>>
    %1176 = vector.broadcast %1175 : f32 to vector<16x128xf32>
    %1177 = arith.mulf %1176, %1125 : vector<16x128xf32>
    %1178 = arith.addf %1146, %1177 : vector<16x128xf32>
    %c199 = arith.constant 199 : index
    %1179 = memref.load %arg3[%c199] : memref<288xf32, #tpu.memory_space<smem>>
    %1180 = vector.broadcast %1179 : f32 to vector<16x128xf32>
    %1181 = arith.mulf %1180, %1125 : vector<16x128xf32>
    %1182 = arith.addf %1150, %1181 : vector<16x128xf32>
    %c235 = arith.constant 235 : index
    %1183 = memref.load %arg3[%c235] : memref<288xf32, #tpu.memory_space<smem>>
    %1184 = vector.broadcast %1183 : f32 to vector<16x128xf32>
    %1185 = arith.mulf %1184, %1125 : vector<16x128xf32>
    %1186 = arith.addf %1154, %1185 : vector<16x128xf32>
    %c271 = arith.constant 271 : index
    %1187 = memref.load %arg3[%c271] : memref<288xf32, #tpu.memory_space<smem>>
    %1188 = vector.broadcast %1187 : f32 to vector<16x128xf32>
    %1189 = arith.mulf %1188, %1125 : vector<16x128xf32>
    %1190 = arith.addf %1158, %1189 : vector<16x128xf32>
    %c127_i32_154 = arith.constant 127 : i32
    %1191 = tpu.dynamic_rotate %1125 by %c127_i32_154 dim 1 : vector<16x128xf32>, i32 -> vector<16x128xf32>
    %c20_155 = arith.constant 20 : index
    %1192 = memref.load %arg3[%c20_155] : memref<288xf32, #tpu.memory_space<smem>>
    %1193 = vector.broadcast %1192 : f32 to vector<16x128xf32>
    %1194 = arith.mulf %1193, %1191 : vector<16x128xf32>
    %1195 = arith.addf %1162, %1194 : vector<16x128xf32>
    %c56_156 = arith.constant 56 : index
    %1196 = memref.load %arg3[%c56_156] : memref<288xf32, #tpu.memory_space<smem>>
    %1197 = vector.broadcast %1196 : f32 to vector<16x128xf32>
    %1198 = arith.mulf %1197, %1191 : vector<16x128xf32>
    %1199 = arith.addf %1166, %1198 : vector<16x128xf32>
    %c92_157 = arith.constant 92 : index
    %1200 = memref.load %arg3[%c92_157] : memref<288xf32, #tpu.memory_space<smem>>
    %1201 = vector.broadcast %1200 : f32 to vector<16x128xf32>
    %1202 = arith.mulf %1201, %1191 : vector<16x128xf32>
    %1203 = arith.addf %1170, %1202 : vector<16x128xf32>
    %c128 = arith.constant 128 : index
    %1204 = memref.load %arg3[%c128] : memref<288xf32, #tpu.memory_space<smem>>
    %1205 = vector.broadcast %1204 : f32 to vector<16x128xf32>
    %1206 = arith.mulf %1205, %1191 : vector<16x128xf32>
    %1207 = arith.addf %1174, %1206 : vector<16x128xf32>
    %c164 = arith.constant 164 : index
    %1208 = memref.load %arg3[%c164] : memref<288xf32, #tpu.memory_space<smem>>
    %1209 = vector.broadcast %1208 : f32 to vector<16x128xf32>
    %1210 = arith.mulf %1209, %1191 : vector<16x128xf32>
    %1211 = arith.addf %1178, %1210 : vector<16x128xf32>
    %c200 = arith.constant 200 : index
    %1212 = memref.load %arg3[%c200] : memref<288xf32, #tpu.memory_space<smem>>
    %1213 = vector.broadcast %1212 : f32 to vector<16x128xf32>
    %1214 = arith.mulf %1213, %1191 : vector<16x128xf32>
    %1215 = arith.addf %1182, %1214 : vector<16x128xf32>
    %c236 = arith.constant 236 : index
    %1216 = memref.load %arg3[%c236] : memref<288xf32, #tpu.memory_space<smem>>
    %1217 = vector.broadcast %1216 : f32 to vector<16x128xf32>
    %1218 = arith.mulf %1217, %1191 : vector<16x128xf32>
    %1219 = arith.addf %1186, %1218 : vector<16x128xf32>
    %c272 = arith.constant 272 : index
    %1220 = memref.load %arg3[%c272] : memref<288xf32, #tpu.memory_space<smem>>
    %1221 = vector.broadcast %1220 : f32 to vector<16x128xf32>
    %1222 = arith.mulf %1221, %1191 : vector<16x128xf32>
    %1223 = arith.addf %1190, %1222 : vector<16x128xf32>
    %c2_158 = arith.constant 2 : index
    %c8_159 = arith.constant 8 : index
    %c0_160 = arith.constant 0 : index
    %1224 = vector.load %arg8[%c2_158, %c8_159, %c0_160] : memref<4x32x128xf32, #tpu.memory_space<vmem>>, vector<1x16x128xf32>
    %1225 = vector.shape_cast %1224 : vector<1x16x128xf32> to vector<16x128xf32>
    %c1_i32_161 = arith.constant 1 : i32
    %1226 = tpu.dynamic_rotate %1225 by %c1_i32_161 dim 1 : vector<16x128xf32>, i32 -> vector<16x128xf32>
    %c21_162 = arith.constant 21 : index
    %1227 = memref.load %arg3[%c21_162] : memref<288xf32, #tpu.memory_space<smem>>
    %1228 = vector.broadcast %1227 : f32 to vector<16x128xf32>
    %1229 = arith.mulf %1228, %1226 : vector<16x128xf32>
    %1230 = arith.addf %1195, %1229 : vector<16x128xf32>
    %c57_163 = arith.constant 57 : index
    %1231 = memref.load %arg3[%c57_163] : memref<288xf32, #tpu.memory_space<smem>>
    %1232 = vector.broadcast %1231 : f32 to vector<16x128xf32>
    %1233 = arith.mulf %1232, %1226 : vector<16x128xf32>
    %1234 = arith.addf %1199, %1233 : vector<16x128xf32>
    %c93_164 = arith.constant 93 : index
    %1235 = memref.load %arg3[%c93_164] : memref<288xf32, #tpu.memory_space<smem>>
    %1236 = vector.broadcast %1235 : f32 to vector<16x128xf32>
    %1237 = arith.mulf %1236, %1226 : vector<16x128xf32>
    %1238 = arith.addf %1203, %1237 : vector<16x128xf32>
    %c129 = arith.constant 129 : index
    %1239 = memref.load %arg3[%c129] : memref<288xf32, #tpu.memory_space<smem>>
    %1240 = vector.broadcast %1239 : f32 to vector<16x128xf32>
    %1241 = arith.mulf %1240, %1226 : vector<16x128xf32>
    %1242 = arith.addf %1207, %1241 : vector<16x128xf32>
    %c165 = arith.constant 165 : index
    %1243 = memref.load %arg3[%c165] : memref<288xf32, #tpu.memory_space<smem>>
    %1244 = vector.broadcast %1243 : f32 to vector<16x128xf32>
    %1245 = arith.mulf %1244, %1226 : vector<16x128xf32>
    %1246 = arith.addf %1211, %1245 : vector<16x128xf32>
    %c201 = arith.constant 201 : index
    %1247 = memref.load %arg3[%c201] : memref<288xf32, #tpu.memory_space<smem>>
    %1248 = vector.broadcast %1247 : f32 to vector<16x128xf32>
    %1249 = arith.mulf %1248, %1226 : vector<16x128xf32>
    %1250 = arith.addf %1215, %1249 : vector<16x128xf32>
    %c237 = arith.constant 237 : index
    %1251 = memref.load %arg3[%c237] : memref<288xf32, #tpu.memory_space<smem>>
    %1252 = vector.broadcast %1251 : f32 to vector<16x128xf32>
    %1253 = arith.mulf %1252, %1226 : vector<16x128xf32>
    %1254 = arith.addf %1219, %1253 : vector<16x128xf32>
    %c273 = arith.constant 273 : index
    %1255 = memref.load %arg3[%c273] : memref<288xf32, #tpu.memory_space<smem>>
    %1256 = vector.broadcast %1255 : f32 to vector<16x128xf32>
    %1257 = arith.mulf %1256, %1226 : vector<16x128xf32>
    %1258 = arith.addf %1223, %1257 : vector<16x128xf32>
    %c22_165 = arith.constant 22 : index
    %1259 = memref.load %arg3[%c22_165] : memref<288xf32, #tpu.memory_space<smem>>
    %1260 = vector.broadcast %1259 : f32 to vector<16x128xf32>
    %1261 = arith.mulf %1260, %1225 : vector<16x128xf32>
    %1262 = arith.addf %1230, %1261 : vector<16x128xf32>
    %c58_166 = arith.constant 58 : index
    %1263 = memref.load %arg3[%c58_166] : memref<288xf32, #tpu.memory_space<smem>>
    %1264 = vector.broadcast %1263 : f32 to vector<16x128xf32>
    %1265 = arith.mulf %1264, %1225 : vector<16x128xf32>
    %1266 = arith.addf %1234, %1265 : vector<16x128xf32>
    %c94_167 = arith.constant 94 : index
    %1267 = memref.load %arg3[%c94_167] : memref<288xf32, #tpu.memory_space<smem>>
    %1268 = vector.broadcast %1267 : f32 to vector<16x128xf32>
    %1269 = arith.mulf %1268, %1225 : vector<16x128xf32>
    %1270 = arith.addf %1238, %1269 : vector<16x128xf32>
    %c130 = arith.constant 130 : index
    %1271 = memref.load %arg3[%c130] : memref<288xf32, #tpu.memory_space<smem>>
    %1272 = vector.broadcast %1271 : f32 to vector<16x128xf32>
    %1273 = arith.mulf %1272, %1225 : vector<16x128xf32>
    %1274 = arith.addf %1242, %1273 : vector<16x128xf32>
    %c166 = arith.constant 166 : index
    %1275 = memref.load %arg3[%c166] : memref<288xf32, #tpu.memory_space<smem>>
    %1276 = vector.broadcast %1275 : f32 to vector<16x128xf32>
    %1277 = arith.mulf %1276, %1225 : vector<16x128xf32>
    %1278 = arith.addf %1246, %1277 : vector<16x128xf32>
    %c202 = arith.constant 202 : index
    %1279 = memref.load %arg3[%c202] : memref<288xf32, #tpu.memory_space<smem>>
    %1280 = vector.broadcast %1279 : f32 to vector<16x128xf32>
    %1281 = arith.mulf %1280, %1225 : vector<16x128xf32>
    %1282 = arith.addf %1250, %1281 : vector<16x128xf32>
    %c238 = arith.constant 238 : index
    %1283 = memref.load %arg3[%c238] : memref<288xf32, #tpu.memory_space<smem>>
    %1284 = vector.broadcast %1283 : f32 to vector<16x128xf32>
    %1285 = arith.mulf %1284, %1225 : vector<16x128xf32>
    %1286 = arith.addf %1254, %1285 : vector<16x128xf32>
    %c274 = arith.constant 274 : index
    %1287 = memref.load %arg3[%c274] : memref<288xf32, #tpu.memory_space<smem>>
    %1288 = vector.broadcast %1287 : f32 to vector<16x128xf32>
    %1289 = arith.mulf %1288, %1225 : vector<16x128xf32>
    %1290 = arith.addf %1258, %1289 : vector<16x128xf32>
    %c127_i32_168 = arith.constant 127 : i32
    %1291 = tpu.dynamic_rotate %1225 by %c127_i32_168 dim 1 : vector<16x128xf32>, i32 -> vector<16x128xf32>
    %c23_169 = arith.constant 23 : index
    %1292 = memref.load %arg3[%c23_169] : memref<288xf32, #tpu.memory_space<smem>>
    %1293 = vector.broadcast %1292 : f32 to vector<16x128xf32>
    %1294 = arith.mulf %1293, %1291 : vector<16x128xf32>
    %1295 = arith.addf %1262, %1294 : vector<16x128xf32>
    %c59_170 = arith.constant 59 : index
    %1296 = memref.load %arg3[%c59_170] : memref<288xf32, #tpu.memory_space<smem>>
    %1297 = vector.broadcast %1296 : f32 to vector<16x128xf32>
    %1298 = arith.mulf %1297, %1291 : vector<16x128xf32>
    %1299 = arith.addf %1266, %1298 : vector<16x128xf32>
    %c95_171 = arith.constant 95 : index
    %1300 = memref.load %arg3[%c95_171] : memref<288xf32, #tpu.memory_space<smem>>
    %1301 = vector.broadcast %1300 : f32 to vector<16x128xf32>
    %1302 = arith.mulf %1301, %1291 : vector<16x128xf32>
    %1303 = arith.addf %1270, %1302 : vector<16x128xf32>
    %c131 = arith.constant 131 : index
    %1304 = memref.load %arg3[%c131] : memref<288xf32, #tpu.memory_space<smem>>
    %1305 = vector.broadcast %1304 : f32 to vector<16x128xf32>
    %1306 = arith.mulf %1305, %1291 : vector<16x128xf32>
    %1307 = arith.addf %1274, %1306 : vector<16x128xf32>
    %c167 = arith.constant 167 : index
    %1308 = memref.load %arg3[%c167] : memref<288xf32, #tpu.memory_space<smem>>
    %1309 = vector.broadcast %1308 : f32 to vector<16x128xf32>
    %1310 = arith.mulf %1309, %1291 : vector<16x128xf32>
    %1311 = arith.addf %1278, %1310 : vector<16x128xf32>
    %c203 = arith.constant 203 : index
    %1312 = memref.load %arg3[%c203] : memref<288xf32, #tpu.memory_space<smem>>
    %1313 = vector.broadcast %1312 : f32 to vector<16x128xf32>
    %1314 = arith.mulf %1313, %1291 : vector<16x128xf32>
    %1315 = arith.addf %1282, %1314 : vector<16x128xf32>
    %c239 = arith.constant 239 : index
    %1316 = memref.load %arg3[%c239] : memref<288xf32, #tpu.memory_space<smem>>
    %1317 = vector.broadcast %1316 : f32 to vector<16x128xf32>
    %1318 = arith.mulf %1317, %1291 : vector<16x128xf32>
    %1319 = arith.addf %1286, %1318 : vector<16x128xf32>
    %c275 = arith.constant 275 : index
    %1320 = memref.load %arg3[%c275] : memref<288xf32, #tpu.memory_space<smem>>
    %1321 = vector.broadcast %1320 : f32 to vector<16x128xf32>
    %1322 = arith.mulf %1321, %1291 : vector<16x128xf32>
    %1323 = arith.addf %1290, %1322 : vector<16x128xf32>
    %c2_172 = arith.constant 2 : index
    %c9_173 = arith.constant 9 : index
    %c0_174 = arith.constant 0 : index
    %1324 = vector.load %arg8[%c2_172, %c9_173, %c0_174] : memref<4x32x128xf32, #tpu.memory_space<vmem>>, vector<1x16x128xf32>
    %1325 = vector.shape_cast %1324 : vector<1x16x128xf32> to vector<16x128xf32>
    %c1_i32_175 = arith.constant 1 : i32
    %1326 = tpu.dynamic_rotate %1325 by %c1_i32_175 dim 1 : vector<16x128xf32>, i32 -> vector<16x128xf32>
    %c24_176 = arith.constant 24 : index
    %1327 = memref.load %arg3[%c24_176] : memref<288xf32, #tpu.memory_space<smem>>
    %1328 = vector.broadcast %1327 : f32 to vector<16x128xf32>
    %1329 = arith.mulf %1328, %1326 : vector<16x128xf32>
    %1330 = arith.addf %1295, %1329 : vector<16x128xf32>
    %c60_177 = arith.constant 60 : index
    %1331 = memref.load %arg3[%c60_177] : memref<288xf32, #tpu.memory_space<smem>>
    %1332 = vector.broadcast %1331 : f32 to vector<16x128xf32>
    %1333 = arith.mulf %1332, %1326 : vector<16x128xf32>
    %1334 = arith.addf %1299, %1333 : vector<16x128xf32>
    %c96_178 = arith.constant 96 : index
    %1335 = memref.load %arg3[%c96_178] : memref<288xf32, #tpu.memory_space<smem>>
    %1336 = vector.broadcast %1335 : f32 to vector<16x128xf32>
    %1337 = arith.mulf %1336, %1326 : vector<16x128xf32>
    %1338 = arith.addf %1303, %1337 : vector<16x128xf32>
    %c132 = arith.constant 132 : index
    %1339 = memref.load %arg3[%c132] : memref<288xf32, #tpu.memory_space<smem>>
    %1340 = vector.broadcast %1339 : f32 to vector<16x128xf32>
    %1341 = arith.mulf %1340, %1326 : vector<16x128xf32>
    %1342 = arith.addf %1307, %1341 : vector<16x128xf32>
    %c168 = arith.constant 168 : index
    %1343 = memref.load %arg3[%c168] : memref<288xf32, #tpu.memory_space<smem>>
    %1344 = vector.broadcast %1343 : f32 to vector<16x128xf32>
    %1345 = arith.mulf %1344, %1326 : vector<16x128xf32>
    %1346 = arith.addf %1311, %1345 : vector<16x128xf32>
    %c204 = arith.constant 204 : index
    %1347 = memref.load %arg3[%c204] : memref<288xf32, #tpu.memory_space<smem>>
    %1348 = vector.broadcast %1347 : f32 to vector<16x128xf32>
    %1349 = arith.mulf %1348, %1326 : vector<16x128xf32>
    %1350 = arith.addf %1315, %1349 : vector<16x128xf32>
    %c240 = arith.constant 240 : index
    %1351 = memref.load %arg3[%c240] : memref<288xf32, #tpu.memory_space<smem>>
    %1352 = vector.broadcast %1351 : f32 to vector<16x128xf32>
    %1353 = arith.mulf %1352, %1326 : vector<16x128xf32>
    %1354 = arith.addf %1319, %1353 : vector<16x128xf32>
    %c276 = arith.constant 276 : index
    %1355 = memref.load %arg3[%c276] : memref<288xf32, #tpu.memory_space<smem>>
    %1356 = vector.broadcast %1355 : f32 to vector<16x128xf32>
    %1357 = arith.mulf %1356, %1326 : vector<16x128xf32>
    %1358 = arith.addf %1323, %1357 : vector<16x128xf32>
    %c25_179 = arith.constant 25 : index
    %1359 = memref.load %arg3[%c25_179] : memref<288xf32, #tpu.memory_space<smem>>
    %1360 = vector.broadcast %1359 : f32 to vector<16x128xf32>
    %1361 = arith.mulf %1360, %1325 : vector<16x128xf32>
    %1362 = arith.addf %1330, %1361 : vector<16x128xf32>
    %c61_180 = arith.constant 61 : index
    %1363 = memref.load %arg3[%c61_180] : memref<288xf32, #tpu.memory_space<smem>>
    %1364 = vector.broadcast %1363 : f32 to vector<16x128xf32>
    %1365 = arith.mulf %1364, %1325 : vector<16x128xf32>
    %1366 = arith.addf %1334, %1365 : vector<16x128xf32>
    %c97_181 = arith.constant 97 : index
    %1367 = memref.load %arg3[%c97_181] : memref<288xf32, #tpu.memory_space<smem>>
    %1368 = vector.broadcast %1367 : f32 to vector<16x128xf32>
    %1369 = arith.mulf %1368, %1325 : vector<16x128xf32>
    %1370 = arith.addf %1338, %1369 : vector<16x128xf32>
    %c133 = arith.constant 133 : index
    %1371 = memref.load %arg3[%c133] : memref<288xf32, #tpu.memory_space<smem>>
    %1372 = vector.broadcast %1371 : f32 to vector<16x128xf32>
    %1373 = arith.mulf %1372, %1325 : vector<16x128xf32>
    %1374 = arith.addf %1342, %1373 : vector<16x128xf32>
    %c169 = arith.constant 169 : index
    %1375 = memref.load %arg3[%c169] : memref<288xf32, #tpu.memory_space<smem>>
    %1376 = vector.broadcast %1375 : f32 to vector<16x128xf32>
    %1377 = arith.mulf %1376, %1325 : vector<16x128xf32>
    %1378 = arith.addf %1346, %1377 : vector<16x128xf32>
    %c205 = arith.constant 205 : index
    %1379 = memref.load %arg3[%c205] : memref<288xf32, #tpu.memory_space<smem>>
    %1380 = vector.broadcast %1379 : f32 to vector<16x128xf32>
    %1381 = arith.mulf %1380, %1325 : vector<16x128xf32>
    %1382 = arith.addf %1350, %1381 : vector<16x128xf32>
    %c241 = arith.constant 241 : index
    %1383 = memref.load %arg3[%c241] : memref<288xf32, #tpu.memory_space<smem>>
    %1384 = vector.broadcast %1383 : f32 to vector<16x128xf32>
    %1385 = arith.mulf %1384, %1325 : vector<16x128xf32>
    %1386 = arith.addf %1354, %1385 : vector<16x128xf32>
    %c277 = arith.constant 277 : index
    %1387 = memref.load %arg3[%c277] : memref<288xf32, #tpu.memory_space<smem>>
    %1388 = vector.broadcast %1387 : f32 to vector<16x128xf32>
    %1389 = arith.mulf %1388, %1325 : vector<16x128xf32>
    %1390 = arith.addf %1358, %1389 : vector<16x128xf32>
    %c127_i32_182 = arith.constant 127 : i32
    %1391 = tpu.dynamic_rotate %1325 by %c127_i32_182 dim 1 : vector<16x128xf32>, i32 -> vector<16x128xf32>
    %c26_183 = arith.constant 26 : index
    %1392 = memref.load %arg3[%c26_183] : memref<288xf32, #tpu.memory_space<smem>>
    %1393 = vector.broadcast %1392 : f32 to vector<16x128xf32>
    %1394 = arith.mulf %1393, %1391 : vector<16x128xf32>
    %1395 = arith.addf %1362, %1394 : vector<16x128xf32>
    %c62_184 = arith.constant 62 : index
    %1396 = memref.load %arg3[%c62_184] : memref<288xf32, #tpu.memory_space<smem>>
    %1397 = vector.broadcast %1396 : f32 to vector<16x128xf32>
    %1398 = arith.mulf %1397, %1391 : vector<16x128xf32>
    %1399 = arith.addf %1366, %1398 : vector<16x128xf32>
    %c98_185 = arith.constant 98 : index
    %1400 = memref.load %arg3[%c98_185] : memref<288xf32, #tpu.memory_space<smem>>
    %1401 = vector.broadcast %1400 : f32 to vector<16x128xf32>
    %1402 = arith.mulf %1401, %1391 : vector<16x128xf32>
    %1403 = arith.addf %1370, %1402 : vector<16x128xf32>
    %c134 = arith.constant 134 : index
    %1404 = memref.load %arg3[%c134] : memref<288xf32, #tpu.memory_space<smem>>
    %1405 = vector.broadcast %1404 : f32 to vector<16x128xf32>
    %1406 = arith.mulf %1405, %1391 : vector<16x128xf32>
    %1407 = arith.addf %1374, %1406 : vector<16x128xf32>
    %c170 = arith.constant 170 : index
    %1408 = memref.load %arg3[%c170] : memref<288xf32, #tpu.memory_space<smem>>
    %1409 = vector.broadcast %1408 : f32 to vector<16x128xf32>
    %1410 = arith.mulf %1409, %1391 : vector<16x128xf32>
    %1411 = arith.addf %1378, %1410 : vector<16x128xf32>
    %c206 = arith.constant 206 : index
    %1412 = memref.load %arg3[%c206] : memref<288xf32, #tpu.memory_space<smem>>
    %1413 = vector.broadcast %1412 : f32 to vector<16x128xf32>
    %1414 = arith.mulf %1413, %1391 : vector<16x128xf32>
    %1415 = arith.addf %1382, %1414 : vector<16x128xf32>
    %c242 = arith.constant 242 : index
    %1416 = memref.load %arg3[%c242] : memref<288xf32, #tpu.memory_space<smem>>
    %1417 = vector.broadcast %1416 : f32 to vector<16x128xf32>
    %1418 = arith.mulf %1417, %1391 : vector<16x128xf32>
    %1419 = arith.addf %1386, %1418 : vector<16x128xf32>
    %c278 = arith.constant 278 : index
    %1420 = memref.load %arg3[%c278] : memref<288xf32, #tpu.memory_space<smem>>
    %1421 = vector.broadcast %1420 : f32 to vector<16x128xf32>
    %1422 = arith.mulf %1421, %1391 : vector<16x128xf32>
    %1423 = arith.addf %1390, %1422 : vector<16x128xf32>
    %c3_186 = arith.constant 3 : index
    %c7_187 = arith.constant 7 : index
    %c0_188 = arith.constant 0 : index
    %1424 = vector.load %arg8[%c3_186, %c7_187, %c0_188] : memref<4x32x128xf32, #tpu.memory_space<vmem>>, vector<1x16x128xf32>
    %1425 = vector.shape_cast %1424 : vector<1x16x128xf32> to vector<16x128xf32>
    %c1_i32_189 = arith.constant 1 : i32
    %1426 = tpu.dynamic_rotate %1425 by %c1_i32_189 dim 1 : vector<16x128xf32>, i32 -> vector<16x128xf32>
    %c27_190 = arith.constant 27 : index
    %1427 = memref.load %arg3[%c27_190] : memref<288xf32, #tpu.memory_space<smem>>
    %1428 = vector.broadcast %1427 : f32 to vector<16x128xf32>
    %1429 = arith.mulf %1428, %1426 : vector<16x128xf32>
    %1430 = arith.addf %1395, %1429 : vector<16x128xf32>
    %c63_191 = arith.constant 63 : index
    %1431 = memref.load %arg3[%c63_191] : memref<288xf32, #tpu.memory_space<smem>>
    %1432 = vector.broadcast %1431 : f32 to vector<16x128xf32>
    %1433 = arith.mulf %1432, %1426 : vector<16x128xf32>
    %1434 = arith.addf %1399, %1433 : vector<16x128xf32>
    %c99_192 = arith.constant 99 : index
    %1435 = memref.load %arg3[%c99_192] : memref<288xf32, #tpu.memory_space<smem>>
    %1436 = vector.broadcast %1435 : f32 to vector<16x128xf32>
    %1437 = arith.mulf %1436, %1426 : vector<16x128xf32>
    %1438 = arith.addf %1403, %1437 : vector<16x128xf32>
    %c135 = arith.constant 135 : index
    %1439 = memref.load %arg3[%c135] : memref<288xf32, #tpu.memory_space<smem>>
    %1440 = vector.broadcast %1439 : f32 to vector<16x128xf32>
    %1441 = arith.mulf %1440, %1426 : vector<16x128xf32>
    %1442 = arith.addf %1407, %1441 : vector<16x128xf32>
    %c171 = arith.constant 171 : index
    %1443 = memref.load %arg3[%c171] : memref<288xf32, #tpu.memory_space<smem>>
    %1444 = vector.broadcast %1443 : f32 to vector<16x128xf32>
    %1445 = arith.mulf %1444, %1426 : vector<16x128xf32>
    %1446 = arith.addf %1411, %1445 : vector<16x128xf32>
    %c207 = arith.constant 207 : index
    %1447 = memref.load %arg3[%c207] : memref<288xf32, #tpu.memory_space<smem>>
    %1448 = vector.broadcast %1447 : f32 to vector<16x128xf32>
    %1449 = arith.mulf %1448, %1426 : vector<16x128xf32>
    %1450 = arith.addf %1415, %1449 : vector<16x128xf32>
    %c243 = arith.constant 243 : index
    %1451 = memref.load %arg3[%c243] : memref<288xf32, #tpu.memory_space<smem>>
    %1452 = vector.broadcast %1451 : f32 to vector<16x128xf32>
    %1453 = arith.mulf %1452, %1426 : vector<16x128xf32>
    %1454 = arith.addf %1419, %1453 : vector<16x128xf32>
    %c279 = arith.constant 279 : index
    %1455 = memref.load %arg3[%c279] : memref<288xf32, #tpu.memory_space<smem>>
    %1456 = vector.broadcast %1455 : f32 to vector<16x128xf32>
    %1457 = arith.mulf %1456, %1426 : vector<16x128xf32>
    %1458 = arith.addf %1423, %1457 : vector<16x128xf32>
    %c28_193 = arith.constant 28 : index
    %1459 = memref.load %arg3[%c28_193] : memref<288xf32, #tpu.memory_space<smem>>
    %1460 = vector.broadcast %1459 : f32 to vector<16x128xf32>
    %1461 = arith.mulf %1460, %1425 : vector<16x128xf32>
    %1462 = arith.addf %1430, %1461 : vector<16x128xf32>
    %c64_194 = arith.constant 64 : index
    %1463 = memref.load %arg3[%c64_194] : memref<288xf32, #tpu.memory_space<smem>>
    %1464 = vector.broadcast %1463 : f32 to vector<16x128xf32>
    %1465 = arith.mulf %1464, %1425 : vector<16x128xf32>
    %1466 = arith.addf %1434, %1465 : vector<16x128xf32>
    %c100 = arith.constant 100 : index
    %1467 = memref.load %arg3[%c100] : memref<288xf32, #tpu.memory_space<smem>>
    %1468 = vector.broadcast %1467 : f32 to vector<16x128xf32>
    %1469 = arith.mulf %1468, %1425 : vector<16x128xf32>
    %1470 = arith.addf %1438, %1469 : vector<16x128xf32>
    %c136 = arith.constant 136 : index
    %1471 = memref.load %arg3[%c136] : memref<288xf32, #tpu.memory_space<smem>>
    %1472 = vector.broadcast %1471 : f32 to vector<16x128xf32>
    %1473 = arith.mulf %1472, %1425 : vector<16x128xf32>
    %1474 = arith.addf %1442, %1473 : vector<16x128xf32>
    %c172 = arith.constant 172 : index
    %1475 = memref.load %arg3[%c172] : memref<288xf32, #tpu.memory_space<smem>>
    %1476 = vector.broadcast %1475 : f32 to vector<16x128xf32>
    %1477 = arith.mulf %1476, %1425 : vector<16x128xf32>
    %1478 = arith.addf %1446, %1477 : vector<16x128xf32>
    %c208 = arith.constant 208 : index
    %1479 = memref.load %arg3[%c208] : memref<288xf32, #tpu.memory_space<smem>>
    %1480 = vector.broadcast %1479 : f32 to vector<16x128xf32>
    %1481 = arith.mulf %1480, %1425 : vector<16x128xf32>
    %1482 = arith.addf %1450, %1481 : vector<16x128xf32>
    %c244 = arith.constant 244 : index
    %1483 = memref.load %arg3[%c244] : memref<288xf32, #tpu.memory_space<smem>>
    %1484 = vector.broadcast %1483 : f32 to vector<16x128xf32>
    %1485 = arith.mulf %1484, %1425 : vector<16x128xf32>
    %1486 = arith.addf %1454, %1485 : vector<16x128xf32>
    %c280 = arith.constant 280 : index
    %1487 = memref.load %arg3[%c280] : memref<288xf32, #tpu.memory_space<smem>>
    %1488 = vector.broadcast %1487 : f32 to vector<16x128xf32>
    %1489 = arith.mulf %1488, %1425 : vector<16x128xf32>
    %1490 = arith.addf %1458, %1489 : vector<16x128xf32>
    %c127_i32_195 = arith.constant 127 : i32
    %1491 = tpu.dynamic_rotate %1425 by %c127_i32_195 dim 1 : vector<16x128xf32>, i32 -> vector<16x128xf32>
    %c29_196 = arith.constant 29 : index
    %1492 = memref.load %arg3[%c29_196] : memref<288xf32, #tpu.memory_space<smem>>
    %1493 = vector.broadcast %1492 : f32 to vector<16x128xf32>
    %1494 = arith.mulf %1493, %1491 : vector<16x128xf32>
    %1495 = arith.addf %1462, %1494 : vector<16x128xf32>
    %c65_197 = arith.constant 65 : index
    %1496 = memref.load %arg3[%c65_197] : memref<288xf32, #tpu.memory_space<smem>>
    %1497 = vector.broadcast %1496 : f32 to vector<16x128xf32>
    %1498 = arith.mulf %1497, %1491 : vector<16x128xf32>
    %1499 = arith.addf %1466, %1498 : vector<16x128xf32>
    %c101 = arith.constant 101 : index
    %1500 = memref.load %arg3[%c101] : memref<288xf32, #tpu.memory_space<smem>>
    %1501 = vector.broadcast %1500 : f32 to vector<16x128xf32>
    %1502 = arith.mulf %1501, %1491 : vector<16x128xf32>
    %1503 = arith.addf %1470, %1502 : vector<16x128xf32>
    %c137 = arith.constant 137 : index
    %1504 = memref.load %arg3[%c137] : memref<288xf32, #tpu.memory_space<smem>>
    %1505 = vector.broadcast %1504 : f32 to vector<16x128xf32>
    %1506 = arith.mulf %1505, %1491 : vector<16x128xf32>
    %1507 = arith.addf %1474, %1506 : vector<16x128xf32>
    %c173 = arith.constant 173 : index
    %1508 = memref.load %arg3[%c173] : memref<288xf32, #tpu.memory_space<smem>>
    %1509 = vector.broadcast %1508 : f32 to vector<16x128xf32>
    %1510 = arith.mulf %1509, %1491 : vector<16x128xf32>
    %1511 = arith.addf %1478, %1510 : vector<16x128xf32>
    %c209 = arith.constant 209 : index
    %1512 = memref.load %arg3[%c209] : memref<288xf32, #tpu.memory_space<smem>>
    %1513 = vector.broadcast %1512 : f32 to vector<16x128xf32>
    %1514 = arith.mulf %1513, %1491 : vector<16x128xf32>
    %1515 = arith.addf %1482, %1514 : vector<16x128xf32>
    %c245 = arith.constant 245 : index
    %1516 = memref.load %arg3[%c245] : memref<288xf32, #tpu.memory_space<smem>>
    %1517 = vector.broadcast %1516 : f32 to vector<16x128xf32>
    %1518 = arith.mulf %1517, %1491 : vector<16x128xf32>
    %1519 = arith.addf %1486, %1518 : vector<16x128xf32>
    %c281 = arith.constant 281 : index
    %1520 = memref.load %arg3[%c281] : memref<288xf32, #tpu.memory_space<smem>>
    %1521 = vector.broadcast %1520 : f32 to vector<16x128xf32>
    %1522 = arith.mulf %1521, %1491 : vector<16x128xf32>
    %1523 = arith.addf %1490, %1522 : vector<16x128xf32>
    %c3_198 = arith.constant 3 : index
    %c8_199 = arith.constant 8 : index
    %c0_200 = arith.constant 0 : index
    %1524 = vector.load %arg8[%c3_198, %c8_199, %c0_200] : memref<4x32x128xf32, #tpu.memory_space<vmem>>, vector<1x16x128xf32>
    %1525 = vector.shape_cast %1524 : vector<1x16x128xf32> to vector<16x128xf32>
    %c1_i32_201 = arith.constant 1 : i32
    %1526 = tpu.dynamic_rotate %1525 by %c1_i32_201 dim 1 : vector<16x128xf32>, i32 -> vector<16x128xf32>
    %c30_202 = arith.constant 30 : index
    %1527 = memref.load %arg3[%c30_202] : memref<288xf32, #tpu.memory_space<smem>>
    %1528 = vector.broadcast %1527 : f32 to vector<16x128xf32>
    %1529 = arith.mulf %1528, %1526 : vector<16x128xf32>
    %1530 = arith.addf %1495, %1529 : vector<16x128xf32>
    %c66_203 = arith.constant 66 : index
    %1531 = memref.load %arg3[%c66_203] : memref<288xf32, #tpu.memory_space<smem>>
    %1532 = vector.broadcast %1531 : f32 to vector<16x128xf32>
    %1533 = arith.mulf %1532, %1526 : vector<16x128xf32>
    %1534 = arith.addf %1499, %1533 : vector<16x128xf32>
    %c102 = arith.constant 102 : index
    %1535 = memref.load %arg3[%c102] : memref<288xf32, #tpu.memory_space<smem>>
    %1536 = vector.broadcast %1535 : f32 to vector<16x128xf32>
    %1537 = arith.mulf %1536, %1526 : vector<16x128xf32>
    %1538 = arith.addf %1503, %1537 : vector<16x128xf32>
    %c138 = arith.constant 138 : index
    %1539 = memref.load %arg3[%c138] : memref<288xf32, #tpu.memory_space<smem>>
    %1540 = vector.broadcast %1539 : f32 to vector<16x128xf32>
    %1541 = arith.mulf %1540, %1526 : vector<16x128xf32>
    %1542 = arith.addf %1507, %1541 : vector<16x128xf32>
    %c174 = arith.constant 174 : index
    %1543 = memref.load %arg3[%c174] : memref<288xf32, #tpu.memory_space<smem>>
    %1544 = vector.broadcast %1543 : f32 to vector<16x128xf32>
    %1545 = arith.mulf %1544, %1526 : vector<16x128xf32>
    %1546 = arith.addf %1511, %1545 : vector<16x128xf32>
    %c210 = arith.constant 210 : index
    %1547 = memref.load %arg3[%c210] : memref<288xf32, #tpu.memory_space<smem>>
    %1548 = vector.broadcast %1547 : f32 to vector<16x128xf32>
    %1549 = arith.mulf %1548, %1526 : vector<16x128xf32>
    %1550 = arith.addf %1515, %1549 : vector<16x128xf32>
    %c246 = arith.constant 246 : index
    %1551 = memref.load %arg3[%c246] : memref<288xf32, #tpu.memory_space<smem>>
    %1552 = vector.broadcast %1551 : f32 to vector<16x128xf32>
    %1553 = arith.mulf %1552, %1526 : vector<16x128xf32>
    %1554 = arith.addf %1519, %1553 : vector<16x128xf32>
    %c282 = arith.constant 282 : index
    %1555 = memref.load %arg3[%c282] : memref<288xf32, #tpu.memory_space<smem>>
    %1556 = vector.broadcast %1555 : f32 to vector<16x128xf32>
    %1557 = arith.mulf %1556, %1526 : vector<16x128xf32>
    %1558 = arith.addf %1523, %1557 : vector<16x128xf32>
    %c31_204 = arith.constant 31 : index
    %1559 = memref.load %arg3[%c31_204] : memref<288xf32, #tpu.memory_space<smem>>
    %1560 = vector.broadcast %1559 : f32 to vector<16x128xf32>
    %1561 = arith.mulf %1560, %1525 : vector<16x128xf32>
    %1562 = arith.addf %1530, %1561 : vector<16x128xf32>
    %c67_205 = arith.constant 67 : index
    %1563 = memref.load %arg3[%c67_205] : memref<288xf32, #tpu.memory_space<smem>>
    %1564 = vector.broadcast %1563 : f32 to vector<16x128xf32>
    %1565 = arith.mulf %1564, %1525 : vector<16x128xf32>
    %1566 = arith.addf %1534, %1565 : vector<16x128xf32>
    %c103 = arith.constant 103 : index
    %1567 = memref.load %arg3[%c103] : memref<288xf32, #tpu.memory_space<smem>>
    %1568 = vector.broadcast %1567 : f32 to vector<16x128xf32>
    %1569 = arith.mulf %1568, %1525 : vector<16x128xf32>
    %1570 = arith.addf %1538, %1569 : vector<16x128xf32>
    %c139 = arith.constant 139 : index
    %1571 = memref.load %arg3[%c139] : memref<288xf32, #tpu.memory_space<smem>>
    %1572 = vector.broadcast %1571 : f32 to vector<16x128xf32>
    %1573 = arith.mulf %1572, %1525 : vector<16x128xf32>
    %1574 = arith.addf %1542, %1573 : vector<16x128xf32>
    %c175 = arith.constant 175 : index
    %1575 = memref.load %arg3[%c175] : memref<288xf32, #tpu.memory_space<smem>>
    %1576 = vector.broadcast %1575 : f32 to vector<16x128xf32>
    %1577 = arith.mulf %1576, %1525 : vector<16x128xf32>
    %1578 = arith.addf %1546, %1577 : vector<16x128xf32>
    %c211 = arith.constant 211 : index
    %1579 = memref.load %arg3[%c211] : memref<288xf32, #tpu.memory_space<smem>>
    %1580 = vector.broadcast %1579 : f32 to vector<16x128xf32>
    %1581 = arith.mulf %1580, %1525 : vector<16x128xf32>
    %1582 = arith.addf %1550, %1581 : vector<16x128xf32>
    %c247 = arith.constant 247 : index
    %1583 = memref.load %arg3[%c247] : memref<288xf32, #tpu.memory_space<smem>>
    %1584 = vector.broadcast %1583 : f32 to vector<16x128xf32>
    %1585 = arith.mulf %1584, %1525 : vector<16x128xf32>
    %1586 = arith.addf %1554, %1585 : vector<16x128xf32>
    %c283 = arith.constant 283 : index
    %1587 = memref.load %arg3[%c283] : memref<288xf32, #tpu.memory_space<smem>>
    %1588 = vector.broadcast %1587 : f32 to vector<16x128xf32>
    %1589 = arith.mulf %1588, %1525 : vector<16x128xf32>
    %1590 = arith.addf %1558, %1589 : vector<16x128xf32>
    %c127_i32_206 = arith.constant 127 : i32
    %1591 = tpu.dynamic_rotate %1525 by %c127_i32_206 dim 1 : vector<16x128xf32>, i32 -> vector<16x128xf32>
    %c32_207 = arith.constant 32 : index
    %1592 = memref.load %arg3[%c32_207] : memref<288xf32, #tpu.memory_space<smem>>
    %1593 = vector.broadcast %1592 : f32 to vector<16x128xf32>
    %1594 = arith.mulf %1593, %1591 : vector<16x128xf32>
    %1595 = arith.addf %1562, %1594 : vector<16x128xf32>
    %c68_208 = arith.constant 68 : index
    %1596 = memref.load %arg3[%c68_208] : memref<288xf32, #tpu.memory_space<smem>>
    %1597 = vector.broadcast %1596 : f32 to vector<16x128xf32>
    %1598 = arith.mulf %1597, %1591 : vector<16x128xf32>
    %1599 = arith.addf %1566, %1598 : vector<16x128xf32>
    %c104 = arith.constant 104 : index
    %1600 = memref.load %arg3[%c104] : memref<288xf32, #tpu.memory_space<smem>>
    %1601 = vector.broadcast %1600 : f32 to vector<16x128xf32>
    %1602 = arith.mulf %1601, %1591 : vector<16x128xf32>
    %1603 = arith.addf %1570, %1602 : vector<16x128xf32>
    %c140 = arith.constant 140 : index
    %1604 = memref.load %arg3[%c140] : memref<288xf32, #tpu.memory_space<smem>>
    %1605 = vector.broadcast %1604 : f32 to vector<16x128xf32>
    %1606 = arith.mulf %1605, %1591 : vector<16x128xf32>
    %1607 = arith.addf %1574, %1606 : vector<16x128xf32>
    %c176 = arith.constant 176 : index
    %1608 = memref.load %arg3[%c176] : memref<288xf32, #tpu.memory_space<smem>>
    %1609 = vector.broadcast %1608 : f32 to vector<16x128xf32>
    %1610 = arith.mulf %1609, %1591 : vector<16x128xf32>
    %1611 = arith.addf %1578, %1610 : vector<16x128xf32>
    %c212 = arith.constant 212 : index
    %1612 = memref.load %arg3[%c212] : memref<288xf32, #tpu.memory_space<smem>>
    %1613 = vector.broadcast %1612 : f32 to vector<16x128xf32>
    %1614 = arith.mulf %1613, %1591 : vector<16x128xf32>
    %1615 = arith.addf %1582, %1614 : vector<16x128xf32>
    %c248 = arith.constant 248 : index
    %1616 = memref.load %arg3[%c248] : memref<288xf32, #tpu.memory_space<smem>>
    %1617 = vector.broadcast %1616 : f32 to vector<16x128xf32>
    %1618 = arith.mulf %1617, %1591 : vector<16x128xf32>
    %1619 = arith.addf %1586, %1618 : vector<16x128xf32>
    %c284 = arith.constant 284 : index
    %1620 = memref.load %arg3[%c284] : memref<288xf32, #tpu.memory_space<smem>>
    %1621 = vector.broadcast %1620 : f32 to vector<16x128xf32>
    %1622 = arith.mulf %1621, %1591 : vector<16x128xf32>
    %1623 = arith.addf %1590, %1622 : vector<16x128xf32>
    %c3_209 = arith.constant 3 : index
    %c9_210 = arith.constant 9 : index
    %c0_211 = arith.constant 0 : index
    %1624 = vector.load %arg8[%c3_209, %c9_210, %c0_211] : memref<4x32x128xf32, #tpu.memory_space<vmem>>, vector<1x16x128xf32>
    %1625 = vector.shape_cast %1624 : vector<1x16x128xf32> to vector<16x128xf32>
    %c1_i32_212 = arith.constant 1 : i32
    %1626 = tpu.dynamic_rotate %1625 by %c1_i32_212 dim 1 : vector<16x128xf32>, i32 -> vector<16x128xf32>
    %c33_213 = arith.constant 33 : index
    %1627 = memref.load %arg3[%c33_213] : memref<288xf32, #tpu.memory_space<smem>>
    %1628 = vector.broadcast %1627 : f32 to vector<16x128xf32>
    %1629 = arith.mulf %1628, %1626 : vector<16x128xf32>
    %1630 = arith.addf %1595, %1629 : vector<16x128xf32>
    %c69_214 = arith.constant 69 : index
    %1631 = memref.load %arg3[%c69_214] : memref<288xf32, #tpu.memory_space<smem>>
    %1632 = vector.broadcast %1631 : f32 to vector<16x128xf32>
    %1633 = arith.mulf %1632, %1626 : vector<16x128xf32>
    %1634 = arith.addf %1599, %1633 : vector<16x128xf32>
    %c105 = arith.constant 105 : index
    %1635 = memref.load %arg3[%c105] : memref<288xf32, #tpu.memory_space<smem>>
    %1636 = vector.broadcast %1635 : f32 to vector<16x128xf32>
    %1637 = arith.mulf %1636, %1626 : vector<16x128xf32>
    %1638 = arith.addf %1603, %1637 : vector<16x128xf32>
    %c141 = arith.constant 141 : index
    %1639 = memref.load %arg3[%c141] : memref<288xf32, #tpu.memory_space<smem>>
    %1640 = vector.broadcast %1639 : f32 to vector<16x128xf32>
    %1641 = arith.mulf %1640, %1626 : vector<16x128xf32>
    %1642 = arith.addf %1607, %1641 : vector<16x128xf32>
    %c177 = arith.constant 177 : index
    %1643 = memref.load %arg3[%c177] : memref<288xf32, #tpu.memory_space<smem>>
    %1644 = vector.broadcast %1643 : f32 to vector<16x128xf32>
    %1645 = arith.mulf %1644, %1626 : vector<16x128xf32>
    %1646 = arith.addf %1611, %1645 : vector<16x128xf32>
    %c213 = arith.constant 213 : index
    %1647 = memref.load %arg3[%c213] : memref<288xf32, #tpu.memory_space<smem>>
    %1648 = vector.broadcast %1647 : f32 to vector<16x128xf32>
    %1649 = arith.mulf %1648, %1626 : vector<16x128xf32>
    %1650 = arith.addf %1615, %1649 : vector<16x128xf32>
    %c249 = arith.constant 249 : index
    %1651 = memref.load %arg3[%c249] : memref<288xf32, #tpu.memory_space<smem>>
    %1652 = vector.broadcast %1651 : f32 to vector<16x128xf32>
    %1653 = arith.mulf %1652, %1626 : vector<16x128xf32>
    %1654 = arith.addf %1619, %1653 : vector<16x128xf32>
    %c285 = arith.constant 285 : index
    %1655 = memref.load %arg3[%c285] : memref<288xf32, #tpu.memory_space<smem>>
    %1656 = vector.broadcast %1655 : f32 to vector<16x128xf32>
    %1657 = arith.mulf %1656, %1626 : vector<16x128xf32>
    %1658 = arith.addf %1623, %1657 : vector<16x128xf32>
    %c34_215 = arith.constant 34 : index
    %1659 = memref.load %arg3[%c34_215] : memref<288xf32, #tpu.memory_space<smem>>
    %1660 = vector.broadcast %1659 : f32 to vector<16x128xf32>
    %1661 = arith.mulf %1660, %1625 : vector<16x128xf32>
    %1662 = arith.addf %1630, %1661 : vector<16x128xf32>
    %c70_216 = arith.constant 70 : index
    %1663 = memref.load %arg3[%c70_216] : memref<288xf32, #tpu.memory_space<smem>>
    %1664 = vector.broadcast %1663 : f32 to vector<16x128xf32>
    %1665 = arith.mulf %1664, %1625 : vector<16x128xf32>
    %1666 = arith.addf %1634, %1665 : vector<16x128xf32>
    %c106 = arith.constant 106 : index
    %1667 = memref.load %arg3[%c106] : memref<288xf32, #tpu.memory_space<smem>>
    %1668 = vector.broadcast %1667 : f32 to vector<16x128xf32>
    %1669 = arith.mulf %1668, %1625 : vector<16x128xf32>
    %1670 = arith.addf %1638, %1669 : vector<16x128xf32>
    %c142 = arith.constant 142 : index
    %1671 = memref.load %arg3[%c142] : memref<288xf32, #tpu.memory_space<smem>>
    %1672 = vector.broadcast %1671 : f32 to vector<16x128xf32>
    %1673 = arith.mulf %1672, %1625 : vector<16x128xf32>
    %1674 = arith.addf %1642, %1673 : vector<16x128xf32>
    %c178 = arith.constant 178 : index
    %1675 = memref.load %arg3[%c178] : memref<288xf32, #tpu.memory_space<smem>>
    %1676 = vector.broadcast %1675 : f32 to vector<16x128xf32>
    %1677 = arith.mulf %1676, %1625 : vector<16x128xf32>
    %1678 = arith.addf %1646, %1677 : vector<16x128xf32>
    %c214 = arith.constant 214 : index
    %1679 = memref.load %arg3[%c214] : memref<288xf32, #tpu.memory_space<smem>>
    %1680 = vector.broadcast %1679 : f32 to vector<16x128xf32>
    %1681 = arith.mulf %1680, %1625 : vector<16x128xf32>
    %1682 = arith.addf %1650, %1681 : vector<16x128xf32>
    %c250 = arith.constant 250 : index
    %1683 = memref.load %arg3[%c250] : memref<288xf32, #tpu.memory_space<smem>>
    %1684 = vector.broadcast %1683 : f32 to vector<16x128xf32>
    %1685 = arith.mulf %1684, %1625 : vector<16x128xf32>
    %1686 = arith.addf %1654, %1685 : vector<16x128xf32>
    %c286 = arith.constant 286 : index
    %1687 = memref.load %arg3[%c286] : memref<288xf32, #tpu.memory_space<smem>>
    %1688 = vector.broadcast %1687 : f32 to vector<16x128xf32>
    %1689 = arith.mulf %1688, %1625 : vector<16x128xf32>
    %1690 = arith.addf %1658, %1689 : vector<16x128xf32>
    %c127_i32_217 = arith.constant 127 : i32
    %1691 = tpu.dynamic_rotate %1625 by %c127_i32_217 dim 1 : vector<16x128xf32>, i32 -> vector<16x128xf32>
    %c35_218 = arith.constant 35 : index
    %1692 = memref.load %arg3[%c35_218] : memref<288xf32, #tpu.memory_space<smem>>
    %1693 = vector.broadcast %1692 : f32 to vector<16x128xf32>
    %1694 = arith.mulf %1693, %1691 : vector<16x128xf32>
    %1695 = arith.addf %1662, %1694 : vector<16x128xf32>
    %c71_219 = arith.constant 71 : index
    %1696 = memref.load %arg3[%c71_219] : memref<288xf32, #tpu.memory_space<smem>>
    %1697 = vector.broadcast %1696 : f32 to vector<16x128xf32>
    %1698 = arith.mulf %1697, %1691 : vector<16x128xf32>
    %1699 = arith.addf %1666, %1698 : vector<16x128xf32>
    %c107 = arith.constant 107 : index
    %1700 = memref.load %arg3[%c107] : memref<288xf32, #tpu.memory_space<smem>>
    %1701 = vector.broadcast %1700 : f32 to vector<16x128xf32>
    %1702 = arith.mulf %1701, %1691 : vector<16x128xf32>
    %1703 = arith.addf %1670, %1702 : vector<16x128xf32>
    %c143 = arith.constant 143 : index
    %1704 = memref.load %arg3[%c143] : memref<288xf32, #tpu.memory_space<smem>>
    %1705 = vector.broadcast %1704 : f32 to vector<16x128xf32>
    %1706 = arith.mulf %1705, %1691 : vector<16x128xf32>
    %1707 = arith.addf %1674, %1706 : vector<16x128xf32>
    %c179 = arith.constant 179 : index
    %1708 = memref.load %arg3[%c179] : memref<288xf32, #tpu.memory_space<smem>>
    %1709 = vector.broadcast %1708 : f32 to vector<16x128xf32>
    %1710 = arith.mulf %1709, %1691 : vector<16x128xf32>
    %1711 = arith.addf %1678, %1710 : vector<16x128xf32>
    %c215 = arith.constant 215 : index
    %1712 = memref.load %arg3[%c215] : memref<288xf32, #tpu.memory_space<smem>>
    %1713 = vector.broadcast %1712 : f32 to vector<16x128xf32>
    %1714 = arith.mulf %1713, %1691 : vector<16x128xf32>
    %1715 = arith.addf %1682, %1714 : vector<16x128xf32>
    %c251 = arith.constant 251 : index
    %1716 = memref.load %arg3[%c251] : memref<288xf32, #tpu.memory_space<smem>>
    %1717 = vector.broadcast %1716 : f32 to vector<16x128xf32>
    %1718 = arith.mulf %1717, %1691 : vector<16x128xf32>
    %1719 = arith.addf %1686, %1718 : vector<16x128xf32>
    %c287 = arith.constant 287 : index
    %1720 = memref.load %arg3[%c287] : memref<288xf32, #tpu.memory_space<smem>>
    %1721 = vector.broadcast %1720 : f32 to vector<16x128xf32>
    %1722 = arith.mulf %1721, %1691 : vector<16x128xf32>
    %1723 = arith.addf %1690, %1722 : vector<16x128xf32>
    %1724 = vector.extract_strided_slice %1695 {offsets = [0, 0], sizes = [16, 127], strides = [1, 1]} : vector<16x128xf32> to vector<16x127xf32>
    %1725 = vector.extract_strided_slice %1695 {offsets = [0, 1], sizes = [16, 127], strides = [1, 1]} : vector<16x128xf32> to vector<16x127xf32>
    %1726 = arith.maximumf %1724, %1725 : vector<16x127xf32>
    %1727 = vector.extract_strided_slice %1726 {offsets = [0, 0], sizes = [15, 127], strides = [1, 1]} : vector<16x127xf32> to vector<15x127xf32>
    %1728 = vector.extract_strided_slice %1726 {offsets = [1, 0], sizes = [15, 127], strides = [1, 1]} : vector<16x127xf32> to vector<15x127xf32>
    %1729 = arith.maximumf %1727, %1728 : vector<15x127xf32>
    %c0_220 = arith.constant 0 : index
    %c0_221 = arith.constant 0 : index
    %c0_222 = arith.constant 0 : index
    %1730 = vector.load %arg6[%c0_220, %c0_221, %c0_222] : memref<8x15x127xf32, #tpu.memory_space<vmem>>, vector<1x15x127xf32>
    %1731 = vector.shape_cast %1730 : vector<1x15x127xf32> to vector<15x127xf32>
    %1732 = arith.mulf %1731, %1729 : vector<15x127xf32>
    %1733 = arith.addf %46, %1732 : vector<15x127xf32>
    %1734 = vector.extract_strided_slice %1699 {offsets = [0, 0], sizes = [16, 127], strides = [1, 1]} : vector<16x128xf32> to vector<16x127xf32>
    %1735 = vector.extract_strided_slice %1699 {offsets = [0, 1], sizes = [16, 127], strides = [1, 1]} : vector<16x128xf32> to vector<16x127xf32>
    %1736 = arith.maximumf %1734, %1735 : vector<16x127xf32>
    %1737 = vector.extract_strided_slice %1736 {offsets = [0, 0], sizes = [15, 127], strides = [1, 1]} : vector<16x127xf32> to vector<15x127xf32>
    %1738 = vector.extract_strided_slice %1736 {offsets = [1, 0], sizes = [15, 127], strides = [1, 1]} : vector<16x127xf32> to vector<15x127xf32>
    %1739 = arith.maximumf %1737, %1738 : vector<15x127xf32>
    %c1_223 = arith.constant 1 : index
    %c0_224 = arith.constant 0 : index
    %c0_225 = arith.constant 0 : index
    %1740 = vector.load %arg6[%c1_223, %c0_224, %c0_225] : memref<8x15x127xf32, #tpu.memory_space<vmem>>, vector<1x15x127xf32>
    %1741 = vector.shape_cast %1740 : vector<1x15x127xf32> to vector<15x127xf32>
    %1742 = arith.mulf %1741, %1739 : vector<15x127xf32>
    %1743 = arith.addf %1733, %1742 : vector<15x127xf32>
    %1744 = vector.extract_strided_slice %1703 {offsets = [0, 0], sizes = [16, 127], strides = [1, 1]} : vector<16x128xf32> to vector<16x127xf32>
    %1745 = vector.extract_strided_slice %1703 {offsets = [0, 1], sizes = [16, 127], strides = [1, 1]} : vector<16x128xf32> to vector<16x127xf32>
    %1746 = arith.maximumf %1744, %1745 : vector<16x127xf32>
    %1747 = vector.extract_strided_slice %1746 {offsets = [0, 0], sizes = [15, 127], strides = [1, 1]} : vector<16x127xf32> to vector<15x127xf32>
    %1748 = vector.extract_strided_slice %1746 {offsets = [1, 0], sizes = [15, 127], strides = [1, 1]} : vector<16x127xf32> to vector<15x127xf32>
    %1749 = arith.maximumf %1747, %1748 : vector<15x127xf32>
    %c2_226 = arith.constant 2 : index
    %c0_227 = arith.constant 0 : index
    %c0_228 = arith.constant 0 : index
    %1750 = vector.load %arg6[%c2_226, %c0_227, %c0_228] : memref<8x15x127xf32, #tpu.memory_space<vmem>>, vector<1x15x127xf32>
    %1751 = vector.shape_cast %1750 : vector<1x15x127xf32> to vector<15x127xf32>
    %1752 = arith.mulf %1751, %1749 : vector<15x127xf32>
    %1753 = arith.addf %1743, %1752 : vector<15x127xf32>
    %1754 = vector.extract_strided_slice %1707 {offsets = [0, 0], sizes = [16, 127], strides = [1, 1]} : vector<16x128xf32> to vector<16x127xf32>
    %1755 = vector.extract_strided_slice %1707 {offsets = [0, 1], sizes = [16, 127], strides = [1, 1]} : vector<16x128xf32> to vector<16x127xf32>
    %1756 = arith.maximumf %1754, %1755 : vector<16x127xf32>
    %1757 = vector.extract_strided_slice %1756 {offsets = [0, 0], sizes = [15, 127], strides = [1, 1]} : vector<16x127xf32> to vector<15x127xf32>
    %1758 = vector.extract_strided_slice %1756 {offsets = [1, 0], sizes = [15, 127], strides = [1, 1]} : vector<16x127xf32> to vector<15x127xf32>
    %1759 = arith.maximumf %1757, %1758 : vector<15x127xf32>
    %c3_229 = arith.constant 3 : index
    %c0_230 = arith.constant 0 : index
    %c0_231 = arith.constant 0 : index
    %1760 = vector.load %arg6[%c3_229, %c0_230, %c0_231] : memref<8x15x127xf32, #tpu.memory_space<vmem>>, vector<1x15x127xf32>
    %1761 = vector.shape_cast %1760 : vector<1x15x127xf32> to vector<15x127xf32>
    %1762 = arith.mulf %1761, %1759 : vector<15x127xf32>
    %1763 = arith.addf %1753, %1762 : vector<15x127xf32>
    %1764 = vector.extract_strided_slice %1711 {offsets = [0, 0], sizes = [16, 127], strides = [1, 1]} : vector<16x128xf32> to vector<16x127xf32>
    %1765 = vector.extract_strided_slice %1711 {offsets = [0, 1], sizes = [16, 127], strides = [1, 1]} : vector<16x128xf32> to vector<16x127xf32>
    %1766 = arith.maximumf %1764, %1765 : vector<16x127xf32>
    %1767 = vector.extract_strided_slice %1766 {offsets = [0, 0], sizes = [15, 127], strides = [1, 1]} : vector<16x127xf32> to vector<15x127xf32>
    %1768 = vector.extract_strided_slice %1766 {offsets = [1, 0], sizes = [15, 127], strides = [1, 1]} : vector<16x127xf32> to vector<15x127xf32>
    %1769 = arith.maximumf %1767, %1768 : vector<15x127xf32>
    %c4_232 = arith.constant 4 : index
    %c0_233 = arith.constant 0 : index
    %c0_234 = arith.constant 0 : index
    %1770 = vector.load %arg6[%c4_232, %c0_233, %c0_234] : memref<8x15x127xf32, #tpu.memory_space<vmem>>, vector<1x15x127xf32>
    %1771 = vector.shape_cast %1770 : vector<1x15x127xf32> to vector<15x127xf32>
    %1772 = arith.mulf %1771, %1769 : vector<15x127xf32>
    %1773 = arith.addf %1763, %1772 : vector<15x127xf32>
    %1774 = vector.extract_strided_slice %1715 {offsets = [0, 0], sizes = [16, 127], strides = [1, 1]} : vector<16x128xf32> to vector<16x127xf32>
    %1775 = vector.extract_strided_slice %1715 {offsets = [0, 1], sizes = [16, 127], strides = [1, 1]} : vector<16x128xf32> to vector<16x127xf32>
    %1776 = arith.maximumf %1774, %1775 : vector<16x127xf32>
    %1777 = vector.extract_strided_slice %1776 {offsets = [0, 0], sizes = [15, 127], strides = [1, 1]} : vector<16x127xf32> to vector<15x127xf32>
    %1778 = vector.extract_strided_slice %1776 {offsets = [1, 0], sizes = [15, 127], strides = [1, 1]} : vector<16x127xf32> to vector<15x127xf32>
    %1779 = arith.maximumf %1777, %1778 : vector<15x127xf32>
    %c5_235 = arith.constant 5 : index
    %c0_236 = arith.constant 0 : index
    %c0_237 = arith.constant 0 : index
    %1780 = vector.load %arg6[%c5_235, %c0_236, %c0_237] : memref<8x15x127xf32, #tpu.memory_space<vmem>>, vector<1x15x127xf32>
    %1781 = vector.shape_cast %1780 : vector<1x15x127xf32> to vector<15x127xf32>
    %1782 = arith.mulf %1781, %1779 : vector<15x127xf32>
    %1783 = arith.addf %1773, %1782 : vector<15x127xf32>
    %1784 = vector.extract_strided_slice %1719 {offsets = [0, 0], sizes = [16, 127], strides = [1, 1]} : vector<16x128xf32> to vector<16x127xf32>
    %1785 = vector.extract_strided_slice %1719 {offsets = [0, 1], sizes = [16, 127], strides = [1, 1]} : vector<16x128xf32> to vector<16x127xf32>
    %1786 = arith.maximumf %1784, %1785 : vector<16x127xf32>
    %1787 = vector.extract_strided_slice %1786 {offsets = [0, 0], sizes = [15, 127], strides = [1, 1]} : vector<16x127xf32> to vector<15x127xf32>
    %1788 = vector.extract_strided_slice %1786 {offsets = [1, 0], sizes = [15, 127], strides = [1, 1]} : vector<16x127xf32> to vector<15x127xf32>
    %1789 = arith.maximumf %1787, %1788 : vector<15x127xf32>
    %c6_238 = arith.constant 6 : index
    %c0_239 = arith.constant 0 : index
    %c0_240 = arith.constant 0 : index
    %1790 = vector.load %arg6[%c6_238, %c0_239, %c0_240] : memref<8x15x127xf32, #tpu.memory_space<vmem>>, vector<1x15x127xf32>
    %1791 = vector.shape_cast %1790 : vector<1x15x127xf32> to vector<15x127xf32>
    %1792 = arith.mulf %1791, %1789 : vector<15x127xf32>
    %1793 = arith.addf %1783, %1792 : vector<15x127xf32>
    %1794 = vector.extract_strided_slice %1723 {offsets = [0, 0], sizes = [16, 127], strides = [1, 1]} : vector<16x128xf32> to vector<16x127xf32>
    %1795 = vector.extract_strided_slice %1723 {offsets = [0, 1], sizes = [16, 127], strides = [1, 1]} : vector<16x128xf32> to vector<16x127xf32>
    %1796 = arith.maximumf %1794, %1795 : vector<16x127xf32>
    %1797 = vector.extract_strided_slice %1796 {offsets = [0, 0], sizes = [15, 127], strides = [1, 1]} : vector<16x127xf32> to vector<15x127xf32>
    %1798 = vector.extract_strided_slice %1796 {offsets = [1, 0], sizes = [15, 127], strides = [1, 1]} : vector<16x127xf32> to vector<15x127xf32>
    %1799 = arith.maximumf %1797, %1798 : vector<15x127xf32>
    %c7_241 = arith.constant 7 : index
    %c0_242 = arith.constant 0 : index
    %c0_243 = arith.constant 0 : index
    %1800 = vector.load %arg6[%c7_241, %c0_242, %c0_243] : memref<8x15x127xf32, #tpu.memory_space<vmem>>, vector<1x15x127xf32>
    %1801 = vector.shape_cast %1800 : vector<1x15x127xf32> to vector<15x127xf32>
    %1802 = arith.mulf %1801, %1799 : vector<15x127xf32>
    %1803 = arith.addf %1793, %1802 : vector<15x127xf32>
    %cst_244 = arith.constant dense<0.000000e+00> : vector<127xf32>
    %1804 = vector.multi_reduction <add>, %1803, %cst_244 [0] : vector<15x127xf32> to vector<127xf32>
    %1805 = vector.shape_cast %1804 : vector<127xf32> to vector<1x127xf32>
    %cst_245 = arith.constant 0.000000e+00 : f32
    %1806 = vector.broadcast %cst_245 : f32 to vector<1x128xf32>
    %1807 = vector.extract_strided_slice %1805 {offsets = [0, 0], sizes = [1, 20], strides = [1, 1]} : vector<1x127xf32> to vector<1x20xf32>
    %1808 = vector.shape_cast %1807 : vector<1x20xf32> to vector<1x1x20xf32>
    %cst_246 = arith.constant dense<0.000000e+00> : vector<1xf32>
    %1809 = vector.multi_reduction <add>, %1808, %cst_246 [1, 2] : vector<1x1x20xf32> to vector<1xf32>
    %1810 = vector.shape_cast %1809 : vector<1xf32> to vector<1x1x1xf32>
    %1811 = vector.extract %1810[0, 0, 0] : f32 from vector<1x1x1xf32>
    %c0_i32_247 = arith.constant 0 : i32
    %1812 = vector.broadcast %c0_i32_247 : i32 to vector<1x128xi32>
    %1813 = arith.cmpi eq, %39, %1812 : vector<1x128xi32>
    %cst_248 = arith.constant 0.000000e+00 : f32
    %1814 = vector.broadcast %1811 : f32 to vector<1x128xf32>
    %1815 = vector.broadcast %cst_248 : f32 to vector<1x128xf32>
    %1816 = arith.select %1813, %1814, %1815 : vector<1x128xi1>, vector<1x128xf32>
    %1817 = arith.addf %1806, %1816 : vector<1x128xf32>
    %1818 = vector.extract_strided_slice %1805 {offsets = [0, 20], sizes = [1, 20], strides = [1, 1]} : vector<1x127xf32> to vector<1x20xf32>
    %1819 = vector.shape_cast %1818 : vector<1x20xf32> to vector<1x1x20xf32>
    %cst_249 = arith.constant dense<0.000000e+00> : vector<1xf32>
    %1820 = vector.multi_reduction <add>, %1819, %cst_249 [1, 2] : vector<1x1x20xf32> to vector<1xf32>
    %1821 = vector.shape_cast %1820 : vector<1xf32> to vector<1x1x1xf32>
    %1822 = vector.extract %1821[0, 0, 0] : f32 from vector<1x1x1xf32>
    %c1_i32_250 = arith.constant 1 : i32
    %1823 = vector.broadcast %c1_i32_250 : i32 to vector<1x128xi32>
    %1824 = arith.cmpi eq, %39, %1823 : vector<1x128xi32>
    %cst_251 = arith.constant 0.000000e+00 : f32
    %1825 = vector.broadcast %1822 : f32 to vector<1x128xf32>
    %1826 = vector.broadcast %cst_251 : f32 to vector<1x128xf32>
    %1827 = arith.select %1824, %1825, %1826 : vector<1x128xi1>, vector<1x128xf32>
    %1828 = arith.addf %1817, %1827 : vector<1x128xf32>
    %1829 = vector.extract_strided_slice %1805 {offsets = [0, 40], sizes = [1, 20], strides = [1, 1]} : vector<1x127xf32> to vector<1x20xf32>
    %1830 = vector.shape_cast %1829 : vector<1x20xf32> to vector<1x1x20xf32>
    %cst_252 = arith.constant dense<0.000000e+00> : vector<1xf32>
    %1831 = vector.multi_reduction <add>, %1830, %cst_252 [1, 2] : vector<1x1x20xf32> to vector<1xf32>
    %1832 = vector.shape_cast %1831 : vector<1xf32> to vector<1x1x1xf32>
    %1833 = vector.extract %1832[0, 0, 0] : f32 from vector<1x1x1xf32>
    %c2_i32_253 = arith.constant 2 : i32
    %1834 = vector.broadcast %c2_i32_253 : i32 to vector<1x128xi32>
    %1835 = arith.cmpi eq, %39, %1834 : vector<1x128xi32>
    %cst_254 = arith.constant 0.000000e+00 : f32
    %1836 = vector.broadcast %1833 : f32 to vector<1x128xf32>
    %1837 = vector.broadcast %cst_254 : f32 to vector<1x128xf32>
    %1838 = arith.select %1835, %1836, %1837 : vector<1x128xi1>, vector<1x128xf32>
    %1839 = arith.addf %1828, %1838 : vector<1x128xf32>
    %1840 = vector.extract_strided_slice %1805 {offsets = [0, 60], sizes = [1, 20], strides = [1, 1]} : vector<1x127xf32> to vector<1x20xf32>
    %1841 = vector.shape_cast %1840 : vector<1x20xf32> to vector<1x1x20xf32>
    %cst_255 = arith.constant dense<0.000000e+00> : vector<1xf32>
    %1842 = vector.multi_reduction <add>, %1841, %cst_255 [1, 2] : vector<1x1x20xf32> to vector<1xf32>
    %1843 = vector.shape_cast %1842 : vector<1xf32> to vector<1x1x1xf32>
    %1844 = vector.extract %1843[0, 0, 0] : f32 from vector<1x1x1xf32>
    %c3_i32 = arith.constant 3 : i32
    %1845 = vector.broadcast %c3_i32 : i32 to vector<1x128xi32>
    %1846 = arith.cmpi eq, %39, %1845 : vector<1x128xi32>
    %cst_256 = arith.constant 0.000000e+00 : f32
    %1847 = vector.broadcast %1844 : f32 to vector<1x128xf32>
    %1848 = vector.broadcast %cst_256 : f32 to vector<1x128xf32>
    %1849 = arith.select %1846, %1847, %1848 : vector<1x128xi1>, vector<1x128xf32>
    %1850 = arith.addf %1839, %1849 : vector<1x128xf32>
    %1851 = vector.extract_strided_slice %1805 {offsets = [0, 80], sizes = [1, 20], strides = [1, 1]} : vector<1x127xf32> to vector<1x20xf32>
    %1852 = vector.shape_cast %1851 : vector<1x20xf32> to vector<1x1x20xf32>
    %cst_257 = arith.constant dense<0.000000e+00> : vector<1xf32>
    %1853 = vector.multi_reduction <add>, %1852, %cst_257 [1, 2] : vector<1x1x20xf32> to vector<1xf32>
    %1854 = vector.shape_cast %1853 : vector<1xf32> to vector<1x1x1xf32>
    %1855 = vector.extract %1854[0, 0, 0] : f32 from vector<1x1x1xf32>
    %c4_i32 = arith.constant 4 : i32
    %1856 = vector.broadcast %c4_i32 : i32 to vector<1x128xi32>
    %1857 = arith.cmpi eq, %39, %1856 : vector<1x128xi32>
    %cst_258 = arith.constant 0.000000e+00 : f32
    %1858 = vector.broadcast %1855 : f32 to vector<1x128xf32>
    %1859 = vector.broadcast %cst_258 : f32 to vector<1x128xf32>
    %1860 = arith.select %1857, %1858, %1859 : vector<1x128xi1>, vector<1x128xf32>
    %1861 = arith.addf %1850, %1860 : vector<1x128xf32>
    %1862 = vector.extract_strided_slice %1805 {offsets = [0, 100], sizes = [1, 20], strides = [1, 1]} : vector<1x127xf32> to vector<1x20xf32>
    %1863 = vector.shape_cast %1862 : vector<1x20xf32> to vector<1x1x20xf32>
    %cst_259 = arith.constant dense<0.000000e+00> : vector<1xf32>
    %1864 = vector.multi_reduction <add>, %1863, %cst_259 [1, 2] : vector<1x1x20xf32> to vector<1xf32>
    %1865 = vector.shape_cast %1864 : vector<1xf32> to vector<1x1x1xf32>
    %1866 = vector.extract %1865[0, 0, 0] : f32 from vector<1x1x1xf32>
    %c5_i32 = arith.constant 5 : i32
    %1867 = vector.broadcast %c5_i32 : i32 to vector<1x128xi32>
    %1868 = arith.cmpi eq, %39, %1867 : vector<1x128xi32>
    %cst_260 = arith.constant 0.000000e+00 : f32
    %1869 = vector.broadcast %1866 : f32 to vector<1x128xf32>
    %1870 = vector.broadcast %cst_260 : f32 to vector<1x128xf32>
    %1871 = arith.select %1868, %1869, %1870 : vector<1x128xi1>, vector<1x128xf32>
    %1872 = arith.addf %1861, %1871 : vector<1x128xf32>
    %c0_261 = arith.constant 0 : index
    %c0_262 = arith.constant 0 : index
    %c0_263 = arith.constant 0 : index
    %1873 = vector.load %arg7[%c0_261, %c0_262, %c0_263] : memref<1x1x128xf32, #tpu.memory_space<vmem>>, vector<1x1x128xf32>
    %1874 = vector.shape_cast %1873 : vector<1x1x128xf32> to vector<1x128xf32>
    %1875 = vector.shape_cast %1872 : vector<1x128xf32> to vector<1x1x128xf32>
    tpu.vector_store %arg7[%c0_261, %c0_262, %c0_263], %1875 {strides = array<i32>} : memref<1x1x128xf32, #tpu.memory_space<vmem>>, vector<1x1x128xf32>,
    return
  }
  func.func @transform_0(%arg0: i32) -> (i32, i32, i32) {
    %c0_i32 = arith.constant 0 : i32
    %c0_i32_0 = arith.constant 0 : i32
    %c0_i32_1 = arith.constant 0 : i32
    return %arg0, %c0_i32, %c0_i32_0 : i32, i32, i32
  }
  func.func @transform_1(%arg0: i32) -> i32 {
    %c0_i32 = arith.constant 0 : i32
    %c0_i32_0 = arith.constant 0 : i32
    return %c0_i32 : i32
  }
  func.func @transform_2(%arg0: i32) -> i32 {
    %c0_i32 = arith.constant 0 : i32
    %c0_i32_0 = arith.constant 0 : i32
    return %c0_i32 : i32
  }
  func.func @transform_3(%arg0: i32) -> i32 {
    %c0_i32 = arith.constant 0 : i32
    %c0_i32_0 = arith.constant 0 : i32
    return %c0_i32 : i32
  }
  func.func @transform_4(%arg0: i32) -> i32 {
    %c0_i32 = arith.constant 0 : i32
    %c0_i32_0 = arith.constant 0 : i32
    return %c0_i32 : i32
  }
  func.func @transform_5(%arg0: i32) -> (i32, i32, i32) {
    %c0_i32 = arith.constant 0 : i32
    %c0_i32_0 = arith.constant 0 : i32
    %c0_i32_1 = arith.constant 0 : i32
    %c0_i32_2 = arith.constant 0 : i32
    return %c0_i32, %c0_i32_0, %c0_i32_1 : i32, i32, i32
  }
  func.func @transform_6(%arg0: i32) -> (i32, i32, i32) {
    %c0_i32 = arith.constant 0 : i32
    %c0_i32_0 = arith.constant 0 : i32
    %c0_i32_1 = arith.constant 0 : i32
    return %arg0, %c0_i32, %c0_i32_0 : i32, i32, i32
  }
}

</mosaic_0001>

<bundles_post_ra>
// kernel: tpu_custom_call.1
= control target key start
LH: loop header
LB: loop body
LE: loop exit
PB: predicated region body
PF: predicated region fallthrough
CT: control target
= control target key end

     0   :  { %s7642_s0 = inlined_call_operand.vmem [shape: f32[1,20,128], index: 0, kind: input, shape index: {}]   ;;  %s7643_s1 = inlined_call_operand.vmem [shape: f32[100], index: 1, kind: input, shape index: {}]   ;;  %s7644_s2 = inlined_call_operand.vmem [shape: f32[288], index: 2, kind: input, shape index: {}]   ;;  %s7645_s3 = inlined_call_operand.vmem [shape: f32[4], index: 3, kind: input, shape index: {}]   ;;  %s7646_s4 = inlined_call_operand.vmem [shape: f32[8], index: 4, kind: input, shape index: {}]   ;;  %s7647_s5 = inlined_call_operand.vmem [shape: f32[8,15,127], index: 5, kind: input, shape index: {}]   ;;  %s7648_s6 = inlined_call_operand.hbm [shape: f32[1,1,128], index: 6, kind: output, shape index: {}]  }
   0x1   :  { %7991 = sst [smem:[#allocation271_spill]] %s7647_s5 }
   0x2   :  { %7992 = sst [smem:[#allocation272_spill]] %s7648_s6 }
   0x3   :  { %11 = vsyncpa [#allocation5], 0 }
   0x4   :  { %12 = vsyncpa [#allocation7], 0 }
   0x5   :  { %13 = vsyncpa [#allocation10], 0  ;;  %s33_s23 = sshll.u32 %s7644_s2, 4  ;;  %s34_s23 = int_to_ptr.vmem [resolvable:$true] %s33_s23 }
   0x6   :  { %14 = vsyncpa [#allocation4], 0  ;;  %s23_s26 = sshll.u32 %s7643_s1, 4  ;;  %s3680_s27 = scalar_lea.vmem %s34_s23, 48  ;;  %s24_s26 = int_to_ptr.vmem [resolvable:$true] %s23_s26 }
   0x7   :  { %p3681_p0 = scmp.ne.s32.totalorder %s34_s23, %s3680_s27  ;;  %s3684_s28 = scalar_lea.vmem %s34_s23, 64 }
   0x8   :  { %p3685_p1 = scmp.lt.s32.totalorder %s34_s23, %s34_s23  ;;  %p3686_p2 = scmp.lt.s32.totalorder %s3684_s28, %s3680_s27 }
   0xa   :  { %p3687_p3 = por %p3686_p2, %p3685_p1 }
   0xc   :  { %p3688_p4 = pnand %p3687_p3, %p3681_p0 }
   0xe   :  { %3691 = shalt.err (!%p3688_p4)
}
   0xf   :  { %s3758_s29 = smov [#allocation6]   ;;  %s3692_s30 = scalar_lea.vmem %s24_s26, 16 }
  0x10   :  { %36 = dma.vmem_to_smem %s34_s23, 48, %s3758_s29, [#allocation7]  }
  0x11   :  { %p3693_p5 = scmp.ne.s32.totalorder %s24_s26, %s3692_s30  ;;  %p3697_p6 = scmp.lt.s32.totalorder %s24_s26, %s24_s26 }
  0x12   :  { %p3698_p7 = scmp.lt.s32.totalorder %s3692_s30, %s3692_s30 }
  0x14   :  { %p3699_p8 = por %p3698_p7, %p3697_p6 }
  0x16   :  { %p3700_p9 = pnand %p3699_p8, %p3693_p5 }
  0x18   :  { %3703 = shalt.err (!%p3700_p9)
}
  0x19   :  { %s3759_s2 = smov [#allocation3]   ;;  %s43_s8 = sshll.u32 %s7645_s3, 4  ;;  %s44_s8 = int_to_ptr.vmem [resolvable:$true] %s43_s8 }
  0x1a   :  { %26 = dma.vmem_to_smem %s24_s26, 16, %s3759_s2, [#allocation5]  }
  0x1b   :  { %s53_s11 = sshll.u32 %s7646_s4, 4  ;;  %s3704_s12 = scalar_lea.vmem %s44_s8, 16  ;;  %s54_s11 = int_to_ptr.vmem [resolvable:$true] %s53_s11 }
  0x1c   :  { %p3705_p10 = scmp.ne.s32.totalorder %s44_s8, %s3704_s12  ;;  %p3709_p11 = scmp.lt.s32.totalorder %s44_s8, %s44_s8 }
  0x1d   :  { %p3710_p12 = scmp.lt.s32.totalorder %s3704_s12, %s3704_s12 }
  0x1f   :  { %p3711_p13 = por %p3710_p12, %p3709_p11 }
  0x21   :  { %p3712_p0 = pnand %p3711_p13, %p3705_p10 }
  0x23   :  { %3715 = shalt.err (!%p3712_p0)
}
  0x24   :  { %s3760_s13 = smov [#allocation8]   ;;  %s3716_s14 = scalar_lea.vmem %s54_s11, 16 }
  0x25   :  { %46 = dma.vmem_to_smem %s44_s8, 16, %s3760_s13, [#allocation7]  }
  0x26   :  { %p3717_p1 = scmp.ne.s32.totalorder %s54_s11, %s3716_s14  ;;  %p3721_p2 = scmp.lt.s32.totalorder %s54_s11, %s54_s11 }
  0x27   :  { %p3722_p3 = scmp.lt.s32.totalorder %s3716_s14, %s3716_s14 }
  0x29   :  { %p3723_p4 = por %p3722_p3, %p3721_p2 }
  0x2b   :  { %p3724_p5 = pnand %p3723_p4, %p3717_p1 }
  0x2d   :  { %3727 = shalt.err (!%p3724_p5)
}
  0x2e   :  { %s3761_s3 = smov [#allocation9]  }
  0x2f   :  { %56 = dma.vmem_to_smem %s54_s11, 16, %s3761_s3, [#allocation10]  }
  0x30   :  { %3750 = dma.done.wait [#allocation5], 16  }
  0x31   :  { %3751 = vsyncadd [#allocation5], 4294967280 }
  0x32   :  { %3752 = dma.done.wait [#allocation7], 64  }
  0x33   :  { %3753 = vsyncadd [#allocation7], 4294967232 }
  0x34   :  { %3754 = dma.done.wait [#allocation10], 16  }
  0x35   :  { %3755 = vsyncadd [#allocation10], 4294967280 }
  0x36   :  { %71 = sfence }
  0x37   :  { %v3823_v0 = vld [vmem:[%s7642_s0] sm:$0xff]  ;;  %s7649_s16 = smov 1   ;;  %s7651_s17 = smov 2   ;;  %v3832_v1 = vld [vmem:[%s7642_s0 + $0x8] sm:$0xff]  ;;  %v3841_v2 = vld [vmem:[%s7642_s0 + $0x10] sm:$0xf] }
  0x38   :  { %146 = vrot.lane.b32.xlu1 %v3823_v0, %s7649_s16  ;;  %118 = vrot.lane.b32.xlu0 %v3823_v0, %s7651_s17  ;;  %s7656_s22 = smov 127   ;;  %v259_v3 = vrot.slane %v3832_v1, 1  ;;  %v261_v4 = vrot.slane %v3841_v2, 1  ;;  %v258_v5 = vrot.slane %v3823_v0, 1  ;;  %vm257_vm0 = vcmask 1046528   ;;  %s7653_s23 = smov 126  }
  0x39   :  { %v447_v8 = vrot.slane %v3832_v1, 2  ;;  %v449_v9 = vrot.slane %v3841_v2, 2  ;;  %v446_v10 = vrot.slane %v3823_v0, 2  ;;  %vm445_vm1 = vcmask 1045504   ;;  %s3878_s0 = sld [smem:[#allocation3 + $0x1]]  ;;  %s3880_s24 = sld [smem:[#allocation3 + $0x1a]] }
  0x3a   :  { %v262_v6 = vsel %vm257_vm0, %v259_v3, %v261_v4  ;;  %v260_v7 = vsel %vm257_vm0, %v258_v5, %v259_v3  ;;  %v635_v13 = vrot.slane %v3832_v1, 3  ;;  %v637_v14 = vrot.slane %v3841_v2, 3  ;;  %s3882_s25 = sld [smem:[#allocation3 + $0x33]]  ;;  %s3886_s26 = sld [smem:[#allocation3 + $0x4c]] }
  0x3b   :  { %v450_v11 = vsel %vm445_vm1, %v447_v8, %v449_v9  ;;  %v448_v12 = vsel %vm445_vm1, %v446_v10, %v447_v8  ;;  %v634_v15 = vrot.slane %v3823_v0, 3  ;;  %vm633_vm2 = vcmask 1044480   ;;  %s3888_s27 = sld [smem:[#allocation8]]  ;;  %s3892_s28 = sld [smem:[#allocation8 + $0x1]] }
  0x3c   :  { %148 = vrot.lane.b32.xlu1 %v3832_v1, %s7649_s16  ;;  %120 = vrot.lane.b32.xlu0 %v3832_v1, %s7651_s17  ;;  %v638_v16 = vsel %vm633_vm2, %v635_v13, %v637_v14  ;;  %s3894_s29 = sld [smem:[#allocation8 + $0x2]]  ;;  %s3896_s30 = sld [smem:[#allocation8 + $0x3]]  ;;  %v823_v18 = vrot.slane %v3832_v1, 4  ;;  %v825_v19 = vrot.slane %v3841_v2, 4  ;;  %v822_v20 = vrot.slane %v3823_v0, 4 }
  0x3d   :  { %v636_v17 = vsel %vm633_vm2, %v634_v15, %v635_v13  ;;  %s3898_s2 = sld [smem:[#allocation3]]  ;;  %s3900_s1 = sld [smem:[#allocation3 + $0x19]]  ;;  %vm821_vm3 = vcmask 1043456  }
  0x3e   :  { %s3902_s7 = sld [smem:[#allocation3 + $0x32]]  ;;  %s3906_s8 = sld [smem:[#allocation3 + $0x4b]]  ;;  %v3951_v26 = vsel %vm821_vm3, %v823_v18, %v825_v19  ;;  %v3954_v27 = vsel %vm821_vm3, %v822_v20, %v823_v18 }
  0x3f   :  { %s3908_s9 = sld [smem:[#allocation3 + $0x2]]  ;;  %s3910_s10 = sld [smem:[#allocation3 + $0x1b]]  ;;  %v151_v21 = vstv %s3878_s0  ;;  %v7777_v22 = vstv %s3880_s24 }
  0x40   :  { %200 = vrot.lane.b32.xlu1 %v3832_v1, %s7656_s22  ;;  %198 = vrot.lane.b32.xlu0 %v3823_v0, %s7656_s22  ;;  %s3912_s11 = sld [smem:[#allocation3 + $0x34]]  ;;  %s3914_s12 = sld [smem:[#allocation3 + $0x4d]] }
  0x41   :  { %7993 = sst [smem:[#allocation16_spill]] %s3892_s28  ;;  %s3916_s13 = sld [smem:[#allocation3 + $0x3]] }
  0x42   :  { %7994 = sst [smem:[#allocation17_spill]] %s3894_s29  ;;  %s3919_s14 = sld [smem:[#allocation3 + $0x1c]] }
  0x43   :  { %7995 = sst [smem:[#allocation18_spill]] %s3896_s30  ;;  %s3921_s3 = sld [smem:[#allocation3 + $0x35]]  ;;  %v7776_v31 = vstv %s3898_s2  ;;  %v7774_v32 = vstv %s3900_s1 }
  0x44   :  { %228 = vrot.lane.b32.xlu1 %v3832_v1, %s7653_s23  ;;  %226 = vrot.lane.b32.xlu0 %v3823_v0, %s7653_s23  ;;  %s3927_s4 = sld [smem:[#allocation3 + $0x4e]]  ;;  %s3929_s15 = sld [smem:[#allocation3 + $0x7]]  ;;  %v7773_v34 = vstv %s3902_s7  ;;  %v7775_v35 = vstv %s3906_s8 }
  0x45   :  { %s3931_s18 = sld [smem:[#allocation3 + $0x4]]  ;;  %s3933_s19 = sld [smem:[#allocation3 + $0x20]]  ;;  %v175_v33 = vstv %s3908_s9  ;;  %v181_v37 = vstv %s3910_s10 }
  0x46   :  { %s3936_s20 = sld [smem:[#allocation3 + $0x1d]]  ;;  %s3938_s21 = sld [smem:[#allocation3 + $0x39]]  ;;  %v3973_v36 = vmul.f32 %v175_v33, %v3832_v1  ;;  %v3981_v38 = vmul.f32 %v181_v37, %v3832_v1  ;;  %v187_v39 = vstv %s3912_s11  ;;  %v193_v40 = vstv %s3914_s12 }
  0x47   :  { %s3960_s6 = sld [smem:[#allocation3 + $0x52]]  ;;  %s3968_s5 = sld [smem:[#allocation3 + $0x37]]  ;;  %v3991_v42 = vmul.f32 %v187_v39, %v3832_v1  ;;  %v3994_v43 = vmul.f32 %v193_v40, %v3832_v1  ;;  %v4001_v48 = vmul.f32 %v175_v33, %v3823_v0  ;;  %v4007_v50 = vmul.f32 %v181_v37, %v3823_v0 }
  0x48   :  { %267 = vrot.lane.b32.xlu1 %v262_v6, %s7651_s17  ;;  %265 = vrot.lane.b32.xlu0 %v260_v7, %s7651_s17  ;;  %s3976_s29 = sld [smem:[#allocation3 + $0x50]]  ;;  %s3978_s30 = sld [smem:[#allocation3 + $0x6]]  ;;  %v4010_v51 = vmul.f32 %v187_v39, %v3823_v0  ;;  %v4013_v52 = vmul.f32 %v193_v40, %v3823_v0 }
  0x49   :  { %s3986_s9 = sld [smem:[#allocation3 + $0x1f]]  ;;  %s8007_s28 = smov 126  }
  0x4a   :  { %7996 = sst [smem:[#allocation19_spill]] %s3927_s4  ;;  %v322_v45 = vstv %s3929_s15  ;;  %s4003_s10 = sld [smem:[#allocation3 + $0x38]] }
  0x4b   :  { %7997 = sst [smem:[#allocation20_spill]] %s3931_s18  ;;  %v339_v49 = vstv %s3933_s19  ;;  %s4015_s11 = sld [smem:[#allocation3 + $0x51]]  ;;  %v4024_v57 = vmul.f32 %v322_v45, %v3832_v1  ;;  %v325_v58 = vmul.f32 %v322_v45, %v3841_v2 }
  0x4c   :  { %295 = vrot.lane.b32.xlu1 %v262_v6, %s7649_s16  ;;  %293 = vrot.lane.b32.xlu0 %v260_v7, %s7649_s16  ;;  %7998 = sst [smem:[#allocation21_spill]] %s3936_s20  ;;  %v356_v53 = vstv %s3938_s21  ;;  %s4018_s12 = sld [smem:[#allocation3 + $0x8]]  ;;  %v4034_v59 = vmul.f32 %v339_v49, %v3832_v1  ;;  %v342_v60 = vmul.f32 %v339_v49, %v3841_v2  ;;  %v340_v20 = vmul.f32 %v339_v49, %v3823_v0 }
  0x4d   :  { %8003 = sst [smem:[#allocation26_spill]] %s3968_s5  ;;  %s4026_s15 = sld [smem:[#allocation3 + $0x21]]  ;;  %v373_v61 = vstv %s3960_s6  ;;  %v4045_v3 = vmul.f32 %v356_v53, %v3832_v1  ;;  %v359_v4 = vmul.f32 %v356_v53, %v3841_v2  ;;  %v330_v13 = vrot.slane %v4024_v57, 1 }
  0x4e   :  { %8004 = sst [smem:[#allocation27_spill]] %s3976_s29  ;;  %s8012_s19 = smov 2   ;;  %v4062_v10 = vmul.f32 %v373_v61, %v3832_v1  ;;  %v332_v14 = vrot.slane %v325_v58, 1  ;;  %v347_v15 = vrot.slane %v4034_v59, 1  ;;  %v357_v39 = vmul.f32 %v356_v53, %v3823_v0 }
  0x4f   :  { %8005 = sst [smem:[#allocation28_spill]] %s3978_s30  ;;  %s4038_s21 = sld [smem:[#allocation3 + $0x3a]]  ;;  %v364_v18 = vrot.slane %v4045_v3, 1  ;;  %v366_v19 = vrot.slane %v359_v4, 1  ;;  %v374_v40 = vmul.f32 %v373_v61, %v3823_v0 }
  0x50   :  { %391 = vrot.lane.b32.xlu1 %v262_v6, %s7656_s22  ;;  %389 = vrot.lane.b32.xlu0 %v260_v7, %s7656_s22  ;;  %8006 = sst [smem:[#allocation29_spill]] %s3986_s9  ;;  %s4056_s6 = sld [smem:[#allocation3 + $0x9]]  ;;  %v4100_v53 = vsel %vm257_vm0, %v330_v13, %v332_v14 }
  0x51   :  { %8008 = sst [smem:[#allocation30_spill]] %s4003_s10  ;;  %s4050_s20 = sld [smem:[#allocation3 + $0x25]]  ;;  %v4112_v3 = vsel %vm257_vm0, %v364_v18, %v366_v19  ;;  %v380_v14 = vrot.slane %v374_v40, 1 }
  0x52   :  { %8009 = sst [smem:[#allocation31_spill]] %s4015_s11  ;;  %s4058_s18 = sld [smem:[#allocation3 + $0x22]] }
  0x53   :  { %8010 = sst [smem:[#allocation32_spill]] %s4018_s12  ;;  %s4068_s5 = sld [smem:[#allocation3 + $0x3e]] }
  0x54   :  { %419 = vrot.lane.b32.xlu1 %v262_v6, %s7653_s23  ;;  %417 = vrot.lane.b32.xlu0 %v260_v7, %s7653_s23  ;;  %8011 = sst [smem:[#allocation33_spill]] %s4026_s15  ;;  %s8018_s30 = smov 1  }
  0x55   :  { %8013 = sst [smem:[#allocation34_spill]] %s4038_s21  ;;  %s4076_s9 = sld [smem:[#allocation3 + $0x57]] }
  0x56   :  { %8015 = sst [smem:[#allocation36_spill]] %s4056_s6  ;;  %s4106_s15 = sld [smem:[#allocation3 + $0x55]] }
  0x57   :  { %s4081_s29 = sld [smem:[#allocation3 + $0x54]]  ;;  %s4108_s12 = sld [smem:[#allocation3 + $0xb]] }
  0x58   :  { %455 = vrot.lane.b32.xlu1 %v450_v11, %s7651_s17  ;;  %453 = vrot.lane.b32.xlu0 %v448_v12, %s7651_s17  ;;  %8016 = sst [smem:[#allocation37_spill]] %s4058_s18  ;;  %s4093_s10 = sld [smem:[#allocation3 + $0x3c]] }
  0x59   :  { %s4117_s11 = sld [smem:[#allocation3 + $0x3d]]  ;;  %s4122_s21 = sld [smem:[#allocation3 + $0x56]]  ;;  %v544_v4 = vstv %s4068_s5 }
  0x5a   :  { %s4148_s5 = sld [smem:[#allocation3 + $0x3f]]  ;;  %s4158_s18 = sld [smem:[#allocation3 + $0x11]]  ;;  %v4167_v33 = vmul.f32 %v544_v4, %v3832_v1 }
  0x5b   :  { %s4196_s6 = sld [smem:[#allocation3 + $0x59]]  ;;  %s8077_s0 = sld [smem:[#allocation19_spill]] }
  0x5c   :  { %483 = vrot.lane.b32.xlu1 %v450_v11, %s7649_s16  ;;  %481 = vrot.lane.b32.xlu0 %v448_v12, %s7649_s16  ;;  %8024 = sst [smem:[#allocation43_spill]] %s4106_s15  ;;  %v552_v7 = vrot.slane %v4167_v33, 2  ;;  %s4296_s15 = sld [smem:[#allocation3 + $0x16]] }
  0x5d   :  { %8019 = sst [smem:[#allocation39_spill]] %s4081_s29  ;;  %s4180_s29 = sld [smem:[#allocation3 + $0x43]] }
  0x5e   :  { %8022 = sst [smem:[#allocation42_spill]] %s4093_s10  ;;  %s4190_s10 = sld [smem:[#allocation3 + $0x40]] }
  0x5f   :  { %8025 = sst [smem:[#allocation44_spill]] %s4108_s12  ;;  %s4230_s12 = sld [smem:[#allocation3 + $0x5a]] }
  0x60   :  { %579 = vrot.lane.b32.xlu1 %v450_v11, %s7656_s22  ;;  %577 = vrot.lane.b32.xlu0 %v448_v12, %s7656_s22  ;;  %8027 = sst [smem:[#allocation46_spill]] %s4117_s11  ;;  %s4201_s11 = sld [smem:[#allocation3 + $0xf]] }
  0x61   :  { %8028 = sst [smem:[#allocation47_spill]] %s4122_s21  ;;  %s4220_s21 = sld [smem:[#allocation3 + $0x41]] }
  0x62   :  { %8031 = sst [smem:[#allocation50_spill]] %s4148_s5  ;;  %s4318_s4 = sld [smem:[#allocation3 + $0x61]] }
  0x63   :  { %8036 = sst [smem:[#allocation55_spill]] %s4196_s6  ;;  %s4242_s5 = sld [smem:[#allocation3 + $0x42]] }
  0x64   :  { %607 = vrot.lane.b32.xlu1 %v450_v11, %s7653_s23  ;;  %605 = vrot.lane.b32.xlu0 %v448_v12, %s7653_s23  ;;  %s3958_s23 = sld [smem:[#allocation3 + $0x5]]  ;;  %v376_v11 = vmul.f32 %v373_v61, %v3841_v2  ;;  %v323_v12 = vmul.f32 %v322_v45, %v3823_v0  ;;  %v381_v45 = vrot.slane %v4062_v10, 1  ;;  %v346_v10 = vrot.slane %v340_v20, 1  ;;  %8035 = sst [smem:[#allocation54_spill]] %s4190_s10 }
  0x65   :  { %s4287_s6 = sld [smem:[#allocation3 + $0x45]]  ;;  %s4294_s10 = sld [smem:[#allocation3 + $0x5e]] }
  0x66   :  { %v383_v57 = vrot.slane %v376_v11, 1  ;;  %v329_v49 = vrot.slane %v323_v12, 1  ;;  %v527_v11 = vstv %s4050_s20  ;;  %v363_v12 = vrot.slane %v357_v39, 1  ;;  %s4146_s20 = sld [smem:[#allocation3 + $0x26]]  ;;  %8037 = sst [smem:[#allocation56_spill]] %s4201_s11 }
  0x67   :  { %v4142_v40 = vmul.f32 %v527_v11, %v3832_v1  ;;  %v4164_v37 = vsel %vm257_vm0, %v380_v14, %v381_v45  ;;  %v528_v9 = vmul.f32 %v527_v11, %v3823_v0  ;;  %8039 = sst [smem:[#allocation58_spill]] %s4220_s21  ;;  %s4311_s11 = sld [smem:[#allocation3 + $0x48]] }
  0x68   :  { %643 = vrot.lane.b32.xlu1 %v638_v16, %s7651_s17  ;;  %641 = vrot.lane.b32.xlu0 %v636_v17, %s7651_s17  ;;  %s3946_s17 = sld [smem:[#allocation3 + $0x4f]]  ;;  %v4125_v58 = vsel %vm257_vm0, %v381_v45, %v383_v57  ;;  %v4128_v19 = vsel %vm257_vm0, %v329_v49, %v330_v13  ;;  %v530_v13 = vmul.f32 %v527_v11, %v3841_v2  ;;  %v561_v57 = vstv %s4076_s9  ;;  %s4170_s9 = sld [smem:[#allocation3 + $0xe]] }
  0x69   :  { %v4151_v49 = vsel %vm257_vm0, %v346_v10, %v347_v15  ;;  %v564_v45 = vmul.f32 %v561_v57, %v3841_v2  ;;  %v534_v8 = vrot.slane %v528_v9, 2  ;;  %s4327_s21 = sld [smem:[#allocation3 + $0x2d]] }
  0x6a   :  { %8001 = sst [smem:[#allocation24_spill]] %s3958_s23  ;;  %s4066_s23 = sld [smem:[#allocation3 + $0x3b]] }
  0x6b   :  { %v571_v5 = vrot.slane %v564_v45, 2  ;;  %v545_v45 = vmul.f32 %v544_v4, %v3823_v0  ;;  %8046 = sst [smem:[#allocation65_spill]] %s4287_s6  ;;  %s4407_s6 = sld [smem:[#allocation3 + $0x4a]] }
  0x6c   :  { %671 = vrot.lane.b32.xlu1 %v638_v16, %s7649_s16  ;;  %669 = vrot.lane.b32.xlu0 %v636_v17, %s7649_s16  ;;  %s3944_s16 = sld [smem:[#allocation3 + $0x36]]  ;;  %8030 = sst [smem:[#allocation49_spill]] %s4146_s20 }
  0x6d   :  { %s4271_s20 = sld [smem:[#allocation3 + $0x13]]  ;;  %8047 = sst [smem:[#allocation66_spill]] %s4294_s10 }
  0x6e   :  { %8000 = sst [smem:[#allocation23_spill]] %s3946_s17  ;;  %s8023_s17 = smov 127  }
  0x6f   :  { %8033 = sst [smem:[#allocation52_spill]] %s4170_s9  ;;  %s4246_s9 = sld [smem:[#allocation3 + $0x5b]] }
  0x70   :  { %767 = vrot.lane.b32.xlu1 %v638_v16, %s7656_s22  ;;  %765 = vrot.lane.b32.xlu0 %v636_v17, %s7656_s22  ;;  %s3966_s22 = sld [smem:[#allocation3 + $0x1e]]  ;;  %8049 = sst [smem:[#allocation68_spill]] %s4327_s21 }
  0x71   :  { %8017 = sst [smem:[#allocation38_spill]] %s4066_s23  ;;  %s4184_s23 = sld [smem:[#allocation3 + $0x27]] }
  0x72   :  { %7999 = sst [smem:[#allocation22_spill]] %s3944_s16  ;;  %s4040_s16 = sld [smem:[#allocation3 + $0xc]] }
  0x73   :  { %s4401_s21 = sld [smem:[#allocation3 + $0x18]]  ;;  %s4403_s10 = sld [smem:[#allocation3 + $0x31]] }
  0x74   :  { %795 = vrot.lane.b32.xlu1 %v638_v16, %s8007_s28  ;;  %793 = vrot.lane.b32.xlu0 %v636_v17, %s8007_s28  ;;  %v349_v16 = vrot.slane %v342_v60, 1  ;;  %v535_v60 = vrot.slane %v4142_v40, 2  ;;  %v562_v17 = vmul.f32 %v561_v57, %v3823_v0 }
  0x75   :  { %8040 = sst [smem:[#allocation59_spill]] %s4246_s9  ;;  %s4342_s9 = sld [smem:[#allocation3 + $0x46]] }
  0x76   :  { %8002 = sst [smem:[#allocation25_spill]] %s3966_s22  ;;  %s4083_s22 = sld [smem:[#allocation3 + $0xa]]  ;;  %v4103_v59 = vsel %vm257_vm0, %v347_v15, %v349_v16  ;;  %v4161_v16 = vsel %vm257_vm0, %v363_v12, %v364_v18  ;;  %v547_v15 = vmul.f32 %v544_v4, %v3841_v2  ;;  %v4177_v12 = vmul.f32 %v561_v57, %v3832_v1 }
  0x77   :  { %8034 = sst [smem:[#allocation53_spill]] %s4184_s23  ;;  %v3766_v18 = vmov 0.0   ;;  %s4261_s23 = sld [smem:[#allocation3 + $0x44]]  ;;  %v4281_v47 = vsel %vm445_vm1, %v534_v8, %v535_v60 }
  0x78   :  { %831 = vrot.lane.b32.xlu1 %v3951_v26, %s8012_s19  ;;  %829 = vrot.lane.b32.xlu0 %v3954_v27, %s8012_s19  ;;  %s4048_s19 = sld [smem:[#allocation3 + $0x53]]  ;;  %v510_v61 = vstv %s4040_s16  ;;  %s4134_s16 = sld [smem:[#allocation3 + $0xd]]  ;;  %v554_v6 = vrot.slane %v547_v15, 2  ;;  %99 = vst [vmem:[#allocation2] sm:$0xff] %v3766_v18  ;;  %100 = vst [vmem:[#allocation2 + $0x20] sm:$0xff] %v3766_v18 }
  0x79   :  { %v4131_v20 = vmul.f32 %v510_v61, %v3832_v1  ;;  %v513_v39 = vmul.f32 %v510_v61, %v3841_v2  ;;  %101 = vst [vmem:[#allocation2 + $0x40] sm:$0xff] %v3766_v18  ;;  %102 = vst [vmem:[#allocation2 + $0x60] sm:$0xff] %v3766_v18 }
  0x7a   :  { %103 = vst [vmem:[#allocation2 + $0x18] sm:$0xff] %v3766_v18  ;;  %104 = vst [vmem:[#allocation2 + $0x38] sm:$0xff] %v3766_v18 }
  0x7b   :  { %v518_v14 = vrot.slane %v4131_v20, 2  ;;  %105 = vst [vmem:[#allocation2 + $0x58] sm:$0xff] %v3766_v18  ;;  %106 = vst [vmem:[#allocation2 + $0x78] sm:$0xff] %v3766_v18  ;;  %v698_v18 = vstv %s4158_s18  ;;  %s4240_s18 = sld [smem:[#allocation3 + $0x29]] }
  0x7c   :  { %859 = vrot.lane.b32.xlu1 %v3951_v26, %s8018_s30  ;;  %857 = vrot.lane.b32.xlu0 %v3954_v27, %s8018_s30  ;;  %8020 = sst [smem:[#allocation40_spill]] %s4083_s22  ;;  %s4089_s30 = sld [smem:[#allocation3 + $0x23]]  ;;  %v4249_v15 = vmul.f32 %v698_v18, %v3832_v1  ;;  %v701_v62 = vmul.f32 %v698_v18, %v3841_v2 }
  0x7d   :  { %s4172_s22 = sld [smem:[#allocation3 + $0x2a]]  ;;  %8043 = sst [smem:[#allocation62_spill]] %s4261_s23 }
  0x7e   :  { %8014 = sst [smem:[#allocation35_spill]] %s4048_s19  ;;  %v706_v46 = vrot.slane %v4249_v15, 3  ;;  %v708_v44 = vrot.slane %v701_v62, 3  ;;  %s4316_s19 = sld [smem:[#allocation3 + $0x14]] }
  0x7f   :  { %8029 = sst [smem:[#allocation48_spill]] %s4134_s16  ;;  %s4366_s23 = sld [smem:[#allocation3 + $0x47]] }
  0x80   :  { %955 = vrot.lane.b32.xlu1 %v3951_v26, %s8023_s17  ;;  %953 = vrot.lane.b32.xlu0 %v3954_v27, %s8023_s17  ;;  %s4115_s17 = sld [smem:[#allocation3 + $0x24]]  ;;  %s4232_s16 = sld [smem:[#allocation3 + $0x10]] }
  0x82   :  { %8021 = sst [smem:[#allocation41_spill]] %s4089_s30  ;;  %s4192_s30 = sld [smem:[#allocation3 + $0x5c]] }
  0x83   :  { %v715_v4 = vstv %s4172_s22  ;;  %s4252_s22 = sld [smem:[#allocation3 + $0x12]] }
  0x84   :  { %983 = vrot.lane.b32.xlu1 %v3951_v26, %s8007_s28  ;;  %981 = vrot.lane.b32.xlu0 %v3954_v27, %s8007_s28  ;;  %s4156_s28 = sld [smem:[#allocation3 + $0x58]]  ;;  %v520_v27 = vrot.slane %v513_v39, 2  ;;  %v537_v26 = vrot.slane %v530_v13, 2  ;;  %v569_v39 = vrot.slane %v4177_v12, 2  ;;  %v511_v13 = vmul.f32 %v510_v61, %v3823_v0  ;;  %8048 = sst [smem:[#allocation67_spill]] %s4316_s19 }
  0x85   :  { %v4255_v9 = vmul.f32 %v715_v4, %v3832_v1  ;;  %v699_v12 = vmul.f32 %v698_v18, %v3823_v0  ;;  %s4392_s19 = sld [smem:[#allocation3 + $0x62]] }
  0x86   :  { %8026 = sst [smem:[#allocation45_spill]] %s4115_s17  ;;  %s4203_s17 = sld [smem:[#allocation3 + $0x28]]  ;;  %v4208_v61 = vsel %vm445_vm1, %v518_v14, %v520_v27  ;;  %v4213_v11 = vsel %vm445_vm1, %v535_v60, %v537_v26  ;;  %v4226_v27 = vsel %vm445_vm1, %v552_v7, %v554_v6  ;;  %v4238_v57 = vsel %vm445_vm1, %v569_v39, %v571_v5 }
  0x87   :  { %v517_v10 = vrot.slane %v511_v13, 2  ;;  %v732_v6 = vstv %s4180_s29  ;;  %v551_v26 = vrot.slane %v545_v45, 2  ;;  %v568_v5 = vrot.slane %v562_v17, 2  ;;  %s4259_s29 = sld [smem:[#allocation3 + $0x2b]] }
  0x88   :  { %v718_v13 = vmul.f32 %v715_v4, %v3841_v2  ;;  %v749_v56 = vstv %s4192_s30  ;;  %v4266_v55 = vmul.f32 %v732_v6, %v3832_v1  ;;  %v735_v54 = vmul.f32 %v732_v6, %v3841_v2  ;;  %s4285_s30 = sld [smem:[#allocation3 + $0x2c]] }
  0x89   :  { %8041 = sst [smem:[#allocation60_spill]] %s4252_s22  ;;  %v4276_v17 = vsel %vm445_vm1, %v517_v10, %v518_v14  ;;  %v4291_v20 = vmul.f32 %v749_v56, %v3832_v1  ;;  %v752_v10 = vmul.f32 %v749_v56, %v3841_v2  ;;  %v4301_v8 = vsel %vm445_vm1, %v551_v26, %v552_v7  ;;  %s4353_s22 = sld [smem:[#allocation3 + $0x15]] }
  0x8a   :  { %8032 = sst [smem:[#allocation51_spill]] %s4156_s28  ;;  %s4269_s28 = sld [smem:[#allocation3 + $0x5d]]  ;;  %v4306_v62 = vsel %vm445_vm1, %v568_v5, %v569_v39  ;;  %v723_v60 = vrot.slane %v4255_v9, 3  ;;  %v725_v40 = vrot.slane %v718_v13, 3  ;;  %v740_v33 = vrot.slane %v4266_v55, 3 }
  0x8b   :  { %v742_v7 = vrot.slane %v735_v54, 3  ;;  %v716_v26 = vmul.f32 %v715_v4, %v3823_v0  ;;  %v733_v5 = vmul.f32 %v732_v6, %v3823_v0  ;;  %v757_v55 = vrot.slane %v4291_v20, 3  ;;  %8052 = sst [smem:[#allocation71_spill]] %s4392_s19  ;;  %s8062_s19 = sld [smem:[#allocation18_spill]] }
  0x8c   :  { %8038 = sst [smem:[#allocation57_spill]] %s4203_s17  ;;  %s4309_s17 = sld [smem:[#allocation3 + $0x2f]]  ;;  %v759_v54 = vrot.slane %v752_v10, 3  ;;  %v4331_v14 = vsel %vm633_vm2, %v706_v46, %v708_v44  ;;  %v4336_v6 = vsel %vm633_vm2, %v723_v60, %v725_v40  ;;  %v705_v20 = vrot.slane %v699_v12, 3 }
  0x8d   :  { %8042 = sst [smem:[#allocation61_spill]] %s4259_s29  ;;  %v4339_v13 = vsel %vm633_vm2, %v740_v33, %v742_v7  ;;  %v750_v10 = vmul.f32 %v749_v56, %v3823_v0  ;;  %v722_v18 = vrot.slane %v716_v26, 3  ;;  %v739_v4 = vrot.slane %v733_v5, 3  ;;  %s4346_s29 = sld [smem:[#allocation3 + $0x5f]] }
  0x8e   :  { %8045 = sst [smem:[#allocation64_spill]] %s4285_s30  ;;  %v4349_v40 = vsel %vm633_vm2, %v757_v55, %v759_v54  ;;  %v886_v12 = vstv %s4296_s15  ;;  %v920_v44 = vstv %s4311_s11  ;;  %v4361_v15 = vsel %vm633_vm2, %v705_v20, %v706_v46  ;;  %s4387_s11 = sld [smem:[#allocation3 + $0x49]] }
  0x8f   :  { %v756_v26 = vrot.slane %v750_v10, 3  ;;  %v937_v54 = vstv %s4318_s4  ;;  %v4370_v9 = vsel %vm633_vm2, %v722_v18, %v723_v60  ;;  %v4373_v7 = vsel %vm633_vm2, %v739_v4, %v740_v33  ;;  %s4375_s15 = sld [smem:[#allocation3 + $0x60]]  ;;  %s4409_s30 = sld [smem:[#allocation3 + $0x63]] }
  0x90   :  { %8044 = sst [smem:[#allocation63_spill]] %s4269_s28  ;;  %s4364_s28 = sld [smem:[#allocation3 + $0x2e]]  ;;  %v888_v56 = vmul.f32 %v886_v12, %v3832_v1  ;;  %v889_v46 = vmul.f32 %v886_v12, %v3841_v2  ;;  %v922_v60 = vmul.f32 %v920_v44, %v3832_v1  ;;  %v923_v33 = vmul.f32 %v920_v44, %v3841_v2 }
  0x91   :  { %s4385_s4 = sld [smem:[#allocation3 + $0x30]]  ;;  %v939_v18 = vmul.f32 %v937_v54, %v3832_v1  ;;  %v940_v4 = vmul.f32 %v937_v54, %v3841_v2  ;;  %v887_v20 = vmul.f32 %v886_v12, %v3823_v0  ;;  %v4396_v39 = vsel %vm633_vm2, %v756_v26, %v757_v55 }
  0x92   :  { %v903_v45 = vstv %s4309_s17  ;;  %s4379_s17 = sld [smem:[#allocation3 + $0x17]]  ;;  %v921_v30 = vmul.f32 %v920_v44, %v3823_v0  ;;  %v896_v29 = vrot.slane %v889_v46, 4  ;;  %v938_v12 = vmul.f32 %v937_v54, %v3823_v0 }
  0x93   :  { %v905_v10 = vmul.f32 %v903_v45, %v3832_v1  ;;  %v906_v5 = vmul.f32 %v903_v45, %v3841_v2  ;;  %v904_v41 = vmul.f32 %v903_v45, %v3823_v0  ;;  %v894_v2 = vrot.slane %v888_v56, 4 }
  0x94   :  { %8051 = sst [smem:[#allocation70_spill]] %s4387_s11  ;;  %v928_v26 = vrot.slane %v922_v60, 4  ;;  %v930_v63 = vrot.slane %v923_v33, 4  ;;  %v945_v28 = vrot.slane %v939_v18, 4  ;;  %v947_v25 = vrot.slane %v940_v4, 4  ;;  %s8060_s11 = sld [smem:[#allocation16_spill]] }
  0x95   :  { %v911_v45 = vrot.slane %v905_v10, 4  ;;  %v913_v44 = vrot.slane %v906_v5, 4  ;;  %v893_v56 = vrot.slane %v887_v20, 4  ;;  %v910_v24 = vrot.slane %v904_v41, 4 }
  0x96   :  { %v927_v0 = vrot.slane %v921_v30, 4  ;;  %v4416_v23 = vsel %vm821_vm3, %v894_v2, %v896_v29  ;;  %v944_v10 = vrot.slane %v938_v12, 4  ;;  %v72_v5 = vlaneseq }
  0x97   :  { %8050 = sst [smem:[#allocation69_spill]] %s4385_s4  ;;  %8053 = vst [vmem:[#allocation72_spill] sm:$0xff] %v4416_v23  ;;  %v4419_v60 = vsel %vm821_vm3, %v911_v45, %v913_v44  ;;  %v4425_v30 = vsel %vm821_vm3, %v928_v26, %v930_v63  ;;  %v4428_v29 = vsel %vm821_vm3, %v945_v28, %v947_v25  ;;  %v4432_v4 = vsel %vm821_vm3, %v893_v56, %v894_v2  ;;  %s8061_s4 = sld [smem:[#allocation17_spill]] }
  0x98   :  { %8054 = vst [vmem:[#allocation73_spill] sm:$0xff] %v4419_v60  ;;  %8055 = vst [vmem:[#allocation74_spill] sm:$0xff] %v4425_v30  ;;  %v4435_v20 = vsel %vm821_vm3, %v910_v24, %v911_v45  ;;  %v4438_v63 = vsel %vm821_vm3, %v927_v0, %v928_v26  ;;  %v4443_v2 = vsel %vm821_vm3, %v944_v10, %v945_v28  ;;  %v4447_v33 = vand.u32 127, %v72_v5 }
  0x99   :  { %8056 = vst [vmem:[#allocation75_spill] sm:$0xff] %v4428_v29  ;;  %8057 = vst [vmem:[#allocation76_spill] sm:$0xff] %v4432_v4  ;;  %v8065_v10 = vstv %s3882_s25  ;;  %v8066_v56 = vstv %s3886_s26  ;;  %v8067_v25 = vstv %s3888_s27  ;;  %v8086_v30 = vstv %s8077_s0  ;;  %s8093_s26 = sld [smem:[#allocation22_spill]]  ;;  %s8129_s0 = sld [smem:[#allocation34_spill]] }
  0x9a   :  { %8058 = vst [vmem:[#allocation77_spill] sm:$0xff] %v4435_v20  ;;  %8059 = vst [vmem:[#allocation78_spill] sm:$0xff] %v4438_v63  ;;  %v8068_v1 = vstv %s8060_s11  ;;  %v8072_v63 = vstv %s3882_s25  ;;  %s8092_s25 = sld [smem:[#allocation21_spill]]  ;;  %vm75_vm4 = vcmp.ge.s32.totalorder %v4447_v33, 2  ;;  %vm76_vm5 = vcmp.lt.s32.totalorder %v4447_v33, 18 }
  0x9b   :  { %8063 = vst [vmem:[#allocation79_spill] sm:$0xff] %v4443_v2  ;;  %8064 = vst [vmem:[#allocation80_spill] sm:$0xff] %v4447_v33  ;;  %v8071_v2 = vstv %s3880_s24  ;;  %s8091_s24 = sld [smem:[#allocation20_spill]]  ;;  %vm79_vm6 = vcmp.ge.s32.totalorder %v4447_v33, 22  ;;  %vm80_vm7 = vcmp.lt.s32.totalorder %v4447_v33, 38  ;;  %vm83_vm8 = vcmp.ge.s32.totalorder %v4447_v33, 42 }
  0x9c   :  { %vm84_vm9 = vcmp.lt.s32.totalorder %v4447_v33, 58  ;;  %vm87_vm10 = vcmp.ge.s32.totalorder %v4447_v33, 62  ;;  %vm88_vm11 = vcmp.lt.s32.totalorder %v4447_v33, 78  ;;  %vm4757_vm12 = vmand %vm75_vm4, %vm76_vm5  ;;  %vm91_vm14 = vcmp.ge.s32.totalorder %v4447_v33, 82 }
  0x9d   :  { %v8069_v55 = vstv %s8061_s4  ;;  %vm4765_vm13 = vmand %vm79_vm6, %vm80_vm7  ;;  %vm92_vm15 = vcmp.lt.s32.totalorder %v4447_v33, 98  ;;  %vm95_vm3 = vcmp.ge.s32.totalorder %v4447_v33, 102  ;;  %vm96_vm4 = vcmp.lt.s32.totalorder %v4447_v33, 118 }
  0x9e   :  { %vm82_vm1 = vmor %vm4757_vm12, %vm4765_vm13  ;;  %vm3109_vm12 = vcmask 1038336   ;;  %vm3107_vm13 = vcmask 1039360  }
  0x9f   :  { %vm4795_vm2 = vmand %vm83_vm8, %vm84_vm9 }
  0xa0   :  { %vm4824_vm5 = vmor %vm82_vm1, %vm4795_vm2 }
  0xa1   :  { %vm4832_vm6 = vmand %vm87_vm10, %vm88_vm11 }
  0xa2   :  { %vm90_vm7 = vmor %vm4824_vm5, %vm4832_vm6 }
  0xa3   :  { %vm93_vm8 = vmand %vm91_vm14, %vm92_vm15 }
  0xa4   :  { %vm4881_vm9 = vmor %vm90_vm7, %vm93_vm8 }
  0xa5   :  { %vm97_vm10 = vmand %vm95_vm3, %vm96_vm4 }
  0xa6   :  { %vm4899_vm11 = vmor %vm4881_vm9, %vm97_vm10 }
  0xaa   :  { %v147_v12 = vpop.permute.xlu1 %146  ;;  %v119_v44 = vpop.permute.xlu0 %118 }
  0xab   :  { %v124_v24 = vmul.f32 %v7776_v31, %v119_v44  ;;  %v130_v45 = vmul.f32 %v7774_v32, %v119_v44  ;;  %v136_v26 = vmul.f32 %v7773_v34, %v119_v44  ;;  %v142_v0 = vmul.f32 %v7775_v35, %v119_v44 }
  0xac   :  { %v152_v41 = vmul.f32 %v151_v21, %v147_v12  ;;  %v158_v28 = vmul.f32 %v7777_v22, %v147_v12  ;;  %v164_v18 = vmul.f32 %v8065_v10, %v147_v12  ;;  %v170_v5 = vmul.f32 %v8066_v56, %v147_v12 }
  0xad   :  { %v126_v54 = vadd.f32 %v124_v24, %v8067_v25  ;;  %v132_v46 = vadd.f32 %v130_v45, %v8068_v1  ;;  %v138_v34 = vadd.f32 %v136_v26, %v8069_v55  ;;  %v8070_v32 = vstv %s8062_s19 }
  0xae   :  { %v144_v44 = vadd.f32 %v142_v0, %v8070_v32  ;;  %v149_v35 = vpop.permute.xlu1 %148  ;;  %v121_v31 = vpop.permute.xlu0 %120  ;;  %v8073_v12 = vmov %v8066_v56  ;;  %v8074_v32 = vstv %s3898_s2  ;;  %v8075_v26 = vstv %s3900_s1  ;;  %s8099_s2 = sld [smem:[#allocation24_spill]]  ;;  %s8100_s1 = sld [smem:[#allocation25_spill]] }
  0xaf   :  { %v153_v22 = vmul.f32 %v151_v21, %v149_v35  ;;  %v159_v10 = vmul.f32 %v8071_v2, %v149_v35  ;;  %v165_v20 = vmul.f32 %v8072_v63, %v149_v35  ;;  %v171_v56 = vmul.f32 %v8073_v12, %v149_v35 }
  0xb0   :  { %v154_v25 = vadd.f32 %v152_v41, %v126_v54  ;;  %v160_v1 = vadd.f32 %v158_v28, %v132_v46  ;;  %v166_v24 = vadd.f32 %v164_v18, %v138_v34  ;;  %v172_v55 = vadd.f32 %v170_v5, %v144_v44 }
  0xb1   :  { %v125_v45 = vmul.f32 %v8074_v32, %v121_v31  ;;  %v131_v21 = vmul.f32 %v8075_v26, %v121_v31  ;;  %v8076_v2 = vstv %s3902_s7  ;;  %v8078_v0 = vstv %s3906_s8  ;;  %s8101_s7 = sld [smem:[#allocation26_spill]]  ;;  %s8103_s8 = sld [smem:[#allocation27_spill]] }
  0xb2   :  { %v137_v63 = vmul.f32 %v8076_v2, %v121_v31  ;;  %v143_v4 = vmul.f32 %v8078_v0, %v121_v31  ;;  %v201_v35 = vpop.permute.xlu1 %200  ;;  %v199_v12 = vpop.permute.xlu0 %198  ;;  %v178_v54 = vadd.f32 %v4001_v48, %v154_v25  ;;  %v184_v34 = vadd.f32 %v4007_v50, %v160_v1 }
  0xb3   :  { %v190_v46 = vadd.f32 %v4010_v51, %v166_v24  ;;  %v196_v18 = vadd.f32 %v4013_v52, %v172_v55  ;;  %v8079_v41 = vstv %s3888_s27  ;;  %v8080_v5 = vstv %s8060_s11  ;;  %s8094_s27 = sld [smem:[#allocation23_spill]]  ;;  %s8128_s11 = sld [smem:[#allocation33_spill]] }
  0xb4   :  { %v127_v28 = vadd.f32 %v125_v45, %v8079_v41  ;;  %v133_v44 = vadd.f32 %v131_v21, %v8080_v5  ;;  %v8081_v32 = vstv %s8061_s4  ;;  %v8082_v26 = vstv %s8062_s19  ;;  %s8115_s19 = sld [smem:[#allocation31_spill]]  ;;  %s8127_s4 = sld [smem:[#allocation32_spill]] }
  0xb5   :  { %v139_v31 = vadd.f32 %v137_v63, %v8081_v32  ;;  %v145_v2 = vadd.f32 %v143_v4, %v8082_v26  ;;  %v8083_v0 = vstv %s3916_s13  ;;  %v8084_v25 = vstv %s3919_s14  ;;  %s8111_s13 = sld [smem:[#allocation28_spill]]  ;;  %s8112_s14 = sld [smem:[#allocation29_spill]] }
  0xb6   :  { %v205_v48 = vmul.f32 %v8083_v0, %v201_v35  ;;  %v211_v29 = vmul.f32 %v8084_v25, %v201_v35  ;;  %v8085_v50 = vstv %s3921_s3  ;;  %v223_v51 = vmul.f32 %v8086_v30, %v201_v35  ;;  %v229_v26 = vpop.permute.xlu1 %228  ;;  %s8113_s3 = sld [smem:[#allocation30_spill]] }
  0xb7   :  { %v217_v1 = vmul.f32 %v8085_v50, %v201_v35  ;;  %v155_v24 = vadd.f32 %v153_v22, %v127_v28  ;;  %v161_v60 = vadd.f32 %v159_v10, %v133_v44  ;;  %v167_v52 = vadd.f32 %v165_v20, %v139_v31 }
  0xb8   :  { %v173_v55 = vadd.f32 %v171_v56, %v145_v2  ;;  %v8087_v23 = vmov %v8083_v0  ;;  %v8088_v41 = vmov %v8084_v25  ;;  %v8089_v5 = vmov %v8085_v50  ;;  %v227_v0 = vpop.permute.xlu0 %226 }
  0xb9   :  { %v204_v45 = vmul.f32 %v8087_v23, %v199_v12  ;;  %v210_v21 = vmul.f32 %v8088_v41, %v199_v12  ;;  %v216_v63 = vmul.f32 %v8089_v5, %v199_v12  ;;  %v8090_v32 = vmov %v8086_v30 }
  0xba   :  { %v222_v4 = vmul.f32 %v8090_v32, %v199_v12  ;;  %v179_v30 = vadd.f32 %v3973_v36, %v155_v24  ;;  %v185_v22 = vadd.f32 %v3981_v38, %v161_v60  ;;  %v191_v20 = vadd.f32 %v3991_v42, %v167_v52 }
  0xbb   :  { %v197_v23 = vadd.f32 %v3994_v43, %v173_v55  ;;  %v206_v10 = vadd.f32 %v204_v45, %v178_v54  ;;  %v212_v56 = vadd.f32 %v210_v21, %v184_v34  ;;  %v218_v35 = vadd.f32 %v216_v63, %v190_v46  ;;  %v268_v54 = vpop.permute.xlu1 %267 }
  0xbc   :  { %v224_v12 = vadd.f32 %v222_v4, %v196_v18  ;;  %v207_v28 = vadd.f32 %v205_v48, %v179_v30  ;;  %v213_v44 = vadd.f32 %v211_v29, %v185_v22  ;;  %v219_v31 = vadd.f32 %v217_v1, %v191_v20  ;;  %v266_v34 = vpop.permute.xlu0 %265 }
  0xbd   :  { %v225_v2 = vadd.f32 %v223_v51, %v197_v23  ;;  %v8095_v25 = vstv %s8091_s24  ;;  %v8096_v50 = vstv %s8092_s25  ;;  %v8097_v60 = vstv %s8093_s26  ;;  %s8130_s24 = sld [smem:[#allocation35_spill]]  ;;  %s8135_s25 = sld [smem:[#allocation36_spill]] }
  0xbe   :  { %v233_v36 = vmul.f32 %v8095_v25, %v229_v26  ;;  %v239_v38 = vmul.f32 %v8096_v50, %v229_v26  ;;  %v245_v42 = vmul.f32 %v8097_v60, %v229_v26  ;;  %v8098_v24 = vstv %s8094_s27  ;;  %s8136_s26 = sld [smem:[#allocation37_spill]]  ;;  %s8137_s27 = sld [smem:[#allocation38_spill]] }
  0xbf   :  { %v251_v43 = vmul.f32 %v8098_v24, %v229_v26  ;;  %v8102_v52 = vmov %v8095_v25  ;;  %v8104_v18 = vmov %v8096_v50  ;;  %v8105_v48 = vmov %v8097_v60 }
  0xc0   :  { %v232_v46 = vmul.f32 %v8102_v52, %v227_v0  ;;  %v238_v29 = vmul.f32 %v8104_v18, %v227_v0  ;;  %v244_v1 = vmul.f32 %v8105_v48, %v227_v0  ;;  %v8106_v51 = vmov %v8098_v24 }
  0xc1   :  { %v250_v55 = vmul.f32 %v8106_v51, %v227_v0  ;;  %v235_v45 = vadd.f32 %v233_v36, %v207_v28  ;;  %v241_v41 = vadd.f32 %v239_v38, %v213_v44  ;;  %v247_v21 = vadd.f32 %v245_v42, %v219_v31  ;;  %v296_v28 = vpop.permute.xlu1 %295  ;;  %v294_v44 = vpop.permute.xlu0 %293 }
  0xc2   :  { %v253_v5 = vadd.f32 %v251_v43, %v225_v2  ;;  %v234_v63 = vadd.f32 %v232_v46, %v206_v10  ;;  %v240_v32 = vadd.f32 %v238_v29, %v212_v56  ;;  %v246_v4 = vadd.f32 %v244_v1, %v218_v35 }
  0xc3   :  { %v252_v26 = vadd.f32 %v250_v55, %v224_v12  ;;  %v8107_v30 = vstv %s8099_s2  ;;  %v8108_v20 = vstv %s8100_s1  ;;  %v8109_v25 = vstv %s8101_s7  ;;  %s8138_s2 = sld [smem:[#allocation39_spill]]  ;;  %s8147_s1 = sld [smem:[#allocation40_spill]] }
  0xc4   :  { %v272_v22 = vmul.f32 %v8107_v30, %v268_v54  ;;  %v278_v23 = vmul.f32 %v8108_v20, %v268_v54  ;;  %v284_v50 = vmul.f32 %v8109_v25, %v268_v54  ;;  %v8110_v60 = vstv %s8103_s8  ;;  %s8149_s7 = sld [smem:[#allocation41_spill]]  ;;  %s8151_s8 = sld [smem:[#allocation42_spill]] }
  0xc5   :  { %v290_v0 = vmul.f32 %v8110_v60, %v268_v54  ;;  %v8114_v36 = vmov %v8107_v30  ;;  %v8116_v10 = vmov %v8108_v20  ;;  %v8117_v35 = vmov %v8109_v25 }
  0xc6   :  { %v271_v31 = vmul.f32 %v8114_v36, %v266_v34  ;;  %v277_v56 = vmul.f32 %v8116_v10, %v266_v34  ;;  %v283_v12 = vmul.f32 %v8117_v35, %v266_v34  ;;  %v8118_v2 = vmov %v8110_v60  ;;  %v390_v36 = vpop.permute.xlu0 %389 }
  0xc7   :  { %v289_v38 = vmul.f32 %v8118_v2, %v266_v34  ;;  %v274_v42 = vadd.f32 %v272_v22, %v235_v45  ;;  %v280_v24 = vadd.f32 %v278_v23, %v241_v41  ;;  %v286_v43 = vadd.f32 %v284_v50, %v247_v21  ;;  %v392_v34 = vpop.permute.xlu1 %391 }
  0xc8   :  { %v292_v54 = vadd.f32 %v290_v0, %v253_v5  ;;  %v273_v52 = vadd.f32 %v271_v31, %v234_v63  ;;  %v279_v46 = vadd.f32 %v277_v56, %v240_v32  ;;  %v285_v18 = vadd.f32 %v283_v12, %v246_v4 }
  0xc9   :  { %v291_v29 = vadd.f32 %v289_v38, %v252_v26  ;;  %v8119_v48 = vstv %s8111_s13  ;;  %v8120_v51 = vstv %s8112_s14  ;;  %v8121_v30 = vstv %s8113_s3  ;;  %s8153_s13 = sld [smem:[#allocation43_spill]]  ;;  %s8155_s14 = sld [smem:[#allocation44_spill]] }
  0xca   :  { %v300_v1 = vmul.f32 %v8119_v48, %v296_v28  ;;  %v306_v55 = vmul.f32 %v8120_v51, %v296_v28  ;;  %v312_v20 = vmul.f32 %v8121_v30, %v296_v28  ;;  %v8122_v25 = vstv %s8115_s19  ;;  %s8157_s3 = sld [smem:[#allocation45_spill]]  ;;  %s8159_s19 = sld [smem:[#allocation46_spill]] }
  0xcb   :  { %v318_v60 = vmul.f32 %v8122_v25, %v296_v28  ;;  %v8123_v45 = vmov %v8119_v48  ;;  %v8124_v41 = vmov %v8120_v51  ;;  %v8125_v21 = vmov %v8121_v30  ;;  %v420_v38 = vpop.permute.xlu1 %419 }
  0xcc   :  { %v299_v22 = vmul.f32 %v8123_v45, %v294_v44  ;;  %v305_v23 = vmul.f32 %v8124_v41, %v294_v44  ;;  %v311_v5 = vmul.f32 %v8125_v21, %v294_v44  ;;  %v8126_v63 = vmov %v8122_v25 }
  0xcd   :  { %v317_v32 = vmul.f32 %v8126_v63, %v294_v44  ;;  %v302_v4 = vadd.f32 %v300_v1, %v274_v42  ;;  %v308_v26 = vadd.f32 %v306_v55, %v280_v24  ;;  %v314_v50 = vadd.f32 %v312_v20, %v286_v43  ;;  %v418_v42 = vpop.permute.xlu0 %417 }
  0xce   :  { %v320_v0 = vadd.f32 %v318_v60, %v292_v54  ;;  %v301_v31 = vadd.f32 %v299_v22, %v273_v52  ;;  %v307_v28 = vadd.f32 %v305_v23, %v279_v46  ;;  %v313_v10 = vadd.f32 %v311_v5, %v285_v18 }
  0xcf   :  { %v319_v56 = vadd.f32 %v317_v32, %v291_v29  ;;  %v337_v35 = vadd.f32 %v4100_v53, %v302_v4  ;;  %v354_v12 = vadd.f32 %v4103_v59, %v308_v26  ;;  %v371_v2 = vadd.f32 %v4112_v3, %v314_v50  ;;  %v456_v41 = vpop.permute.xlu1 %455 }
  0xd0   :  { %v388_v44 = vadd.f32 %v4125_v58, %v320_v0  ;;  %v8131_v24 = vstv %s8127_s4  ;;  %v8132_v54 = vstv %s8128_s11  ;;  %v8133_v46 = vstv %s8129_s0  ;;  %s8161_s4 = sld [smem:[#allocation47_spill]]  ;;  %s8171_s11 = sld [smem:[#allocation48_spill]] }
  0xd1   :  { %v396_v43 = vmul.f32 %v8131_v24, %v392_v34  ;;  %v402_v52 = vmul.f32 %v8132_v54, %v392_v34  ;;  %v408_v18 = vmul.f32 %v8133_v46, %v392_v34  ;;  %v8134_v29 = vstv %s8130_s24  ;;  %s8173_s0 = sld [smem:[#allocation49_spill]]  ;;  %s8175_s24 = sld [smem:[#allocation50_spill]] }
  0xd2   :  { %v414_v53 = vmul.f32 %v8134_v29, %v392_v34  ;;  %v336_v59 = vadd.f32 %v4128_v19, %v301_v31  ;;  %v353_v58 = vadd.f32 %v4151_v49, %v307_v28  ;;  %v370_v3 = vadd.f32 %v4161_v16, %v313_v10  ;;  %v454_v16 = vpop.permute.xlu0 %453 }
  0xd3   :  { %v387_v48 = vadd.f32 %v4164_v37, %v319_v56  ;;  %v398_v1 = vadd.f32 %v396_v43, %v337_v35  ;;  %v404_v51 = vadd.f32 %v402_v52, %v354_v12  ;;  %v410_v55 = vadd.f32 %v408_v18, %v371_v2 }
  0xd4   :  { %v416_v30 = vadd.f32 %v414_v53, %v388_v44  ;;  %v8139_v20 = vmov %v8131_v24  ;;  %v8140_v60 = vmov %v8132_v54  ;;  %v8141_v19 = vmov %v8133_v46  ;;  %v484_v46 = vpop.permute.xlu1 %483 }
  0xd5   :  { %v395_v25 = vmul.f32 %v8139_v20, %v390_v36  ;;  %v401_v34 = vmul.f32 %v8140_v60, %v390_v36  ;;  %v407_v45 = vmul.f32 %v8141_v19, %v390_v36  ;;  %v8142_v49 = vmov %v8134_v29 }
  0xd6   :  { %v413_v22 = vmul.f32 %v8142_v49, %v390_v36  ;;  %v8143_v23 = vstv %s8135_s25  ;;  %v8144_v21 = vstv %s8136_s26  ;;  %v8145_v63 = vstv %s8137_s27  ;;  %v482_v18 = vpop.permute.xlu0 %481  ;;  %s8177_s25 = sld [smem:[#allocation51_spill]]  ;;  %s8183_s26 = sld [smem:[#allocation52_spill]] }
  0xd7   :  { %v424_v37 = vmul.f32 %v8143_v23, %v420_v38  ;;  %v430_v5 = vmul.f32 %v8144_v21, %v420_v38  ;;  %v436_v32 = vmul.f32 %v8145_v63, %v420_v38  ;;  %v8146_v4 = vstv %s8138_s2  ;;  %s8184_s27 = sld [smem:[#allocation53_spill]]  ;;  %s8185_s2 = sld [smem:[#allocation54_spill]] }
  0xd8   :  { %v442_v26 = vmul.f32 %v8146_v4, %v420_v38  ;;  %v397_v50 = vadd.f32 %v395_v25, %v336_v59  ;;  %v403_v0 = vadd.f32 %v401_v34, %v353_v58  ;;  %v409_v31 = vadd.f32 %v407_v45, %v370_v3 }
  0xd9   :  { %v415_v28 = vadd.f32 %v413_v22, %v387_v48  ;;  %v8148_v10 = vmov %v8143_v23  ;;  %v8150_v35 = vmov %v8144_v21  ;;  %v8152_v12 = vmov %v8145_v63 }
  0xda   :  { %v423_v56 = vmul.f32 %v8148_v10, %v418_v42  ;;  %v429_v36 = vmul.f32 %v8150_v35, %v418_v42  ;;  %v435_v2 = vmul.f32 %v8152_v12, %v418_v42  ;;  %v8154_v44 = vmov %v8146_v4  ;;  %v578_v4 = vpop.permute.xlu0 %577 }
  0xdb   :  { %v441_v24 = vmul.f32 %v8154_v44, %v418_v42  ;;  %v426_v43 = vadd.f32 %v424_v37, %v398_v1  ;;  %v432_v38 = vadd.f32 %v430_v5, %v404_v51  ;;  %v438_v54 = vadd.f32 %v436_v32, %v410_v55  ;;  %v580_v32 = vpop.permute.xlu1 %579 }
  0xdc   :  { %v444_v52 = vadd.f32 %v442_v26, %v416_v30  ;;  %v425_v29 = vadd.f32 %v423_v56, %v397_v50  ;;  %v431_v53 = vadd.f32 %v429_v36, %v403_v0  ;;  %v437_v59 = vadd.f32 %v435_v2, %v409_v31 }
  0xdd   :  { %v443_v58 = vadd.f32 %v441_v24, %v415_v28  ;;  %v8156_v3 = vstv %s8147_s1  ;;  %v8158_v20 = vstv %s8149_s7  ;;  %v8160_v25 = vstv %s8151_s8  ;;  %s8186_s1 = sld [smem:[#allocation55_spill]]  ;;  %s8195_s7 = sld [smem:[#allocation56_spill]] }
  0xde   :  { %v460_v48 = vmul.f32 %v8156_v3, %v456_v41  ;;  %v466_v42 = vmul.f32 %v8158_v20, %v456_v41  ;;  %v472_v1 = vmul.f32 %v8160_v25, %v456_v41  ;;  %v8162_v51 = vstv %s8153_s13  ;;  %s8196_s8 = sld [smem:[#allocation57_spill]]  ;;  %s8197_s13 = sld [smem:[#allocation58_spill]] }
  0xdf   :  { %v478_v60 = vmul.f32 %v8162_v51, %v456_v41  ;;  %v8163_v55 = vmov %v8156_v3  ;;  %v8164_v34 = vmov %v8158_v20  ;;  %v8165_v45 = vmov %v8160_v25 }
  0xe0   :  { %v459_v30 = vmul.f32 %v8163_v55, %v454_v16  ;;  %v465_v19 = vmul.f32 %v8164_v34, %v454_v16  ;;  %v471_v49 = vmul.f32 %v8165_v45, %v454_v16  ;;  %v8166_v22 = vmov %v8162_v51 }
  0xe1   :  { %v477_v23 = vmul.f32 %v8166_v22, %v454_v16  ;;  %v462_v37 = vadd.f32 %v460_v48, %v426_v43  ;;  %v468_v21 = vadd.f32 %v466_v42, %v432_v38  ;;  %v474_v5 = vadd.f32 %v472_v1, %v438_v54 }
  0xe2   :  { %v480_v63 = vadd.f32 %v478_v60, %v444_v52  ;;  %v8167_v26 = vstv %s8155_s14  ;;  %v8168_v50 = vstv %s8157_s3  ;;  %v8169_v31 = vstv %s8159_s19  ;;  %s8206_s14 = sld [smem:[#allocation59_spill]]  ;;  %s8218_s3 = sld [smem:[#allocation61_spill]] }
  0xe3   :  { %v488_v41 = vmul.f32 %v8167_v26, %v484_v46  ;;  %v494_v0 = vmul.f32 %v8168_v50, %v484_v46  ;;  %v500_v28 = vmul.f32 %v8169_v31, %v484_v46  ;;  %v8170_v10 = vstv %s8161_s4  ;;  %s8220_s19 = sld [smem:[#allocation62_spill]]  ;;  %s8222_s4 = sld [smem:[#allocation63_spill]] }
  0xe4   :  { %v506_v56 = vmul.f32 %v8170_v10, %v484_v46  ;;  %v461_v35 = vadd.f32 %v459_v30, %v425_v29  ;;  %v467_v16 = vadd.f32 %v465_v19, %v431_v53  ;;  %v473_v36 = vadd.f32 %v471_v49, %v437_v59  ;;  %v608_v29 = vpop.permute.xlu1 %607  ;;  %v606_v53 = vpop.permute.xlu0 %605 }
  0xe5   :  { %v479_v12 = vadd.f32 %v477_v23, %v443_v58  ;;  %v490_v2 = vadd.f32 %v488_v41, %v462_v37  ;;  %v496_v44 = vadd.f32 %v494_v0, %v468_v21  ;;  %v502_v24 = vadd.f32 %v500_v28, %v474_v5 }
  0xe6   :  { %v508_v43 = vadd.f32 %v506_v56, %v480_v63  ;;  %v8172_v38 = vmov %v8167_v26  ;;  %v8174_v52 = vmov %v8168_v50  ;;  %v8176_v48 = vmov %v8169_v31 }
  0xe7   :  { %v487_v54 = vmul.f32 %v8172_v38, %v482_v18  ;;  %v493_v3 = vmul.f32 %v8174_v52, %v482_v18  ;;  %v499_v20 = vmul.f32 %v8176_v48, %v482_v18  ;;  %v8178_v42 = vmov %v8170_v10 }
  0xe8   :  { %v505_v46 = vmul.f32 %v8178_v42, %v482_v18  ;;  %v525_v59 = vadd.f32 %v4208_v61, %v490_v2  ;;  %v542_v58 = vadd.f32 %v4213_v11, %v496_v44  ;;  %v559_v25 = vadd.f32 %v4226_v27, %v502_v24  ;;  %v644_v21 = vpop.permute.xlu1 %643  ;;  %v642_v5 = vpop.permute.xlu0 %641 }
  0xe9   :  { %v576_v1 = vadd.f32 %v4238_v57, %v508_v43  ;;  %v489_v51 = vadd.f32 %v487_v54, %v461_v35  ;;  %v495_v60 = vadd.f32 %v493_v3, %v467_v16  ;;  %v501_v55 = vadd.f32 %v499_v20, %v473_v36 }
  0xea   :  { %v507_v30 = vadd.f32 %v505_v46, %v479_v12  ;;  %v8179_v34 = vstv %s8171_s11  ;;  %v8180_v45 = vstv %s8173_s0  ;;  %v8181_v49 = vstv %s8175_s24  ;;  %s8238_s11 = sld [smem:[#allocation67_spill]]  ;;  %s8239_s0 = sld [smem:[#allocation68_spill]] }
  0xeb   :  { %v584_v19 = vmul.f32 %v8179_v34, %v580_v32  ;;  %v590_v18 = vmul.f32 %v8180_v45, %v580_v32  ;;  %v596_v61 = vmul.f32 %v8181_v49, %v580_v32  ;;  %v8182_v22 = vstv %s8177_s25  ;;  %s4977_s24 = sld [smem:[#allocation6 + $0xfd]]  ;;  %s4979_s25 = sld [smem:[#allocation6 + $0x4]] }
  0xec   :  { %v602_v11 = vmul.f32 %v8182_v22, %v580_v32  ;;  %v524_v27 = vadd.f32 %v4276_v17, %v489_v51  ;;  %v541_v57 = vadd.f32 %v4281_v47, %v495_v60  ;;  %v558_v23 = vadd.f32 %v4301_v8, %v501_v55  ;;  %v670_v52 = vpop.permute.xlu0 %669 }
  0xed   :  { %v575_v37 = vadd.f32 %v4306_v62, %v507_v30  ;;  %v586_v63 = vadd.f32 %v584_v19, %v525_v59  ;;  %v592_v26 = vadd.f32 %v590_v18, %v542_v58  ;;  %v598_v41 = vadd.f32 %v596_v61, %v559_v25 }
  0xee   :  { %v604_v50 = vadd.f32 %v602_v11, %v576_v1  ;;  %v8187_v0 = vmov %v8179_v34  ;;  %v8188_v32 = vmov %v8180_v45  ;;  %v8189_v10 = vmov %v8181_v49 }
  0xef   :  { %v583_v31 = vmul.f32 %v8187_v0, %v578_v4  ;;  %v589_v28 = vmul.f32 %v8188_v32, %v578_v4  ;;  %v595_v17 = vmul.f32 %v8189_v10, %v578_v4  ;;  %v8190_v56 = vmov %v8182_v22 }
  0xf0   :  { %v601_v47 = vmul.f32 %v8190_v56, %v578_v4  ;;  %v8191_v35 = vstv %s8183_s26  ;;  %v8192_v16 = vstv %s8184_s27  ;;  %v8193_v36 = vstv %s8185_s2  ;;  %v672_v4 = vpop.permute.xlu1 %671  ;;  %s4981_s26 = sld [smem:[#allocation6 + $0x28]]  ;;  %s4983_s27 = sld [smem:[#allocation6 + $0x4c]] }
  0xf1   :  { %v612_v8 = vmul.f32 %v8191_v35, %v608_v29  ;;  %v618_v62 = vmul.f32 %v8192_v16, %v608_v29  ;;  %v624_v12 = vmul.f32 %v8193_v36, %v608_v29  ;;  %v8194_v2 = vstv %s8186_s1  ;;  %8309 = sst [smem:[#allocation22_spill]] %s4977_s24  ;;  %s4985_s2 = sld [smem:[#allocation6 + $0x70]] }
  0xf2   :  { %v630_v44 = vmul.f32 %v8194_v2, %v608_v29  ;;  %v585_v24 = vadd.f32 %v583_v31, %v524_v27  ;;  %v591_v43 = vadd.f32 %v589_v28, %v541_v57  ;;  %v597_v38 = vadd.f32 %v595_v17, %v558_v23  ;;  %s4987_s1 = sld [smem:[#allocation6 + $0x94]] }
  0xf3   :  { %v603_v54 = vadd.f32 %v601_v47, %v575_v37  ;;  %v614_v3 = vadd.f32 %v612_v8, %v586_v63  ;;  %v620_v48 = vadd.f32 %v618_v62, %v592_v26  ;;  %v626_v20 = vadd.f32 %v624_v12, %v598_v41  ;;  %v766_v41 = vpop.permute.xlu0 %765 }
  0xf4   :  { %v632_v42 = vadd.f32 %v630_v44, %v604_v50  ;;  %v8198_v46 = vmov %v8191_v35  ;;  %v8199_v58 = vmov %v8192_v16  ;;  %v8200_v1 = vmov %v8193_v36 }
  0xf5   :  { %v611_v59 = vmul.f32 %v8198_v46, %v606_v53  ;;  %v617_v25 = vmul.f32 %v8199_v58, %v606_v53  ;;  %v623_v51 = vmul.f32 %v8200_v1, %v606_v53  ;;  %v8201_v29 = vmov %v8194_v2 }
  0xf6   :  { %v629_v60 = vmul.f32 %v8201_v29, %v606_v53  ;;  %v8202_v55 = vstv %s8195_s7  ;;  %v8203_v34 = vstv %s8196_s8  ;;  %v8204_v45 = vstv %s8197_s13  ;;  %v768_v53 = vpop.permute.xlu1 %767  ;;  %s4989_s7 = sld [smem:[#allocation6 + $0xb8]]  ;;  %s4991_s8 = sld [smem:[#allocation6 + $0xdc]] }
  0xf7   :  { %v648_v30 = vmul.f32 %v8202_v55, %v644_v21  ;;  %v654_v19 = vmul.f32 %v8203_v34, %v644_v21  ;;  %v660_v18 = vmul.f32 %v8204_v45, %v644_v21  ;;  %v8205_v49 = vstv %s4230_s12  ;;  %s8216_s12 = sld [smem:[#allocation60_spill]]  ;;  %s4997_s13 = sld [smem:[#allocation9]] }
  0xf8   :  { %v666_v61 = vmul.f32 %v8205_v49, %v644_v21  ;;  %v613_v22 = vadd.f32 %v611_v59, %v585_v24  ;;  %v619_v11 = vadd.f32 %v617_v25, %v591_v43  ;;  %v625_v27 = vadd.f32 %v623_v51, %v597_v38 }
  0xf9   :  { %v631_v57 = vadd.f32 %v629_v60, %v603_v54  ;;  %v650_v23 = vadd.f32 %v648_v30, %v614_v3  ;;  %v656_v37 = vadd.f32 %v654_v19, %v620_v48  ;;  %v662_v63 = vadd.f32 %v660_v18, %v626_v20  ;;  %v794_v30 = vpop.permute.xlu0 %793 }
  0xfa   :  { %v668_v26 = vadd.f32 %v666_v61, %v632_v42  ;;  %v8207_v50 = vmov %v8202_v55  ;;  %v8208_v31 = vmov %v8203_v34  ;;  %v8209_v28 = vmov %v8204_v45  ;;  %v796_v43 = vpop.permute.xlu1 %795 }
  0xfb   :  { %v647_v0 = vmul.f32 %v8207_v50, %v642_v5  ;;  %v653_v32 = vmul.f32 %v8208_v31, %v642_v5  ;;  %v659_v10 = vmul.f32 %v8209_v28, %v642_v5  ;;  %v8210_v21 = vmov %v8205_v49 }
  0xfc   :  { %v665_v17 = vmul.f32 %v8210_v21, %v642_v5  ;;  %v8211_v56 = vstv %s4232_s16  ;;  %v8212_v35 = vstv %s4240_s18  ;;  %v8213_v16 = vstv %s4242_s5  ;;  %s8227_s16 = sld [smem:[#allocation64_spill]]  ;;  %s8228_s5 = sld [smem:[#allocation65_spill]] }
  0xfd   :  { %v676_v47 = vmul.f32 %v8211_v56, %v672_v4  ;;  %v682_v8 = vmul.f32 %v8212_v35, %v672_v4  ;;  %v688_v62 = vmul.f32 %v8213_v16, %v672_v4  ;;  %v8214_v36 = vstv %s8206_s14  ;;  %s8229_s18 = sld [smem:[#allocation66_spill]]  ;;  %8310 = sst [smem:[#allocation23_spill]] %s4997_s13 }
  0xfe   :  { %v694_v12 = vmul.f32 %v8214_v36, %v672_v4  ;;  %v649_v2 = vadd.f32 %v647_v0, %v613_v22  ;;  %v655_v44 = vadd.f32 %v653_v32, %v619_v11  ;;  %v661_v24 = vadd.f32 %v659_v10, %v625_v27  ;;  %s4999_s14 = sld [smem:[#allocation6 + $0x100]]  ;;  %s5076_s13 = sld [smem:[#allocation6 + $0xb6]] }
  0xff   :  { %v667_v5 = vadd.f32 %v665_v17, %v631_v57  ;;  %v678_v38 = vadd.f32 %v676_v47, %v650_v23  ;;  %v684_v54 = vadd.f32 %v682_v8, %v656_v37  ;;  %v690_v3 = vadd.f32 %v688_v62, %v662_v63  ;;  %v832_v37 = vpop.permute.xlu1 %831  ;;  %v830_v62 = vpop.permute.xlu0 %829 }
 0x100   :  { %v696_v48 = vadd.f32 %v694_v12, %v668_v26  ;;  %v8215_v4 = vmov %v8211_v56  ;;  %v8217_v42 = vmov %v8212_v35  ;;  %v8219_v59 = vmov %v8213_v16 }
 0x101   :  { %v675_v20 = vmul.f32 %v8215_v4, %v670_v52  ;;  %v681_v46 = vmul.f32 %v8217_v42, %v670_v52  ;;  %v687_v58 = vmul.f32 %v8219_v59, %v670_v52  ;;  %v8221_v25 = vmov %v8214_v36 }
 0x102   :  { %v693_v1 = vmul.f32 %v8221_v25, %v670_v52  ;;  %v713_v51 = vadd.f32 %v4331_v14, %v678_v38  ;;  %v730_v29 = vadd.f32 %v4336_v6, %v684_v54  ;;  %v747_v60 = vadd.f32 %v4339_v13, %v690_v3  ;;  %v8273_v54 = vld [vmem:[#allocation72_spill] sm:$0xff] }
 0x103   :  { %v764_v55 = vadd.f32 %v4349_v40, %v696_v48  ;;  %v677_v34 = vadd.f32 %v675_v20, %v649_v2  ;;  %v683_v19 = vadd.f32 %v681_v46, %v655_v44  ;;  %v689_v45 = vadd.f32 %v687_v58, %v661_v24  ;;  %v860_v25 = vpop.permute.xlu1 %859 }
 0x104   :  { %v695_v18 = vadd.f32 %v693_v1, %v667_v5  ;;  %v8223_v52 = vstv %s8216_s12  ;;  %v8224_v49 = vstv %s8218_s3  ;;  %v8225_v13 = vstv %s8220_s19  ;;  %s5001_s12 = sld [smem:[#allocation9 + $0x1]]  ;;  %s5003_s3 = sld [smem:[#allocation9 + $0x2]] }
 0x105   :  { %v772_v14 = vmul.f32 %v8223_v52, %v768_v53  ;;  %v778_v6 = vmul.f32 %v8224_v49, %v768_v53  ;;  %v784_v61 = vmul.f32 %v8225_v13, %v768_v53  ;;  %v8226_v40 = vstv %s8222_s4  ;;  %s5005_s19 = sld [smem:[#allocation9 + $0x3]]  ;;  %s5007_s4 = sld [smem:[#allocation9 + $0x4]] }
 0x106   :  { %v790_v22 = vmul.f32 %v8226_v40, %v768_v53  ;;  %v712_v11 = vadd.f32 %v4361_v15, %v677_v34  ;;  %v729_v27 = vadd.f32 %v4370_v9, %v683_v19  ;;  %v746_v57 = vadd.f32 %v4373_v7, %v689_v45  ;;  %8334 = sst [smem:[#allocation44_spill]] %s5076_s13  ;;  %s5192_s13 = sld [smem:[#allocation6 + $0x2e]] }
 0x107   :  { %v763_v23 = vadd.f32 %v4396_v39, %v695_v18  ;;  %v774_v63 = vadd.f32 %v772_v14, %v713_v51  ;;  %v780_v26 = vadd.f32 %v778_v6, %v730_v29  ;;  %v786_v50 = vadd.f32 %v784_v61, %v747_v60 }
 0x108   :  { %v792_v0 = vadd.f32 %v790_v22, %v764_v55  ;;  %v8230_v31 = vmov %v8223_v52  ;;  %v8231_v53 = vmov %v8224_v49  ;;  %v8232_v10 = vmov %v8225_v13  ;;  %v8284_v22 = vld [vmem:[#allocation79_spill] sm:$0xff] }
 0x109   :  { %v771_v32 = vmul.f32 %v8230_v31, %v766_v41  ;;  %v777_v28 = vmul.f32 %v8231_v53, %v766_v41  ;;  %v783_v15 = vmul.f32 %v8232_v10, %v766_v41  ;;  %v8233_v21 = vmov %v8226_v40  ;;  %v858_v40 = vpop.permute.xlu0 %857 }
 0x10a   :  { %v789_v17 = vmul.f32 %v8233_v21, %v766_v41  ;;  %v8234_v9 = vstv %s4271_s20  ;;  %v8235_v7 = vstv %s8227_s16  ;;  %v8236_v47 = vstv %s8228_s5  ;;  %s8267_s20 = sld [smem:[#allocation69_spill]]  ;;  %8311 = sst [smem:[#allocation24_spill]] %s5001_s12 }
 0x10b   :  { %v800_v39 = vmul.f32 %v8234_v9, %v796_v43  ;;  %v806_v56 = vmul.f32 %v8235_v7, %v796_v43  ;;  %v812_v35 = vmul.f32 %v8236_v47, %v796_v43  ;;  %v8237_v8 = vstv %s8229_s18  ;;  %8312 = sst [smem:[#allocation25_spill]] %s5003_s3  ;;  %s5009_s16 = sld [smem:[#allocation9 + $0x5]] }
 0x10c   :  { %v818_v16 = vmul.f32 %v8237_v8, %v796_v43  ;;  %v773_v36 = vadd.f32 %v771_v32, %v712_v11  ;;  %v779_v12 = vadd.f32 %v777_v28, %v729_v27  ;;  %v785_v41 = vadd.f32 %v783_v15, %v746_v57  ;;  %8313 = sst [smem:[#allocation26_spill]] %s5005_s19  ;;  %s5011_s5 = sld [smem:[#allocation9 + $0x6]] }
 0x10d   :  { %v791_v2 = vadd.f32 %v789_v17, %v763_v23  ;;  %v802_v24 = vadd.f32 %v800_v39, %v774_v63  ;;  %v808_v5 = vadd.f32 %v806_v56, %v780_v26  ;;  %v814_v43 = vadd.f32 %v812_v35, %v786_v50  ;;  %v956_v56 = vpop.permute.xlu1 %955  ;;  %8314 = sst [smem:[#allocation27_spill]] %s5007_s4  ;;  %s5017_s18 = sld [smem:[#allocation9 + $0x7]] }
 0x10e   :  { %v820_v38 = vadd.f32 %v818_v16, %v792_v0  ;;  %v8244_v3 = vmov %v8234_v9  ;;  %v8245_v4 = vmov %v8235_v7  ;;  %v8246_v42 = vmov %v8236_v47  ;;  %s5120_s4 = sld [smem:[#allocation6 + $0x4f]]  ;;  %s5300_s12 = sld [smem:[#allocation6 + $0x9a]] }
 0x10f   :  { %v799_v48 = vmul.f32 %v8244_v3, %v794_v30  ;;  %v805_v20 = vmul.f32 %v8245_v4, %v794_v30  ;;  %v811_v46 = vmul.f32 %v8246_v42, %v794_v30  ;;  %v8247_v59 = vmov %v8237_v8  ;;  %s5156_s3 = sld [smem:[#allocation6 + $0xdf]] }
 0x110   :  { %v817_v58 = vmul.f32 %v8247_v59, %v794_v30  ;;  %v8248_v1 = vstv %s8238_s11  ;;  %v8249_v29 = vstv %s8239_s0  ;;  %v8250_v55 = vstv %s4342_s9  ;;  %s8269_s9 = sld [smem:[#allocation70_spill]]  ;;  %s5019_s11 = sld [smem:[#allocation6]] }
 0x111   :  { %v836_v51 = vmul.f32 %v8248_v1, %v832_v37  ;;  %v842_v60 = vmul.f32 %v8249_v29, %v832_v37  ;;  %v848_v34 = vmul.f32 %v8250_v55, %v832_v37  ;;  %v8251_v19 = vstv %s4346_s29  ;;  %s8271_s29 = sld [smem:[#allocation71_spill]]  ;;  %8315 = sst [smem:[#allocation28_spill]] %s5009_s16 }
 0x112   :  { %v854_v45 = vmul.f32 %v8251_v19, %v832_v37  ;;  %v801_v18 = vadd.f32 %v799_v48, %v773_v36  ;;  %v807_v52 = vadd.f32 %v805_v20, %v779_v12  ;;  %v813_v30 = vadd.f32 %v811_v46, %v785_v41  ;;  %v8274_v48 = vld [vmem:[#allocation73_spill] sm:$0xff]  ;;  %v8275_v20 = vld [vmem:[#allocation74_spill] sm:$0xff]  ;;  %v8276_v46 = vld [vmem:[#allocation75_spill] sm:$0xff]  ;;  %8316 = sst [smem:[#allocation29_spill]] %s5011_s5  ;;  %s5021_s0 = sld [smem:[#allocation6 + $0x24]] }
 0x113   :  { %v819_v14 = vadd.f32 %v817_v58, %v791_v2  ;;  %v838_v49 = vadd.f32 %v836_v51, %v802_v24  ;;  %v844_v6 = vadd.f32 %v842_v60, %v808_v5  ;;  %v850_v13 = vadd.f32 %v848_v34, %v814_v43  ;;  %v954_v58 = vpop.permute.xlu0 %953  ;;  %8317 = sst [smem:[#allocation30_spill]] %s5017_s18  ;;  %s8337_s5 = smov 1  }
 0x114   :  { %v856_v61 = vadd.f32 %v854_v45, %v820_v38  ;;  %v8254_v11 = vmov %v8248_v1  ;;  %v8255_v57 = vmov %v8249_v29  ;;  %v8256_v37 = vmov %v8250_v55  ;;  %s5104_s18 = sld [smem:[#allocation6 + $0x7]]  ;;  %s5118_s16 = sld [smem:[#allocation6 + $0x2b]] }
 0x115   :  { %v835_v27 = vmul.f32 %v8254_v11, %v830_v62  ;;  %v841_v23 = vmul.f32 %v8255_v57, %v830_v62  ;;  %v847_v63 = vmul.f32 %v8256_v37, %v830_v62  ;;  %v8257_v26 = vmov %v8251_v19  ;;  %s5261_s19 = sld [smem:[#allocation6 + $0xb7]] }
 0x116   :  { %v853_v50 = vmul.f32 %v8257_v26, %v830_v62  ;;  %v8258_v0 = vstv %s4353_s22  ;;  %v8259_v32 = vstv %s4364_s28  ;;  %v8260_v28 = vstv %s4366_s23  ;;  %s8301_s23 = smov 1   ;;  %s4965_s28 = sld [smem:[#allocation6 + $0x6d]] }
 0x117   :  { %v864_v31 = vmul.f32 %v8258_v0, %v860_v25  ;;  %v870_v53 = vmul.f32 %v8259_v32, %v860_v25  ;;  %v876_v10 = vmul.f32 %v8260_v28, %v860_v25  ;;  %v8261_v15 = vstv %s4375_s15  ;;  %s4967_s22 = sld [smem:[#allocation6 + $0x91]]  ;;  %8318 = sst [smem:[#allocation31_spill]] %s5019_s11 }
 0x118   :  { %v882_v21 = vmul.f32 %v8261_v15, %v860_v25  ;;  %v837_v17 = vadd.f32 %v835_v27, %v801_v18  ;;  %v843_v9 = vadd.f32 %v841_v23, %v807_v52  ;;  %v849_v39 = vadd.f32 %v847_v63, %v813_v30  ;;  %v984_v27 = vpop.permute.xlu1 %983  ;;  %s4971_s15 = sld [smem:[#allocation6 + $0xd9]]  ;;  %8319 = sst [smem:[#allocation32_spill]] %s5021_s0 }
 0x119   :  { %v855_v7 = vadd.f32 %v853_v50, %v819_v14  ;;  %v866_v35 = vadd.f32 %v864_v31, %v838_v49  ;;  %v872_v8 = vadd.f32 %v870_v53, %v844_v6  ;;  %v878_v16 = vadd.f32 %v876_v10, %v850_v13  ;;  %v8281_v14 = vld [vmem:[#allocation76_spill] sm:$0xff]  ;;  %v8282_v6 = vld [vmem:[#allocation77_spill] sm:$0xff]  ;;  %s5035_s11 = sld [smem:[#allocation6 + $0xd8]]  ;;  %s5263_s0 = sld [smem:[#allocation6 + $0xdb]] }
 0x11a   :  { %v884_v62 = vadd.f32 %v882_v21, %v856_v61  ;;  %v8266_v12 = vmov %v8258_v0  ;;  %v8268_v2 = vmov %v8259_v32  ;;  %v8270_v24 = vmov %v8260_v28  ;;  %v8283_v61 = vld [vmem:[#allocation78_spill] sm:$0xff] }
 0x11b   :  { %v863_v41 = vmul.f32 %v8266_v12, %v858_v40  ;;  %v869_v44 = vmul.f32 %v8268_v2, %v858_v40  ;;  %v875_v5 = vmul.f32 %v8270_v24, %v858_v40  ;;  %v8272_v43 = vmov %v8261_v15  ;;  %8350 = sst [smem:[#allocation52_spill]] %s5261_s19  ;;  %s5466_s19 = sld [smem:[#allocation6 + $0xa0]] }
 0x11c   :  { %v881_v38 = vmul.f32 %v8272_v43, %v858_v40  ;;  %v901_v3 = vadd.f32 %v8273_v54, %v866_v35  ;;  %v918_v4 = vadd.f32 %v8274_v48, %v872_v8  ;;  %v935_v42 = vadd.f32 %v8275_v20, %v878_v16  ;;  %v982_v8 = vpop.permute.xlu0 %981 }
 0x11d   :  { %v952_v59 = vadd.f32 %v8276_v46, %v884_v62  ;;  %v865_v25 = vadd.f32 %v863_v41, %v837_v17  ;;  %v871_v1 = vadd.f32 %v869_v44, %v843_v9  ;;  %v877_v51 = vadd.f32 %v875_v5, %v849_v39  ;;  %8305 = sst [smem:[#allocation19_spill]] %s4967_s22 }
 0x11e   :  { %v883_v29 = vadd.f32 %v881_v38, %v855_v7  ;;  %v8277_v60 = vstv %s4379_s17  ;;  %v8278_v34 = vstv %s8267_s20  ;;  %v8279_v45 = vstv %s8269_s9  ;;  %8307 = sst [smem:[#allocation21_spill]] %s4971_s15  ;;  %s8308_s17 = smov 127  }
 0x11f   :  { %v960_v55 = vmul.f32 %v8277_v60, %v956_v56  ;;  %v966_v19 = vmul.f32 %v8278_v34, %v956_v56  ;;  %v972_v18 = vmul.f32 %v8279_v45, %v956_v56  ;;  %v8280_v52 = vstv %s8271_s29  ;;  %s5023_s20 = sld [smem:[#allocation6 + $0x48]]  ;;  %s5025_s9 = sld [smem:[#allocation6 + $0x6c]] }
 0x120   :  { %v978_v30 = vmul.f32 %v8280_v52, %v956_v56  ;;  %v900_v49 = vadd.f32 %v8281_v14, %v865_v25  ;;  %v917_v13 = vadd.f32 %v8282_v6, %v871_v1  ;;  %v934_v40 = vadd.f32 %v8283_v61, %v877_v51  ;;  %s5027_s29 = sld [smem:[#allocation6 + $0x90]]  ;;  %8324 = sst [smem:[#allocation37_spill]] %s5035_s11 }
 0x121   :  { %v951_v11 = vadd.f32 %v8284_v22, %v883_v29  ;;  %v962_v57 = vadd.f32 %v960_v55, %v901_v3  ;;  %v968_v23 = vadd.f32 %v966_v19, %v918_v4  ;;  %v974_v37 = vadd.f32 %v972_v18, %v935_v42  ;;  %8351 = sst [smem:[#allocation53_spill]] %s5263_s0  ;;  %s5464_s0 = sld [smem:[#allocation6 + $0x7c]] }
 0x122   :  { %v980_v63 = vadd.f32 %v978_v30, %v952_v59  ;;  %v8285_v26 = vmov %v8277_v60  ;;  %v8286_v0 = vmov %v8278_v34  ;;  %v8287_v32 = vmov %v8279_v45  ;;  %s5398_s11 = sld [smem:[#allocation6 + $0x55]] }
 0x123   :  { %v959_v50 = vmul.f32 %v8285_v26, %v954_v58  ;;  %v965_v31 = vmul.f32 %v8286_v0, %v954_v58  ;;  %v971_v53 = vmul.f32 %v8287_v32, %v954_v58  ;;  %v8288_v28 = vmov %v8280_v52 }
 0x124   :  { %v977_v10 = vmul.f32 %v8288_v28, %v954_v58  ;;  %v8291_v21 = vstv %s4401_s21  ;;  %v8292_v9 = vstv %s4403_s10  ;;  %v8293_v7 = vstv %s4407_s6  ;;  %s4959_s10 = sld [smem:[#allocation6 + $0x1]]  ;;  %s4961_s21 = sld [smem:[#allocation6 + $0x25]] }
 0x125   :  { %v988_v17 = vmul.f32 %v8291_v21, %v984_v27  ;;  %v994_v39 = vmul.f32 %v8292_v9, %v984_v27  ;;  %v1000_v56 = vmul.f32 %v8293_v7, %v984_v27  ;;  %v8294_v47 = vstv %s4409_s30  ;;  %s4963_s6 = sld [smem:[#allocation6 + $0x49]]  ;;  %s4969_s30 = sld [smem:[#allocation6 + $0xb5]] }
 0x126   :  { %v1006_v35 = vmul.f32 %v8294_v47, %v984_v27  ;;  %v961_v16 = vadd.f32 %v959_v50, %v900_v49  ;;  %v967_v62 = vadd.f32 %v965_v31, %v917_v13  ;;  %v973_v36 = vadd.f32 %v971_v53, %v934_v40  ;;  %8320 = sst [smem:[#allocation33_spill]] %s5023_s20  ;;  %s5240_s20 = sld [smem:[#allocation6 + $0x93]] }
 0x127   :  { %v979_v12 = vadd.f32 %v977_v10, %v951_v11  ;;  %v990_v41 = vadd.f32 %v988_v17, %v962_v57  ;;  %v996_v2 = vadd.f32 %v994_v39, %v968_v23  ;;  %v1002_v44 = vadd.f32 %v1000_v56, %v974_v37  ;;  %8321 = sst [smem:[#allocation34_spill]] %s5025_s9 }
 0x128   :  { %v1008_v24 = vadd.f32 %v1006_v35, %v980_v63  ;;  %v8297_v43 = vmov %v8291_v21  ;;  %v8298_v54 = vmov %v8292_v9  ;;  %v8299_v48 = vmov %v8293_v7  ;;  %8322 = sst [smem:[#allocation35_spill]] %s5027_s29  ;;  %s5044_s29 = sld [smem:[#allocation6 + $0xfc]] }
 0x129   :  { %v987_v38 = vmul.f32 %v8297_v43, %v982_v8  ;;  %v993_v3 = vmul.f32 %v8298_v54, %v982_v8  ;;  %v999_v4 = vmul.f32 %v8299_v48, %v982_v8  ;;  %v8300_v20 = vmov %v8294_v47  ;;  %s5172_s9 = sld [smem:[#allocation6 + $0xa]] }
 0x12a   :  { %v1005_v42 = vmul.f32 %v8300_v20, %v982_v8  ;;  %v1010_v46 = vmax.f32 %v990_v41, 0.0  ;;  %v1016_v59 = vmax.f32 %v996_v2, 0.0  ;;  %v1023_v58 = vmax.f32 %v1002_v44, 0.0  ;;  %8302 = sst [smem:[#allocation16_spill]] %s4959_s10 }
 0x12b   :  { %v1030_v25 = vmax.f32 %v1008_v24, 0.0  ;;  %v989_v1 = vadd.f32 %v987_v38, %v961_v16  ;;  %v995_v51 = vadd.f32 %v993_v3, %v967_v62  ;;  %v1001_v29 = vadd.f32 %v999_v4, %v973_v36  ;;  %8303 = sst [smem:[#allocation17_spill]] %s4961_s21 }
 0x12c   :  { %v1007_v60 = vadd.f32 %v1005_v42, %v979_v12  ;;  %v4913_v55 = vsel %vm4899_vm11, %v1010_v46, 0.0  ;;  %v4917_v34 = vsel %vm4899_vm11, %v1016_v59, 0.0  ;;  %v4921_v19 = vsel %vm4899_vm11, %v1023_v58, 0.0  ;;  %8304 = sst [smem:[#allocation18_spill]] %s4963_s6 }
 0x12d   :  { %v4925_v45 = vsel %vm4899_vm11, %v1030_v25, 0.0  ;;  %1014 = vst [vmem:[#allocation2 + $0x10] sm:$0xff] %v4913_v55  ;;  %1021 = vst [vmem:[#allocation2 + $0x30] sm:$0xff] %v4917_v34  ;;  %v1009_v18 = vmax.f32 %v989_v1, 0.0  ;;  %v1015_v52 = vmax.f32 %v995_v51, 0.0  ;;  %v1022_v30 = vmax.f32 %v1001_v29, 0.0 }
 0x12e   :  { %1028 = vst [vmem:[#allocation2 + $0x50] sm:$0xff] %v4921_v19  ;;  %1035 = vst [vmem:[#allocation2 + $0x70] sm:$0xff] %v4925_v45  ;;  %v1029_v14 = vmax.f32 %v1007_v60, 0.0  ;;  %8306 = sst [smem:[#allocation20_spill]] %s4969_s30  ;;  %v1107_v57 = vstv %s4959_s10  ;;  %v1113_v23 = vstv %s4961_s21  ;;  %v1119_v37 = vstv %s4963_s6  ;;  %s5048_s10 = sld [smem:[#allocation6 + $0x2]] }
 0x12f   :  { %v4933_v49 = vsel %vm4899_vm11, %v1009_v18, 0.0  ;;  %v4937_v6 = vsel %vm4899_vm11, %v1015_v52, 0.0  ;;  %v4941_v13 = vsel %vm4899_vm11, %v1022_v30, 0.0  ;;  %8325 = sst [smem:[#allocation38_spill]] %s5044_s29  ;;  %v1125_v63 = vstv %s4965_s28  ;;  %s5056_s21 = sld [smem:[#allocation6 + $0x4a]] }
 0x130   :  { %v4945_v61 = vsel %vm4899_vm11, %v1029_v14, 0.0  ;;  %1013 = vst [vmem:[#allocation2 + $0x8] sm:$0xff] %v4933_v49  ;;  %1020 = vst [vmem:[#allocation2 + $0x28] sm:$0xff] %v4937_v6  ;;  %v1131_v26 = vstv %s4967_s22  ;;  %v1137_v50 = vstv %s4969_s30  ;;  %v1143_v0 = vstv %s4971_s15  ;;  %s5053_s6 = sld [smem:[#allocation6 + $0x26]]  ;;  %s5078_s30 = sld [smem:[#allocation6 + $0xda]] }
 0x131   :  { %1027 = vst [vmem:[#allocation2 + $0x48] sm:$0xff] %v4941_v13  ;;  %1034 = vst [vmem:[#allocation2 + $0x68] sm:$0xff] %v4945_v61  ;;  %v1149_v31 = vstv %s4977_s24  ;;  %v1261_v32 = vstv %s4979_s25  ;;  %v1267_v53 = vstv %s4981_s26  ;;  %v1273_v28 = vstv %s4983_s27  ;;  %s5065_s24 = sld [smem:[#allocation6 + $0x92]]  ;;  %s8332_s25 = smov 127  }
 0x132   :  { %v1279_v10 = vstv %s4985_s2  ;;  %v1285_v15 = vstv %s4987_s1  ;;  %v1291_v17 = vstv %s4989_s7  ;;  %v1297_v9 = vstv %s4991_s8  ;;  %s5084_s22 = sld [smem:[#allocation6 + $0xfe]]  ;;  %s5214_s27 = sld [smem:[#allocation6 + $0x27]] }
 0x133   :  { %v1303_v39 = vstv %s4999_s14  ;;  %v5108_v4 = vmul.f32 %v1261_v32, %v4913_v55  ;;  %v5111_v20 = vmul.f32 %v1267_v53, %v4913_v55  ;;  %v5116_v42 = vmul.f32 %v1273_v28, %v4913_v55  ;;  %s5216_s2 = sld [smem:[#allocation6 + $0x4b]]  ;;  %s5284_s28 = sld [smem:[#allocation6 + $0x52]] }
 0x134   :  { %v5029_v11 = vld [vmem:[#allocation2 + $0x11] sm:$0xff]  ;;  %8326 = sst [smem:[#allocation39_spill]] %s5048_s10  ;;  %v5127_v58 = vmul.f32 %v1279_v10, %v4913_v55  ;;  %v5132_v25 = vmul.f32 %v1285_v15, %v4913_v55  ;;  %v5142_v51 = vmul.f32 %v1291_v17, %v4913_v55  ;;  %v5147_v29 = vmul.f32 %v1297_v9, %v4913_v55  ;;  %s5314_s1 = sld [smem:[#allocation6 + $0xbe]] }
 0x135   :  { %8328 = sst [smem:[#allocation41_spill]] %s5056_s21  ;;  %s5136_s10 = sld [smem:[#allocation6 + $0x97]]  ;;  %v5152_v60 = vmul.f32 %v1303_v39, %v4913_v55  ;;  %v5165_v30 = vmul.f32 %v1261_v32, %v4933_v49  ;;  %v5185_v32 = vmul.f32 %v1273_v28, %v4933_v49  ;;  %v1415_v62 = vstv %s5104_s18  ;;  %v5364_v5 = vld [vmem:[#allocation2 + $0x31] sm:$0xff] }
 0x136   :  { %8327 = sst [smem:[#allocation40_spill]] %s5053_s6  ;;  %s5134_s6 = sld [smem:[#allocation6 + $0x73]]  ;;  %v1421_v16 = vstv %s5118_s16  ;;  %v1451_v56 = vstv %s5156_s3 }
 0x137   :  { %v4951_v40 = vld [vmem:[#allocation2 + $0xf] sm:$0xff]  ;;  %v4953_v22 = vld [vmem:[#allocation2 + $0x7] sm:$0xff]  ;;  %8330 = sst [smem:[#allocation43_spill]] %s5065_s24  ;;  %s5281_s21 = sld [smem:[#allocation6 + $0xff]]  ;;  %v5333_v47 = vmul.f32 %v1421_v16, %v5029_v11  ;;  %v5376_v36 = vmul.f32 %v1451_v56, %v5029_v11 }
 0x138   :  { %1056 = vrot.lane.b32.xlu1 %v4951_v40, %s8301_s23  ;;  %1054 = vrot.lane.b32.xlu0 %v4953_v22, %s8301_s23  ;;  %v5031_v27 = vld [vmem:[#allocation2 + $0x9] sm:$0xff]  ;;  %8335 = sst [smem:[#allocation45_spill]] %s5078_s30  ;;  %v5178_v1 = vmul.f32 %v1107_v57, %v4951_v40  ;;  %s5180_s30 = sld [smem:[#allocation6 + $0x3]]  ;;  %v5197_v14 = vmul.f32 %v1113_v23, %v4951_v40  ;;  %v5202_v52 = vmul.f32 %v1119_v37, %v4951_v40 }
 0x139   :  { %8336 = sst [smem:[#allocation46_spill]] %s5084_s22  ;;  %v5090_v2 = vld [vmem:[#allocation2 + $0x2f] sm:$0xff]  ;;  %v5092_v44 = vld [vmem:[#allocation2 + $0x27] sm:$0xff]  ;;  %v5207_v28 = vmul.f32 %v1125_v63, %v4951_v40  ;;  %v5221_v18 = vmul.f32 %v1137_v50, %v4951_v40  ;;  %v5226_v59 = vmul.f32 %v1143_v0, %v4951_v40  ;;  %v5231_v46 = vmul.f32 %v1149_v31, %v4951_v40  ;;  %s5238_s22 = sld [smem:[#allocation6 + $0x6f]]  ;;  %8354 = vst [vmem:[#allocation72_spill] sm:$0xff] %v5333_v47 }
 0x13a   :  { %8346 = sst [smem:[#allocation48_spill]] %s5214_s27  ;;  %v5236_v48 = vmul.f32 %v1107_v57, %v4953_v22  ;;  %v5254_v57 = vmul.f32 %v1119_v37, %v4953_v22  ;;  %v5259_v3 = vmul.f32 %v1125_v63, %v4953_v22  ;;  %v5274_v37 = vmul.f32 %v1137_v50, %v4953_v22  ;;  %s5298_s24 = sld [smem:[#allocation6 + $0x76]]  ;;  %v5366_v24 = vld [vmem:[#allocation2 + $0x29] sm:$0xff]  ;;  %8365 = vst [vmem:[#allocation78_spill] sm:$0xff] %v5376_v36 }
 0x13b   :  { %8347 = sst [smem:[#allocation49_spill]] %s5216_s2  ;;  %v5279_v63 = vmul.f32 %v1143_v0, %v4953_v22  ;;  %v5289_v8 = vmul.f32 %v1149_v31, %v4953_v22  ;;  %v1427_v50 = vstv %s5120_s4  ;;  %v5305_v0 = vmul.f32 %v1291_v17, %v4933_v49  ;;  %s5322_s7 = sld [smem:[#allocation6 + $0x5]] }
 0x13c   :  { %1156 = vrot.lane.b32.xlu1 %v4951_v40, %s8308_s17  ;;  %1154 = vrot.lane.b32.xlu0 %v4953_v22, %s8308_s17  ;;  %8349 = sst [smem:[#allocation51_spill]] %s5240_s20  ;;  %v1433_v35 = vstv %s5134_s6  ;;  %v1439_v31 = vstv %s5136_s10  ;;  %s5316_s6 = sld [smem:[#allocation6 + $0xe2]]  ;;  %v5327_v17 = vmul.f32 %v1303_v39, %v4933_v49  ;;  %v5342_v21 = vmul.f32 %v1427_v50, %v5029_v11 }
 0x13d   :  { %8352 = sst [smem:[#allocation54_spill]] %s5281_s21  ;;  %s5339_s10 = sld [smem:[#allocation6 + $0x29]]  ;;  %v5356_v7 = vmul.f32 %v1439_v31, %v5029_v11  ;;  %v5362_v43 = vmul.f32 %v1415_v62, %v5031_v27  ;;  %v5390_v41 = vmul.f32 %v1421_v16, %v5031_v27  ;;  %v1575_v36 = vstv %s5192_s13 }
 0x13e   :  { %8345 = sst [smem:[#allocation47_spill]] %s5180_s30  ;;  %8356 = vst [vmem:[#allocation73_spill] sm:$0xff] %v5342_v21  ;;  %s5348_s8 = sld [smem:[#allocation6 + $0xd]]  ;;  %v5403_v54 = vmul.f32 %v1427_v50, %v5031_v27  ;;  %v5409_v16 = vmul.f32 %v1439_v31, %v5031_v27  ;;  %v1593_v50 = vstv %s5300_s12  ;;  %v5441_v31 = vmul.f32 %v1575_v36, %v5090_v2 }
 0x13f   :  { %8348 = sst [smem:[#allocation50_spill]] %s5238_s22  ;;  %s5351_s14 = sld [smem:[#allocation6 + $0x4d]]  ;;  %8360 = vst [vmem:[#allocation75_spill] sm:$0xff] %v5356_v7  ;;  %8362 = vst [vmem:[#allocation77_spill] sm:$0xff] %v5362_v43  ;;  %v1569_v43 = vstv %s5172_s9 }
 0x140   :  { %1210 = vrot.lane.b32.xlu1 %v4913_v55, %s8301_s23  ;;  %1208 = vrot.lane.b32.xlu0 %v4933_v49, %s8301_s23  ;;  %s5353_s3 = sld [smem:[#allocation6 + $0x71]]  ;;  %s5384_s16 = sld [smem:[#allocation6 + $0xdd]]  ;;  %8368 = vst [vmem:[#allocation81_spill] sm:$0xff] %v5390_v41  ;;  %8369 = vst [vmem:[#allocation82_spill] sm:$0xff] %v5403_v54  ;;  %v5420_v41 = vmul.f32 %v1451_v56, %v5031_v27  ;;  %v1599_v56 = vstv %s5314_s1  ;;  %v5475_v54 = vmul.f32 %v1569_v43, %v5092_v44 }
 0x141   :  { %8353 = sst [smem:[#allocation55_spill]] %s5322_s7  ;;  %s5373_s4 = sld [smem:[#allocation6 + $0xb9]]  ;;  %8371 = vst [vmem:[#allocation84_spill] sm:$0xff] %v5409_v16  ;;  %8377 = vst [vmem:[#allocation89_spill] sm:$0xff] %v5441_v31 }
 0x142   :  { %s5392_s18 = sld [smem:[#allocation6 + $0x31]]  ;;  %s5412_s26 = sld [smem:[#allocation6 + $0x9d]]  ;;  %8373 = vst [vmem:[#allocation86_spill] sm:$0xff] %v5420_v41  ;;  %v1605_v41 = vstv %s5316_s6  ;;  %8381 = vst [vmem:[#allocation93_spill] sm:$0xff] %v5475_v54  ;;  %v1735_v54 = vstv %s5398_s11 }
 0x143   :  { %8355 = sst [smem:[#allocation56_spill]] %s5339_s10  ;;  %s5400_s29 = sld [smem:[#allocation6 + $0x79]] }
 0x144   :  { %1310 = vrot.lane.b32.xlu1 %v4913_v55, %s8308_s17  ;;  %1308 = vrot.lane.b32.xlu0 %v4933_v49, %s8308_s17  ;;  %s5033_s17 = sld [smem:[#allocation6 + $0xb4]]  ;;  %v5168_v55 = vmul.f32 %v1267_v53, %v4933_v49  ;;  %v5190_v53 = vmul.f32 %v1279_v10, %v4933_v49  ;;  %v5212_v10 = vmul.f32 %v1131_v26, %v4951_v40  ;;  %s5414_s13 = sld [smem:[#allocation6 + $0xc1]] }
 0x145   :  { %v5249_v40 = vmul.f32 %v1113_v23, %v4953_v22  ;;  %v5269_v23 = vmul.f32 %v1131_v26, %v4953_v22  ;;  %v5294_v26 = vmul.f32 %v1285_v15, %v4933_v49  ;;  %v5310_v22 = vmul.f32 %v1297_v9, %v4933_v49  ;;  %8358 = sst [smem:[#allocation57_spill]] %s5351_s14  ;;  %s5426_s9 = sld [smem:[#allocation6 + $0xe5]] }
 0x146   :  { %v5330_v9 = vmul.f32 %v1415_v62, %v5029_v11  ;;  %v5345_v49 = vmul.f32 %v1433_v35, %v5029_v11  ;;  %8359 = sst [smem:[#allocation58_spill]] %s5353_s3  ;;  %v1587_v62 = vstv %s5298_s24  ;;  %s5435_s24 = sld [smem:[#allocation6 + $0x101]] }
 0x147   :  { %8364 = sst [smem:[#allocation60_spill]] %s5373_s4  ;;  %s5446_s12 = sld [smem:[#allocation6 + $0x10]]  ;;  %v5510_v31 = vmul.f32 %v1587_v62, %v5092_v44 }
 0x148   :  { %1364 = vrot.lane.b32.xlu1 %v5029_v11, %s8301_s23  ;;  %1362 = vrot.lane.b32.xlu0 %v5031_v27, %s8301_s23  ;;  %s5058_s23 = sld [smem:[#allocation6 + $0x6e]]  ;;  %8357 = vst [vmem:[#allocation74_spill] sm:$0xff] %v5345_v49  ;;  %8366 = sst [smem:[#allocation61_spill]] %s5384_s16 }
 0x149   :  { %s5454_s7 = sld [smem:[#allocation6 + $0x34]]  ;;  %s5456_s21 = sld [smem:[#allocation6 + $0x58]]  ;;  %8390 = vst [vmem:[#allocation99_spill] sm:$0xff] %v5510_v31 }
 0x14a   :  { %8323 = sst [smem:[#allocation36_spill]] %s5033_s17  ;;  %s5170_s17 = sld [smem:[#allocation6 + $0x103]] }
 0x14b   :  { %s5480_s1 = sld [smem:[#allocation6 + $0xc4]]  ;;  %s5482_s6 = sld [smem:[#allocation6 + $0xe8]]  ;;  %v1759_v31 = vstv %s5426_s9 }
 0x14c   :  { %1464 = vrot.lane.b32.xlu1 %v5029_v11, %s8332_s25  ;;  %1462 = vrot.lane.b32.xlu0 %v5031_v27, %s8332_s25  ;;  %8375 = sst [smem:[#allocation62_spill]] %s5435_s24  ;;  %s5500_s4 = sld [smem:[#allocation6 + $0x10c]] }
 0x14d   :  { %s5504_s16 = sld [smem:[#allocation6 + $0x4e]]  ;;  %s5516_s3 = sld [smem:[#allocation6 + $0x72]] }
 0x14e   :  { %8329 = sst [smem:[#allocation42_spill]] %s5058_s23  ;;  %s5154_s23 = sld [smem:[#allocation6 + $0xbb]] }
 0x14f   :  { %s5522_s14 = sld [smem:[#allocation6 + $0x13]]  ;;  %s5524_s10 = sld [smem:[#allocation6 + $0x96]] }
 0x150   :  { %1518 = vrot.lane.b32.xlu1 %v5090_v2, %s8337_s5  ;;  %1516 = vrot.lane.b32.xlu0 %v5092_v44, %s8337_s5  ;;  %v1457_v39 = vstv %s5170_s17  ;;  %s5371_s17 = sld [smem:[#allocation6 + $0x95]]  ;;  %s5532_s20 = sld [smem:[#allocation6 + $0x37]] }
 0x151   :  { %v5387_v12 = vmul.f32 %v1457_v39, %v5029_v11  ;;  %s5552_s11 = sld [smem:[#allocation6 + $0x102]]  ;;  %s5596_s9 = sld [smem:[#allocation6 + $0xc7]] }
 0x152   :  { %s5605_s24 = sld [smem:[#allocation6 + $0x8]]  ;;  %s5607_s22 = sld [smem:[#allocation6 + $0x2c]] }
 0x153   :  { %8367 = vst [vmem:[#allocation79_spill] sm:$0xff] %v5387_v12  ;;  %8388 = sst [smem:[#allocation65_spill]] %s5504_s16  ;;  %s5622_s2 = sld [smem:[#allocation6 + $0x74]] }
 0x154   :  { %1618 = vrot.lane.b32.xlu1 %v5090_v2, %s8332_s25  ;;  %1616 = vrot.lane.b32.xlu0 %v5092_v44, %s8332_s25  ;;  %v1445_v15 = vstv %s5154_s23  ;;  %s5336_s23 = sld [smem:[#allocation6 + $0x106]]  ;;  %8392 = sst [smem:[#allocation66_spill]] %s5516_s3 }
 0x155   :  { %v5359_v38 = vmul.f32 %v1445_v15, %v5029_v11  ;;  %v5406_v11 = vmul.f32 %v1433_v35, %v5031_v27  ;;  %v5417_v33 = vmul.f32 %v1445_v15, %v5031_v27  ;;  %v5423_v35 = vmul.f32 %v1457_v39, %v5031_v27  ;;  %v5468_v39 = vld [vmem:[#allocation2 + $0x4f] sm:$0xff]  ;;  %8393 = sst [smem:[#allocation67_spill]] %s5524_s10  ;;  %s5627_s27 = sld [smem:[#allocation6 + $0x98]] }
 0x156   :  { %8363 = sst [smem:[#allocation59_spill]] %s5371_s17  ;;  %v5438_v27 = vmul.f32 %v1569_v43, %v5090_v2  ;;  %v5495_v43 = vmul.f32 %v1605_v41, %v5090_v2  ;;  %s5502_s17 = sld [smem:[#allocation6 + $0x2a]] }
 0x157   :  { %8361 = vst [vmem:[#allocation76_spill] sm:$0xff] %v5359_v38  ;;  %v1581_v38 = vstv %s5284_s28  ;;  %8370 = vst [vmem:[#allocation83_spill] sm:$0xff] %v5406_v11  ;;  %s5428_s28 = sld [smem:[#allocation6 + $0x109]]  ;;  %8400 = sst [smem:[#allocation70_spill]] %s5552_s11 }
 0x158   :  { %1672 = vrot.lane.b32.xlu1 %v4917_v34, %s8337_s5  ;;  %1670 = vrot.lane.b32.xlu0 %v4937_v6, %s8337_s5  ;;  %8372 = vst [vmem:[#allocation85_spill] sm:$0xff] %v5417_v33  ;;  %8374 = vst [vmem:[#allocation87_spill] sm:$0xff] %v5423_v35  ;;  %v5444_v15 = vmul.f32 %v1581_v38, %v5090_v2  ;;  %v5450_v35 = vmul.f32 %v1587_v62, %v5090_v2  ;;  %v1753_v62 = vstv %s5414_s13  ;;  %s5582_s13 = sld [smem:[#allocation6 + $0xa3]]  ;;  %8413 = sst [smem:[#allocation71_spill]] %s5605_s24 }
 0x159   :  { %8376 = vst [vmem:[#allocation88_spill] sm:$0xff] %v5438_v27  ;;  %v5461_v33 = vmul.f32 %v1593_v50, %v5090_v2  ;;  %v5478_v27 = vmul.f32 %v1575_v36, %v5092_v44  ;;  %v5492_v36 = vmul.f32 %v1599_v56, %v5090_v2  ;;  %8385 = vst [vmem:[#allocation96_spill] sm:$0xff] %v5495_v43  ;;  %v1741_v43 = vstv %s5400_s29  ;;  %s5566_s29 = sld [smem:[#allocation6 + $0x5b]]  ;;  %8414 = sst [smem:[#allocation16_spill]] %s5607_s22 }
 0x15a   :  { %8378 = vst [vmem:[#allocation90_spill] sm:$0xff] %v5444_v15  ;;  %8379 = vst [vmem:[#allocation91_spill] sm:$0xff] %v5450_v35  ;;  %v1611_v15 = vstv %s5336_s23  ;;  %v5470_v35 = vld [vmem:[#allocation2 + $0x47] sm:$0xff]  ;;  %s5489_s23 = sld [smem:[#allocation6 + $0x6]]  ;;  %v5498_v16 = vmul.f32 %v1581_v38, %v5092_v44  ;;  %v1723_v38 = vstv %s5348_s8  ;;  %s5539_s8 = sld [smem:[#allocation6 + $0xba]]  ;;  %v5561_v12 = vmul.f32 %v1741_v43, %v4917_v34 }
 0x15b   :  { %8380 = vst [vmem:[#allocation92_spill] sm:$0xff] %v5461_v33  ;;  %8382 = vst [vmem:[#allocation94_spill] sm:$0xff] %v5478_v27  ;;  %v5507_v11 = vmul.f32 %v1611_v15, %v5090_v2  ;;  %v5513_v27 = vmul.f32 %v1593_v50, %v5092_v44  ;;  %v5527_v2 = vmul.f32 %v1599_v56, %v5092_v44  ;;  %8419 = sst [smem:[#allocation18_spill]] %s5622_s2  ;;  %s5632_s30 = sld [smem:[#allocation6 + $0x10f]] }
 0x15c   :  { %1772 = vrot.lane.b32.xlu1 %v4917_v34, %s8332_s25  ;;  %1770 = vrot.lane.b32.xlu0 %v4937_v6, %s8332_s25  ;;  %8384 = vst [vmem:[#allocation95_spill] sm:$0xff] %v5492_v36  ;;  %8386 = vst [vmem:[#allocation97_spill] sm:$0xff] %v5498_v16  ;;  %8387 = sst [smem:[#allocation64_spill]] %s5502_s17  ;;  %v1729_v16 = vstv %s5392_s18  ;;  %v1747_v36 = vstv %s5412_s26  ;;  %s5541_s18 = sld [smem:[#allocation6 + $0xde]]  ;;  %v5547_v56 = vmul.f32 %v1611_v15, %v5092_v44 }
 0x15d   :  { %8389 = vst [vmem:[#allocation98_spill] sm:$0xff] %v5507_v11  ;;  %8391 = vst [vmem:[#allocation100_spill] sm:$0xff] %v5513_v27  ;;  %v1765_v11 = vstv %s5428_s28  ;;  %v5544_v27 = vmul.f32 %v1605_v41, %v5092_v44  ;;  %v5555_v33 = vmul.f32 %v1729_v16, %v4917_v34  ;;  %v5558_v50 = vmul.f32 %v1735_v54, %v4917_v34  ;;  %s5580_s26 = sld [smem:[#allocation6 + $0x7f]]  ;;  %s5598_s28 = sld [smem:[#allocation6 + $0xeb]] }
 0x15e   :  { %8394 = vst [vmem:[#allocation101_spill] sm:$0xff] %v5527_v2  ;;  %8398 = vst [vmem:[#allocation103_spill] sm:$0xff] %v5547_v56  ;;  %v5550_v2 = vmul.f32 %v1723_v38, %v4917_v34  ;;  %v5564_v41 = vmul.f32 %v1747_v36, %v4917_v34  ;;  %v5569_v44 = vmul.f32 %v1753_v62, %v4917_v34  ;;  %8420 = sst [smem:[#allocation19_spill]] %s5627_s27  ;;  %s5638_s16 = sld [smem:[#allocation6 + $0x16]] }
 0x15f   :  { %8397 = vst [vmem:[#allocation102_spill] sm:$0xff] %v5544_v27  ;;  %8401 = vst [vmem:[#allocation105_spill] sm:$0xff] %v5555_v33  ;;  %v5572_v15 = vmul.f32 %v1759_v31, %v4917_v34  ;;  %v5575_v33 = vmul.f32 %v1765_v11, %v4917_v34  ;;  %v5594_v34 = vmul.f32 %v1747_v36, %v4937_v6  ;;  %s5640_s17 = sld [smem:[#allocation6 + $0x3a]]  ;;  %s5722_s11 = sld [smem:[#allocation6 + $0x19]] }
 0x160   :  { %1826 = vrot.lane.b32.xlu1 %v5364_v5, %s8337_s5  ;;  %1824 = vrot.lane.b32.xlu0 %v5366_v24, %s8337_s5  ;;  %8383 = sst [smem:[#allocation63_spill]] %s5489_s23  ;;  %8399 = vst [vmem:[#allocation104_spill] sm:$0xff] %v5550_v2  ;;  %8402 = vst [vmem:[#allocation106_spill] sm:$0xff] %v5558_v50  ;;  %v5578_v50 = vmul.f32 %v1723_v38, %v4937_v6  ;;  %v5613_v36 = vmul.f32 %v1759_v31, %v4937_v6  ;;  %s5620_s23 = sld [smem:[#allocation6 + $0x50]]  ;;  %v1889_v31 = vstv %s5456_s21 }
 0x161   :  { %8395 = sst [smem:[#allocation68_spill]] %s5539_s8  ;;  %8403 = vst [vmem:[#allocation107_spill] sm:$0xff] %v5561_v12  ;;  %8404 = vst [vmem:[#allocation108_spill] sm:$0xff] %v5564_v41  ;;  %v5585_v41 = vmul.f32 %v1729_v16, %v4937_v6  ;;  %v5610_v16 = vmul.f32 %v1753_v62, %v4937_v6  ;;  %v1919_v38 = vstv %s5500_s4  ;;  %s5682_s4 = sld [smem:[#allocation6 + $0x82]] }
 0x162   :  { %8396 = sst [smem:[#allocation69_spill]] %s5541_s18  ;;  %8405 = vst [vmem:[#allocation109_spill] sm:$0xff] %v5569_v44  ;;  %8406 = vst [vmem:[#allocation110_spill] sm:$0xff] %v5572_v15  ;;  %v5588_v44 = vmul.f32 %v1735_v54, %v4937_v6  ;;  %v5591_v15 = vmul.f32 %v1741_v43, %v4937_v6  ;;  %v5616_v43 = vmul.f32 %v1765_v11, %v4937_v6  ;;  %v1907_v11 = vstv %s5480_s1  ;;  %s5659_s21 = sld [smem:[#allocation6 + $0x104]] }
 0x163   :  { %8407 = vst [vmem:[#allocation111_spill] sm:$0xff] %v5575_v33  ;;  %8408 = vst [vmem:[#allocation112_spill] sm:$0xff] %v5578_v50  ;;  %v1913_v54 = vstv %s5482_s6  ;;  %v5662_v50 = vmul.f32 %v1889_v31, %v5364_v5  ;;  %v5673_v62 = vmul.f32 %v1907_v11, %v5364_v5  ;;  %s5704_s1 = sld [smem:[#allocation6 + $0xee]]  ;;  %s5720_s6 = sld [smem:[#allocation6 + $0x112]] }
 0x164   :  { %1926 = vrot.lane.b32.xlu1 %v5364_v5, %s8332_s25  ;;  %1924 = vrot.lane.b32.xlu0 %v5366_v24, %s8332_s25  ;;  %8409 = vst [vmem:[#allocation113_spill] sm:$0xff] %v5585_v41  ;;  %8410 = vst [vmem:[#allocation114_spill] sm:$0xff] %v5588_v44  ;;  %v5679_v41 = vmul.f32 %v1919_v38, %v5364_v5  ;;  %s5730_s24 = sld [smem:[#allocation6 + $0x3d]]  ;;  %s5732_s18 = sld [smem:[#allocation6 + $0x61]] }
 0x165   :  { %8411 = vst [vmem:[#allocation115_spill] sm:$0xff] %v5591_v15  ;;  %8412 = vst [vmem:[#allocation116_spill] sm:$0xff] %v5594_v34  ;;  %v1877_v34 = vstv %s5446_s12  ;;  %v1883_v15 = vstv %s5454_s7  ;;  %s5670_s7 = sld [smem:[#allocation6 + $0x5e]]  ;;  %s5738_s8 = sld [smem:[#allocation6 + $0x85]] }
 0x166   :  { %8415 = vst [vmem:[#allocation117_spill] sm:$0xff] %v5610_v16  ;;  %8416 = vst [vmem:[#allocation118_spill] sm:$0xff] %v5613_v36  ;;  %8418 = sst [smem:[#allocation17_spill]] %s5620_s23  ;;  %v1895_v36 = vstv %s5464_s0  ;;  %v1901_v16 = vstv %s5466_s19  ;;  %s5648_s0 = sld [smem:[#allocation6 + $0xbc]]  ;;  %v5653_v6 = vmul.f32 %v1877_v34, %v5364_v5  ;;  %v5656_v44 = vmul.f32 %v1883_v15, %v5364_v5 }
 0x167   :  { %8417 = vst [vmem:[#allocation119_spill] sm:$0xff] %v5616_v43  ;;  %s5650_s19 = sld [smem:[#allocation6 + $0xe0]]  ;;  %8426 = vst [vmem:[#allocation122_spill] sm:$0xff] %v5662_v50  ;;  %v5665_v33 = vmul.f32 %v1895_v36, %v5364_v5  ;;  %v5668_v43 = vmul.f32 %v1901_v16, %v5364_v5  ;;  %s5684_s12 = sld [smem:[#allocation6 + $0xa6]] }
 0x168   :  { %1980 = vrot.lane.b32.xlu1 %v5468_v39, %s8337_s5  ;;  %1978 = vrot.lane.b32.xlu0 %v5470_v35, %s8337_s5  ;;  %8423 = vst [vmem:[#allocation120_spill] sm:$0xff] %v5653_v6  ;;  %8424 = vst [vmem:[#allocation121_spill] sm:$0xff] %v5656_v44  ;;  %8425 = sst [smem:[#allocation22_spill]] %s5659_s21  ;;  %v5676_v44 = vmul.f32 %v1913_v54, %v5364_v5  ;;  %v2031_v6 = vstv %s5522_s14  ;;  %v5697_v5 = vmul.f32 %v1889_v31, %v5366_v24  ;;  %s5702_s14 = sld [smem:[#allocation6 + $0xca]] }
 0x169   :  { %8427 = vst [vmem:[#allocation123_spill] sm:$0xff] %v5665_v33  ;;  %8428 = vst [vmem:[#allocation124_spill] sm:$0xff] %v5668_v43  ;;  %v5686_v33 = vld [vmem:[#allocation2 + $0x51] sm:$0xff]  ;;  %v5688_v43 = vld [vmem:[#allocation2 + $0x49] sm:$0xff]  ;;  %v5718_v31 = vmul.f32 %v1913_v54, %v5366_v24  ;;  %s5740_s10 = sld [smem:[#allocation6 + $0xa9]]  ;;  %s5746_s2 = sld [smem:[#allocation6 + $0xcd]] }
 0x16a   :  { %8429 = vst [vmem:[#allocation125_spill] sm:$0xff] %v5673_v62  ;;  %8430 = vst [vmem:[#allocation126_spill] sm:$0xff] %v5676_v44  ;;  %v5691_v62 = vmul.f32 %v1877_v34, %v5366_v24  ;;  %v5694_v44 = vmul.f32 %v1883_v15, %v5366_v24  ;;  %v5712_v34 = vmul.f32 %v1901_v16, %v5366_v24  ;;  %v2061_v15 = vstv %s5596_s9  ;;  %s5748_s23 = sld [smem:[#allocation6 + $0xf1]]  ;;  %s5782_s9 = sld [smem:[#allocation6 + $0xbd]] }
 0x16b   :  { %8431 = vst [vmem:[#allocation127_spill] sm:$0xff] %v5679_v41  ;;  %8434 = vst [vmem:[#allocation130_spill] sm:$0xff] %v5697_v5  ;;  %v5700_v41 = vmul.f32 %v1895_v36, %v5366_v24  ;;  %v5715_v36 = vmul.f32 %v1907_v11, %v5366_v24  ;;  %v5728_v16 = vmul.f32 %v1919_v38, %v5366_v24  ;;  %v2037_v11 = vstv %s5532_s20  ;;  %s5756_s20 = sld [smem:[#allocation6 + $0x9]]  ;;  %s5876_s21 = sld [smem:[#allocation6 + $0x2f]] }
 0x16c   :  { %2080 = vrot.lane.b32.xlu1 %v5468_v39, %s8332_s25  ;;  %2078 = vrot.lane.b32.xlu0 %v5470_v35, %s8332_s25  ;;  %8421 = sst [smem:[#allocation20_spill]] %s5648_s0  ;;  %8432 = vst [vmem:[#allocation128_spill] sm:$0xff] %v5691_v62  ;;  %8433 = vst [vmem:[#allocation129_spill] sm:$0xff] %v5694_v44  ;;  %v2055_v5 = vstv %s5582_s13  ;;  %v2073_v24 = vstv %s5632_s30  ;;  %s5767_s30 = sld [smem:[#allocation6 + $0x51]]  ;;  %v5772_v54 = vmul.f32 %v2037_v11, %v5468_v39 }
 0x16d   :  { %8422 = sst [smem:[#allocation21_spill]] %s5650_s19  ;;  %8435 = vst [vmem:[#allocation131_spill] sm:$0xff] %v5700_v41  ;;  %8436 = vst [vmem:[#allocation132_spill] sm:$0xff] %v5712_v34  ;;  %v2067_v41 = vstv %s5598_s28  ;;  %v5764_v34 = vmul.f32 %v2031_v6, %v5470_v35  ;;  %s5780_s13 = sld [smem:[#allocation6 + $0x99]]  ;;  %v5788_v44 = vmul.f32 %v2061_v15, %v5468_v39  ;;  %v2197_v50 = vstv %s5670_s7 }
 0x16e   :  { %8437 = vst [vmem:[#allocation133_spill] sm:$0xff] %v5715_v36  ;;  %8438 = vst [vmem:[#allocation134_spill] sm:$0xff] %v5718_v31  ;;  %v2043_v31 = vstv %s5566_s29  ;;  %v2049_v36 = vstv %s5580_s26  ;;  %s5758_s29 = sld [smem:[#allocation6 + $0x2d]]  ;;  %s5800_s28 = sld [smem:[#allocation6 + $0xe1]]  ;;  %v5832_v12 = vmul.f32 %v2061_v15, %v5470_v35  ;;  %v2215_v2 = vstv %s5702_s14 }
 0x16f   :  { %8439 = vst [vmem:[#allocation135_spill] sm:$0xff] %v5728_v16  ;;  %v5761_v16 = vmul.f32 %v2031_v6, %v5468_v39  ;;  %8443 = vst [vmem:[#allocation139_spill] sm:$0xff] %v5764_v34  ;;  %s5769_s26 = sld [smem:[#allocation6 + $0x75]]  ;;  %v5775_v38 = vmul.f32 %v2043_v31, %v5468_v39  ;;  %v5778_v62 = vmul.f32 %v2049_v36, %v5468_v39  ;;  %s5836_s0 = sld [smem:[#allocation6 + $0x1c]] }
 0x170   :  { %2134 = vrot.lane.b32.xlu1 %v4921_v19, %s8337_s5  ;;  %2132 = vrot.lane.b32.xlu0 %v4941_v13, %s8337_s5  ;;  %8446 = vst [vmem:[#allocation142_spill] sm:$0xff] %v5772_v54  ;;  %8450 = sst [smem:[#allocation146_spill]] %s5782_s9  ;;  %v5785_v6 = vmul.f32 %v2055_v5, %v5468_v39  ;;  %8452 = vst [vmem:[#allocation148_spill] sm:$0xff] %v5788_v44  ;;  %v5791_v34 = vmul.f32 %v2067_v41, %v5468_v39  ;;  %v5796_v54 = vld [vmem:[#allocation2 + $0x6f] sm:$0xff]  ;;  %v2191_v44 = vstv %s5640_s17  ;;  %s5824_s17 = sld [smem:[#allocation6 + $0x43]] }
 0x171   :  { %8440 = sst [smem:[#allocation136_spill]] %s5756_s20  ;;  %8442 = vst [vmem:[#allocation138_spill] sm:$0xff] %v5761_v16  ;;  %8447 = vst [vmem:[#allocation143_spill] sm:$0xff] %v5775_v38  ;;  %v5794_v38 = vmul.f32 %v2073_v24, %v5468_v39  ;;  %v5803_v16 = vmul.f32 %v2037_v11, %v5470_v35  ;;  %s5808_s19 = sld [smem:[#allocation6 + $0x115]]  ;;  %v5815_v39 = vmul.f32 %v2043_v31, %v5470_v35  ;;  %v2221_v31 = vstv %s5704_s1 }
 0x172   :  { %8444 = sst [smem:[#allocation140_spill]] %s5767_s30  ;;  %8448 = vst [vmem:[#allocation144_spill] sm:$0xff] %v5778_v62  ;;  %8451 = vst [vmem:[#allocation147_spill] sm:$0xff] %v5785_v6  ;;  %v5798_v62 = vld [vmem:[#allocation2 + $0x67] sm:$0xff]  ;;  %v2185_v6 = vstv %s5638_s16  ;;  %v5818_v11 = vmul.f32 %v2049_v36, %v5470_v35  ;;  %s5822_s16 = sld [smem:[#allocation6 + $0x1f]]  ;;  %v5839_v36 = vmul.f32 %v2067_v41, %v5470_v35  ;;  %v5853_v15 = vmul.f32 %v2191_v44, %v4921_v19 }
 0x173   :  { %8449 = sst [smem:[#allocation145_spill]] %s5780_s13  ;;  %8453 = vst [vmem:[#allocation149_spill] sm:$0xff] %v5791_v34  ;;  %8454 = vst [vmem:[#allocation150_spill] sm:$0xff] %v5794_v38  ;;  %v2209_v38 = vstv %s5684_s12  ;;  %s5826_s7 = sld [smem:[#allocation6 + $0x105]]  ;;  %v5829_v34 = vmul.f32 %v2055_v5, %v5470_v35  ;;  %v2227_v5 = vstv %s5720_s6 }
 0x174   :  { %2234 = vrot.lane.b32.xlu1 %v4921_v19, %s8332_s25  ;;  %2232 = vrot.lane.b32.xlu0 %v4941_v13, %s8332_s25  ;;  %8441 = sst [smem:[#allocation137_spill]] %s5758_s29  ;;  %8456 = vst [vmem:[#allocation152_spill] sm:$0xff] %v5803_v16  ;;  %8457 = vst [vmem:[#allocation153_spill] sm:$0xff] %v5815_v39  ;;  %v2203_v16 = vstv %s5682_s4  ;;  %v5845_v39 = vmul.f32 %v2185_v6, %v4921_v19  ;;  %s5848_s4 = sld [smem:[#allocation6 + $0x22]] }
 0x175   :  { %8445 = sst [smem:[#allocation141_spill]] %s5769_s26  ;;  %8458 = vst [vmem:[#allocation154_spill] sm:$0xff] %v5818_v11  ;;  %8460 = vst [vmem:[#allocation156_spill] sm:$0xff] %v5829_v34  ;;  %v5842_v11 = vmul.f32 %v2073_v24, %v5470_v35  ;;  %s5850_s12 = sld [smem:[#allocation6 + $0x40]]  ;;  %v5859_v41 = vmul.f32 %v2203_v16, %v4921_v19  ;;  %v5862_v35 = vmul.f32 %v2209_v38, %v4921_v19 }
 0x176   :  { %8455 = sst [smem:[#allocation151_spill]] %s5800_s28  ;;  %8461 = vst [vmem:[#allocation157_spill] sm:$0xff] %v5832_v12  ;;  %8462 = vst [vmem:[#allocation158_spill] sm:$0xff] %v5839_v36  ;;  %v5856_v12 = vmul.f32 %v2197_v50, %v4921_v19  ;;  %s5866_s1 = sld [smem:[#allocation6 + $0x67]]  ;;  %v5894_v24 = vmul.f32 %v2185_v6, %v4941_v13  ;;  %v2339_v6 = vstv %s5722_s11 }
 0x177   :  { %8463 = vst [vmem:[#allocation159_spill] sm:$0xff] %v5842_v11  ;;  %8464 = vst [vmem:[#allocation160_spill] sm:$0xff] %v5845_v39  ;;  %s5864_s14 = sld [smem:[#allocation6 + $0x46]]  ;;  %s5874_s6 = sld [smem:[#allocation6 + $0xb]]  ;;  %v5904_v39 = vmul.f32 %v2197_v50, %v4941_v13  ;;  %v2351_v11 = vstv %s5732_s18  ;;  %v5925_v50 = vmul.f32 %v2203_v16, %v4941_v13  ;;  %v5943_v16 = vmul.f32 %v2221_v31, %v4941_v13 }
 0x178   :  { %2288 = vrot.lane.b32.xlu1 %v5686_v33, %s8337_s5  ;;  %2286 = vrot.lane.b32.xlu0 %v5688_v43, %s8337_s5  ;;  %8465 = vst [vmem:[#allocation161_spill] sm:$0xff] %v5853_v15  ;;  %8466 = vst [vmem:[#allocation162_spill] sm:$0xff] %v5856_v12  ;;  %8470 = sst [smem:[#allocation166_spill]] %s5876_s21  ;;  %s5886_s27 = sld [smem:[#allocation6 + $0x53]]  ;;  %v5891_v12 = vmul.f32 %v2227_v5, %v4921_v19  ;;  %v2363_v15 = vstv %s5740_s10 }
 0x179   :  { %8459 = sst [smem:[#allocation155_spill]] %s5826_s7  ;;  %8467 = vst [vmem:[#allocation163_spill] sm:$0xff] %v5859_v41  ;;  %8468 = vst [vmem:[#allocation164_spill] sm:$0xff] %v5862_v35  ;;  %v5879_v35 = vmul.f32 %v2215_v2, %v4921_v19  ;;  %v5882_v41 = vmul.f32 %v2221_v31, %v4921_v19  ;;  %s5898_s29 = sld [smem:[#allocation6 + $0x9b]]  ;;  %v2357_v19 = vstv %s5738_s8 }
 0x17a   :  { %s5888_s20 = sld [smem:[#allocation6 + $0x77]]  ;;  %8475 = vst [vmem:[#allocation171_spill] sm:$0xff] %v5891_v12  ;;  %8476 = vst [vmem:[#allocation172_spill] sm:$0xff] %v5894_v24  ;;  %s5906_s26 = sld [smem:[#allocation6 + $0x64]]  ;;  %v2369_v24 = vstv %s5746_s2  ;;  %v2375_v12 = vstv %s5748_s23  ;;  %v5963_v31 = vmul.f32 %v2357_v19, %v5686_v33 }
 0x17b   :  { %8471 = vst [vmem:[#allocation167_spill] sm:$0xff] %v5879_v35  ;;  %8472 = vst [vmem:[#allocation168_spill] sm:$0xff] %v5882_v41  ;;  %v5901_v41 = vmul.f32 %v2191_v44, %v4941_v13  ;;  %s5909_s30 = sld [smem:[#allocation6 + $0xbf]]  ;;  %v2345_v35 = vstv %s5730_s24  ;;  %s5914_s9 = sld [smem:[#allocation6 + $0x6a]]  ;;  %v5928_v44 = vmul.f32 %v2209_v38, %v4941_v13  ;;  %v5946_v38 = vmul.f32 %v2227_v5, %v4941_v13 }
 0x17c   :  { %2388 = vrot.lane.b32.xlu1 %v5686_v33, %s8332_s25  ;;  %2386 = vrot.lane.b32.xlu0 %v5688_v43, %s8332_s25  ;;  %8479 = vst [vmem:[#allocation175_spill] sm:$0xff] %v5904_v39  ;;  %s5920_s13 = sld [smem:[#allocation6 + $0xe3]]  ;;  %s5922_s22 = sld [smem:[#allocation6 + $0x107]]  ;;  %8483 = vst [vmem:[#allocation179_spill] sm:$0xff] %v5925_v50  ;;  %v2381_v39 = vstv %s5808_s19  ;;  %v6018_v5 = vmul.f32 %v2357_v19, %v5688_v43  ;;  %v6037_v19 = vmul.f32 %v2363_v15, %v5688_v43 }
 0x17d   :  { %8469 = sst [smem:[#allocation165_spill]] %s5874_s6  ;;  %8478 = vst [vmem:[#allocation174_spill] sm:$0xff] %v5901_v41  ;;  %8484 = vst [vmem:[#allocation180_spill] sm:$0xff] %v5928_v44  ;;  %v5934_v41 = vmul.f32 %v2215_v2, %v4941_v13  ;;  %s5940_s18 = sld [smem:[#allocation6 + $0x8b]]  ;;  %v5949_v44 = vmul.f32 %v2339_v6, %v5686_v33  ;;  %v5957_v2 = vmul.f32 %v2345_v35, %v5686_v33 }
 0x17e   :  { %8473 = sst [smem:[#allocation169_spill]] %s5886_s27  ;;  %s5938_s24 = sld [smem:[#allocation6 + $0x88]]  ;;  %8486 = vst [vmem:[#allocation182_spill] sm:$0xff] %v5943_v16  ;;  %8487 = vst [vmem:[#allocation183_spill] sm:$0xff] %v5946_v38  ;;  %v5966_v13 = vmul.f32 %v2363_v15, %v5686_v33  ;;  %v6060_v15 = vld [vmem:[#allocation2 + $0x70] sm:$0xff] }
 0x17f   :  { %8477 = sst [smem:[#allocation173_spill]] %s5898_s29  ;;  %8485 = vst [vmem:[#allocation181_spill] sm:$0xff] %v5934_v41  ;;  %8488 = vst [vmem:[#allocation184_spill] sm:$0xff] %v5949_v44  ;;  %s5952_s10 = sld [smem:[#allocation6 + $0x8e]]  ;;  %v5960_v41 = vmul.f32 %v2351_v11, %v5686_v33 }
 0x180   :  { %2442 = vrot.lane.b32.xlu1 %v5796_v54, %s8337_s5  ;;  %2440 = vrot.lane.b32.xlu0 %v5798_v62, %s8337_s5  ;;  %8474 = sst [smem:[#allocation170_spill]] %s5888_s20  ;;  %s5954_s2 = sld [smem:[#allocation6 + $0xaf]]  ;;  %8489 = vst [vmem:[#allocation185_spill] sm:$0xff] %v5957_v2  ;;  %8491 = vst [vmem:[#allocation187_spill] sm:$0xff] %v5963_v31  ;;  %v5979_v2 = vmul.f32 %v2369_v24, %v5686_v33  ;;  %v5982_v31 = vmul.f32 %v2375_v12, %v5686_v33 }
 0x181   :  { %8480 = sst [smem:[#allocation176_spill]] %s5909_s30  ;;  %8490 = vst [vmem:[#allocation186_spill] sm:$0xff] %v5960_v41  ;;  %8492 = vst [vmem:[#allocation188_spill] sm:$0xff] %v5966_v13  ;;  %s5968_s23 = sld [smem:[#allocation6 + $0xac]]  ;;  %v5994_v41 = vmul.f32 %v2339_v6, %v5688_v43  ;;  %v6005_v13 = vmul.f32 %v2351_v11, %v5688_v43  ;;  %v6014_v6 = vld [vmem:[#allocation2 + $0x69] sm:$0xff]  ;;  %v6050_v11 = vmul.f32 %v2381_v39, %v5688_v43 }
 0x182   :  { %8481 = sst [smem:[#allocation177_spill]] %s5920_s13  ;;  %s5970_s8 = sld [smem:[#allocation6 + $0xd3]]  ;;  %8493 = vst [vmem:[#allocation189_spill] sm:$0xff] %v5979_v2  ;;  %8494 = vst [vmem:[#allocation190_spill] sm:$0xff] %v5982_v31  ;;  %v6002_v31 = vmul.f32 %v2345_v35, %v5688_v43  ;;  %v2801_v35 = vstv %s5848_s4 }
 0x183   :  { %8482 = sst [smem:[#allocation178_spill]] %s5922_s22  ;;  %s5984_s11 = sld [smem:[#allocation6 + $0xb2]]  ;;  %8496 = vst [vmem:[#allocation192_spill] sm:$0xff] %v5994_v41  ;;  %8498 = vst [vmem:[#allocation194_spill] sm:$0xff] %v6005_v13  ;;  %v6040_v41 = vmul.f32 %v2369_v24, %v5688_v43 }
 0x184   :  { %2542 = vrot.lane.b32.xlu1 %v5796_v54, %s8332_s25  ;;  %2540 = vrot.lane.b32.xlu0 %v5798_v62, %s8332_s25  ;;  %s5986_s19 = sld [smem:[#allocation6 + $0xd0]]  ;;  %s5996_s21 = sld [smem:[#allocation6 + $0xd6]]  ;;  %8497 = vst [vmem:[#allocation193_spill] sm:$0xff] %v6002_v31  ;;  %8499 = vst [vmem:[#allocation195_spill] sm:$0xff] %v6018_v5  ;;  %v6047_v5 = vmul.f32 %v2375_v12, %v5688_v43  ;;  %v2499_v31 = vstv %s5850_s12  ;;  %v2653_v43 = vstv %s5824_s17 }
 0x185   :  { %s5998_s6 = sld [smem:[#allocation6 + $0xf7]]  ;;  %s6008_s20 = sld [smem:[#allocation6 + $0xf4]]  ;;  %8503 = vst [vmem:[#allocation199_spill] sm:$0xff] %v6037_v19  ;;  %8504 = vst [vmem:[#allocation200_spill] sm:$0xff] %v6040_v41  ;;  %v2665_v41 = vstv %s5940_s18 }
 0x186   :  { %s6010_s27 = sld [smem:[#allocation6 + $0xfa]]  ;;  %s6022_s29 = sld [smem:[#allocation6 + $0x118]]  ;;  %8507 = vst [vmem:[#allocation203_spill] sm:$0xff] %v6047_v5  ;;  %8508 = vst [vmem:[#allocation204_spill] sm:$0xff] %v6050_v11  ;;  %v6077_v11 = vld [vmem:[#allocation2 + $0x68] sm:$0xff]  ;;  %v2671_v19 = vstv %s5954_s2 }
 0x187   :  { %s6024_s7 = sld [smem:[#allocation6 + $0x11b]]  ;;  %s6034_s30 = sld [smem:[#allocation6 + $0x30]] }
 0x188   :  { %2596 = vrot.lane.b32.xlu1 %v4925_v45, %s8337_s5  ;;  %2594 = vrot.lane.b32.xlu0 %v4945_v61, %s8337_s5  ;;  %s6044_s4 = sld [smem:[#allocation6 + $0x78]]  ;;  %s6070_s22 = sld [smem:[#allocation6 + $0xe4]] }
 0x189   :  { %s6058_s13 = sld [smem:[#allocation6 + $0xc0]]  ;;  %s6090_s17 = sld [smem:[#allocation6 + $0xe]] }
 0x18a   :  { %s6072_s28 = sld [smem:[#allocation6 + $0x108]]  ;;  %s6092_s12 = sld [smem:[#allocation6 + $0x32]] }
 0x18b   :  { %s6132_s3 = sld [smem:[#allocation6 + $0x10a]]  ;;  %s6148_s18 = sld [smem:[#allocation6 + $0x33]] }
 0x18c   :  { %2696 = vrot.lane.b32.xlu1 %v4925_v45, %s8332_s25  ;;  %2694 = vrot.lane.b32.xlu0 %v4945_v61, %s8332_s25  ;;  %v5991_v61 = vmul.f32 %v2381_v39, %v5686_v33  ;;  %v2493_v45 = vstv %s5836_s0  ;;  %v6012_v33 = vld [vmem:[#allocation2 + $0x71] sm:$0xff]  ;;  %s6032_s0 = sld [smem:[#allocation6 + $0xc]]  ;;  %v2807_v39 = vstv %s5864_s14  ;;  %s6104_s14 = sld [smem:[#allocation6 + $0x7a]] }
 0x18d   :  { %8500 = sst [smem:[#allocation196_spill]] %s6024_s7  ;;  %v6053_v13 = vmul.f32 %v2493_v45, %v5796_v54  ;;  %v6066_v12 = vmul.f32 %v2801_v35, %v6012_v33  ;;  %s6156_s15 = sld [smem:[#allocation6 + $0x57]] }
 0x18e   :  { %8495 = vst [vmem:[#allocation191_spill] sm:$0xff] %v5991_v61  ;;  %v2647_v61 = vstv %s5822_s16  ;;  %8502 = sst [smem:[#allocation198_spill]] %s6034_s30  ;;  %s6042_s16 = sld [smem:[#allocation6 + $0x54]] }
 0x18f   :  { %8506 = sst [smem:[#allocation202_spill]] %s6044_s4  ;;  %8509 = vst [vmem:[#allocation205_spill] sm:$0xff] %v6053_v13  ;;  %v6063_v24 = vmul.f32 %v6060_v15, %v2647_v61  ;;  %8513 = vst [vmem:[#allocation209_spill] sm:$0xff] %v6066_v12  ;;  %v6075_v13 = vmul.f32 %v2493_v45, %v5798_v62  ;;  %v6080_v5 = vmul.f32 %v6077_v11, %v2647_v61  ;;  %v2505_v12 = vstv %s5906_s26  ;;  %s6102_s26 = sld [smem:[#allocation6 + $0x56]] }
 0x190   :  { %2750 = vrot.lane.b32.xlu1 %v6012_v33, %s8337_s5  ;;  %2748 = vrot.lane.b32.xlu0 %v6014_v6, %s8337_s5  ;;  %s6056_s5 = sld [smem:[#allocation6 + $0x9c]]  ;;  %8511 = sst [smem:[#allocation207_spill]] %s6058_s13  ;;  %v6095_v45 = vmul.f32 %v2499_v31, %v5796_v54  ;;  %v6098_v61 = vmul.f32 %v2499_v31, %v5798_v62  ;;  %v6116_v31 = vmul.f32 %v2807_v39, %v6014_v6 }
 0x191   :  { %8512 = vst [vmem:[#allocation208_spill] sm:$0xff] %v6063_v24  ;;  %8514 = sst [smem:[#allocation210_spill]] %s6070_s22  ;;  %8516 = vst [vmem:[#allocation212_spill] sm:$0xff] %v6075_v13  ;;  %v6083_v24 = vmul.f32 %v2801_v35, %v6014_v6  ;;  %v2659_v35 = vstv %s5866_s1  ;;  %v6110_v13 = vmul.f32 %v2807_v39, %v6012_v33  ;;  %s6120_s1 = sld [smem:[#allocation6 + $0xc2]] }
 0x192   :  { %8501 = sst [smem:[#allocation197_spill]] %s6032_s0  ;;  %8517 = vst [vmem:[#allocation213_spill] sm:$0xff] %v6080_v5  ;;  %8520 = vst [vmem:[#allocation216_spill] sm:$0xff] %v6095_v45  ;;  %v6107_v5 = vmul.f32 %v6060_v15, %v2653_v43  ;;  %v6113_v45 = vmul.f32 %v6077_v11, %v2653_v43  ;;  %v6135_v43 = vmul.f32 %v6060_v15, %v2659_v35  ;;  %s6158_s7 = sld [smem:[#allocation6 + $0x7b]] }
 0x193   :  { %8515 = sst [smem:[#allocation211_spill]] %s6072_s28  ;;  %8518 = vst [vmem:[#allocation214_spill] sm:$0xff] %v6083_v24  ;;  %8521 = vst [vmem:[#allocation217_spill] sm:$0xff] %v6098_v61  ;;  %v2813_v24 = vstv %s5914_s9  ;;  %s6118_s9 = sld [smem:[#allocation6 + $0x9e]]  ;;  %v6123_v61 = vmul.f32 %v2505_v12, %v5796_v54 }
 0x194   :  { %8505 = sst [smem:[#allocation201_spill]] %s6042_s16  ;;  %2850 = vrot.lane.b32.xlu1 %v6012_v33, %s8332_s25  ;;  %2848 = vrot.lane.b32.xlu0 %v6014_v6, %s8332_s25  ;;  %8522 = vst [vmem:[#allocation218_spill] sm:$0xff] %v6107_v5  ;;  %8523 = vst [vmem:[#allocation219_spill] sm:$0xff] %v6110_v13  ;;  %v6126_v5 = vmul.f32 %v2505_v12, %v5798_v62  ;;  %v2511_v13 = vstv %s5938_s24  ;;  %s6130_s25 = sld [smem:[#allocation6 + $0xe6]]  ;;  %v6138_v39 = vmul.f32 %v2813_v24, %v6012_v33 }
 0x195   :  { %8519 = sst [smem:[#allocation215_spill]] %s6090_s17  ;;  %8524 = vst [vmem:[#allocation220_spill] sm:$0xff] %v6113_v45  ;;  %8525 = vst [vmem:[#allocation221_spill] sm:$0xff] %v6116_v31  ;;  %v6141_v31 = vmul.f32 %v6077_v11, %v2659_v35  ;;  %v2819_v45 = vstv %s5952_s10  ;;  %s6146_s24 = sld [smem:[#allocation6 + $0xf]]  ;;  %v6161_v35 = vmul.f32 %v2511_v13, %v5796_v54  ;;  %v6175_v2 = vmul.f32 %v2511_v13, %v5798_v62 }
 0x196   :  { %8510 = sst [smem:[#allocation206_spill]] %s6056_s5  ;;  %8527 = vst [vmem:[#allocation223_spill] sm:$0xff] %v6123_v61  ;;  %8528 = vst [vmem:[#allocation224_spill] sm:$0xff] %v6126_v5  ;;  %v6151_v61 = vmul.f32 %v2813_v24, %v6014_v6  ;;  %v6164_v5 = vmul.f32 %v6060_v15, %v2665_v41  ;;  %s6167_s10 = sld [smem:[#allocation6 + $0x9f]]  ;;  %v6172_v24 = vmul.f32 %v2819_v45, %v6012_v33  ;;  %v2523_v13 = vstv %s5986_s19 }
 0x197   :  { %8526 = sst [smem:[#allocation222_spill]] %s6120_s1  ;;  %8531 = vst [vmem:[#allocation227_spill] sm:$0xff] %v6135_v43  ;;  %8532 = vst [vmem:[#allocation228_spill] sm:$0xff] %v6138_v39  ;;  %v2517_v43 = vstv %s5968_s23  ;;  %s6169_s23 = sld [smem:[#allocation6 + $0xc3]]  ;;  %v6184_v12 = vmul.f32 %v6077_v11, %v2665_v41  ;;  %v2831_v39 = vstv %s5996_s21 }
 0x198   :  { %8530 = sst [smem:[#allocation226_spill]] %s6132_s3  ;;  %8533 = vst [vmem:[#allocation229_spill] sm:$0xff] %v6141_v31  ;;  %8536 = vst [vmem:[#allocation232_spill] sm:$0xff] %v6151_v61  ;;  %s6179_s4 = sld [smem:[#allocation6 + $0xe7]]  ;;  %v2825_v31 = vstv %s5984_s11  ;;  %v2677_v61 = vstv %s5970_s8  ;;  %v6203_v41 = vmul.f32 %v2517_v43, %v5796_v54 }
 0x199   :  { %8535 = sst [smem:[#allocation231_spill]] %s6148_s18  ;;  %8539 = vst [vmem:[#allocation235_spill] sm:$0xff] %v6161_v35  ;;  %8540 = vst [vmem:[#allocation236_spill] sm:$0xff] %v6164_v5  ;;  %s6181_s16 = sld [smem:[#allocation6 + $0x10b]]  ;;  %v6187_v5 = vmul.f32 %v2819_v45, %v6014_v6  ;;  %v6206_v45 = vmul.f32 %v6060_v15, %v2671_v19  ;;  %v6209_v35 = vmul.f32 %v2517_v43, %v5798_v62 }
 0x19a   :  { %8529 = sst [smem:[#allocation225_spill]] %s6130_s25  ;;  %8542 = vst [vmem:[#allocation238_spill] sm:$0xff] %v6172_v24  ;;  %8543 = vst [vmem:[#allocation239_spill] sm:$0xff] %v6175_v2  ;;  %s6192_s5 = sld [smem:[#allocation6 + $0x11]]  ;;  %v6220_v24 = vmul.f32 %v6077_v11, %v2671_v19  ;;  %v6231_v43 = vmul.f32 %v2523_v13, %v5796_v54  ;;  %v6237_v19 = vmul.f32 %v2523_v13, %v5798_v62  ;;  %v2535_v13 = vstv %s6022_s29 }
 0x19b   :  { %8534 = sst [smem:[#allocation230_spill]] %s6146_s24  ;;  %8546 = vst [vmem:[#allocation242_spill] sm:$0xff] %v6184_v12  ;;  %8547 = vst [vmem:[#allocation243_spill] sm:$0xff] %v6187_v5  ;;  %s6198_s2 = sld [smem:[#allocation6 + $0x59]]  ;;  %v6217_v5 = vmul.f32 %v2825_v31, %v6012_v33  ;;  %v6223_v12 = vmul.f32 %v2825_v31, %v6014_v6  ;;  %v6246_v31 = vmul.f32 %v2831_v39, %v6012_v33 }
 0x19c   :  { %8537 = sst [smem:[#allocation233_spill]] %s6156_s15  ;;  %s6194_s30 = sld [smem:[#allocation6 + $0x35]]  ;;  %8550 = vst [vmem:[#allocation246_spill] sm:$0xff] %v6203_v41  ;;  %8551 = vst [vmem:[#allocation247_spill] sm:$0xff] %v6206_v45  ;;  %v2529_v45 = vstv %s6008_s20 }
 0x19d   :  { %8538 = sst [smem:[#allocation234_spill]] %s6158_s7  ;;  %s6200_s13 = sld [smem:[#allocation6 + $0x7d]]  ;;  %8552 = vst [vmem:[#allocation248_spill] sm:$0xff] %v6209_v35  ;;  %8554 = vst [vmem:[#allocation250_spill] sm:$0xff] %v6217_v5  ;;  %v6234_v5 = vmul.f32 %v6060_v15, %v2677_v61  ;;  %v6273_v35 = vmul.f32 %v2529_v45, %v5798_v62 }
 0x19e   :  { %8541 = sst [smem:[#allocation237_spill]] %s6167_s10  ;;  %s6214_s19 = sld [smem:[#allocation6 + $0xc5]]  ;;  %8555 = vst [vmem:[#allocation251_spill] sm:$0xff] %v6220_v24  ;;  %8556 = vst [vmem:[#allocation252_spill] sm:$0xff] %v6223_v12  ;;  %v2683_v24 = vstv %s5998_s6  ;;  %v6249_v12 = vmul.f32 %v6077_v11, %v2677_v61 }
 0x19f   :  { %8544 = sst [smem:[#allocation240_spill]] %s6179_s4  ;;  %s6212_s11 = sld [smem:[#allocation6 + $0xa1]]  ;;  %8558 = vst [vmem:[#allocation254_spill] sm:$0xff] %v6231_v43  ;;  %8559 = vst [vmem:[#allocation255_spill] sm:$0xff] %v6234_v5  ;;  %v6252_v5 = vmul.f32 %v2831_v39, %v6014_v6  ;;  %v6270_v39 = vmul.f32 %v6060_v15, %v2683_v24  ;;  %v6280_v61 = vmul.f32 %v6077_v11, %v2683_v24 }
 0x1a0   :  { %8545 = sst [smem:[#allocation241_spill]] %s6181_s16  ;;  %s6226_s8 = sld [smem:[#allocation6 + $0xe9]]  ;;  %8560 = vst [vmem:[#allocation256_spill] sm:$0xff] %v6237_v19  ;;  %8562 = vst [vmem:[#allocation258_spill] sm:$0xff] %v6246_v31  ;;  %v6261_v19 = vmul.f32 %v2529_v45, %v5796_v54  ;;  %v2837_v31 = vstv %s6010_s27 }
 0x1a1   :  { %8548 = sst [smem:[#allocation244_spill]] %s6198_s2  ;;  %s6228_s28 = sld [smem:[#allocation6 + $0x10d]]  ;;  %8563 = vst [vmem:[#allocation259_spill] sm:$0xff] %v6249_v12  ;;  %8564 = vst [vmem:[#allocation260_spill] sm:$0xff] %v6252_v5  ;;  %v6284_v15 = vmul.f32 %v2837_v31, %v6012_v33  ;;  %v6287_v45 = vmul.f32 %v2837_v31, %v6014_v6  ;;  %v6297_v33 = vmul.f32 %v2535_v13, %v5796_v54 }
 0x1a2   :  { %s6241_s21 = sld [smem:[#allocation6 + $0x12]]  ;;  %s6243_s20 = sld [smem:[#allocation6 + $0x36]]  ;;  %8566 = vst [vmem:[#allocation261_spill] sm:$0xff] %v6261_v19  ;;  %8569 = vst [vmem:[#allocation264_spill] sm:$0xff] %v6270_v39  ;;  %v6300_v6 = vmul.f32 %v2535_v13, %v5798_v62 }
 0x1a3   :  { %8549 = sst [smem:[#allocation245_spill]] %s6200_s13  ;;  %s6256_s6 = sld [smem:[#allocation6 + $0x5a]]  ;;  %8570 = vst [vmem:[#allocation265_spill] sm:$0xff] %v6273_v35  ;;  %8571 = vst [vmem:[#allocation266_spill] sm:$0xff] %v6280_v61 }
 0x1a4   :  { %s6258_s17 = sld [smem:[#allocation6 + $0x7e]]  ;;  %s6265_s0 = sld [smem:[#allocation6 + $0xa2]]  ;;  %8572 = vst [vmem:[#allocation267_spill] sm:$0xff] %v6284_v15  ;;  %8573 = vst [vmem:[#allocation268_spill] sm:$0xff] %v6287_v45 }
 0x1a5   :  { %8553 = sst [smem:[#allocation249_spill]] %s6212_s11  ;;  %s6292_s27 = sld [smem:[#allocation6 + $0xea]]  ;;  %8574 = vst [vmem:[#allocation269_spill] sm:$0xff] %v6297_v33  ;;  %8575 = vst [vmem:[#allocation270_spill] sm:$0xff] %v6300_v6 }
 0x1a6   :  { %8557 = sst [smem:[#allocation253_spill]] %s6226_s8  ;;  %s6294_s29 = sld [smem:[#allocation6 + $0x10e]] }
 0x1a7   :  { %s8577_s22 = sld [smem:[#allocation31_spill]]  ;;  %s8578_s18 = sld [smem:[#allocation32_spill]] }
 0x1a8   :  { %8561 = sst [smem:[#allocation257_spill]] %s6243_s20  ;;  %s6267_s20 = sld [smem:[#allocation6 + $0xc6]] }
 0x1a9   :  { %s8576_s25 = sld [smem:[#allocation257_spill]]  ;;  %s8579_s24 = sld [smem:[#allocation33_spill]] }
 0x1aa   :  { %8567 = sst [smem:[#allocation262_spill]] %s6265_s0  ;;  %s8580_s1 = sld [smem:[#allocation34_spill]]  ;;  %v1057_v12 = vpop.permute.xlu1 %1056 }
 0x1ab   :  { %s8581_s3 = sld [smem:[#allocation35_spill]]  ;;  %s8582_s15 = sld [smem:[#allocation36_spill]] }
 0x1ac   :  { %s8583_s7 = sld [smem:[#allocation37_spill]]  ;;  %s8584_s10 = sld [smem:[#allocation38_spill]] }
 0x1ad   :  { %s8585_s4 = sld [smem:[#allocation23_spill]]  ;;  %s8586_s16 = sld [smem:[#allocation24_spill]]  ;;  %v8589_v13 = vstv %s8577_s22  ;;  %v8591_v15 = vstv %s8578_s18 }
 0x1ae   :  { %8568 = sst [smem:[#allocation263_spill]] %s6267_s20  ;;  %s8587_s2 = sld [smem:[#allocation25_spill]]  ;;  %v1061_v24 = vmul.f32 %v8589_v13, %v1057_v12  ;;  %v1067_v31 = vmul.f32 %v8591_v15, %v1057_v12  ;;  %v1055_v15 = vpop.permute.xlu0 %1054 }
 0x1af   :  { %s8588_s13 = sld [smem:[#allocation26_spill]]  ;;  %s8590_s11 = sld [smem:[#allocation27_spill]]  ;;  %v8593_v5 = vstv %s8579_s24  ;;  %v8609_v2 = vstv %s8579_s24 }
 0x1b0   :  { %s8592_s8 = sld [smem:[#allocation28_spill]]  ;;  %v1073_v11 = vmul.f32 %v8593_v5, %v1057_v12  ;;  %v8594_v19 = vstv %s8580_s1  ;;  %s8598_s20 = sld [smem:[#allocation29_spill]]  ;;  %v1072_v36 = vmul.f32 %v8609_v2, %v1055_v15 }
 0x1b1   :  { %v1079_v6 = vmul.f32 %v8594_v19, %v1057_v12  ;;  %v8595_v61 = vstv %s8581_s3  ;;  %v8596_v54 = vstv %s8582_s15  ;;  %s8600_s0 = sld [smem:[#allocation30_spill]]  ;;  %v8617_v21 = vstv %s8581_s3  ;;  %s8620_s24 = sld [smem:[#allocation40_spill]] }
 0x1b2   :  { %v1085_v43 = vmul.f32 %v8595_v61, %v1057_v12  ;;  %v1091_v45 = vmul.f32 %v8596_v54, %v1057_v12  ;;  %v8597_v33 = vstv %s8583_s7  ;;  %v8599_v39 = vstv %s8584_s10  ;;  %s8630_s3 = sld [smem:[#allocation46_spill]] }
 0x1b3   :  { %v1097_v62 = vmul.f32 %v8597_v33, %v1057_v12  ;;  %v1103_v13 = vmul.f32 %v8599_v39, %v1057_v12  ;;  %v8601_v35 = vstv %s8585_s4  ;;  %v8602_v41 = vstv %s8586_s16 }
 0x1b4   :  { %v1063_v5 = vadd.f32 %v1061_v24, %v8601_v35  ;;  %v1069_v19 = vadd.f32 %v1067_v31, %v8602_v41  ;;  %v8603_v44 = vstv %s8587_s2  ;;  %v8607_v35 = vstv %s8577_s22  ;;  %s8618_s22 = sld [smem:[#allocation39_spill]] }
 0x1b5   :  { %v1075_v54 = vadd.f32 %v1073_v11, %v8603_v44  ;;  %v8604_v38 = vstv %s8588_s13  ;;  %v8605_v16 = vstv %s8590_s11  ;;  %v1060_v24 = vmul.f32 %v8607_v35, %v1055_v15 }
 0x1b6   :  { %v1081_v33 = vadd.f32 %v1079_v6, %v8604_v38  ;;  %v1087_v12 = vadd.f32 %v1085_v43, %v8605_v16  ;;  %v8606_v39 = vstv %s8592_s8  ;;  %v8608_v41 = vstv %s8578_s18  ;;  %s8624_s18 = sld [smem:[#allocation42_spill]] }
 0x1b7   :  { %v1093_v50 = vadd.f32 %v1091_v45, %v8606_v39  ;;  %v1066_v31 = vmul.f32 %v8608_v41, %v1055_v15  ;;  %v8610_v61 = vstv %s8580_s1  ;;  %v8611_v56 = vstv %s8598_s20  ;;  %s8622_s1 = sld [smem:[#allocation41_spill]] }
 0x1b8   :  { %v1078_v34 = vmul.f32 %v8610_v61, %v1055_v15  ;;  %v1099_v44 = vadd.f32 %v1097_v62, %v8611_v56  ;;  %v8612_v11 = vstv %s8600_s0  ;;  %v8613_v38 = vstv %s8583_s7  ;;  %s8626_s7 = sld [smem:[#allocation43_spill]] }
 0x1b9   :  { %v1105_v27 = vadd.f32 %v1103_v13, %v8612_v11  ;;  %v1096_v6 = vmul.f32 %v8613_v38, %v1055_v15  ;;  %v8614_v7 = vstv %s8584_s10  ;;  %v8615_v43 = vstv %s8585_s4  ;;  %s8628_s4 = sld [smem:[#allocation44_spill]]  ;;  %s8648_s10 = sld [smem:[#allocation50_spill]] }
 0x1ba   :  { %v1102_v16 = vmul.f32 %v8614_v7, %v1055_v15  ;;  %v1062_v49 = vadd.f32 %v1060_v24, %v8615_v43  ;;  %v8616_v45 = vstv %s8586_s16  ;;  %v1084_v35 = vmul.f32 %v8617_v21, %v1055_v15  ;;  %s8629_s16 = sld [smem:[#allocation45_spill]] }
 0x1bb   :  { %v1068_v39 = vadd.f32 %v1066_v31, %v8616_v45  ;;  %v8619_v41 = vstv %s8582_s15  ;;  %v8621_v47 = vstv %s8587_s2  ;;  %v8623_v56 = vstv %s8588_s13  ;;  %v1157_v31 = vpop.permute.xlu1 %1156  ;;  %s8644_s15 = sld [smem:[#allocation47_spill]]  ;;  %s8646_s13 = sld [smem:[#allocation48_spill]] }
 0x1bc   :  { %v1090_v2 = vmul.f32 %v8619_v41, %v1055_v15  ;;  %v1074_v61 = vadd.f32 %v1072_v36, %v8621_v47  ;;  %v1080_v62 = vadd.f32 %v1078_v34, %v8623_v56  ;;  %v8625_v13 = vstv %s8598_s20  ;;  %s8650_s2 = sld [smem:[#allocation51_spill]]  ;;  %s8654_s20 = sld [smem:[#allocation54_spill]] }
 0x1bd   :  { %v1098_v11 = vadd.f32 %v1096_v6, %v8625_v13  ;;  %v8627_v7 = vstv %s8600_s0  ;;  %v1111_v21 = vadd.f32 %v5178_v1, %v1063_v5  ;;  %v1117_v15 = vadd.f32 %v5197_v14, %v1069_v19  ;;  %s8647_s0 = sld [smem:[#allocation49_spill]] }
 0x1be   :  { %v1104_v24 = vadd.f32 %v1102_v16, %v8627_v7  ;;  %v1123_v47 = vadd.f32 %v5202_v52, %v1075_v54  ;;  %v1129_v36 = vadd.f32 %v5207_v28, %v1081_v33  ;;  %v1135_v34 = vadd.f32 %v5212_v10, %v1087_v12 }
 0x1bf   :  { %v1141_v38 = vadd.f32 %v5221_v18, %v1093_v50  ;;  %v1147_v6 = vadd.f32 %v5226_v59, %v1099_v44  ;;  %v1153_v16 = vadd.f32 %v5231_v46, %v1105_v27  ;;  %v8631_v43 = vstv %s8618_s22 }
 0x1c0   :  { %v1161_v45 = vmul.f32 %v8631_v43, %v1157_v31  ;;  %v8632_v41 = vstv %s8620_s24  ;;  %v8633_v5 = vstv %s8622_s1  ;;  %v8634_v14 = vstv %s8624_s18 }
 0x1c1   :  { %v1167_v1 = vmul.f32 %v8632_v41, %v1157_v31  ;;  %v1173_v56 = vmul.f32 %v8633_v5, %v1157_v31  ;;  %v1179_v19 = vmul.f32 %v8634_v14, %v1157_v31  ;;  %v8635_v13 = vstv %s8626_s7 }
 0x1c2   :  { %v1185_v52 = vmul.f32 %v8635_v13, %v1157_v31  ;;  %v8636_v54 = vstv %s8628_s4  ;;  %v8637_v33 = vstv %s8629_s16  ;;  %v8638_v12 = vstv %s8630_s3  ;;  %v1155_v13 = vpop.permute.xlu0 %1154  ;;  %s8680_s3 = sld [smem:[#allocation61_spill]] }
 0x1c3   :  { %v1191_v28 = vmul.f32 %v8636_v54, %v1157_v31  ;;  %v1197_v10 = vmul.f32 %v8637_v33, %v1157_v31  ;;  %v1203_v18 = vmul.f32 %v8638_v12, %v1157_v31  ;;  %v8639_v50 = vstv %s8590_s11  ;;  %s8652_s11 = sld [smem:[#allocation52_spill]] }
 0x1c4   :  { %v1086_v59 = vadd.f32 %v1084_v35, %v8639_v50  ;;  %v8640_v44 = vstv %s8592_s8  ;;  %v1163_v27 = vadd.f32 %v1161_v45, %v1111_v21  ;;  %v1169_v7 = vadd.f32 %v1167_v1, %v1117_v15  ;;  %s8653_s8 = sld [smem:[#allocation53_spill]] }
 0x1c5   :  { %v1092_v46 = vadd.f32 %v1090_v2, %v8640_v44  ;;  %v1175_v43 = vadd.f32 %v1173_v56, %v1123_v47  ;;  %v1181_v41 = vadd.f32 %v1179_v19, %v1129_v36  ;;  %v1199_v5 = vadd.f32 %v1197_v10, %v1147_v6 }
 0x1c6   :  { %v1205_v14 = vadd.f32 %v1203_v18, %v1153_v16  ;;  %v1187_v54 = vadd.f32 %v1185_v52, %v1135_v34  ;;  %v1193_v33 = vadd.f32 %v1191_v28, %v1141_v38  ;;  %v1110_v31 = vadd.f32 %v5236_v48, %v1062_v49 }
 0x1c7   :  { %v1116_v35 = vadd.f32 %v5249_v40, %v1068_v39  ;;  %v1122_v2 = vadd.f32 %v5254_v57, %v1074_v61  ;;  %v1128_v21 = vadd.f32 %v5259_v3, %v1080_v62  ;;  %v1146_v15 = vadd.f32 %v5279_v63, %v1098_v11  ;;  %v1211_v61 = vpop.permute.xlu1 %1210 }
 0x1c8   :  { %v1152_v47 = vadd.f32 %v5289_v8, %v1104_v24  ;;  %v8641_v36 = vstv %s8618_s22  ;;  %v8642_v16 = vstv %s8620_s24  ;;  %v8643_v34 = vstv %s8622_s1  ;;  %s8672_s22 = sld [smem:[#allocation55_spill]]  ;;  %s8674_s24 = sld [smem:[#allocation56_spill]] }
 0x1c9   :  { %v1160_v6 = vmul.f32 %v8641_v36, %v1155_v13  ;;  %v1166_v45 = vmul.f32 %v8642_v16, %v1155_v13  ;;  %v1172_v38 = vmul.f32 %v8643_v34, %v1155_v13  ;;  %v8645_v48 = vstv %s8624_s18  ;;  %v1209_v16 = vpop.permute.xlu0 %1208  ;;  %s8675_s1 = sld [smem:[#allocation57_spill]]  ;;  %s8676_s18 = sld [smem:[#allocation58_spill]] }
 0x1ca   :  { %v1178_v40 = vmul.f32 %v8645_v48, %v1155_v13  ;;  %v1134_v57 = vadd.f32 %v5269_v23, %v1086_v59  ;;  %v1140_v3 = vadd.f32 %v5274_v37, %v1092_v46  ;;  %v8649_v49 = vstv %s8629_s16  ;;  %s8679_s16 = sld [smem:[#allocation60_spill]] }
 0x1cb   :  { %v1196_v63 = vmul.f32 %v8649_v49, %v1155_v13  ;;  %v8651_v8 = vmov %v8638_v12  ;;  %v1162_v62 = vadd.f32 %v1160_v6, %v1110_v31  ;;  %v1168_v11 = vadd.f32 %v1166_v45, %v1116_v35 }
 0x1cc   :  { %v1202_v39 = vmul.f32 %v8651_v8, %v1155_v13  ;;  %v8655_v24 = vstv %s8626_s7  ;;  %v8656_v56 = vstv %s8628_s4  ;;  %v1174_v52 = vadd.f32 %v1172_v38, %v1122_v2  ;;  %s8677_s7 = sld [smem:[#allocation59_spill]]  ;;  %s8678_s4 = sld [smem:[#allocation62_spill]] }
 0x1cd   :  { %v1184_v1 = vmul.f32 %v8655_v24, %v1155_v13  ;;  %v1190_v19 = vmul.f32 %v8656_v56, %v1155_v13  ;;  %v1180_v23 = vadd.f32 %v1178_v40, %v1128_v21  ;;  %v1198_v28 = vadd.f32 %v1196_v63, %v1146_v15 }
 0x1ce   :  { %v1204_v10 = vadd.f32 %v1202_v39, %v1152_v47  ;;  %v8657_v37 = vstv %s8644_s15  ;;  %v8658_v18 = vstv %s8646_s13  ;;  %v8659_v59 = vstv %s8647_s0  ;;  %s8692_s15 = sld [smem:[#allocation63_spill]]  ;;  %s8694_s13 = sld [smem:[#allocation64_spill]] }
 0x1cf   :  { %v1215_v12 = vmul.f32 %v8657_v37, %v1211_v61  ;;  %v1221_v50 = vmul.f32 %v8658_v18, %v1211_v61  ;;  %v1227_v44 = vmul.f32 %v8659_v59, %v1211_v61  ;;  %v8660_v46 = vstv %s8648_s10  ;;  %s8695_s0 = sld [smem:[#allocation65_spill]]  ;;  %s8696_s10 = sld [smem:[#allocation66_spill]] }
 0x1d0   :  { %v1233_v36 = vmul.f32 %v8660_v46, %v1211_v61  ;;  %v8661_v31 = vstv %s8650_s2  ;;  %v8662_v6 = vstv %s8652_s11  ;;  %v8663_v2 = vstv %s8653_s8  ;;  %s8701_s8 = sld [smem:[#allocation69_spill]] }
 0x1d1   :  { %v1239_v35 = vmul.f32 %v8661_v31, %v1211_v61  ;;  %v1245_v13 = vmul.f32 %v8662_v6, %v1211_v61  ;;  %v1251_v21 = vmul.f32 %v8663_v2, %v1211_v61  ;;  %v8664_v15 = vstv %s8654_s20  ;;  %s8702_s20 = sld [smem:[#allocation70_spill]] }
 0x1d2   :  { %v1257_v47 = vmul.f32 %v8664_v15, %v1211_v61  ;;  %v1186_v45 = vadd.f32 %v1184_v1, %v1134_v57  ;;  %v1192_v34 = vadd.f32 %v1190_v19, %v1140_v3  ;;  %v1217_v38 = vadd.f32 %v1215_v12, %v1163_v27 }
 0x1d3   :  { %v1223_v48 = vadd.f32 %v1221_v50, %v1169_v7  ;;  %v1229_v40 = vadd.f32 %v1227_v44, %v1175_v43  ;;  %v1235_v49 = vadd.f32 %v1233_v36, %v1181_v41  ;;  %v1241_v63 = vadd.f32 %v1239_v35, %v1187_v54 }
 0x1d4   :  { %v1259_v8 = vadd.f32 %v1257_v47, %v1205_v14  ;;  %v8665_v39 = vmov %v8657_v37  ;;  %v8666_v56 = vmov %v8658_v18  ;;  %v8667_v18 = vmov %v8659_v59 }
 0x1d5   :  { %v1214_v24 = vmul.f32 %v8665_v39, %v1209_v16  ;;  %v1220_v37 = vmul.f32 %v8666_v56, %v1209_v16  ;;  %v1226_v59 = vmul.f32 %v8667_v18, %v1209_v16  ;;  %v8668_v61 = vmov %v8660_v46 }
 0x1d6   :  { %v1232_v46 = vmul.f32 %v8668_v61, %v1209_v16  ;;  %v1247_v31 = vadd.f32 %v1245_v13, %v1193_v33  ;;  %v1253_v6 = vadd.f32 %v1251_v21, %v1199_v5  ;;  %v8669_v57 = vmov %v8663_v2  ;;  %v1311_v5 = vpop.permute.xlu1 %1310 }
 0x1d7   :  { %v1250_v3 = vmul.f32 %v8669_v57, %v1209_v16  ;;  %v8670_v27 = vmov %v8664_v15  ;;  %v1216_v7 = vadd.f32 %v1214_v24, %v1162_v62  ;;  %v1222_v19 = vadd.f32 %v1220_v37, %v1168_v11 }
 0x1d8   :  { %v1256_v1 = vmul.f32 %v8670_v27, %v1209_v16  ;;  %v8671_v43 = vstv %s8650_s2  ;;  %v8673_v14 = vstv %s8652_s11  ;;  %v1228_v12 = vadd.f32 %v1226_v59, %v1174_v52  ;;  %s8698_s2 = sld [smem:[#allocation67_spill]]  ;;  %s8700_s11 = sld [smem:[#allocation68_spill]] }
 0x1d9   :  { %v1238_v41 = vmul.f32 %v8671_v43, %v1209_v16  ;;  %v1244_v54 = vmul.f32 %v8673_v14, %v1209_v16  ;;  %v1234_v50 = vadd.f32 %v1232_v46, %v1180_v23  ;;  %v1252_v44 = vadd.f32 %v1250_v3, %v1198_v28 }
 0x1da   :  { %v1258_v36 = vadd.f32 %v1256_v1, %v1204_v10  ;;  %v1265_v33 = vadd.f32 %v5108_v4, %v1217_v38  ;;  %v1271_v62 = vadd.f32 %v5111_v20, %v1223_v48  ;;  %v1277_v11 = vadd.f32 %v5116_v42, %v1229_v40 }
 0x1db   :  { %v1283_v35 = vadd.f32 %v5127_v58, %v1235_v49  ;;  %v1289_v13 = vadd.f32 %v5132_v25, %v1241_v63  ;;  %v1295_v52 = vadd.f32 %v5142_v51, %v1247_v31  ;;  %v1301_v23 = vadd.f32 %v5147_v29, %v1253_v6 }
 0x1dc   :  { %v1307_v28 = vadd.f32 %v5152_v60, %v1259_v8  ;;  %v8681_v10 = vstv %s8672_s22  ;;  %v8682_v21 = vstv %s8674_s24  ;;  %v8683_v15 = vstv %s8675_s1  ;;  %s8720_s22 = sld [smem:[#allocation71_spill]]  ;;  %s8722_s24 = sld [smem:[#allocation16_spill]] }
 0x1dd   :  { %v1315_v2 = vmul.f32 %v8681_v10, %v1311_v5  ;;  %v1321_v4 = vmul.f32 %v8682_v21, %v1311_v5  ;;  %v1327_v20 = vmul.f32 %v8683_v15, %v1311_v5  ;;  %v8684_v47 = vstv %s8676_s18  ;;  %s8723_s1 = sld [smem:[#allocation17_spill]]  ;;  %s8724_s18 = sld [smem:[#allocation18_spill]] }
 0x1de   :  { %v1333_v42 = vmul.f32 %v8684_v47, %v1311_v5  ;;  %v1240_v16 = vadd.f32 %v1238_v41, %v1186_v45  ;;  %v1246_v38 = vadd.f32 %v1244_v54, %v1192_v34  ;;  %v8685_v58 = vstv %s8677_s7  ;;  %v1309_v45 = vpop.permute.xlu0 %1308  ;;  %v1365_v41 = vpop.permute.xlu1 %1364  ;;  %s8725_s7 = sld [smem:[#allocation19_spill]] }
 0x1df   :  { %v1339_v48 = vmul.f32 %v8685_v58, %v1311_v5  ;;  %v8686_v40 = vstv %s8678_s4  ;;  %v1317_v49 = vadd.f32 %v1315_v2, %v1265_v33  ;;  %v1323_v51 = vadd.f32 %v1321_v4, %v1271_v62  ;;  %s8726_s4 = sld [smem:[#allocation22_spill]] }
 0x1e0   :  { %v1357_v25 = vmul.f32 %v8686_v40, %v1311_v5  ;;  %v8687_v63 = vstv %s8679_s16  ;;  %v8688_v60 = vstv %s8680_s3  ;;  %v1329_v39 = vadd.f32 %v1327_v20, %v1277_v11  ;;  %s8730_s16 = sld [smem:[#allocation20_spill]]  ;;  %s8732_s3 = sld [smem:[#allocation21_spill]] }
 0x1e1   :  { %v1345_v29 = vmul.f32 %v8687_v63, %v1311_v5  ;;  %v1351_v8 = vmul.f32 %v8688_v60, %v1311_v5  ;;  %v1335_v24 = vadd.f32 %v1333_v42, %v1283_v35  ;;  %v1341_v56 = vadd.f32 %v1339_v48, %v1289_v13 }
 0x1e2   :  { %v1359_v37 = vadd.f32 %v1357_v25, %v1307_v28  ;;  %v1264_v34 = vadd.f32 %v5165_v30, %v1216_v7  ;;  %v1270_v18 = vadd.f32 %v5168_v55, %v1222_v19  ;;  %v1276_v59 = vadd.f32 %v5185_v32, %v1228_v12  ;;  %v1363_v48 = vpop.permute.xlu0 %1362 }
 0x1e3   :  { %v1282_v61 = vadd.f32 %v5190_v53, %v1234_v50  ;;  %v1288_v46 = vadd.f32 %v5294_v26, %v1240_v16  ;;  %v1294_v31 = vadd.f32 %v5305_v0, %v1246_v38  ;;  %v1300_v6 = vadd.f32 %v5310_v22, %v1252_v44 }
 0x1e4   :  { %v1306_v57 = vadd.f32 %v5327_v17, %v1258_v36  ;;  %v8689_v3 = vmov %v8681_v10  ;;  %v8690_v1 = vmov %v8682_v21  ;;  %v8691_v7 = vmov %v8683_v15 }
 0x1e5   :  { %v1314_v27 = vmul.f32 %v8689_v3, %v1309_v45  ;;  %v1320_v30 = vmul.f32 %v8690_v1, %v1309_v45  ;;  %v1326_v55 = vmul.f32 %v8691_v7, %v1309_v45  ;;  %v8693_v32 = vmov %v8684_v47 }
 0x1e6   :  { %v1332_v53 = vmul.f32 %v8693_v32, %v1309_v45  ;;  %v1347_v19 = vadd.f32 %v1345_v29, %v1295_v52  ;;  %v1353_v26 = vadd.f32 %v1351_v8, %v1301_v23  ;;  %v8697_v43 = vmov %v8688_v60 }
 0x1e7   :  { %v1350_v0 = vmul.f32 %v8697_v43, %v1309_v45  ;;  %v8699_v22 = vmov %v8686_v40  ;;  %v1316_v14 = vadd.f32 %v1314_v27, %v1264_v34  ;;  %v1322_v54 = vadd.f32 %v1320_v30, %v1270_v18 }
 0x1e8   :  { %v1356_v17 = vmul.f32 %v8699_v22, %v1309_v45  ;;  %v8703_v12 = vmov %v8685_v58  ;;  %v8704_v44 = vmov %v8687_v63  ;;  %v1328_v5 = vadd.f32 %v1326_v55, %v1276_v59 }
 0x1e9   :  { %v1338_v50 = vmul.f32 %v8703_v12, %v1309_v45  ;;  %v1344_v36 = vmul.f32 %v8704_v44, %v1309_v45  ;;  %v1334_v33 = vadd.f32 %v1332_v53, %v1282_v61  ;;  %v1352_v62 = vadd.f32 %v1350_v0, %v1300_v6  ;;  %v8729_v12 = vld [vmem:[#allocation74_spill] sm:$0xff]  ;;  %v8731_v44 = vld [vmem:[#allocation75_spill] sm:$0xff] }
 0x1ea   :  { %v1358_v11 = vadd.f32 %v1356_v17, %v1306_v57  ;;  %v8705_v35 = vstv %s8692_s15  ;;  %v8706_v52 = vstv %s8694_s13  ;;  %v8707_v28 = vstv %s8695_s0  ;;  %v8727_v17 = vld [vmem:[#allocation72_spill] sm:$0xff]  ;;  %s8755_s15 = sld [smem:[#allocation136_spill]]  ;;  %s8757_s13 = sld [smem:[#allocation137_spill]] }
 0x1eb   :  { %v1369_v13 = vmul.f32 %v8705_v35, %v1365_v41  ;;  %v1375_v23 = vmul.f32 %v8706_v52, %v1365_v41  ;;  %v1381_v10 = vmul.f32 %v8707_v28, %v1365_v41  ;;  %v8708_v2 = vstv %s8696_s10  ;;  %s8758_s0 = sld [smem:[#allocation140_spill]]  ;;  %s8759_s10 = sld [smem:[#allocation141_spill]] }
 0x1ec   :  { %v1387_v21 = vmul.f32 %v8708_v2, %v1365_v41  ;;  %v8709_v4 = vstv %s8698_s2  ;;  %v8710_v20 = vstv %s8700_s11  ;;  %v8711_v42 = vstv %s8701_s8  ;;  %s8761_s2 = sld [smem:[#allocation145_spill]]  ;;  %s8763_s11 = sld [smem:[#allocation146_spill]] }
 0x1ed   :  { %v1393_v15 = vmul.f32 %v8709_v4, %v1365_v41  ;;  %v1399_v47 = vmul.f32 %v8710_v20, %v1365_v41  ;;  %v1405_v16 = vmul.f32 %v8711_v42, %v1365_v41  ;;  %v8712_v38 = vstv %s8702_s20  ;;  %s8764_s8 = sld [smem:[#allocation151_spill]]  ;;  %s8765_s20 = sld [smem:[#allocation155_spill]] }
 0x1ee   :  { %v1411_v58 = vmul.f32 %v8712_v38, %v1365_v41  ;;  %v1340_v40 = vadd.f32 %v1338_v50, %v1288_v46  ;;  %v1346_v25 = vadd.f32 %v1344_v36, %v1294_v31  ;;  %v1371_v63 = vadd.f32 %v1369_v13, %v1317_v49 }
 0x1ef   :  { %v1377_v29 = vadd.f32 %v1375_v23, %v1323_v51  ;;  %v1383_v60 = vadd.f32 %v1381_v10, %v1329_v39  ;;  %v1389_v8 = vadd.f32 %v1387_v21, %v1335_v24  ;;  %v1395_v45 = vadd.f32 %v1393_v15, %v1341_v56 }
 0x1f0   :  { %v1413_v34 = vadd.f32 %v1411_v58, %v1359_v37  ;;  %v8713_v18 = vmov %v8705_v35  ;;  %v8714_v61 = vmov %v8706_v52  ;;  %v8715_v57 = vmov %v8707_v28 }
 0x1f1   :  { %v1368_v59 = vmul.f32 %v8713_v18, %v1363_v48  ;;  %v1374_v6 = vmul.f32 %v8714_v61, %v1363_v48  ;;  %v1380_v3 = vmul.f32 %v8715_v57, %v1363_v48  ;;  %v8716_v27 = vmov %v8708_v2 }
 0x1f2   :  { %v1386_v1 = vmul.f32 %v8716_v27, %v1363_v48  ;;  %v1401_v30 = vadd.f32 %v1399_v47, %v1347_v19  ;;  %v1407_v7 = vadd.f32 %v1405_v16, %v1353_v26  ;;  %v8717_v46 = vmov %v8709_v4  ;;  %v1465_v19 = vpop.permute.xlu1 %1464 }
 0x1f3   :  { %v1392_v31 = vmul.f32 %v8717_v46, %v1363_v48  ;;  %v8718_v49 = vmov %v8712_v38  ;;  %v1370_v51 = vadd.f32 %v1368_v59, %v1316_v14  ;;  %v1376_v32 = vadd.f32 %v1374_v6, %v1322_v54  ;;  %v8728_v14 = vld [vmem:[#allocation73_spill] sm:$0xff] }
 0x1f4   :  { %v1410_v55 = vmul.f32 %v8718_v49, %v1363_v48  ;;  %v8719_v39 = vmov %v8710_v20  ;;  %v8721_v56 = vmov %v8711_v42  ;;  %v1382_v53 = vadd.f32 %v1380_v3, %v1328_v5  ;;  %v8733_v5 = vld [vmem:[#allocation76_spill] sm:$0xff]  ;;  %v8745_v6 = vld [vmem:[#allocation81_spill] sm:$0xff]  ;;  %v8746_v3 = vld [vmem:[#allocation82_spill] sm:$0xff] }
 0x1f5   :  { %v1398_v24 = vmul.f32 %v8719_v39, %v1363_v48  ;;  %v1404_v37 = vmul.f32 %v8721_v56, %v1363_v48  ;;  %v1388_v43 = vadd.f32 %v1386_v1, %v1334_v33  ;;  %v1394_v0 = vadd.f32 %v1392_v31, %v1340_v40  ;;  %v8734_v33 = vld [vmem:[#allocation78_spill] sm:$0xff]  ;;  %v8747_v1 = vld [vmem:[#allocation83_spill] sm:$0xff]  ;;  %v8749_v31 = vld [vmem:[#allocation85_spill] sm:$0xff] }
 0x1f6   :  { %v1412_v22 = vadd.f32 %v1410_v55, %v1358_v11  ;;  %v1419_v26 = vadd.f32 %v5330_v9, %v1371_v63  ;;  %v1425_v41 = vadd.f32 %v8727_v17, %v1377_v29  ;;  %v1431_v54 = vadd.f32 %v8728_v14, %v1383_v60  ;;  %v8735_v11 = vld [vmem:[#allocation79_spill] sm:$0xff]  ;;  %v8750_v55 = vld [vmem:[#allocation86_spill] sm:$0xff] }
 0x1f7   :  { %v1437_v50 = vadd.f32 %v8729_v12, %v1389_v8  ;;  %v1443_v36 = vadd.f32 %v8731_v44, %v1395_v45  ;;  %v1449_v35 = vadd.f32 %v8733_v5, %v1401_v30  ;;  %v1455_v13 = vadd.f32 %v8734_v33, %v1407_v7  ;;  %v8748_v7 = vld [vmem:[#allocation84_spill] sm:$0xff] }
 0x1f8   :  { %v1461_v52 = vadd.f32 %v8735_v11, %v1413_v34  ;;  %v8736_v23 = vstv %s8720_s22  ;;  %v8737_v10 = vstv %s8722_s24  ;;  %v8738_v2 = vstv %s8723_s1  ;;  %s8783_s22 = sld [smem:[#allocation165_spill]]  ;;  %s8785_s24 = sld [smem:[#allocation166_spill]] }
 0x1f9   :  { %v1469_v28 = vmul.f32 %v8736_v23, %v1465_v19  ;;  %v1475_v9 = vmul.f32 %v8737_v10, %v1465_v19  ;;  %v1481_v21 = vmul.f32 %v8738_v2, %v1465_v19  ;;  %v8739_v4 = vstv %s8724_s18  ;;  %s8786_s1 = sld [smem:[#allocation169_spill]]  ;;  %s8787_s18 = sld [smem:[#allocation170_spill]] }
 0x1fa   :  { %v1487_v15 = vmul.f32 %v8739_v4, %v1465_v19  ;;  %v1400_v20 = vadd.f32 %v1398_v24, %v1346_v25  ;;  %v1406_v47 = vadd.f32 %v1404_v37, %v1352_v62  ;;  %v8740_v42 = vstv %s8725_s7  ;;  %v1463_v62 = vpop.permute.xlu0 %1462  ;;  %v8744_v25 = vld [vmem:[#allocation77_spill] sm:$0xff]  ;;  %v8751_v24 = vld [vmem:[#allocation87_spill] sm:$0xff]  ;;  %s8788_s7 = sld [smem:[#allocation173_spill]] }
 0x1fb   :  { %v1493_v16 = vmul.f32 %v8740_v42, %v1465_v19  ;;  %v8741_v38 = vstv %s8726_s4  ;;  %v1471_v48 = vadd.f32 %v1469_v28, %v1419_v26  ;;  %v1477_v40 = vadd.f32 %v1475_v9, %v1425_v41  ;;  %s8790_s4 = sld [smem:[#allocation178_spill]] }
 0x1fc   :  { %v1511_v58 = vmul.f32 %v8741_v38, %v1465_v19  ;;  %v8742_v63 = vstv %s8730_s16  ;;  %v8743_v60 = vstv %s8732_s3  ;;  %v1483_v45 = vadd.f32 %v1481_v21, %v1431_v54  ;;  %s8794_s16 = sld [smem:[#allocation176_spill]]  ;;  %s8796_s3 = sld [smem:[#allocation177_spill]] }
 0x1fd   :  { %v1499_v29 = vmul.f32 %v8742_v63, %v1465_v19  ;;  %v1505_v8 = vmul.f32 %v8743_v60, %v1465_v19  ;;  %v1489_v34 = vadd.f32 %v1487_v15, %v1437_v50  ;;  %v1495_v18 = vadd.f32 %v1493_v16, %v1443_v36  ;;  %v1519_v50 = vpop.permute.xlu1 %1518 }
 0x1fe   :  { %v1513_v59 = vadd.f32 %v1511_v58, %v1461_v52  ;;  %v1418_v61 = vadd.f32 %v8744_v25, %v1370_v51  ;;  %v1424_v57 = vadd.f32 %v8745_v6, %v1376_v32  ;;  %v1430_v27 = vadd.f32 %v8746_v3, %v1382_v53 }
 0x1ff   :  { %v1436_v30 = vadd.f32 %v8747_v1, %v1388_v43  ;;  %v1442_v46 = vadd.f32 %v8748_v7, %v1394_v0  ;;  %v1448_v49 = vadd.f32 %v8749_v31, %v1400_v20  ;;  %v1454_v39 = vadd.f32 %v8750_v55, %v1406_v47 }
 0x200   :  { %v1460_v56 = vadd.f32 %v8751_v24, %v1412_v22  ;;  %v8752_v37 = vmov %v8736_v23  ;;  %v8753_v26 = vmov %v8737_v10  ;;  %v8754_v17 = vmov %v8738_v2 }
 0x201   :  { %v1468_v19 = vmul.f32 %v8752_v37, %v1463_v62  ;;  %v1474_v51 = vmul.f32 %v8753_v26, %v1463_v62  ;;  %v1480_v32 = vmul.f32 %v8754_v17, %v1463_v62  ;;  %v8756_v53 = vmov %v8739_v4 }
 0x202   :  { %v1486_v43 = vmul.f32 %v8756_v53, %v1463_v62  ;;  %v1501_v41 = vadd.f32 %v1499_v29, %v1449_v35  ;;  %v1507_v0 = vadd.f32 %v1505_v8, %v1455_v13  ;;  %v8760_v14 = vmov %v8740_v42 }
 0x203   :  { %v1492_v54 = vmul.f32 %v8760_v14, %v1463_v62  ;;  %v8762_v12 = vmov %v8741_v38  ;;  %v1470_v44 = vadd.f32 %v1468_v19, %v1418_v61  ;;  %v1476_v36 = vadd.f32 %v1474_v51, %v1424_v57 }
 0x204   :  { %v1510_v22 = vmul.f32 %v8762_v12, %v1463_v62  ;;  %v8766_v5 = vmov %v8742_v63  ;;  %v8767_v11 = vmov %v8743_v60  ;;  %v1482_v23 = vadd.f32 %v1480_v32, %v1430_v27 }
 0x205   :  { %v1498_v33 = vmul.f32 %v8766_v5, %v1463_v62  ;;  %v1504_v52 = vmul.f32 %v8767_v11, %v1463_v62  ;;  %v1488_v28 = vadd.f32 %v1486_v43, %v1436_v30  ;;  %v1494_v35 = vadd.f32 %v1492_v54, %v1442_v46  ;;  %v1517_v62 = vpop.permute.xlu0 %1516  ;;  %v8793_v5 = vld [vmem:[#allocation91_spill] sm:$0xff]  ;;  %v8795_v11 = vld [vmem:[#allocation92_spill] sm:$0xff] }
 0x206   :  { %v1512_v10 = vadd.f32 %v1510_v22, %v1460_v56  ;;  %v8768_v13 = vstv %s8755_s15  ;;  %v8769_v2 = vstv %s8757_s13  ;;  %v8770_v4 = vstv %s8758_s0  ;;  %v8791_v22 = vld [vmem:[#allocation89_spill] sm:$0xff]  ;;  %s8819_s15 = sld [smem:[#allocation197_spill]]  ;;  %s8821_s13 = sld [smem:[#allocation198_spill]] }
 0x207   :  { %v1523_v9 = vmul.f32 %v8768_v13, %v1519_v50  ;;  %v1529_v21 = vmul.f32 %v8769_v2, %v1519_v50  ;;  %v1535_v15 = vmul.f32 %v8770_v4, %v1519_v50  ;;  %v8771_v20 = vstv %s8759_s10  ;;  %s8822_s0 = sld [smem:[#allocation201_spill]]  ;;  %s8823_s10 = sld [smem:[#allocation202_spill]] }
 0x208   :  { %v1541_v47 = vmul.f32 %v8771_v20, %v1519_v50  ;;  %v8772_v42 = vstv %s8761_s2  ;;  %v8773_v38 = vstv %s8763_s11  ;;  %v8774_v63 = vstv %s8764_s8  ;;  %s8825_s2 = sld [smem:[#allocation206_spill]]  ;;  %s8827_s11 = sld [smem:[#allocation207_spill]] }
 0x209   :  { %v1547_v16 = vmul.f32 %v8772_v42, %v1519_v50  ;;  %v1553_v58 = vmul.f32 %v8773_v38, %v1519_v50  ;;  %v1559_v29 = vmul.f32 %v8774_v63, %v1519_v50  ;;  %v8775_v60 = vstv %s8765_s20  ;;  %s8828_s8 = sld [smem:[#allocation210_spill]]  ;;  %s8829_s20 = sld [smem:[#allocation211_spill]] }
 0x20a   :  { %v1565_v8 = vmul.f32 %v8775_v60, %v1519_v50  ;;  %v1500_v25 = vadd.f32 %v1498_v33, %v1448_v49  ;;  %v1506_v61 = vadd.f32 %v1504_v52, %v1454_v39  ;;  %v1525_v6 = vadd.f32 %v1523_v9, %v1471_v48 }
 0x20b   :  { %v1531_v57 = vadd.f32 %v1529_v21, %v1477_v40  ;;  %v1537_v3 = vadd.f32 %v1535_v15, %v1483_v45  ;;  %v1543_v27 = vadd.f32 %v1541_v47, %v1489_v34  ;;  %v1549_v1 = vadd.f32 %v1547_v16, %v1495_v18 }
 0x20c   :  { %v1567_v30 = vadd.f32 %v1565_v8, %v1513_v59  ;;  %v8776_v7 = vmov %v8768_v13  ;;  %v8777_v31 = vmov %v8769_v2  ;;  %v8778_v24 = vmov %v8770_v4 }
 0x20d   :  { %v1522_v46 = vmul.f32 %v8776_v7, %v1517_v62  ;;  %v1528_v55 = vmul.f32 %v8777_v31, %v1517_v62  ;;  %v1534_v56 = vmul.f32 %v8778_v24, %v1517_v62  ;;  %v8779_v37 = vmov %v8771_v20  ;;  %v8809_v24 = vld [vmem:[#allocation94_spill] sm:$0xff] }
 0x20e   :  { %v1540_v19 = vmul.f32 %v8779_v37, %v1517_v62  ;;  %v1555_v26 = vadd.f32 %v1553_v58, %v1501_v41  ;;  %v1561_v51 = vadd.f32 %v1559_v29, %v1507_v0  ;;  %v8780_v49 = vmov %v8772_v42  ;;  %v1619_v41 = vpop.permute.xlu1 %1618  ;;  %v8789_v0 = vld [vmem:[#allocation88_spill] sm:$0xff]  ;;  %v8810_v37 = vld [vmem:[#allocation97_spill] sm:$0xff] }
 0x20f   :  { %v1546_v39 = vmul.f32 %v8780_v49, %v1517_v62  ;;  %v8781_v48 = vmov %v8775_v60  ;;  %v1524_v40 = vadd.f32 %v1522_v46, %v1470_v44  ;;  %v1530_v32 = vadd.f32 %v1528_v55, %v1476_v36  ;;  %v8792_v44 = vld [vmem:[#allocation90_spill] sm:$0xff]  ;;  %v8812_v49 = vld [vmem:[#allocation100_spill] sm:$0xff] }
 0x210   :  { %v1564_v17 = vmul.f32 %v8781_v48, %v1517_v62  ;;  %v8782_v45 = vmov %v8773_v38  ;;  %v8784_v18 = vmov %v8774_v63  ;;  %v1536_v53 = vadd.f32 %v1534_v56, %v1482_v23  ;;  %v8797_v23 = vld [vmem:[#allocation95_spill] sm:$0xff]  ;;  %v8813_v48 = vld [vmem:[#allocation101_spill] sm:$0xff] }
 0x211   :  { %v1552_v34 = vmul.f32 %v8782_v45, %v1517_v62  ;;  %v1558_v59 = vmul.f32 %v8784_v18, %v1517_v62  ;;  %v1542_v43 = vadd.f32 %v1540_v19, %v1488_v28  ;;  %v1548_v14 = vadd.f32 %v1546_v39, %v1494_v35  ;;  %v8798_v28 = vld [vmem:[#allocation96_spill] sm:$0xff]  ;;  %v8814_v45 = vld [vmem:[#allocation102_spill] sm:$0xff]  ;;  %v8815_v18 = vld [vmem:[#allocation103_spill] sm:$0xff] }
 0x212   :  { %v1566_v54 = vadd.f32 %v1564_v17, %v1512_v10  ;;  %v1573_v12 = vadd.f32 %v8789_v0, %v1525_v6  ;;  %v1579_v50 = vadd.f32 %v8791_v22, %v1531_v57  ;;  %v1585_v36 = vadd.f32 %v8792_v44, %v1537_v3  ;;  %v8799_v10 = vld [vmem:[#allocation98_spill] sm:$0xff] }
 0x213   :  { %v1591_v33 = vadd.f32 %v8793_v5, %v1543_v27  ;;  %v1597_v52 = vadd.f32 %v8795_v11, %v1549_v1  ;;  %v1603_v13 = vadd.f32 %v8797_v23, %v1555_v26  ;;  %v1609_v35 = vadd.f32 %v8798_v28, %v1561_v51  ;;  %v8811_v26 = vld [vmem:[#allocation99_spill] sm:$0xff] }
 0x214   :  { %v1615_v9 = vadd.f32 %v8799_v10, %v1567_v30  ;;  %v8800_v2 = vstv %s8783_s22  ;;  %v8801_v4 = vstv %s8785_s24  ;;  %v8802_v20 = vstv %s8786_s1  ;;  %s8847_s22 = sld [smem:[#allocation215_spill]]  ;;  %s8850_s24 = sld [smem:[#allocation226_spill]] }
 0x215   :  { %v1623_v21 = vmul.f32 %v8800_v2, %v1619_v41  ;;  %v1629_v15 = vmul.f32 %v8801_v4, %v1619_v41  ;;  %v1635_v47 = vmul.f32 %v8802_v20, %v1619_v41  ;;  %v8803_v42 = vstv %s8787_s18  ;;  %s8854_s1 = sld [smem:[#allocation222_spill]]  ;;  %s8856_s18 = sld [smem:[#allocation225_spill]] }
 0x216   :  { %v1641_v16 = vmul.f32 %v8803_v42, %v1619_v41  ;;  %v1554_v38 = vadd.f32 %v1552_v34, %v1500_v25  ;;  %v1560_v58 = vadd.f32 %v1558_v59, %v1506_v61  ;;  %v8804_v63 = vstv %s8788_s7  ;;  %v1617_v25 = vpop.permute.xlu0 %1616  ;;  %v8808_v61 = vld [vmem:[#allocation93_spill] sm:$0xff]  ;;  %s8879_s7 = sld [smem:[#allocation230_spill]] }
 0x217   :  { %v1647_v29 = vmul.f32 %v8804_v63, %v1619_v41  ;;  %v8805_v60 = vstv %s8790_s4  ;;  %v1625_v62 = vadd.f32 %v1623_v21, %v1573_v12  ;;  %v1631_v6 = vadd.f32 %v1629_v15, %v1579_v50  ;;  %s8881_s4 = sld [smem:[#allocation231_spill]] }
 0x218   :  { %v1665_v8 = vmul.f32 %v8805_v60, %v1619_v41  ;;  %v8806_v57 = vstv %s8794_s16  ;;  %v8807_v27 = vstv %s8796_s3  ;;  %v1637_v30 = vadd.f32 %v1635_v47, %v1585_v36  ;;  %s8882_s16 = sld [smem:[#allocation233_spill]]  ;;  %s8883_s3 = sld [smem:[#allocation234_spill]] }
 0x219   :  { %v1653_v3 = vmul.f32 %v8806_v57, %v1619_v41  ;;  %v1659_v1 = vmul.f32 %v8807_v27, %v1619_v41  ;;  %v1643_v7 = vadd.f32 %v1641_v16, %v1591_v33  ;;  %v1649_v46 = vadd.f32 %v1647_v29, %v1597_v52  ;;  %v1673_v33 = vpop.permute.xlu1 %1672 }
 0x21a   :  { %v1667_v31 = vadd.f32 %v1665_v8, %v1615_v9  ;;  %v1572_v55 = vadd.f32 %v8808_v61, %v1524_v40  ;;  %v1578_v56 = vadd.f32 %v8809_v24, %v1530_v32  ;;  %v1584_v19 = vadd.f32 %v8810_v37, %v1536_v53 }
 0x21b   :  { %v1590_v51 = vadd.f32 %v8811_v26, %v1542_v43  ;;  %v1596_v39 = vadd.f32 %v8812_v49, %v1548_v14  ;;  %v1602_v17 = vadd.f32 %v8813_v48, %v1554_v38  ;;  %v1608_v34 = vadd.f32 %v8814_v45, %v1560_v58 }
 0x21c   :  { %v1614_v59 = vadd.f32 %v8815_v18, %v1566_v54  ;;  %v8816_v41 = vmov %v8800_v2  ;;  %v8817_v12 = vmov %v8801_v4  ;;  %v8818_v22 = vmov %v8802_v20 }
 0x21d   :  { %v1622_v0 = vmul.f32 %v8816_v41, %v1617_v25  ;;  %v1628_v40 = vmul.f32 %v8817_v12, %v1617_v25  ;;  %v1634_v32 = vmul.f32 %v8818_v22, %v1617_v25  ;;  %v8820_v53 = vmov %v8803_v42 }
 0x21e   :  { %v1640_v43 = vmul.f32 %v8820_v53, %v1617_v25  ;;  %v1655_v50 = vadd.f32 %v1653_v3, %v1603_v13  ;;  %v1661_v14 = vadd.f32 %v1659_v1, %v1609_v35  ;;  %v8824_v44 = vmov %v8804_v63 }
 0x21f   :  { %v1646_v36 = vmul.f32 %v8824_v44, %v1617_v25  ;;  %v8826_v5 = vmov %v8805_v60  ;;  %v1624_v11 = vadd.f32 %v1622_v0, %v1572_v55  ;;  %v1630_v52 = vadd.f32 %v1628_v40, %v1578_v56 }
 0x220   :  { %v1664_v54 = vmul.f32 %v8826_v5, %v1617_v25  ;;  %v8830_v23 = vmov %v8806_v57  ;;  %v8831_v10 = vmov %v8807_v27  ;;  %v1636_v2 = vadd.f32 %v1634_v32, %v1584_v19 }
 0x221   :  { %v1652_v28 = vmul.f32 %v8830_v23, %v1617_v25  ;;  %v1658_v9 = vmul.f32 %v8831_v10, %v1617_v25  ;;  %v1642_v21 = vadd.f32 %v1640_v43, %v1590_v51  ;;  %v1648_v13 = vadd.f32 %v1646_v36, %v1596_v39  ;;  %v1671_v25 = vpop.permute.xlu0 %1670  ;;  %v8853_v23 = vld [vmem:[#allocation107_spill] sm:$0xff]  ;;  %v8855_v10 = vld [vmem:[#allocation108_spill] sm:$0xff] }
 0x222   :  { %v1666_v4 = vadd.f32 %v1664_v54, %v1614_v59  ;;  %v8832_v35 = vstv %s8819_s15  ;;  %v8833_v20 = vstv %s8821_s13  ;;  %v8834_v42 = vstv %s8822_s0  ;;  %v8851_v54 = vld [vmem:[#allocation105_spill] sm:$0xff]  ;;  %s8885_s15 = sld [smem:[#allocation237_spill]]  ;;  %s8887_s13 = sld [smem:[#allocation240_spill]] }
 0x223   :  { %v1677_v15 = vmul.f32 %v8832_v35, %v1673_v33  ;;  %v1683_v47 = vmul.f32 %v8833_v20, %v1673_v33  ;;  %v1689_v16 = vmul.f32 %v8834_v42, %v1673_v33  ;;  %v8835_v38 = vstv %s8823_s10  ;;  %s6836_s0 = sld [smem:[#allocation6 + $0x14]]  ;;  %s6838_s10 = sld [smem:[#allocation6 + $0x38]] }
 0x224   :  { %v1695_v58 = vmul.f32 %v8835_v38, %v1673_v33  ;;  %v8836_v63 = vstv %s8825_s2  ;;  %v8837_v60 = vstv %s8827_s11  ;;  %v8838_v57 = vstv %s8828_s8  ;;  %s6842_s2 = sld [smem:[#allocation6 + $0x80]]  ;;  %s6864_s8 = sld [smem:[#allocation6 + $0xec]] }
 0x225   :  { %v1701_v29 = vmul.f32 %v8836_v63, %v1673_v33  ;;  %v1707_v8 = vmul.f32 %v8837_v60, %v1673_v33  ;;  %v1713_v3 = vmul.f32 %v8838_v57, %v1673_v33  ;;  %v8839_v27 = vstv %s8829_s20  ;;  %s6854_s11 = sld [smem:[#allocation6 + $0xc8]] }
 0x226   :  { %v1719_v1 = vmul.f32 %v8839_v27, %v1673_v33  ;;  %v1654_v61 = vadd.f32 %v1652_v28, %v1602_v17  ;;  %v1660_v55 = vadd.f32 %v1658_v9, %v1608_v34  ;;  %v1679_v24 = vadd.f32 %v1677_v15, %v1625_v62  ;;  %s6866_s20 = sld [smem:[#allocation6 + $0x110]] }
 0x227   :  { %v1685_v56 = vadd.f32 %v1683_v47, %v1631_v6  ;;  %v1691_v37 = vadd.f32 %v1689_v16, %v1637_v30  ;;  %v1697_v19 = vadd.f32 %v1695_v58, %v1643_v7  ;;  %v1703_v26 = vadd.f32 %v1701_v29, %v1649_v46 }
 0x228   :  { %v1721_v51 = vadd.f32 %v1719_v1, %v1667_v31  ;;  %v8840_v49 = vmov %v8832_v35  ;;  %v8841_v48 = vmov %v8833_v20  ;;  %v8842_v18 = vmov %v8834_v42 }
 0x229   :  { %v1676_v39 = vmul.f32 %v8840_v49, %v1671_v25  ;;  %v1682_v45 = vmul.f32 %v8841_v48, %v1671_v25  ;;  %v1688_v59 = vmul.f32 %v8842_v18, %v1671_v25  ;;  %v8843_v41 = vmov %v8835_v38  ;;  %v8869_v18 = vld [vmem:[#allocation113_spill] sm:$0xff] }
 0x22a   :  { %v1694_v0 = vmul.f32 %v8843_v41, %v1671_v25  ;;  %v1709_v12 = vadd.f32 %v1707_v8, %v1655_v50  ;;  %v1715_v40 = vadd.f32 %v1713_v3, %v1661_v14  ;;  %v8844_v17 = vmov %v8836_v63  ;;  %v1773_v50 = vpop.permute.xlu1 %1772  ;;  %v8849_v14 = vld [vmem:[#allocation104_spill] sm:$0xff]  ;;  %v8870_v41 = vld [vmem:[#allocation114_spill] sm:$0xff] }
 0x22b   :  { %v1700_v34 = vmul.f32 %v8844_v17, %v1671_v25  ;;  %v8845_v62 = vmov %v8839_v27  ;;  %v1678_v6 = vadd.f32 %v1676_v39, %v1624_v11  ;;  %v1684_v32 = vadd.f32 %v1682_v45, %v1630_v52  ;;  %v8852_v11 = vld [vmem:[#allocation106_spill] sm:$0xff]  ;;  %v8872_v17 = vld [vmem:[#allocation116_spill] sm:$0xff] }
 0x22c   :  { %v1718_v22 = vmul.f32 %v8845_v62, %v1671_v25  ;;  %v8846_v30 = vmov %v8837_v60  ;;  %v8848_v46 = vmov %v8838_v57  ;;  %v1690_v53 = vadd.f32 %v1688_v59, %v1636_v2  ;;  %v8857_v2 = vld [vmem:[#allocation109_spill] sm:$0xff] }
 0x22d   :  { %v1706_v7 = vmul.f32 %v8846_v30, %v1671_v25  ;;  %v1712_v31 = vmul.f32 %v8848_v46, %v1671_v25  ;;  %v1696_v43 = vadd.f32 %v1694_v0, %v1642_v21  ;;  %v1702_v44 = vadd.f32 %v1700_v34, %v1648_v13  ;;  %v8858_v21 = vld [vmem:[#allocation110_spill] sm:$0xff]  ;;  %v8873_v62 = vld [vmem:[#allocation117_spill] sm:$0xff]  ;;  %v8875_v46 = vld [vmem:[#allocation119_spill] sm:$0xff] }
 0x22e   :  { %v1720_v36 = vadd.f32 %v1718_v22, %v1666_v4  ;;  %v1727_v5 = vadd.f32 %v8849_v14, %v1679_v24  ;;  %v1733_v33 = vadd.f32 %v8851_v54, %v1685_v56  ;;  %v1739_v52 = vadd.f32 %v8852_v11, %v1691_v37  ;;  %v8859_v4 = vld [vmem:[#allocation111_spill] sm:$0xff]  ;;  %v8874_v30 = vld [vmem:[#allocation118_spill] sm:$0xff] }
 0x22f   :  { %v1745_v28 = vadd.f32 %v8853_v23, %v1697_v19  ;;  %v1751_v9 = vadd.f32 %v8855_v10, %v1703_v26  ;;  %v1757_v35 = vadd.f32 %v8857_v2, %v1709_v12  ;;  %v1763_v13 = vadd.f32 %v8858_v21, %v1715_v40  ;;  %v8871_v12 = vld [vmem:[#allocation115_spill] sm:$0xff] }
 0x230   :  { %v1769_v15 = vadd.f32 %v8859_v4, %v1721_v51  ;;  %v8860_v20 = vstv %s8847_s22  ;;  %v8861_v42 = vstv %s6092_s12  ;;  %v8862_v38 = vstv %s6102_s26  ;;  %s8888_s12 = sld [smem:[#allocation241_spill]]  ;;  %s8907_s26 = sld [smem:[#allocation244_spill]] }
 0x231   :  { %v1777_v47 = vmul.f32 %v8860_v20, %v1773_v50  ;;  %v1783_v16 = vmul.f32 %v8861_v42, %v1773_v50  ;;  %v1789_v58 = vmul.f32 %v8862_v38, %v1773_v50  ;;  %v8863_v63 = vstv %s6104_s14  ;;  %s8908_s14 = sld [smem:[#allocation245_spill]] }
 0x232   :  { %v1795_v29 = vmul.f32 %v8863_v63, %v1773_v50  ;;  %v1708_v60 = vadd.f32 %v1706_v7, %v1654_v61  ;;  %v1714_v8 = vadd.f32 %v1712_v31, %v1660_v55  ;;  %v8864_v57 = vstv %s6118_s9  ;;  %v1771_v61 = vpop.permute.xlu0 %1770  ;;  %v8868_v55 = vld [vmem:[#allocation112_spill] sm:$0xff]  ;;  %s8909_s9 = sld [smem:[#allocation249_spill]]  ;;  %s6916_s22 = sld [smem:[#allocation6 + $0xed]] }
 0x233   :  { %v1801_v3 = vmul.f32 %v8864_v57, %v1773_v50  ;;  %v8865_v27 = vstv %s8850_s24  ;;  %v1779_v25 = vadd.f32 %v1777_v47, %v1727_v5  ;;  %v1785_v24 = vadd.f32 %v1783_v16, %v1733_v33  ;;  %s6918_s24 = sld [smem:[#allocation6 + $0x111]] }
 0x234   :  { %v1819_v1 = vmul.f32 %v8865_v27, %v1773_v50  ;;  %v8866_v56 = vstv %s8854_s1  ;;  %v8867_v19 = vstv %s8856_s18  ;;  %v1791_v51 = vadd.f32 %v1789_v58, %v1739_v52  ;;  %s6932_s1 = sld [smem:[#allocation6 + $0x17]]  ;;  %s6934_s18 = sld [smem:[#allocation6 + $0x3b]] }
 0x235   :  { %v1807_v37 = vmul.f32 %v8866_v56, %v1773_v50  ;;  %v1813_v26 = vmul.f32 %v8867_v19, %v1773_v50  ;;  %v1797_v49 = vadd.f32 %v1795_v29, %v1745_v28  ;;  %v1803_v39 = vadd.f32 %v1801_v3, %v1751_v9  ;;  %v1827_v28 = vpop.permute.xlu1 %1826 }
 0x236   :  { %v1821_v48 = vadd.f32 %v1819_v1, %v1769_v15  ;;  %v1726_v45 = vadd.f32 %v8868_v55, %v1678_v6  ;;  %v1732_v59 = vadd.f32 %v8869_v18, %v1684_v32  ;;  %v1738_v0 = vadd.f32 %v8870_v41, %v1690_v53 }
 0x237   :  { %v1744_v40 = vadd.f32 %v8871_v12, %v1696_v43  ;;  %v1750_v34 = vadd.f32 %v8872_v17, %v1702_v44  ;;  %v1756_v22 = vadd.f32 %v8873_v62, %v1708_v60  ;;  %v1762_v7 = vadd.f32 %v8874_v30, %v1714_v8 }
 0x238   :  { %v1768_v31 = vadd.f32 %v8875_v46, %v1720_v36  ;;  %v8876_v50 = vmov %v8860_v20  ;;  %v8877_v5 = vmov %v8861_v42  ;;  %v8878_v54 = vmov %v8862_v38 }
 0x239   :  { %v1776_v14 = vmul.f32 %v8876_v50, %v1771_v61  ;;  %v1782_v6 = vmul.f32 %v8877_v5, %v1771_v61  ;;  %v1788_v32 = vmul.f32 %v8878_v54, %v1771_v61  ;;  %v8880_v53 = vmov %v8863_v63 }
 0x23a   :  { %v1794_v43 = vmul.f32 %v8880_v53, %v1771_v61  ;;  %v1809_v33 = vadd.f32 %v1807_v37, %v1757_v35  ;;  %v1815_v44 = vadd.f32 %v1813_v26, %v1763_v13  ;;  %v8884_v11 = vmov %v8864_v57 }
 0x23b   :  { %v1800_v52 = vmul.f32 %v8884_v11, %v1771_v61  ;;  %v8886_v23 = vmov %v8865_v27  ;;  %v1778_v10 = vadd.f32 %v1776_v14, %v1726_v45  ;;  %v1784_v9 = vadd.f32 %v1782_v6, %v1732_v59 }
 0x23c   :  { %v1818_v36 = vmul.f32 %v8886_v23, %v1771_v61  ;;  %v8889_v2 = vmov %v8866_v56  ;;  %v8890_v4 = vmov %v8867_v19  ;;  %v1790_v20 = vadd.f32 %v1788_v32, %v1738_v0 }
 0x23d   :  { %v1806_v21 = vmul.f32 %v8889_v2, %v1771_v61  ;;  %v1812_v15 = vmul.f32 %v8890_v4, %v1771_v61  ;;  %v1796_v47 = vadd.f32 %v1794_v43, %v1744_v40  ;;  %v1802_v35 = vadd.f32 %v1800_v52, %v1750_v34  ;;  %v1825_v61 = vpop.permute.xlu0 %1824  ;;  %v8913_v2 = vld [vmem:[#allocation123_spill] sm:$0xff]  ;;  %v8915_v4 = vld [vmem:[#allocation124_spill] sm:$0xff] }
 0x23e   :  { %v1820_v42 = vadd.f32 %v1818_v36, %v1768_v31  ;;  %v8891_v13 = vstv %s8879_s7  ;;  %v8892_v38 = vstv %s8881_s4  ;;  %v8893_v63 = vstv %s8882_s16  ;;  %v8911_v36 = vld [vmem:[#allocation121_spill] sm:$0xff]  ;;  %s6940_s7 = sld [smem:[#allocation6 + $0x5f]]  ;;  %s6942_s4 = sld [smem:[#allocation6 + $0x83]] }
 0x23f   :  { %v1831_v16 = vmul.f32 %v8891_v13, %v1827_v28  ;;  %v1837_v58 = vmul.f32 %v8892_v38, %v1827_v28  ;;  %v1843_v29 = vmul.f32 %v8893_v63, %v1827_v28  ;;  %v8894_v60 = vstv %s8883_s3  ;;  %s6944_s16 = sld [smem:[#allocation6 + $0xa7]]  ;;  %s6946_s3 = sld [smem:[#allocation6 + $0xcb]] }
 0x240   :  { %v1849_v8 = vmul.f32 %v8894_v60, %v1827_v28  ;;  %v8895_v57 = vstv %s8885_s15  ;;  %v8896_v27 = vstv %s6169_s23  ;;  %v8897_v56 = vstv %s8887_s13  ;;  %s8914_s23 = sld [smem:[#allocation253_spill]]  ;;  %s6950_s13 = sld [smem:[#allocation6 + $0x113]] }
 0x241   :  { %v1855_v3 = vmul.f32 %v8895_v57, %v1827_v28  ;;  %v1861_v1 = vmul.f32 %v8896_v27, %v1827_v28  ;;  %v1867_v37 = vmul.f32 %v8897_v56, %v1827_v28  ;;  %v8898_v19 = vstv %s8888_s12  ;;  %s6948_s15 = sld [smem:[#allocation6 + $0xef]]  ;;  %s6970_s12 = sld [smem:[#allocation6 + $0x18]] }
 0x242   :  { %v1873_v26 = vmul.f32 %v8898_v19, %v1827_v28  ;;  %v1808_v55 = vadd.f32 %v1806_v21, %v1756_v22  ;;  %v1814_v45 = vadd.f32 %v1812_v15, %v1762_v7  ;;  %v1833_v18 = vadd.f32 %v1831_v16, %v1779_v25  ;;  %v8918_v16 = vld [vmem:[#allocation127_spill] sm:$0xff] }
 0x243   :  { %v1839_v59 = vadd.f32 %v1837_v58, %v1785_v24  ;;  %v1845_v41 = vadd.f32 %v1843_v29, %v1791_v51  ;;  %v1851_v0 = vadd.f32 %v1849_v8, %v1797_v49  ;;  %v1857_v12 = vadd.f32 %v1855_v3, %v1803_v39 }
 0x244   :  { %v1863_v40 = vadd.f32 %v1861_v1, %v1809_v33  ;;  %v8899_v17 = vmov %v8891_v13  ;;  %v8900_v62 = vmov %v8892_v38  ;;  %v8901_v46 = vmov %v8893_v63 }
 0x245   :  { %v1830_v34 = vmul.f32 %v8899_v17, %v1825_v61  ;;  %v1836_v30 = vmul.f32 %v8900_v62, %v1825_v61  ;;  %v1842_v31 = vmul.f32 %v8901_v46, %v1825_v61  ;;  %v8902_v50 = vmov %v8894_v60  ;;  %v8928_v46 = vld [vmem:[#allocation129_spill] sm:$0xff] }
 0x246   :  { %v1848_v14 = vmul.f32 %v8902_v50, %v1825_v61  ;;  %v1869_v5 = vadd.f32 %v1867_v37, %v1815_v44  ;;  %v1875_v6 = vadd.f32 %v1873_v26, %v1821_v48  ;;  %v8903_v22 = vmov %v8895_v57  ;;  %v1927_v48 = vpop.permute.xlu1 %1926  ;;  %v8910_v44 = vld [vmem:[#allocation120_spill] sm:$0xff]  ;;  %v8929_v50 = vld [vmem:[#allocation130_spill] sm:$0xff] }
 0x247   :  { %v1854_v7 = vmul.f32 %v8903_v22, %v1825_v61  ;;  %v8904_v25 = vmov %v8896_v27  ;;  %v1832_v24 = vadd.f32 %v1830_v34, %v1778_v10  ;;  %v1838_v32 = vadd.f32 %v1836_v30, %v1784_v9  ;;  %v8912_v10 = vld [vmem:[#allocation122_spill] sm:$0xff]  ;;  %v8931_v22 = vld [vmem:[#allocation132_spill] sm:$0xff] }
 0x248   :  { %v1860_v54 = vmul.f32 %v8904_v25, %v1825_v61  ;;  %v8905_v51 = vmov %v8897_v56  ;;  %v8906_v39 = vmov %v8898_v19  ;;  %v1844_v43 = vadd.f32 %v1842_v31, %v1790_v20  ;;  %v8916_v20 = vld [vmem:[#allocation125_spill] sm:$0xff] }
 0x249   :  { %v1866_v49 = vmul.f32 %v8905_v51, %v1825_v61  ;;  %v1872_v53 = vmul.f32 %v8906_v39, %v1825_v61  ;;  %v1850_v33 = vadd.f32 %v1848_v14, %v1796_v47  ;;  %v1856_v11 = vadd.f32 %v1854_v7, %v1802_v35  ;;  %v8917_v47 = vld [vmem:[#allocation126_spill] sm:$0xff]  ;;  %v8932_v25 = vld [vmem:[#allocation133_spill] sm:$0xff]  ;;  %v8934_v39 = vld [vmem:[#allocation135_spill] sm:$0xff] }
 0x24a   :  { %v1862_v52 = vadd.f32 %v1860_v54, %v1808_v55  ;;  %v1881_v23 = vadd.f32 %v8910_v44, %v1833_v18  ;;  %v1887_v28 = vadd.f32 %v8911_v36, %v1839_v59  ;;  %v1893_v9 = vadd.f32 %v8912_v10, %v1845_v41  ;;  %v8933_v51 = vld [vmem:[#allocation134_spill] sm:$0xff] }
 0x24b   :  { %v1899_v21 = vadd.f32 %v8913_v2, %v1851_v0  ;;  %v1905_v15 = vadd.f32 %v8915_v4, %v1857_v12  ;;  %v1911_v13 = vadd.f32 %v8916_v20, %v1863_v40  ;;  %v1917_v35 = vadd.f32 %v8917_v47, %v1869_v5  ;;  %v8930_v5 = vld [vmem:[#allocation131_spill] sm:$0xff] }
 0x24c   :  { %v1923_v38 = vadd.f32 %v8918_v16, %v1875_v6  ;;  %v8919_v58 = vstv %s6192_s5  ;;  %v8920_v29 = vstv %s6194_s30  ;;  %v8921_v8 = vstv %s8907_s26  ;;  %s8943_s30 = sld [smem:[#allocation262_spill]]  ;;  %s8944_s5 = sld [smem:[#allocation263_spill]] }
 0x24d   :  { %v1931_v63 = vmul.f32 %v8919_v58, %v1927_v48  ;;  %v1937_v60 = vmul.f32 %v8920_v29, %v1927_v48  ;;  %v1943_v57 = vmul.f32 %v8921_v8, %v1927_v48  ;;  %v8922_v3 = vstv %s8908_s14  ;;  %s6972_s26 = sld [smem:[#allocation6 + $0x3c]]  ;;  %s6974_s14 = sld [smem:[#allocation6 + $0x60]] }
 0x24e   :  { %v1949_v27 = vmul.f32 %v8922_v3, %v1927_v48  ;;  %v1868_v1 = vadd.f32 %v1866_v49, %v1814_v45  ;;  %v1874_v56 = vadd.f32 %v1872_v53, %v1820_v42  ;;  %v8923_v37 = vstv %s8909_s9  ;;  %v1925_v42 = vpop.permute.xlu0 %1924  ;;  %v8927_v45 = vld [vmem:[#allocation128_spill] sm:$0xff]  ;;  %s6976_s9 = sld [smem:[#allocation6 + $0x84]] }
 0x24f   :  { %v1955_v19 = vmul.f32 %v8923_v37, %v1927_v48  ;;  %v8924_v26 = vstv %s6214_s19  ;;  %v1933_v55 = vadd.f32 %v1931_v63, %v1881_v23  ;;  %v1939_v18 = vadd.f32 %v1937_v60, %v1887_v28  ;;  %s6840_s19 = sld [smem:[#allocation6 + $0x5c]] }
 0x250   :  { %v1961_v61 = vmul.f32 %v8924_v26, %v1927_v48  ;;  %v8925_v59 = vstv %s8914_s23  ;;  %v8926_v0 = vstv %s6228_s28  ;;  %v1945_v40 = vadd.f32 %v1943_v57, %v1893_v9  ;;  %s6852_s28 = sld [smem:[#allocation6 + $0xa4]]  ;;  %s6982_s23 = sld [smem:[#allocation6 + $0xa8]] }
 0x251   :  { %v1967_v41 = vmul.f32 %v8925_v59, %v1927_v48  ;;  %v1973_v12 = vmul.f32 %v8926_v0, %v1927_v48  ;;  %v1951_v17 = vadd.f32 %v1949_v27, %v1899_v21  ;;  %v1957_v34 = vadd.f32 %v1955_v19, %v1905_v15  ;;  %v1981_v21 = vpop.permute.xlu1 %1980 }
 0x252   :  { %v1963_v62 = vadd.f32 %v1961_v61, %v1911_v13  ;;  %v1880_v30 = vadd.f32 %v8927_v45, %v1832_v24  ;;  %v1886_v31 = vadd.f32 %v8928_v46, %v1838_v32  ;;  %v1892_v14 = vadd.f32 %v8929_v50, %v1844_v43 }
 0x253   :  { %v1898_v6 = vadd.f32 %v8930_v5, %v1850_v33  ;;  %v1904_v7 = vadd.f32 %v8931_v22, %v1856_v11  ;;  %v1910_v54 = vadd.f32 %v8932_v25, %v1862_v52  ;;  %v1916_v49 = vadd.f32 %v8933_v51, %v1868_v1 }
 0x254   :  { %v1922_v53 = vadd.f32 %v8934_v39, %v1874_v56  ;;  %v8935_v48 = vmov %v8919_v58  ;;  %v8936_v23 = vmov %v8920_v29  ;;  %v8937_v36 = vmov %v8921_v8 }
 0x255   :  { %v1930_v44 = vmul.f32 %v8935_v48, %v1925_v42  ;;  %v1936_v24 = vmul.f32 %v8936_v23, %v1925_v42  ;;  %v1942_v32 = vmul.f32 %v8937_v36, %v1925_v42  ;;  %v8938_v28 = vmov %v8922_v3 }
 0x256   :  { %v1948_v43 = vmul.f32 %v8938_v28, %v1925_v42  ;;  %v1969_v10 = vadd.f32 %v1967_v41, %v1917_v35  ;;  %v1975_v33 = vadd.f32 %v1973_v12, %v1923_v38  ;;  %v8939_v9 = vmov %v8923_v37 }
 0x257   :  { %v1954_v11 = vmul.f32 %v8939_v9, %v1925_v42  ;;  %v8940_v2 = vmov %v8924_v26  ;;  %v1932_v4 = vadd.f32 %v1930_v44, %v1880_v30  ;;  %v1938_v15 = vadd.f32 %v1936_v24, %v1886_v31 }
 0x258   :  { %v1960_v52 = vmul.f32 %v8940_v2, %v1925_v42  ;;  %v8941_v20 = vmov %v8925_v59  ;;  %v8942_v47 = vmov %v8926_v0  ;;  %v1944_v35 = vadd.f32 %v1942_v32, %v1892_v14 }
 0x259   :  { %v1966_v13 = vmul.f32 %v8941_v20, %v1925_v42  ;;  %v1972_v16 = vmul.f32 %v8942_v47, %v1925_v42  ;;  %v1950_v38 = vadd.f32 %v1948_v43, %v1898_v6  ;;  %v1956_v58 = vadd.f32 %v1954_v11, %v1904_v7  ;;  %v1979_v42 = vpop.permute.xlu0 %1978 }
 0x25a   :  { %v1962_v63 = vadd.f32 %v1960_v52, %v1910_v54  ;;  %v8945_v29 = vstv %s6241_s21  ;;  %v8946_v8 = vstv %s8576_s25  ;;  %v8947_v3 = vstv %s6256_s6  ;;  %s6900_s25 = sld [smem:[#allocation6 + $0x15]]  ;;  %s6906_s6 = sld [smem:[#allocation6 + $0x81]] }
 0x25b   :  { %v1985_v60 = vmul.f32 %v8945_v29, %v1981_v21  ;;  %v1991_v57 = vmul.f32 %v8946_v8, %v1981_v21  ;;  %v1997_v27 = vmul.f32 %v8947_v3, %v1981_v21  ;;  %v8948_v1 = vstv %s6258_s17  ;;  %s6902_s17 = sld [smem:[#allocation6 + $0x39]]  ;;  %s6904_s21 = sld [smem:[#allocation6 + $0x5d]] }
 0x25c   :  { %v2003_v56 = vmul.f32 %v8948_v1, %v1981_v21  ;;  %v8949_v37 = vstv %s8943_s30  ;;  %v8950_v26 = vstv %s8944_s5  ;;  %v8951_v59 = vstv %s6292_s27  ;;  %s6912_s27 = sld [smem:[#allocation6 + $0xa5]]  ;;  %s6984_s30 = sld [smem:[#allocation6 + $0xcc]] }
 0x25d   :  { %v2009_v19 = vmul.f32 %v8949_v37, %v1981_v21  ;;  %v2015_v61 = vmul.f32 %v8950_v26, %v1981_v21  ;;  %v2021_v41 = vmul.f32 %v8951_v59, %v1981_v21  ;;  %v8952_v0 = vstv %s6294_s29  ;;  %s6914_s29 = sld [smem:[#allocation6 + $0xc9]]  ;;  %s6986_s5 = sld [smem:[#allocation6 + $0xf0]] }
 0x25e   :  { %v2027_v12 = vmul.f32 %v8952_v0, %v1981_v21  ;;  %v1968_v45 = vadd.f32 %v1966_v13, %v1916_v49  ;;  %v1974_v30 = vadd.f32 %v1972_v16, %v1922_v53  ;;  %v1987_v46 = vadd.f32 %v1985_v60, %v1933_v55  ;;  %v2081_v16 = vpop.permute.xlu1 %2080 }
 0x25f   :  { %v1993_v31 = vadd.f32 %v1991_v57, %v1939_v18  ;;  %v1999_v50 = vadd.f32 %v1997_v27, %v1945_v40  ;;  %v2005_v14 = vadd.f32 %v2003_v56, %v1951_v17  ;;  %v2011_v5 = vadd.f32 %v2009_v19, %v1957_v34 }
 0x260   :  { %v2017_v6 = vadd.f32 %v2015_v61, %v1963_v62  ;;  %v8953_v22 = vmov %v8945_v29  ;;  %v8954_v25 = vmov %v8946_v8  ;;  %v8955_v51 = vmov %v8947_v3  ;;  %v8961_v29 = vld [vmem:[#allocation138_spill] sm:$0xff]  ;;  %v8963_v8 = vld [vmem:[#allocation143_spill] sm:$0xff] }
 0x261   :  { %v1984_v7 = vmul.f32 %v8953_v22, %v1979_v42  ;;  %v1990_v54 = vmul.f32 %v8954_v25, %v1979_v42  ;;  %v1996_v39 = vmul.f32 %v8955_v51, %v1979_v42  ;;  %v8956_v48 = vmov %v8948_v1  ;;  %v8964_v3 = vld [vmem:[#allocation144_spill] sm:$0xff]  ;;  %v8967_v1 = vld [vmem:[#allocation149_spill] sm:$0xff]  ;;  %v8969_v25 = vld [vmem:[#allocation139_spill] sm:$0xff] }
 0x262   :  { %v2002_v49 = vmul.f32 %v8956_v48, %v1979_v42  ;;  %v2023_v55 = vadd.f32 %v2021_v41, %v1969_v10  ;;  %v2029_v18 = vadd.f32 %v2027_v12, %v1975_v33  ;;  %v8957_v53 = vmov %v8949_v37  ;;  %v8968_v37 = vld [vmem:[#allocation150_spill] sm:$0xff]  ;;  %v8970_v51 = vld [vmem:[#allocation152_spill] sm:$0xff]  ;;  %v8971_v48 = vld [vmem:[#allocation153_spill] sm:$0xff] }
 0x263   :  { %v2008_v40 = vmul.f32 %v8957_v53, %v1979_v42  ;;  %v8958_v17 = vmov %v8950_v26  ;;  %v1986_v62 = vadd.f32 %v1984_v7, %v1932_v4  ;;  %v1992_v44 = vadd.f32 %v1990_v54, %v1938_v15  ;;  %v8962_v15 = vld [vmem:[#allocation142_spill] sm:$0xff]  ;;  %v2079_v7 = vpop.permute.xlu0 %2078  ;;  %v8973_v53 = vld [vmem:[#allocation156_spill] sm:$0xff] }
 0x264   :  { %v2014_v34 = vmul.f32 %v8958_v17, %v1979_v42  ;;  %v8959_v23 = vmov %v8951_v59  ;;  %v8960_v36 = vmov %v8952_v0  ;;  %v1998_v28 = vadd.f32 %v1996_v39, %v1944_v35  ;;  %v8974_v17 = vld [vmem:[#allocation157_spill] sm:$0xff] }
 0x265   :  { %v2020_v24 = vmul.f32 %v8959_v23, %v1979_v42  ;;  %v2026_v32 = vmul.f32 %v8960_v36, %v1979_v42  ;;  %v2004_v43 = vadd.f32 %v2002_v49, %v1950_v38  ;;  %v2010_v9 = vadd.f32 %v2008_v40, %v1956_v58  ;;  %v8965_v38 = vld [vmem:[#allocation147_spill] sm:$0xff]  ;;  %v8975_v23 = vld [vmem:[#allocation158_spill] sm:$0xff]  ;;  %v8976_v36 = vld [vmem:[#allocation159_spill] sm:$0xff] }
 0x266   :  { %v2016_v11 = vadd.f32 %v2014_v34, %v1962_v63  ;;  %v2083_v10 = vstv %s6836_s0  ;;  %v2089_v2 = vstv %s6838_s10  ;;  %v2095_v33 = vstv %s6840_s19  ;;  %v8966_v63 = vld [vmem:[#allocation148_spill] sm:$0xff]  ;;  %s6988_s0 = sld [smem:[#allocation6 + $0x114]]  ;;  %s7008_s10 = sld [smem:[#allocation6 + $0x1a]] }
 0x267   :  { %v2101_v52 = vstv %s6842_s2  ;;  %v2107_v21 = vstv %s6852_s28  ;;  %v2113_v20 = vstv %s6854_s11  ;;  %v2119_v13 = vstv %s6864_s8  ;;  %s7010_s19 = sld [smem:[#allocation6 + $0x3e]]  ;;  %s7016_s2 = sld [smem:[#allocation6 + $0x62]] }
 0x268   :  { %v2125_v47 = vstv %s6866_s20  ;;  %v2035_v4 = vadd.f32 %v8961_v29, %v1987_v46  ;;  %v2041_v60 = vadd.f32 %v8962_v15, %v1993_v31  ;;  %v2047_v57 = vadd.f32 %v8963_v8, %v1999_v50  ;;  %s7018_s28 = sld [smem:[#allocation6 + $0x86]]  ;;  %s7020_s11 = sld [smem:[#allocation6 + $0xaa]] }
 0x269   :  { %v2053_v35 = vadd.f32 %v8964_v3, %v2005_v14  ;;  %v2059_v58 = vadd.f32 %v8965_v38, %v2011_v5  ;;  %v2065_v27 = vadd.f32 %v8966_v63, %v2017_v6  ;;  %v2071_v56 = vadd.f32 %v8967_v1, %v2023_v55  ;;  %v8972_v55 = vld [vmem:[#allocation154_spill] sm:$0xff]  ;;  %v2135_v3 = vpop.permute.xlu1 %2134  ;;  %s7022_s8 = sld [smem:[#allocation6 + $0xce]]  ;;  %s7024_s20 = sld [smem:[#allocation6 + $0xf2]] }
 0x26a   :  { %v2077_v19 = vadd.f32 %v8968_v37, %v2029_v18  ;;  %v2085_v26 = vmul.f32 %v2083_v10, %v2081_v16  ;;  %v2091_v61 = vmul.f32 %v2089_v2, %v2081_v16  ;;  %v2097_v59 = vmul.f32 %v2095_v33, %v2081_v16 }
 0x26b   :  { %v2103_v41 = vmul.f32 %v2101_v52, %v2081_v16  ;;  %v2022_v0 = vadd.f32 %v2020_v24, %v1968_v45  ;;  %v2028_v12 = vadd.f32 %v2026_v32, %v1974_v30  ;;  %v2109_v42 = vmul.f32 %v2107_v21, %v2081_v16 }
 0x26c   :  { %v2115_v46 = vmul.f32 %v2113_v20, %v2081_v16  ;;  %v6908_v31 = vadd.f32 %v2085_v26, %v2035_v4  ;;  %v6910_v50 = vadd.f32 %v2091_v61, %v2041_v60  ;;  %v2121_v14 = vmul.f32 %v2119_v13, %v2081_v16 }
 0x26d   :  { %v2127_v5 = vmul.f32 %v2125_v47, %v2081_v16  ;;  %v2099_v6 = vadd.f32 %v2097_v59, %v2047_v57  ;;  %v2105_v22 = vadd.f32 %v2103_v41, %v2053_v35  ;;  %v2111_v45 = vadd.f32 %v2109_v42, %v2059_v58  ;;  %v2133_v59 = vpop.permute.xlu0 %2132 }
 0x26e   :  { %v2117_v30 = vadd.f32 %v2115_v46, %v2065_v27  ;;  %v2034_v54 = vadd.f32 %v8969_v25, %v1986_v62  ;;  %v2040_v39 = vadd.f32 %v8970_v51, %v1992_v44  ;;  %v2046_v49 = vadd.f32 %v8971_v48, %v1998_v28 }
 0x26f   :  { %v2052_v18 = vadd.f32 %v8972_v55, %v2004_v43  ;;  %v2058_v40 = vadd.f32 %v8973_v53, %v2010_v9  ;;  %v2064_v34 = vadd.f32 %v8974_v17, %v2016_v11  ;;  %v2070_v24 = vadd.f32 %v8975_v23, %v2022_v0 }
 0x270   :  { %v2076_v32 = vadd.f32 %v8976_v36, %v2028_v12  ;;  %v2084_v16 = vmul.f32 %v2083_v10, %v2079_v7  ;;  %v2090_v29 = vmul.f32 %v2089_v2, %v2079_v7  ;;  %v2096_v4 = vmul.f32 %v2095_v33, %v2079_v7  ;;  %v2235_v36 = vpop.permute.xlu1 %2234 }
 0x271   :  { %v2102_v62 = vmul.f32 %v2101_v52, %v2079_v7  ;;  %v2123_v44 = vadd.f32 %v2121_v14, %v2071_v56  ;;  %v2129_v28 = vadd.f32 %v2127_v5, %v2077_v19  ;;  %v2108_v15 = vmul.f32 %v2107_v21, %v2079_v7 }
 0x272   :  { %v2114_v43 = vmul.f32 %v2113_v20, %v2079_v7  ;;  %v2086_v9 = vadd.f32 %v2084_v16, %v2034_v54  ;;  %v2092_v11 = vadd.f32 %v2090_v29, %v2040_v39  ;;  %v2120_v60 = vmul.f32 %v2119_v13, %v2079_v7 }
 0x273   :  { %v2126_v8 = vmul.f32 %v2125_v47, %v2079_v7  ;;  %v2098_v10 = vadd.f32 %v2096_v4, %v2046_v49  ;;  %v2104_v2 = vadd.f32 %v2102_v62, %v2052_v18  ;;  %v2110_v57 = vadd.f32 %v2108_v15, %v2058_v40  ;;  %v8977_v62 = vld [vmem:[#allocation160_spill] sm:$0xff] }
 0x274   :  { %v2116_v33 = vadd.f32 %v2114_v43, %v2064_v34  ;;  %v2137_v52 = vstv %s6900_s25  ;;  %v2143_v35 = vstv %s6902_s17  ;;  %v2149_v38 = vstv %s6904_s21  ;;  %v8979_v43 = vld [vmem:[#allocation162_spill] sm:$0xff]  ;;  %s7026_s25 = sld [smem:[#allocation6 + $0x116]]  ;;  %s7060_s17 = sld [smem:[#allocation6 + $0x1b]] }
 0x275   :  { %v2155_v58 = vstv %s6906_s6  ;;  %v2161_v21 = vstv %s6912_s27  ;;  %v2167_v20 = vstv %s6914_s29  ;;  %v2173_v63 = vstv %s6916_s22  ;;  %s7062_s21 = sld [smem:[#allocation6 + $0x3f]]  ;;  %s7066_s6 = sld [smem:[#allocation6 + $0x63]] }
 0x276   :  { %v2179_v27 = vstv %s6918_s24  ;;  %v2139_v13 = vmul.f32 %v2137_v52, %v2135_v3  ;;  %v2145_v47 = vmul.f32 %v2143_v35, %v2135_v3  ;;  %v2151_v1 = vmul.f32 %v2149_v38, %v2135_v3  ;;  %s7068_s27 = sld [smem:[#allocation6 + $0x87]]  ;;  %s7078_s29 = sld [smem:[#allocation6 + $0xab]] }
 0x277   :  { %v2157_v56 = vmul.f32 %v2155_v58, %v2135_v3  ;;  %v2163_v37 = vmul.f32 %v2161_v21, %v2135_v3  ;;  %v2169_v19 = vmul.f32 %v2167_v20, %v2135_v3  ;;  %v2175_v26 = vmul.f32 %v2173_v63, %v2135_v3  ;;  %s7080_s22 = sld [smem:[#allocation6 + $0xcf]]  ;;  %s7090_s24 = sld [smem:[#allocation6 + $0xf3]] }
 0x278   :  { %v2181_v61 = vmul.f32 %v2179_v27, %v2135_v3  ;;  %v2122_v41 = vadd.f32 %v2120_v60, %v2070_v24  ;;  %v2128_v0 = vadd.f32 %v2126_v8, %v2076_v32  ;;  %v2141_v12 = vadd.f32 %v2139_v13, %v6908_v31  ;;  %v8981_v8 = vld [vmem:[#allocation164_spill] sm:$0xff] }
 0x279   :  { %v2147_v42 = vadd.f32 %v2145_v47, %v6910_v50  ;;  %v2153_v46 = vadd.f32 %v2151_v1, %v2099_v6  ;;  %v2159_v14 = vadd.f32 %v2157_v56, %v2105_v22  ;;  %v2165_v5 = vadd.f32 %v2163_v37, %v2111_v45  ;;  %v2233_v1 = vpop.permute.xlu0 %2232 }
 0x27a   :  { %v2171_v7 = vadd.f32 %v2169_v19, %v2117_v30  ;;  %v2138_v25 = vmul.f32 %v2137_v52, %v2133_v59  ;;  %v2144_v54 = vmul.f32 %v2143_v35, %v2133_v59  ;;  %v2150_v51 = vmul.f32 %v2149_v38, %v2133_v59  ;;  %v8984_v52 = vld [vmem:[#allocation171_spill] sm:$0xff] }
 0x27b   :  { %v2156_v39 = vmul.f32 %v2155_v58, %v2133_v59  ;;  %v2177_v48 = vadd.f32 %v2175_v26, %v2123_v44  ;;  %v2183_v49 = vadd.f32 %v2181_v61, %v2129_v28  ;;  %v2162_v55 = vmul.f32 %v2161_v21, %v2133_v59  ;;  %v8978_v28 = vld [vmem:[#allocation161_spill] sm:$0xff]  ;;  %v2289_v61 = vpop.permute.xlu1 %2288 }
 0x27c   :  { %v2168_v31 = vmul.f32 %v2167_v20, %v2133_v59  ;;  %v2140_v50 = vadd.f32 %v2138_v25, %v2086_v9  ;;  %v2146_v6 = vadd.f32 %v2144_v54, %v2092_v11  ;;  %v2174_v22 = vmul.f32 %v2173_v63, %v2133_v59  ;;  %v8980_v11 = vld [vmem:[#allocation163_spill] sm:$0xff]  ;;  %v8987_v54 = vld [vmem:[#allocation175_spill] sm:$0xff] }
 0x27d   :  { %v2180_v45 = vmul.f32 %v2179_v27, %v2133_v59  ;;  %v2152_v30 = vadd.f32 %v2150_v51, %v2098_v10  ;;  %v2158_v18 = vadd.f32 %v2156_v39, %v2104_v2  ;;  %v2164_v53 = vadd.f32 %v2162_v55, %v2110_v57  ;;  %v8982_v2 = vld [vmem:[#allocation167_spill] sm:$0xff]  ;;  %v8988_v39 = vld [vmem:[#allocation179_spill] sm:$0xff] }
 0x27e   :  { %v2170_v40 = vadd.f32 %v2168_v31, %v2116_v33  ;;  %v2237_v17 = vstv %s6932_s1  ;;  %v2243_v34 = vstv %s6934_s18  ;;  %v2249_v23 = vstv %s6940_s7  ;;  %v8983_v33 = vld [vmem:[#allocation168_spill] sm:$0xff]  ;;  %v8990_v31 = vld [vmem:[#allocation181_spill] sm:$0xff]  ;;  %s7092_s1 = sld [smem:[#allocation6 + $0x117]]  ;;  %s7116_s18 = sld [smem:[#allocation6 + $0xd1]] }
 0x27f   :  { %v2255_v24 = vstv %s6942_s4  ;;  %v2261_v32 = vstv %s6944_s16  ;;  %v2267_v16 = vstv %s6946_s3  ;;  %v2273_v29 = vstv %s6948_s15  ;;  %s7126_s7 = sld [smem:[#allocation6 + $0xf5]]  ;;  %s7128_s4 = sld [smem:[#allocation6 + $0x119]] }
 0x280   :  { %v2279_v4 = vstv %s6950_s13  ;;  %v2189_v44 = vadd.f32 %v8977_v62, %v2141_v12  ;;  %v2195_v15 = vadd.f32 %v8978_v28, %v2147_v42  ;;  %v2201_v9 = vadd.f32 %v8979_v43, %v2153_v46  ;;  %v8991_v28 = vld [vmem:[#allocation182_spill] sm:$0xff]  ;;  %v8992_v43 = vld [vmem:[#allocation183_spill] sm:$0xff]  ;;  %s7138_s16 = sld [smem:[#allocation6 + $0x1d]]  ;;  %s7140_s3 = sld [smem:[#allocation6 + $0x1e]] }
 0x281   :  { %v2207_v60 = vadd.f32 %v8980_v11, %v2159_v14  ;;  %v2213_v10 = vadd.f32 %v8981_v8, %v2165_v5  ;;  %v2219_v57 = vadd.f32 %v8982_v2, %v2171_v7  ;;  %v2225_v3 = vadd.f32 %v8983_v33, %v2177_v48  ;;  %v8986_v7 = vld [vmem:[#allocation174_spill] sm:$0xff]  ;;  %s7144_s15 = sld [smem:[#allocation6 + $0x20]]  ;;  %s7146_s13 = sld [smem:[#allocation6 + $0x21]] }
 0x282   :  { %v2231_v35 = vadd.f32 %v8984_v52, %v2183_v49  ;;  %v2239_v38 = vmul.f32 %v2237_v17, %v2235_v36  ;;  %v2245_v58 = vmul.f32 %v2243_v34, %v2235_v36  ;;  %v2251_v21 = vmul.f32 %v2249_v23, %v2235_v36  ;;  %v8989_v49 = vld [vmem:[#allocation180_spill] sm:$0xff] }
 0x283   :  { %v2257_v20 = vmul.f32 %v2255_v24, %v2235_v36  ;;  %v2263_v63 = vmul.f32 %v2261_v32, %v2235_v36  ;;  %v2269_v27 = vmul.f32 %v2267_v16, %v2235_v36  ;;  %v2275_v13 = vmul.f32 %v2273_v29, %v2235_v36 }
 0x284   :  { %v2281_v47 = vmul.f32 %v2279_v4, %v2235_v36  ;;  %v2176_v56 = vadd.f32 %v2174_v22, %v2122_v41  ;;  %v2182_v37 = vadd.f32 %v2180_v45, %v2128_v0  ;;  %v6978_v19 = vadd.f32 %v2239_v38, %v2189_v44  ;;  %v8985_v0 = vld [vmem:[#allocation172_spill] sm:$0xff] }
 0x285   :  { %v6980_v26 = vadd.f32 %v2245_v58, %v2195_v15  ;;  %v2253_v59 = vadd.f32 %v2251_v21, %v2201_v9  ;;  %v2259_v12 = vadd.f32 %v2257_v20, %v2207_v60  ;;  %v2265_v42 = vadd.f32 %v2263_v63, %v2213_v10  ;;  %v2287_v9 = vpop.permute.xlu0 %2286 }
 0x286   :  { %v2271_v46 = vadd.f32 %v2269_v27, %v2219_v57  ;;  %v6990_v14 = vadd.f32 %v2275_v13, %v2225_v3  ;;  %v6992_v41 = vadd.f32 %v2281_v47, %v2231_v35  ;;  %v2188_v5 = vadd.f32 %v8985_v0, %v2140_v50 }
 0x287   :  { %v2194_v25 = vadd.f32 %v8986_v7, %v2146_v6  ;;  %v2200_v51 = vadd.f32 %v8987_v54, %v2152_v30  ;;  %v2206_v48 = vadd.f32 %v8988_v39, %v2158_v18  ;;  %v2212_v55 = vadd.f32 %v8989_v49, %v2164_v53 }
 0x288   :  { %v2218_v22 = vadd.f32 %v8990_v31, %v2170_v40  ;;  %v2238_v45 = vmul.f32 %v2237_v17, %v2233_v1  ;;  %v2244_v36 = vmul.f32 %v2243_v34, %v2233_v1  ;;  %v2250_v62 = vmul.f32 %v2249_v23, %v2233_v1  ;;  %v7002_v34 = vpop.permute.xlu1 %2388 }
 0x289   :  { %v2256_v44 = vmul.f32 %v2255_v24, %v2233_v1  ;;  %v2224_v15 = vadd.f32 %v8991_v28, %v2176_v56  ;;  %v2230_v50 = vadd.f32 %v8992_v43, %v2182_v37  ;;  %v2262_v6 = vmul.f32 %v2261_v32, %v2233_v1  ;;  %v7028_v63 = vpop.permute.xlu0 %2386 }
 0x28a   :  { %v2268_v30 = vmul.f32 %v2267_v16, %v2233_v1  ;;  %v2240_v18 = vadd.f32 %v2238_v45, %v2188_v5  ;;  %v2246_v53 = vadd.f32 %v2244_v36, %v2194_v25  ;;  %v2274_v40 = vmul.f32 %v2273_v29, %v2233_v1 }
 0x28b   :  { %v2280_v17 = vmul.f32 %v2279_v4, %v2233_v1  ;;  %v2252_v23 = vadd.f32 %v2250_v62, %v2200_v51  ;;  %v2258_v24 = vadd.f32 %v2256_v44, %v2206_v48  ;;  %v2264_v11 = vadd.f32 %v2262_v6, %v2212_v55  ;;  %v8993_v6 = vld [vmem:[#allocation184_spill] sm:$0xff] }
 0x28c   :  { %v2270_v60 = vadd.f32 %v2268_v30, %v2218_v22  ;;  %v2291_v8 = vstv %s6970_s12  ;;  %v2297_v10 = vstv %s6972_s26  ;;  %v2303_v2 = vstv %s6974_s14  ;;  %v7032_v56 = vpop.permute.xlu1 %2442  ;;  %s7168_s12 = sld [smem:[#allocation6 + $0x23]]  ;;  %s7184_s26 = sld [smem:[#allocation6 + $0x41]] }
 0x28d   :  { %v2309_v32 = vstv %s6976_s9  ;;  %v2315_v16 = vstv %s6982_s23  ;;  %v2321_v57 = vstv %s6984_s30  ;;  %v2327_v33 = vstv %s6986_s5  ;;  %v7036_v45 = vpop.permute.xlu0 %2440  ;;  %s7193_s14 = sld [smem:[#allocation6 + $0x42]]  ;;  %s7195_s9 = sld [smem:[#allocation6 + $0x44]] }
 0x28e   :  { %v2333_v29 = vstv %s6988_s0  ;;  %v2293_v4 = vmul.f32 %v2291_v8, %v2289_v61  ;;  %v2299_v3 = vmul.f32 %v2297_v10, %v2289_v61  ;;  %v2305_v52 = vmul.f32 %v2303_v2, %v2289_v61  ;;  %s7218_s23 = sld [smem:[#allocation6 + $0x45]]  ;;  %s7220_s30 = sld [smem:[#allocation6 + $0x47]] }
 0x28f   :  { %v2311_v35 = vmul.f32 %v2309_v32, %v2289_v61  ;;  %v2317_v38 = vmul.f32 %v2315_v16, %v2289_v61  ;;  %v2323_v58 = vmul.f32 %v2321_v57, %v2289_v61  ;;  %v2329_v21 = vmul.f32 %v2327_v33, %v2289_v61  ;;  %s7247_s5 = sld [smem:[#allocation6 + $0x65]]  ;;  %s7249_s0 = sld [smem:[#allocation6 + $0x66]] }
 0x290   :  { %v2335_v20 = vmul.f32 %v2333_v29, %v2289_v61  ;;  %v2276_v27 = vadd.f32 %v2274_v40, %v2224_v15  ;;  %v2282_v13 = vadd.f32 %v2280_v17, %v2230_v50  ;;  %v2295_v47 = vadd.f32 %v2293_v4, %v6978_v19  ;;  %v7042_v44 = vpop.permute.xlu1 %2542  ;;  %v8996_v17 = vld [vmem:[#allocation187_spill] sm:$0xff] }
 0x291   :  { %v2301_v1 = vadd.f32 %v2299_v3, %v6980_v26  ;;  %v2307_v37 = vadd.f32 %v2305_v52, %v2253_v59  ;;  %v2313_v0 = vadd.f32 %v2311_v35, %v2259_v12  ;;  %v2319_v5 = vadd.f32 %v2317_v38, %v2265_v42 }
 0x292   :  { %v2325_v7 = vadd.f32 %v2323_v58, %v2271_v46  ;;  %v2292_v25 = vmul.f32 %v2291_v8, %v2287_v9  ;;  %v2298_v61 = vmul.f32 %v2297_v10, %v2287_v9  ;;  %v2304_v54 = vmul.f32 %v2303_v2, %v2287_v9  ;;  %v8999_v10 = vld [vmem:[#allocation190_spill] sm:$0xff]  ;;  %v7070_v58 = vpop.permute.xlu0 %2540 }
 0x293   :  { %v2310_v51 = vmul.f32 %v2309_v32, %v2287_v9  ;;  %v2331_v39 = vadd.f32 %v2329_v21, %v6990_v14  ;;  %v2337_v19 = vadd.f32 %v2335_v20, %v6992_v41  ;;  %v2316_v48 = vmul.f32 %v2315_v16, %v2287_v9  ;;  %v9000_v32 = vld [vmem:[#allocation191_spill] sm:$0xff] }
 0x294   :  { %v2322_v26 = vmul.f32 %v2321_v57, %v2287_v9  ;;  %v2294_v59 = vadd.f32 %v2292_v25, %v2240_v18  ;;  %v2300_v12 = vadd.f32 %v2298_v61, %v2246_v53  ;;  %v2328_v42 = vmul.f32 %v2327_v33, %v2287_v9  ;;  %v8994_v18 = vld [vmem:[#allocation185_spill] sm:$0xff]  ;;  %v8995_v53 = vld [vmem:[#allocation186_spill] sm:$0xff] }
 0x295   :  { %v2334_v46 = vmul.f32 %v2333_v29, %v2287_v9  ;;  %v2306_v49 = vadd.f32 %v2304_v54, %v2252_v23  ;;  %v2312_v55 = vadd.f32 %v2310_v51, %v2258_v24  ;;  %v2318_v31 = vadd.f32 %v2316_v48, %v2264_v11  ;;  %v8997_v24 = vld [vmem:[#allocation188_spill] sm:$0xff]  ;;  %v9003_v54 = vld [vmem:[#allocation194_spill] sm:$0xff] }
 0x296   :  { %v2324_v22 = vadd.f32 %v2322_v26, %v2270_v60  ;;  %v2391_v14 = vstv %s7008_s10  ;;  %v2397_v36 = vstv %s7010_s19  ;;  %v2403_v62 = vstv %s7016_s2  ;;  %v8998_v60 = vld [vmem:[#allocation189_spill] sm:$0xff]  ;;  %v9005_v48 = vld [vmem:[#allocation199_spill] sm:$0xff]  ;;  %s7259_s10 = sld [smem:[#allocation6 + $0x68]]  ;;  %s7267_s19 = sld [smem:[#allocation6 + $0x69]] }
 0x297   :  { %v2409_v41 = vstv %s7018_s28  ;;  %v2415_v28 = vstv %s7020_s11  ;;  %v2421_v15 = vstv %s7022_s8  ;;  %v2427_v43 = vstv %s7024_s20  ;;  %s7269_s2 = sld [smem:[#allocation6 + $0x6b]]  ;;  %s7288_s28 = sld [smem:[#allocation6 + $0x89]] }
 0x298   :  { %v2433_v50 = vstv %s7026_s25  ;;  %v2343_v30 = vadd.f32 %v8993_v6, %v2295_v47  ;;  %v2349_v9 = vadd.f32 %v8994_v18, %v2301_v1  ;;  %v2355_v40 = vadd.f32 %v8995_v53, %v2307_v37  ;;  %v9007_v6 = vld [vmem:[#allocation203_spill] sm:$0xff]  ;;  %v9008_v18 = vld [vmem:[#allocation204_spill] sm:$0xff]  ;;  %s7292_s11 = sld [smem:[#allocation6 + $0x8a]]  ;;  %s7294_s8 = sld [smem:[#allocation6 + $0x8c]] }
 0x299   :  { %v2361_v23 = vadd.f32 %v8996_v17, %v2313_v0  ;;  %v2367_v11 = vadd.f32 %v8997_v24, %v2319_v5  ;;  %v2373_v8 = vadd.f32 %v8998_v60, %v2325_v7  ;;  %v2379_v2 = vadd.f32 %v8999_v10, %v2331_v39  ;;  %v9001_v7 = vld [vmem:[#allocation192_spill] sm:$0xff]  ;;  %v9004_v39 = vld [vmem:[#allocation195_spill] sm:$0xff]  ;;  %s7302_s20 = sld [smem:[#allocation6 + $0x8d]]  ;;  %s7304_s25 = sld [smem:[#allocation6 + $0x8f]] }
 0x29a   :  { %v2385_v16 = vadd.f32 %v9000_v32, %v2337_v19  ;;  %v2393_v57 = vmul.f32 %v2391_v14, %v7002_v34  ;;  %v2399_v33 = vmul.f32 %v2397_v36, %v7002_v34  ;;  %v2405_v29 = vmul.f32 %v2403_v62, %v7002_v34 }
 0x29b   :  { %v2411_v4 = vmul.f32 %v2409_v41, %v7002_v34  ;;  %v2330_v3 = vadd.f32 %v2328_v42, %v2276_v27  ;;  %v2336_v52 = vadd.f32 %v2334_v46, %v2282_v13  ;;  %v2417_v35 = vmul.f32 %v2415_v28, %v7002_v34  ;;  %v7082_v27 = vpop.permute.xlu1 %2596  ;;  %v9006_v42 = vld [vmem:[#allocation200_spill] sm:$0xff] }
 0x29c   :  { %v2423_v38 = vmul.f32 %v2421_v15, %v7002_v34  ;;  %v7072_v21 = vadd.f32 %v2393_v57, %v2343_v30  ;;  %v7074_v20 = vadd.f32 %v2399_v33, %v2349_v9  ;;  %v2429_v47 = vmul.f32 %v2427_v43, %v7002_v34 }
 0x29d   :  { %v2435_v1 = vmul.f32 %v2433_v50, %v7002_v34  ;;  %v7084_v13 = vadd.f32 %v2405_v29, %v2355_v40  ;;  %v7086_v37 = vadd.f32 %v2411_v4, %v2361_v23  ;;  %v7088_v0 = vadd.f32 %v2417_v35, %v2367_v11  ;;  %v9002_v34 = vld [vmem:[#allocation193_spill] sm:$0xff] }
 0x29e   :  { %v2425_v5 = vadd.f32 %v2423_v38, %v2373_v8  ;;  %v2342_v25 = vadd.f32 %v9001_v7, %v2294_v59  ;;  %v2348_v61 = vadd.f32 %v9002_v34, %v2300_v12  ;;  %v2354_v51 = vadd.f32 %v9003_v54, %v2306_v49 }
 0x29f   :  { %v2360_v19 = vadd.f32 %v9004_v39, %v2312_v55  ;;  %v2366_v26 = vadd.f32 %v9005_v48, %v2318_v31  ;;  %v2372_v46 = vadd.f32 %v9006_v42, %v2324_v22  ;;  %v2378_v30 = vadd.f32 %v9007_v6, %v2330_v3  ;;  %v7108_v22 = vpop.permute.xlu0 %2594 }
 0x2a0   :  { %v2384_v9 = vadd.f32 %v9008_v18, %v2336_v52  ;;  %v2392_v53 = vmul.f32 %v2391_v14, %v7028_v63  ;;  %v2398_v40 = vmul.f32 %v2397_v36, %v7028_v63  ;;  %v2404_v59 = vmul.f32 %v2403_v62, %v7028_v63 }
 0x2a1   :  { %v2410_v12 = vmul.f32 %v2409_v41, %v7028_v63  ;;  %v2431_v17 = vadd.f32 %v2429_v47, %v2379_v2  ;;  %v2437_v49 = vadd.f32 %v2435_v1, %v2385_v16  ;;  %v2416_v55 = vmul.f32 %v2415_v28, %v7028_v63  ;;  %v7118_v41 = vpop.permute.xlu1 %2696 }
 0x2a2   :  { %v2422_v31 = vmul.f32 %v2421_v15, %v7028_v63  ;;  %v7110_v23 = vadd.f32 %v2392_v53, %v2342_v25  ;;  %v7112_v14 = vadd.f32 %v2398_v40, %v2348_v61  ;;  %v2428_v36 = vmul.f32 %v2427_v43, %v7028_v63 }
 0x2a3   :  { %v2434_v62 = vmul.f32 %v2433_v50, %v7028_v63  ;;  %v7120_v28 = vadd.f32 %v2404_v59, %v2354_v51  ;;  %v7122_v15 = vadd.f32 %v2410_v12, %v2360_v19  ;;  %v7124_v24 = vadd.f32 %v2416_v55, %v2366_v26  ;;  %v7154_v38 = vpop.permute.xlu0 %2694 }
 0x2a4   :  { %v2424_v11 = vadd.f32 %v2422_v31, %v2372_v46  ;;  %v2445_v43 = vstv %s7060_s17  ;;  %v2451_v60 = vstv %s7062_s21  ;;  %v2457_v8 = vstv %s7066_s6  ;;  %s9021_s17 = smov 127   ;;  %s7330_s21 = sld [smem:[#allocation6 + $0xad]] }
 0x2a5   :  { %v2463_v63 = vstv %s7068_s27  ;;  %v2469_v50 = vstv %s7078_s29  ;;  %v2475_v10 = vstv %s7080_s22  ;;  %v2481_v2 = vstv %s7090_s24  ;;  %v7166_v34 = vpop.permute.xlu1 %2750  ;;  %s7332_s6 = sld [smem:[#allocation6 + $0xae]]  ;;  %s7342_s27 = sld [smem:[#allocation6 + $0xb0]] }
 0x2a6   :  { %v2487_v32 = vstv %s7092_s1  ;;  %v2430_v16 = vadd.f32 %v2428_v36, %v2378_v30  ;;  %v2436_v57 = vadd.f32 %v2434_v62, %v2384_v9  ;;  %v2447_v33 = vmul.f32 %v2445_v43, %v7032_v56  ;;  %s7347_s29 = sld [smem:[#allocation6 + $0xb1]]  ;;  %s7353_s22 = sld [smem:[#allocation6 + $0xb3]] }
 0x2a7   :  { %v2453_v29 = vmul.f32 %v2451_v60, %v7032_v56  ;;  %v7149_v4 = vmul.f32 %v2457_v8, %v7032_v56  ;;  %v2477_v3 = vmul.f32 %v2475_v10, %v7032_v56  ;;  %v2483_v52 = vmul.f32 %v2481_v2, %v7032_v56  ;;  %v7215_v12 = vpop.permute.xlu0 %2748  ;;  %s7376_s24 = sld [smem:[#allocation6 + $0xd2]]  ;;  %s7380_s1 = sld [smem:[#allocation6 + $0xd4]] }
 0x2a8   :  { %v2489_v35 = vmul.f32 %v2487_v32, %v7032_v56  ;;  %v7157_v47 = vmul.f32 %v2463_v63, %v7032_v56  ;;  %v7160_v1 = vmul.f32 %v2469_v50, %v7032_v56  ;;  %v2446_v7 = vmul.f32 %v2445_v43, %v7036_v45  ;;  %v9010_v43 = vld [vmem:[#allocation205_spill] sm:$0xff] }
 0x2a9   :  { %v7164_v25 = vmul.f32 %v2451_v60, %v7036_v45  ;;  %v7170_v61 = vadd.f32 %v2477_v3, %v2425_v5  ;;  %v7172_v54 = vadd.f32 %v2483_v52, %v2431_v17  ;;  %v7175_v51 = vmul.f32 %v2457_v8, %v7036_v45  ;;  %v9012_v3 = vld [vmem:[#allocation212_spill] sm:$0xff] }
 0x2aa   :  { %v7178_v56 = vmul.f32 %v2463_v63, %v7036_v45  ;;  %v2476_v39 = vmul.f32 %v2475_v10, %v7036_v45  ;;  %v2482_v19 = vmul.f32 %v2481_v2, %v7036_v45  ;;  %v2488_v48 = vmul.f32 %v2487_v32, %v7036_v45 }
 0x2ab   :  { %v2575_v26 = vstv %s7116_s18  ;;  %v7186_v42 = vadd.f32 %v2489_v35, %v2437_v49  ;;  %v7189_v5 = vmul.f32 %v2469_v50, %v7036_v45  ;;  %v2581_v46 = vstv %s7126_s7  ;;  %v7222_v49 = vpop.permute.xlu1 %2850  ;;  %s7382_s18 = sld [smem:[#allocation6 + $0xd5]]  ;;  %s7390_s7 = sld [smem:[#allocation6 + $0xd7]] }
 0x2ac   :  { %v2587_v6 = vstv %s7128_s4  ;;  %v7197_v30 = vadd.f32 %v2476_v39, %v2424_v11  ;;  %v7199_v18 = vadd.f32 %v2482_v19, %v2430_v16  ;;  %v7202_v9 = vmul.f32 %v2575_v26, %v7042_v44  ;;  %s7408_s4 = sld [smem:[#allocation6 + $0xf6]] }
 0x2ad   :  { %v7205_v45 = vmul.f32 %v2575_v26, %v7070_v58  ;;  %v7207_v53 = vadd.f32 %v2488_v48, %v2436_v57  ;;  %v7210_v40 = vmul.f32 %v2581_v46, %v7042_v44  ;;  %v7213_v59 = vmul.f32 %v2587_v6, %v7042_v44 }
 0x2ae   :  { %v2449_v17 = vadd.f32 %v2447_v33, %v7072_v21  ;;  %v2545_v55 = vstv %s7138_s16  ;;  %v2599_v31 = vstv %s7140_s3  ;;  %v2699_v36 = vstv %s7144_s15  ;;  %s7418_s16 = sld [smem:[#allocation6 + $0xf8]]  ;;  %s7424_s3 = sld [smem:[#allocation6 + $0xf9]] }
 0x2af   :  { %9009 = vst [vmem:[#allocation72_spill] sm:$0xff] %v7207_v53  ;;  %v2753_v62 = vstv %s7146_s13  ;;  %v7229_v11 = vmul.f32 %v2581_v46, %v7070_v58  ;;  %v2547_v8 = vmul.f32 %v2545_v55, %v7042_v44  ;;  %v2601_v63 = vmul.f32 %v2599_v31, %v7082_v27  ;;  %s7430_s15 = sld [smem:[#allocation6 + $0xfb]]  ;;  %s7450_s13 = sld [smem:[#allocation6 + $0x11a]] }
 0x2b0   :  { %v2497_v60 = vadd.f32 %v9010_v43, %v2449_v17  ;;  %v7235_v21 = vmul.f32 %v2587_v6, %v7070_v58  ;;  %v2853_v50 = vstv %s7168_s12  ;;  %v2448_v10 = vadd.f32 %v2446_v7, %v7110_v23  ;;  %v7251_v23 = vpop.permute.xlu0 %2848  ;;  %v9013_v17 = vld [vmem:[#allocation216_spill] sm:$0xff]  ;;  %s7455_s12 = sld [smem:[#allocation6 + $0x11c]] }
 0x2b1   :  { %v2546_v2 = vmul.f32 %v2545_v55, %v7070_v58  ;;  %v2701_v16 = vmul.f32 %v2699_v36, %v7118_v41  ;;  %v2755_v57 = vmul.f32 %v2753_v62, %v7166_v34  ;;  %v2855_v33 = vmul.f32 %v2853_v50, %v7222_v49 }
 0x2b2   :  { %9011 = vst [vmem:[#allocation73_spill] sm:$0xff] %v7235_v21  ;;  %v2549_v32 = vadd.f32 %v2547_v8, %v2497_v60  ;;  %v2496_v52 = vadd.f32 %v9012_v3, %v2448_v10  ;;  %v2600_v35 = vmul.f32 %v2599_v31, %v7108_v22  ;;  %v2700_v39 = vmul.f32 %v2699_v36, %v7154_v38 }
 0x2b3   :  { %v2455_v19 = vadd.f32 %v2453_v29, %v7074_v20  ;;  %v2551_v48 = vstv %s7184_s26  ;;  %v2605_v26 = vstv %s7193_s14  ;;  %v2705_v46 = vstv %s7195_s9  ;;  %v9014_v20 = vld [vmem:[#allocation208_spill] sm:$0xff]  ;;  %s7460_s26 = sld [smem:[#allocation6 + $0x11d]]  ;;  %s7471_s14 = sld [smem:[#allocation6 + $0x11e]] }
 0x2b4   :  { %v2603_v7 = vadd.f32 %v2601_v63, %v2549_v32  ;;  %v2548_v6 = vadd.f32 %v2546_v2, %v2496_v52  ;;  %v2553_v31 = vmul.f32 %v2551_v48, %v7042_v44  ;;  %v2607_v36 = vmul.f32 %v2605_v26, %v7082_v27  ;;  %s7481_s9 = sld [smem:[#allocation6 + $0x11f]] }
 0x2b5   :  { %v2503_v55 = vadd.f32 %v9013_v17, %v2455_v19  ;;  %v2754_v43 = vmul.f32 %v2753_v62, %v7215_v12  ;;  %v2759_v60 = vstv %s7218_s23  ;;  %v2859_v8 = vstv %s7220_s30  ;;  %s9051_s23 = sld [smem:[#allocation196_spill]] }
 0x2b6   :  { %v2651_v29 = vadd.f32 %v9014_v20, %v2603_v7  ;;  %v2602_v10 = vadd.f32 %v2600_v35, %v2548_v6  ;;  %v2854_v63 = vmul.f32 %v2853_v50, %v7251_v23  ;;  %v2707_v2 = vmul.f32 %v2705_v46, %v7118_v41  ;;  %v9015_v35 = vld [vmem:[#allocation213_spill] sm:$0xff] }
 0x2b7   :  { %v2555_v32 = vadd.f32 %v2553_v31, %v2503_v55  ;;  %v2761_v52 = vmul.f32 %v2759_v60, %v7166_v34  ;;  %v2454_v62 = vadd.f32 %v7164_v25, %v7112_v14  ;;  %v2552_v19 = vmul.f32 %v2551_v48, %v7070_v58  ;;  %v9016_v31 = vld [vmem:[#allocation217_spill] sm:$0xff]  ;;  %v9017_v14 = vld [vmem:[#allocation218_spill] sm:$0xff] }
 0x2b8   :  { %v2703_v3 = vadd.f32 %v2701_v16, %v2651_v29  ;;  %v2650_v7 = vadd.f32 %v9015_v35, %v2602_v10  ;;  %v2861_v6 = vmul.f32 %v2859_v8, %v7222_v49  ;;  %v2606_v17 = vmul.f32 %v2605_v26, %v7108_v22  ;;  %v9018_v10 = vld [vmem:[#allocation209_spill] sm:$0xff]  ;;  %v9019_v35 = vld [vmem:[#allocation223_spill] sm:$0xff] }
 0x2b9   :  { %v2609_v50 = vadd.f32 %v2607_v36, %v2555_v32  ;;  %v2502_v20 = vadd.f32 %v9016_v31, %v2454_v62  ;;  %v2706_v16 = vmul.f32 %v2705_v46, %v7154_v38  ;;  %v2461_v29 = vadd.f32 %v7149_v4, %v7084_v13 }
 0x2ba   :  { %v2757_v55 = vadd.f32 %v2755_v57, %v2703_v3  ;;  %v2702_v21 = vadd.f32 %v2700_v39, %v2650_v7  ;;  %v2557_v48 = vstv %s7247_s5  ;;  %v2611_v53 = vstv %s7249_s0  ;;  %s9061_s0 = sld [smem:[#allocation271_spill]] }
 0x2bb   :  { %v2657_v25 = vadd.f32 %v9017_v14, %v2609_v50  ;;  %v2554_v32 = vadd.f32 %v2552_v19, %v2502_v20  ;;  %v2509_v26 = vadd.f32 %v9019_v35, %v2461_v29  ;;  %v2559_v57 = vmul.f32 %v2557_v48, %v7042_v44  ;;  %v9020_v50 = vld [vmem:[#allocation214_spill] sm:$0xff] }
 0x2bc   :  { %v2805_v36 = vadd.f32 %v9018_v10, %v2757_v55  ;;  %v2756_v46 = vadd.f32 %v2754_v43, %v2702_v21  ;;  %v2613_v13 = vmul.f32 %v2611_v53, %v7082_v27  ;;  %v2711_v4 = vstv %s7259_s10  ;;  %v9022_v21 = vld [vmem:[#allocation220_spill] sm:$0xff]  ;;  %v9023_v14 = vld [vmem:[#allocation219_spill] sm:$0xff]  ;;  %s3768_s10 = smov 108  }
 0x2bd   :  { %v2709_v3 = vadd.f32 %v2707_v2, %v2657_v25  ;;  %v2608_v62 = vadd.f32 %v2606_v17, %v2554_v32  ;;  %v2760_v19 = vmul.f32 %v2759_v60, %v7215_v12  ;;  %v2561_v7 = vadd.f32 %v2559_v57, %v2509_v26  ;;  %v9024_v32 = vld [vmem:[#allocation227_spill] sm:$0xff]  ;;  %v9025_v57 = vld [vmem:[#allocation224_spill] sm:$0xff] }
 0x2be   :  { %v7296_v39 = vadd.f32 %v2855_v33, %v2805_v36  ;;  %v2804_v55 = vadd.f32 %v9020_v50, %v2756_v46  ;;  %v2765_v20 = vstv %s7267_s19  ;;  %v2865_v29 = vstv %s7269_s2  ;;  %s3769_s19 = smov 48   ;;  %s3770_s2 = smov 68  }
 0x2bf   :  { %v2763_v31 = vadd.f32 %v2761_v52, %v2709_v3  ;;  %v2656_v43 = vadd.f32 %v9022_v21, %v2608_v62  ;;  %v2860_v33 = vmul.f32 %v2859_v8, %v7251_v23  ;;  %v2615_v2 = vadd.f32 %v2613_v13, %v2561_v7 }
 0x2c0   :  { %2904 = vrot.lane.b32.xlu1 %v7296_v39, %s9021_s17  ;;  %v2713_v60 = vmul.f32 %v2711_v4, %v7118_v41  ;;  %v7311_v17 = vadd.f32 %v2854_v63, %v2804_v55  ;;  %v2460_v25 = vadd.f32 %v7175_v51, %v7120_v28  ;;  %v2558_v10 = vmul.f32 %v2557_v48, %v7070_v58  ;;  %v9027_v55 = vld [vmem:[#allocation235_spill] sm:$0xff] }
 0x2c1   :  { %v2811_v52 = vadd.f32 %v9023_v14, %v2763_v31  ;;  %v2708_v36 = vadd.f32 %v2706_v16, %v2656_v43  ;;  %v2663_v35 = vadd.f32 %v9024_v32, %v2615_v2  ;;  %v2767_v26 = vmul.f32 %v2765_v20, %v7166_v34  ;;  %v9028_v14 = vld [vmem:[#allocation228_spill] sm:$0xff] }
 0x2c2   :  { %v2867_v8 = vmul.f32 %v2865_v29, %v7222_v49  ;;  %2902 = vrot.lane.b32.xlu0 %v7311_v17, %s9021_s17  ;;  %v2508_v46 = vadd.f32 %v9025_v57, %v2460_v25  ;;  %v2612_v28 = vmul.f32 %v2611_v53, %v7108_v22  ;;  %v2712_v51 = vmul.f32 %v2711_v4, %v7154_v38 }
 0x2c3   :  { %v7322_v63 = vadd.f32 %v2861_v6, %v2811_v52  ;;  %v2762_v16 = vadd.f32 %v2760_v19, %v2708_v36  ;;  %v2715_v48 = vadd.f32 %v2713_v60, %v2663_v35  ;;  %v2467_v3 = vadd.f32 %v7157_v47, %v7086_v37  ;;  %v9026_v19 = vld [vmem:[#allocation221_spill] sm:$0xff]  ;;  %v9029_v36 = vld [vmem:[#allocation229_spill] sm:$0xff] }
 0x2c4   :  { %v2563_v13 = vstv %s7288_s28  ;;  %v2560_v6 = vadd.f32 %v2558_v10, %v2508_v46  ;;  %v2617_v62 = vstv %s7292_s11  ;;  %v2717_v4 = vstv %s7294_s8  ;;  %s3771_s28 = smov 28  }
 0x2c5   :  { %2929 = vrot.lane.b32.xlu1 %v7322_v63, %s9021_s17  ;;  %v2565_v53 = vmul.f32 %v2563_v13, %v7042_v44  ;;  %v2810_v7 = vadd.f32 %v9026_v19, %v2762_v16  ;;  %v2769_v50 = vadd.f32 %v2767_v26, %v2715_v48  ;;  %v2515_v37 = vadd.f32 %v9027_v55, %v2467_v3  ;;  %v9030_v16 = vld [vmem:[#allocation239_spill] sm:$0xff] }
 0x2c6   :  { %v2619_v47 = vmul.f32 %v2617_v62, %v7082_v27  ;;  %v2614_v31 = vadd.f32 %v2612_v28, %v2560_v6  ;;  %v2766_v21 = vmul.f32 %v2765_v20, %v7215_v12  ;;  %v2771_v43 = vstv %s7302_s20 }
 0x2c7   :  { %v2871_v2 = vstv %s7304_s25  ;;  %v7349_v60 = vadd.f32 %v2860_v33, %v2810_v7  ;;  %v2817_v52 = vadd.f32 %v9028_v14, %v2769_v50  ;;  %v2866_v25 = vmul.f32 %v2865_v29, %v7251_v23  ;;  %v9032_v50 = vld [vmem:[#allocation246_spill] sm:$0xff] }
 0x2c8   :  { %v2567_v10 = vadd.f32 %v2565_v53, %v2515_v37  ;;  %v2662_v32 = vadd.f32 %v9029_v36, %v2614_v31  ;;  %v2719_v35 = vmul.f32 %v2717_v4, %v7118_v41  ;;  %v2466_v20 = vadd.f32 %v7178_v56, %v7122_v15  ;;  %v9031_v15 = vld [vmem:[#allocation236_spill] sm:$0xff]  ;;  %v9033_v37 = vld [vmem:[#allocation232_spill] sm:$0xff] }
 0x2c9   :  { %v2564_v26 = vmul.f32 %v2563_v13, %v7070_v58  ;;  %2927 = vrot.lane.b32.xlu0 %v7349_v60, %s9021_s17  ;;  %v7362_v33 = vadd.f32 %v2867_v8, %v2817_v52  ;;  %v2773_v57 = vmul.f32 %v2771_v43, %v7166_v34  ;;  %v2873_v46 = vmul.f32 %v2871_v2, %v7222_v49 }
 0x2ca   :  { %v2621_v29 = vadd.f32 %v2619_v47, %v2567_v10  ;;  %v2714_v28 = vadd.f32 %v2712_v51, %v2662_v32  ;;  %v2514_v48 = vadd.f32 %v9030_v16, %v2466_v20  ;;  %v2618_v3 = vmul.f32 %v2617_v62, %v7108_v22  ;;  %v9034_v32 = vld [vmem:[#allocation242_spill] sm:$0xff] }
 0x2cb   :  { %v2718_v6 = vmul.f32 %v2717_v4, %v7154_v38  ;;  %2955 = vrot.lane.b32.xlu1 %v7362_v33, %s9021_s17  ;;  %v2473_v8 = vadd.f32 %v7160_v1, %v7088_v0  ;;  %v2569_v13 = vstv %s7330_s21  ;;  %v2623_v53 = vstv %s7332_s6  ;;  %v9036_v16 = vld [vmem:[#allocation248_spill] sm:$0xff]  ;;  %s3772_s6 = smov [#allocation11]  }
 0x2cc   :  { %v2669_v56 = vadd.f32 %v9031_v15, %v2621_v29  ;;  %v2768_v51 = vadd.f32 %v2766_v21, %v2714_v28  ;;  %v2566_v19 = vadd.f32 %v2564_v26, %v2514_v48  ;;  %v2772_v62 = vmul.f32 %v2771_v43, %v7215_v12  ;;  %v9035_v29 = vld [vmem:[#allocation238_spill] sm:$0xff]  ;;  %v9037_v15 = vld [vmem:[#allocation247_spill] sm:$0xff] }
 0x2cd   :  { %v2571_v4 = vmul.f32 %v2569_v13, %v7042_v44  ;;  %v2521_v55 = vadd.f32 %v9032_v50, %v2473_v8  ;;  %v2625_v0 = vmul.f32 %v2623_v53, %v7082_v27  ;;  %v2723_v1 = vstv %s7342_s27  ;;  %s3226_s27 = sshll.u32 %s3772_s6, 4  ;;  %s3227_s27 = int_to_ptr.vmem [resolvable:$true] %s3226_s27 }
 0x2ce   :  { %v2721_v7 = vadd.f32 %v2719_v35, %v2669_v56  ;;  %v2816_v47 = vadd.f32 %v9033_v37, %v2768_v51  ;;  %v2620_v31 = vadd.f32 %v2618_v3, %v2566_v19  ;;  %v2872_v21 = vmul.f32 %v2871_v2, %v7251_v23  ;;  %p3733_p7 = scmp.lt.s32.totalorder %s3227_s27, %s3227_s27 }
 0x2cf   :  { %v2777_v14 = vstv %s7347_s29  ;;  %v2573_v44 = vadd.f32 %v2571_v4, %v2521_v55  ;;  %v2877_v52 = vstv %s7353_s22  ;;  %v2472_v10 = vadd.f32 %v7189_v5, %v7124_v24  ;;  %s3728_s29 = scalar_lea.vmem %s3227_s27, 16  ;;  %s3732_s22 = scalar_lea.vmem %s3227_s27, 32 }
 0x2d0   :  { %v2775_v43 = vadd.f32 %v2773_v57, %v2721_v7  ;;  %v7395_v36 = vadd.f32 %v2866_v25, %v2816_v47  ;;  %v2668_v35 = vadd.f32 %v9034_v32, %v2620_v31  ;;  %v2725_v20 = vmul.f32 %v2723_v1, %v7118_v41  ;;  %v9040_v31 = vld [vmem:[#allocation251_spill] sm:$0xff]  ;;  %p3729_p6 = scmp.ne.s32.totalorder %s3227_s27, %s3728_s29  ;;  %p3734_p8 = scmp.lt.s32.totalorder %s3732_s22, %s3728_s29 }
 0x2d1   :  { %v2570_v26 = vmul.f32 %v2569_v13, %v7070_v58  ;;  %v2627_v28 = vadd.f32 %v2625_v0, %v2573_v44  ;;  %v2520_v57 = vadd.f32 %v9036_v16, %v2472_v10  ;;  %v2624_v48 = vmul.f32 %v2623_v53, %v7108_v22  ;;  %v9038_v13 = vld [vmem:[#allocation254_spill] sm:$0xff]  ;;  %v9039_v0 = vld [vmem:[#allocation243_spill] sm:$0xff] }
 0x2d2   :  { %v2823_v2 = vadd.f32 %v9035_v29, %v2775_v43  ;;  %2953 = vrot.lane.b32.xlu0 %v7395_v36, %s9021_s17  ;;  %v2720_v24 = vadd.f32 %v2718_v6, %v2668_v35  ;;  %v2779_v5 = vmul.f32 %v2777_v14, %v7166_v34  ;;  %v2879_v25 = vmul.f32 %v2877_v52, %v7222_v49  ;;  %v9041_v35 = vld [vmem:[#allocation256_spill] sm:$0xff]  ;;  %p3735_p9 = por %p3734_p8, %p3733_p7 }
 0x2d3   :  { %v2724_v58 = vmul.f32 %v2723_v1, %v7154_v38  ;;  %v2675_v56 = vadd.f32 %v9037_v15, %v2627_v28  ;;  %v2572_v8 = vadd.f32 %v2570_v26, %v2520_v57  ;;  %v2527_v53 = vadd.f32 %v9038_v13, %v7170_v61 }
 0x2d4   :  { %v7410_v3 = vadd.f32 %v2873_v46, %v2823_v2  ;;  %v2774_v51 = vadd.f32 %v2772_v62, %v2720_v24  ;;  %v2629_v19 = vstv %s7376_s24  ;;  %v2729_v6 = vstv %s7380_s1  ;;  %v9043_v2 = vld [vmem:[#allocation255_spill] sm:$0xff]  ;;  %p3736_p10 = pnand %p3735_p9, %p3729_p6 }
 0x2d5   :  { %v2783_v4 = vstv %s7382_s18  ;;  %v2727_v7 = vadd.f32 %v2725_v20, %v2675_v56  ;;  %v2626_v50 = vadd.f32 %v2624_v48, %v2572_v8  ;;  %v2579_v46 = vadd.f32 %v7202_v9, %v2527_v53  ;;  %v9044_v48 = vld [vmem:[#allocation261_spill] sm:$0xff] }
 0x2d6   :  { %2981 = vrot.lane.b32.xlu1 %v7410_v3, %s9021_s17  ;;  %v2631_v55 = vmul.f32 %v2629_v19, %v7082_v27  ;;  %v2822_v1 = vadd.f32 %v9039_v0, %v2774_v51  ;;  %v2778_v61 = vmul.f32 %v2777_v14, %v7215_v12  ;;  %v2878_v62 = vmul.f32 %v2877_v52, %v7251_v23  ;;  %v9042_v52 = vld [vmem:[#allocation250_spill] sm:$0xff] }
 0x2d7   :  { %v2883_v37 = vstv %s7390_s7  ;;  %v2781_v47 = vadd.f32 %v2779_v5, %v2727_v7  ;;  %v2674_v43 = vadd.f32 %v9040_v31, %v2626_v50  ;;  %v2731_v9 = vmul.f32 %v2729_v6, %v7118_v41  ;;  %v9046_v7 = vld [vmem:[#allocation259_spill] sm:$0xff] }
 0x2d8   :  { %v2633_v44 = vadd.f32 %v2631_v55, %v2579_v46  ;;  %v7434_v10 = vadd.f32 %v2872_v21, %v2822_v1  ;;  %v2785_v32 = vmul.f32 %v2783_v4, %v7166_v34  ;;  %v2526_v20 = vadd.f32 %v9041_v35, %v7197_v30  ;;  %v9048_v1 = vld [vmem:[#allocation258_spill] sm:$0xff] }
 0x2d9   :  { %v2630_v14 = vmul.f32 %v2629_v19, %v7108_v22  ;;  %v2829_v26 = vadd.f32 %v9042_v52, %v2781_v47  ;;  %v2726_v29 = vadd.f32 %v2724_v58, %v2674_v43  ;;  %v2885_v16 = vmul.f32 %v2883_v37, %v7222_v49 }
 0x2da   :  { %v2681_v28 = vadd.f32 %v9043_v2, %v2633_v44  ;;  %2979 = vrot.lane.b32.xlu0 %v7434_v10, %s9021_s17  ;;  %v2578_v21 = vadd.f32 %v7205_v45, %v2526_v20  ;;  %v2730_v57 = vmul.f32 %v2729_v6, %v7154_v38  ;;  %v2533_v30 = vadd.f32 %v9044_v48, %v7172_v54  ;;  %v9045_v54 = vld [vmem:[#allocation252_spill] sm:$0xff]  ;;  %v9050_v20 = vld [vmem:[#allocation269_spill] sm:$0xff] }
 0x2db   :  { %v2635_v24 = vstv %s7408_s4  ;;  %v7452_v5 = vadd.f32 %v2879_v25, %v2829_v26  ;;  %v2780_v58 = vadd.f32 %v2778_v61, %v2726_v29  ;;  %v2784_v45 = vmul.f32 %v2783_v4, %v7215_v12  ;;  %v9047_v4 = vld [vmem:[#allocation265_spill] sm:$0xff]  ;;  %v9049_v44 = vld [vmem:[#allocation264_spill] sm:$0xff] }
 0x2dc   :  { %v2733_v15 = vadd.f32 %v2731_v9, %v2681_v28  ;;  %v2637_v56 = vmul.f32 %v2635_v24, %v7082_v27  ;;  %v2632_v8 = vadd.f32 %v2630_v14, %v2578_v21  ;;  %v2585_v13 = vadd.f32 %v7210_v40, %v2533_v30 }
 0x2dd   :  { %v2735_v53 = vstv %s7418_s16  ;;  %3007 = vrot.lane.b32.xlu1 %v7452_v5, %s9021_s17  ;;  %v2828_v25 = vadd.f32 %v9045_v54, %v2780_v58  ;;  %v2789_v6 = vstv %s7424_s3  ;;  %v2889_v55 = vstv %s7430_s15  ;;  %v9056_v54 = vld [vmem:[#allocation270_spill] sm:$0xff] }
 0x2de   :  { %v2787_v51 = vadd.f32 %v2785_v32, %v2733_v15  ;;  %v2737_v19 = vmul.f32 %v2735_v53, %v7118_v41  ;;  %v2680_v50 = vadd.f32 %v9046_v7, %v2632_v8  ;;  %v2639_v46 = vadd.f32 %v2637_v56, %v2585_v13  ;;  %v3676_v56 = vld [vmem:[#allocation2 + $0x70] sm:$0xff] }
 0x2df   :  { %v2532_v0 = vadd.f32 %v9047_v4, %v7199_v18  ;;  %v7473_v40 = vadd.f32 %v2878_v62, %v2828_v25  ;;  %v2884_v47 = vmul.f32 %v2883_v37, %v7251_v23  ;;  %v2636_v31 = vmul.f32 %v2635_v24, %v7108_v22 }
 0x2e0   :  { %v2835_v61 = vadd.f32 %v9048_v1, %v2787_v51  ;;  %v2732_v43 = vadd.f32 %v2730_v57, %v2680_v50  ;;  %v2687_v9 = vadd.f32 %v9049_v44, %v2639_v46  ;;  %v2791_v32 = vmul.f32 %v2789_v6, %v7166_v34  ;;  %v9052_v57 = vld [vmem:[#allocation260_spill] sm:$0xff]  ;;  %v9058_v46 = vld [vmem:[#allocation73_spill] sm:$0xff] }
 0x2e1   :  { %v2584_v35 = vadd.f32 %v7229_v11, %v2532_v0  ;;  %3005 = vrot.lane.b32.xlu0 %v7473_v40, %s9021_s17  ;;  %v2891_v62 = vmul.f32 %v2889_v55, %v7222_v49  ;;  %v2736_v37 = vmul.f32 %v2735_v53, %v7154_v38  ;;  %v2539_v14 = vadd.f32 %v9050_v20, %v7186_v42  ;;  %v9053_v42 = vld [vmem:[#allocation266_spill] sm:$0xff]  ;;  %v9055_v53 = vld [vmem:[#allocation72_spill] sm:$0xff] }
 0x2e2   :  { %v7485_v18 = vadd.f32 %v2885_v16, %v2835_v61  ;;  %v2786_v52 = vadd.f32 %v2784_v45, %v2732_v43  ;;  %v2739_v26 = vadd.f32 %v2737_v19, %v2687_v9  ;;  %v2641_v11 = vstv %s7450_s13  ;;  %v3677_v44 = vld [vmem:[#allocation2 + $0x68] sm:$0xff] }
 0x2e3   :  { %v2638_v29 = vadd.f32 %v2636_v31, %v2584_v35  ;;  %v2790_v2 = vmul.f32 %v2789_v6, %v7215_v12  ;;  %v2591_v28 = vadd.f32 %v7213_v59, %v2539_v14  ;;  %v2643_v16 = vmul.f32 %v2641_v11, %v7082_v27  ;;  %v9057_v27 = vld [vmem:[#allocation267_spill] sm:$0xff] }
 0x2e4   :  { %3033 = vrot.lane.b32.xlu1 %v7485_v18, %s9021_s17  ;;  %v2741_v21 = vstv %s7455_s12  ;;  %v2834_v48 = vadd.f32 %v9052_v57, %v2786_v52  ;;  %v2793_v30 = vadd.f32 %v2791_v32, %v2739_v26  ;;  %v2795_v58 = vstv %s7460_s26 }
 0x2e5   :  { %v2686_v24 = vadd.f32 %v9053_v42, %v2638_v29  ;;  %v2645_v15 = vadd.f32 %v2643_v16, %v2591_v28  ;;  %v9054_v8 = vstv %s9051_s23  ;;  %v2743_v13 = vmul.f32 %v2741_v21, %v7118_v41  ;;  %v3679_v28 = vld [vmem:[#allocation2 + $0x69] sm:$0xff] }
 0x2e6   :  { %v2691_v45 = vmul.f32 %v3676_v56, %v9054_v8  ;;  %v2538_v25 = vadd.f32 %v9056_v54, %v9055_v53  ;;  %v7506_v59 = vadd.f32 %v2884_v47, %v2834_v48  ;;  %v2841_v51 = vadd.f32 %v9057_v27, %v2793_v30 }
 0x2e7   :  { %v2738_v19 = vadd.f32 %v2736_v37, %v2686_v24  ;;  %v2843_v6 = vstv %s7471_s14  ;;  %v2797_v50 = vmul.f32 %v2795_v58, %v7166_v34  ;;  %v2642_v0 = vmul.f32 %v2641_v11, %v7108_v22  ;;  %v9060_v22 = vld [vmem:[#allocation268_spill] sm:$0xff] }
 0x2e8   :  { %v2693_v7 = vadd.f32 %v2691_v45, %v2645_v15  ;;  %v2590_v4 = vadd.f32 %v9058_v46, %v2538_v25  ;;  %3031 = vrot.lane.b32.xlu0 %v7506_v59, %s9021_s17  ;;  %v7515_v41 = vadd.f32 %v2891_v62, %v2841_v51  ;;  %v2890_v61 = vmul.f32 %v2889_v55, %v7251_v23  ;;  %v3678_v37 = vld [vmem:[#allocation2 + $0x71] sm:$0xff] }
 0x2e9   :  { %v2792_v1 = vadd.f32 %v2790_v2, %v2738_v19  ;;  %v2895_v47 = vstv %s7481_s9  ;;  %v9059_v9 = vmov %v9054_v8  ;;  %v2742_v34 = vmul.f32 %v2741_v21, %v7154_v38 }
 0x2ea   :  { %v2745_v31 = vadd.f32 %v2743_v13, %v2693_v7  ;;  %v2644_v43 = vadd.f32 %v2642_v0, %v2590_v4  ;;  %v2690_v32 = vmul.f32 %v3677_v44, %v9059_v9  ;;  %3059 = vrot.lane.b32.xlu1 %v7515_v41, %s9021_s17  ;;  %v2845_v20 = vmul.f32 %v3678_v37, %v2843_v6 }
 0x2eb   :  { %v2840_v35 = vadd.f32 %v9060_v22, %v2792_v1  ;;  %v2897_v14 = vmul.f32 %v2895_v47, %v7222_v49  ;;  %v2796_v55 = vmul.f32 %v2795_v58, %v7215_v12  ;;  %v2844_v16 = vmul.f32 %v3679_v28, %v2843_v6 }
 0x2ec   :  { %v2799_v62 = vadd.f32 %v2797_v50, %v2745_v31  ;;  %v2692_v52 = vadd.f32 %v2690_v32, %v2644_v43  ;;  %v2896_v21 = vmul.f32 %v2895_v47, %v7251_v23  ;;  %v3636_v43 = vld [vmem:[%s9061_s0 + $0x28] sm:$0x7f] }
 0x2ed   :  { %v7527_v26 = vadd.f32 %v2890_v61, %v2840_v35 }
 0x2ee   :  { %v2847_v29 = vadd.f32 %v2845_v20, %v2799_v62  ;;  %v2744_v11 = vadd.f32 %v2742_v34, %v2692_v52  ;;  %v3638_v52 = vld [vmem:[%s9061_s0 + $0x38] sm:$0x7f] }
 0x2ef   :  { %3057 = vrot.lane.b32.xlu0 %v7527_v26, %s9021_s17 }
 0x2f0   :  { %v7531_v38 = vadd.f32 %v2897_v14, %v2847_v29  ;;  %v2798_v2 = vadd.f32 %v2796_v55, %v2744_v11  ;;  %v3633_v14 = vld [vmem:[%s9061_s0 + $0x10] sm:$0xff] }
 0x2f2   :  { %3085 = vrot.lane.b32.xlu1 %v7531_v38, %s9021_s17  ;;  %v2846_v49 = vadd.f32 %v2844_v16, %v2798_v2  ;;  %v2919_v16 = vld [vmem:[%s9061_s0] sm:$0xff] }
 0x2f4   :  { %v7536_v57 = vadd.f32 %v2896_v21, %v2846_v49  ;;  %v3635_v21 = vld [vmem:[%s9061_s0 + $0x20] sm:$0xff] }
 0x2f6   :  { %3083 = vrot.lane.b32.xlu0 %v7536_v57, %s9021_s17 }
 0x332   :  { %v2905_v12 = vpop.permute.xlu1 %2904 }
 0x333   :  { %v2909_v45 = vmax.f32 %v7296_v39, %v2905_v12 }
 0x334   :  { %v2903_v48 = vpop.permute.xlu0 %2902 }
 0x335   :  { %v2908_v53 = vmax.f32 %v7311_v17, %v2903_v48  ;;  %v2913_v6 = vrot.slane %v2909_v45, 1 }
 0x337   :  { %v2930_v30 = vpop.permute.xlu1 %2929  ;;  %v2912_v50 = vrot.slane %v2908_v53, 1 }
 0x338   :  { %v2934_v8 = vmax.f32 %v7322_v63, %v2930_v30 }
 0x33a   :  { %v2938_v27 = vrot.slane %v2934_v8, 1 }
 0x33b   :  { %v2928_v42 = vpop.permute.xlu0 %2927 }
 0x33c   :  { %v2933_v13 = vmax.f32 %v7349_v60, %v2928_v42  ;;  %v2943_v17 = vmax.f32 %v2934_v8, %v2938_v27 }
 0x33d   :  { %v2956_v24 = vpop.permute.xlu1 %2955 }
 0x33e   :  { %v2960_v54 = vmax.f32 %v7362_v33, %v2956_v24  ;;  %v2937_v7 = vrot.slane %v2933_v13, 1 }
 0x340   :  { %v2964_v46 = vrot.slane %v2960_v54, 1  ;;  %v2939_v1 = vsel %vm257_vm0, %v2937_v7, %v2938_v27 }
 0x341   :  { %v2942_v34 = vmax.f32 %v2933_v13, %v2939_v1 }
 0x342   :  { %v2969_v47 = vmax.f32 %v2960_v54, %v2964_v46  ;;  %v3642_v54 = vld [vmem:[%s9061_s0 + $0x58] sm:$0x7f] }
 0x343   :  { %v2947_v30 = vmul.f32 %v3633_v14, %v2942_v34 }
 0x344   :  { %v2954_v58 = vpop.permute.xlu0 %2953  ;;  %v2974_v29 = vmul.f32 %v3636_v43, %v2969_v47 }
 0x345   :  { %v2959_v25 = vmax.f32 %v7395_v36, %v2954_v58  ;;  %v2918_v36 = vmax.f32 %v2909_v45, %v2913_v6 }
 0x347   :  { %v2963_v4 = vrot.slane %v2959_v25, 1 }
 0x348   :  { %v2982_v15 = vpop.permute.xlu1 %2981 }
 0x349   :  { %v2986_v51 = vmax.f32 %v7410_v3, %v2982_v15  ;;  %v3634_v3 = vld [vmem:[%s9061_s0 + $0x18] sm:$0x7f]  ;;  %v2965_v44 = vsel %vm257_vm0, %v2963_v4, %v2964_v46  ;;  %v3639_v46 = vld [vmem:[%s9061_s0 + $0x40] sm:$0xff] }
 0x34a   :  { %v2968_v11 = vmax.f32 %v2959_v25, %v2965_v44 }
 0x34b   :  { %v2990_v0 = vrot.slane %v2986_v51, 1 }
 0x34c   :  { %v2980_v56 = vpop.permute.xlu0 %2979  ;;  %v2973_v13 = vmul.f32 %v3635_v21, %v2968_v11 }
 0x34d   :  { %v7548_v63 = vmax.f32 %v7434_v10, %v2980_v56  ;;  %v2920_v10 = vld [vmem:[%s9061_s0 + $0x8] sm:$0x7f]  ;;  %v2995_v22 = vmax.f32 %v2986_v51, %v2990_v0 }
 0x34e   :  { %v2922_v20 = vmul.f32 %v2920_v10, %v2918_v36  ;;  %v3641_v36 = vld [vmem:[%s9061_s0 + $0x50] sm:$0xff] }
 0x34f   :  { %v3008_v23 = vpop.permute.xlu1 %3007  ;;  %v2989_v31 = vrot.slane %v7548_v63, 1  ;;  %v3000_v42 = vmul.f32 %v3638_v52, %v2995_v22 }
 0x350   :  { %v3012_v60 = vmax.f32 %v7452_v5, %v3008_v23  ;;  %v2914_v5 = vsel %vm257_vm0, %v2912_v50, %v2913_v6 }
 0x351   :  { %v2917_v62 = vmax.f32 %v2908_v53, %v2914_v5  ;;  %v2991_v2 = vsel %vm257_vm0, %v2989_v31, %v2990_v0  ;;  %v3637_v53 = vld [vmem:[%s9061_s0 + $0x30] sm:$0xff]  ;;  %v3643_v31 = vld [vmem:[%s9061_s0 + $0x60] sm:$0xff] }
 0x352   :  { %v3016_v9 = vrot.slane %v3012_v60, 1  ;;  %v2994_v15 = vmax.f32 %v7548_v63, %v2991_v2  ;;  %v3644_v63 = vld [vmem:[%s9061_s0 + $0x68] sm:$0x7f] }
 0x353   :  { %v3006_v19 = vpop.permute.xlu0 %3005  ;;  %v2921_v23 = vmul.f32 %v2919_v16, %v2917_v62 }
 0x354   :  { %v7552_v33 = vmax.f32 %v7473_v40, %v3006_v19  ;;  %v3021_v49 = vmax.f32 %v3012_v60, %v3016_v9  ;;  %v2999_v4 = vmul.f32 %v3637_v53, %v2994_v15 }
 0x356   :  { %v3034_v39 = vpop.permute.xlu1 %3033  ;;  %v3015_v35 = vrot.slane %v7552_v33, 1 }
 0x357   :  { %v3038_v61 = vmax.f32 %v7485_v18, %v3034_v39  ;;  %v2948_v18 = vmul.f32 %v3634_v3, %v2943_v17 }
 0x358   :  { %v3017_v24 = vsel %vm257_vm0, %v3015_v35, %v3016_v9 }
 0x359   :  { %v3042_v55 = vrot.slane %v3038_v61, 1  ;;  %v2950_v48 = vadd.f32 %v2948_v18, %v2922_v20  ;;  %v3020_v51 = vmax.f32 %v7552_v33, %v3017_v24  ;;  %v3645_v20 = vld [vmem:[%s9061_s0 + $0x70] sm:$0xff] }
 0x35a   :  { %v3032_v40 = vpop.permute.xlu0 %3031 }
 0x35b   :  { %v7569_v32 = vmax.f32 %v7506_v59, %v3032_v40  ;;  %v3047_v56 = vmax.f32 %v3038_v61, %v3042_v55  ;;  %v2976_v45 = vadd.f32 %v2974_v29, %v2950_v48  ;;  %v3025_v61 = vmul.f32 %v3639_v46, %v3020_v51 }
 0x35c   :  { %v3060_v37 = vpop.permute.xlu1 %3059 }
 0x35d   :  { %v3064_v59 = vmax.f32 %v7515_v41, %v3060_v37  ;;  %v3041_v28 = vrot.slane %v7569_v32, 1  ;;  %v3640_v41 = vld [vmem:[%s9061_s0 + $0x48] sm:$0x7f]  ;;  %v3002_v50 = vadd.f32 %v3000_v42, %v2976_v45  ;;  %v3052_v60 = vmul.f32 %v3642_v54, %v3047_v56 }
 0x35e   :  { %v3026_v27 = vmul.f32 %v3640_v41, %v3021_v49 }
 0x35f   :  { %v3068_v12 = vrot.slane %v3064_v59, 1  ;;  %v3043_v25 = vsel %vm257_vm0, %v3041_v28, %v3042_v55 }
 0x360   :  { %v3046_v17 = vmax.f32 %v7569_v32, %v3043_v25  ;;  %v3028_v1 = vadd.f32 %v3026_v27, %v3002_v50 }
 0x361   :  { %v3058_v58 = vpop.permute.xlu0 %3057  ;;  %v3073_v19 = vmax.f32 %v3064_v59, %v3068_v12 }
 0x362   :  { %v3063_v8 = vmax.f32 %v7527_v26, %v3058_v58  ;;  %v2949_v26 = vadd.f32 %v2947_v30, %v2921_v23  ;;  %v3054_v9 = vadd.f32 %v3052_v60, %v3028_v1  ;;  %v3051_v32 = vmul.f32 %v3641_v36, %v3046_v17 }
 0x363   :  { %v3078_v10 = vmul.f32 %v3644_v63, %v3073_v19 }
 0x364   :  { %v3067_v6 = vrot.slane %v3063_v8, 1  ;;  %v3086_v7 = vpop.permute.xlu1 %3085  ;;  %v2975_v33 = vadd.f32 %v2973_v13, %v2949_v26 }
 0x365   :  { %v3090_v39 = vmax.f32 %v7531_v38, %v3086_v7  ;;  %v3646_v38 = vld [vmem:[%s9061_s0 + $0x78] sm:$0x7f]  ;;  %v3080_v35 = vadd.f32 %v3078_v10, %v3054_v9  ;;  %s3767_s0 = smov 88  }
 0x366   :  { %v3069_v0 = vsel %vm257_vm0, %v3067_v6, %v3068_v12  ;;  %v3001_v44 = vadd.f32 %v2999_v4, %v2975_v33 }
 0x367   :  { %v3094_v3 = vrot.slane %v3090_v39, 1  ;;  %v3072_v5 = vmax.f32 %v3063_v8, %v3069_v0 }
 0x368   :  { %v3084_v47 = vpop.permute.xlu0 %3083  ;;  %v3027_v22 = vadd.f32 %v3025_v61, %v3001_v44 }
 0x369   :  { %v3099_v40 = vmax.f32 %v3090_v39, %v3094_v3  ;;  %v3089_v43 = vmax.f32 %v7536_v57, %v3084_v47  ;;  %v3077_v37 = vmul.f32 %v3643_v31, %v3072_v5 }
 0x36a   :  { %v3053_v14 = vadd.f32 %v3051_v32, %v3027_v22 }
 0x36b   :  { %v3104_v18 = vmul.f32 %v3646_v38, %v3099_v40  ;;  %v3093_v34 = vrot.slane %v3089_v43, 1 }
 0x36c   :  { %v3079_v59 = vadd.f32 %v3077_v37, %v3053_v14 }
 0x36d   :  { %v3095_v62 = vsel %vm257_vm0, %v3093_v34, %v3094_v3  ;;  %v3106_v52 = vadd.f32 %v3104_v18, %v3080_v35  ;;  %vm3118_vm0 = vcmask 155648  }
 0x36e   :  { %v3098_v55 = vmax.f32 %v3089_v43, %v3095_v62 }
 0x36f   :  { %v3110_v29 = vsel %vm3109_vm12, %v3106_v52, 0.0 }
 0x370   :  { %v3103_v57 = vmul.f32 %v3645_v20, %v3098_v55 }
 0x372   :  { %v3105_v11 = vadd.f32 %v3103_v57, %v3079_v59  ;;  %v9062_v57 = vld [vmem:[#allocation80_spill] sm:$0xff] }
 0x373   :  { %vm3147_vm14 = vcmp.eq.s32.totalorder %v9062_v57, 1  ;;  %vm3129_vm15 = vcmp.eq.s32.totalorder %v9062_v57, 0  ;;  %vm3164_vm1 = vcmp.eq.s32.totalorder %v9062_v57, 2  ;;  %vm3181_vm2 = vcmp.eq.s32.totalorder %v9062_v57, 3 }
 0x374   :  { %v3108_v2 = vsel %vm3107_vm13, %v3105_v11, 0.0  ;;  %vm3198_vm3 = vcmp.eq.s32.totalorder %v9062_v57, 4  ;;  %vm3215_vm4 = vcmp.eq.s32.totalorder %v9062_v57, 5 }
 0x375   :  { %v3111_v28 = vadd.f32 %v3110_v29, %v3108_v2 }
 0x377   :  { %v3112_v16 = vrot.slane %v3111_v28, 4 }
 0x379   :  { %v3113_v21 = vadd.f32 %v3112_v16, %v3111_v28 }
 0x37b   :  { %v3114_v49 = vrot.slane %v3113_v21, 2 }
 0x37d   :  { %v3115_v12 = vadd.f32 %v3114_v49, %v3113_v21 }
 0x37f   :  { %v3116_v48 = vrot.slane %v3115_v12, 1 }
 0x381   :  { %v3117_v30 = vadd.f32 %v3116_v48, %v3115_v12 }
 0x383   :  { %3151 = vrot.lane.b32.xlu1 %v3117_v30, %s3767_s0  ;;  %3134 = vrot.lane.b32.xlu0 %v3117_v30, %s3768_s10  ;;  %v3119_v42 = vsel %vm3118_vm0, %v3117_v30, 0.0 }
 0x387   :  { %3185 = vrot.lane.b32.xlu1 %v3117_v30, %s3769_s19  ;;  %3168 = vrot.lane.b32.xlu0 %v3117_v30, %s3770_s2 }
 0x38b   :  { %3202 = vrot.lane.b32.xlu0 %v3117_v30, %s3771_s28 }
 0x3ab   :  { %3120 = vadd.xlane.f32.xlu1 %v3119_v42 }
 0x3f5   :  { %v3152_v41 = vpop.permute.xlu1 %3151  ;;  %v3135_v24 = vpop.permute.xlu0 %3134 }
 0x3f6   :  { %v3137_v58 = vsel %vm3118_vm0, %v3135_v24, 0.0  ;;  %v3154_v56 = vsel %vm3118_vm0, %v3152_v41, 0.0 }
 0x3f7   :  { %3138 = vadd.xlane.f32.xlu0 %v3137_v58 }
 0x3f9   :  { %v3169_v15 = vpop.permute.xlu0 %3168  ;;  %v3186_v23 = vpop.permute.xlu1 %3185 }
 0x3fa   :  { %v3171_v8 = vsel %vm3118_vm0, %v3169_v15, 0.0  ;;  %v3188_v13 = vsel %vm3118_vm0, %v3186_v23, 0.0 }
 0x3fb   :  { %3155 = vadd.xlane.f32.xlu0 %v3154_v56  ;;  %3172 = vadd.xlane.f32.xlu1 %v3171_v8 }
 0x3fd   :  { %v3203_v45 = vpop.permute.xlu0 %3202 }
 0x3fe   :  { %v3205_v53 = vsel %vm3118_vm0, %v3203_v45, 0.0 }
 0x3ff   :  { %3189 = vadd.xlane.f32.xlu0 %v3188_v13  ;;  %3206 = vadd.xlane.f32.xlu1 %v3205_v53 }
 0x438   :  { %v3121_v54 = vpop.xlane.xlu1 %3120 }
 0x439   :  { %v3122_v25 = vrot.slane %v3121_v54, 4 }
 0x43b   :  { %v3123_v27 = vadd.f32 %v3122_v25, %v3121_v54 }
 0x43d   :  { %v3124_v51 = vrot.slane %v3123_v27, 2 }
 0x43f   :  { %v3125_v19 = vadd.f32 %v3124_v51, %v3123_v27 }
 0x441   :  { %v3126_v6 = vrot.slane %v3125_v19, 1 }
 0x443   :  { %v3127_v7 = vadd.f32 %v3126_v6, %v3125_v19 }
 0x445   :  { %3647 = vpush %v3127_v7 }
 0x476   :  { %s3648_s11 = spop %3647 }
 0x477   :  { %v3130_v29 = vstv %s3648_s11 }
 0x478   :  { %v3131_v28 = vsel %vm3129_vm15, %v3130_v29, 0.0 }
 0x484   :  { %v3139_v26 = vpop.xlane.xlu0 %3138 }
 0x485   :  { %v3140_v50 = vrot.slane %v3139_v26, 4 }
 0x487   :  { %v3141_v46 = vadd.f32 %v3140_v50, %v3139_v26 }
 0x488   :  { %v3156_v63 = vpop.xlane.xlu0 %3155  ;;  %v3173_v39 = vpop.xlane.xlu1 %3172 }
 0x489   :  { %v3142_v4 = vrot.slane %v3141_v46, 2  ;;  %v3157_v60 = vrot.slane %v3156_v63, 4  ;;  %v3174_v17 = vrot.slane %v3173_v39, 4 }
 0x48b   :  { %v3158_v0 = vadd.f32 %v3157_v60, %v3156_v63  ;;  %v3175_v33 = vadd.f32 %v3174_v17, %v3173_v39  ;;  %v3143_v36 = vadd.f32 %v3142_v4, %v3141_v46 }
 0x48c   :  { %v3190_v3 = vpop.xlane.xlu0 %3189  ;;  %v3207_v1 = vpop.xlane.xlu1 %3206 }
 0x48d   :  { %v3159_v61 = vrot.slane %v3158_v0, 2  ;;  %v3176_v10 = vrot.slane %v3175_v33, 2  ;;  %v3191_v5 = vrot.slane %v3190_v3, 4  ;;  %v3208_v38 = vrot.slane %v3207_v1, 4 }
 0x48e   :  { %v3144_v47 = vrot.slane %v3143_v36, 1 }
 0x48f   :  { %v3192_v31 = vadd.f32 %v3191_v5, %v3190_v3  ;;  %v3209_v40 = vadd.f32 %v3208_v38, %v3207_v1  ;;  %v3160_v43 = vadd.f32 %v3159_v61, %v3158_v0  ;;  %v3177_v44 = vadd.f32 %v3176_v10, %v3175_v33 }
 0x490   :  { %v3145_v9 = vadd.f32 %v3144_v47, %v3143_v36 }
 0x491   :  { %v3193_v32 = vrot.slane %v3192_v31, 2  ;;  %v3210_v18 = vrot.slane %v3209_v40, 2  ;;  %v3161_v34 = vrot.slane %v3160_v43, 1  ;;  %v3178_v22 = vrot.slane %v3177_v44, 1 }
 0x492   :  { %3649 = vpush %v3145_v9 }
 0x493   :  { %v3194_v35 = vadd.f32 %v3193_v32, %v3192_v31  ;;  %v3211_v37 = vadd.f32 %v3210_v18, %v3209_v40  ;;  %v3162_v20 = vadd.f32 %v3161_v34, %v3160_v43  ;;  %v3179_v62 = vadd.f32 %v3178_v22, %v3177_v44 }
 0x495   :  { %3651 = vpush %v3162_v20  ;;  %v3195_v14 = vrot.slane %v3194_v35, 1  ;;  %v3212_v52 = vrot.slane %v3211_v37, 1 }
 0x496   :  { %3653 = vpush %v3179_v62 }
 0x497   :  { %v3196_v55 = vadd.f32 %v3195_v14, %v3194_v35  ;;  %v3213_v59 = vadd.f32 %v3212_v52, %v3211_v37 }
 0x499   :  { %3655 = vpush %v3196_v55 }
 0x49a   :  { %3657 = vpush %v3213_v59 }
 0x4c3   :  { %s3650_s8 = spop %3649 }
 0x4c4   :  { %v3148_v11 = vstv %s3650_s8 }
 0x4c5   :  { %v3149_v2 = vsel %vm3147_vm14, %v3148_v11, 0.0 }
 0x4c6   :  { %s3652_s20 = spop %3651  ;;  %v3150_v16 = vadd.f32 %v3149_v2, %v3131_v28 }
 0x4c7   :  { %v3165_v21 = vstv %s3652_s20  ;;  %s3654_s25 = spop %3653 }
 0x4c8   :  { %v3166_v49 = vsel %vm3164_vm1, %v3165_v21, 0.0  ;;  %v3182_v12 = vstv %s3654_s25 }
 0x4c9   :  { %v3167_v48 = vadd.f32 %v3166_v49, %v3150_v16  ;;  %v3183_v30 = vsel %vm3181_vm2, %v3182_v12, 0.0 }
 0x4ca   :  { %s3656_s17 = spop %3655 }
 0x4cb   :  { %v3184_v42 = vadd.f32 %v3183_v30, %v3167_v48  ;;  %v3199_v41 = vstv %s3656_s17  ;;  %s3658_s21 = spop %3657 }
 0x4cc   :  { %v3200_v24 = vsel %vm3198_vm3, %v3199_v41, 0.0  ;;  %v3216_v58 = vstv %s3658_s21 }
 0x4cd   :  { %v3201_v15 = vadd.f32 %v3200_v24, %v3184_v42  ;;  %v3217_v56 = vsel %vm3215_vm4, %v3216_v58, 0.0 }
 0x4cf   :  { %v3218_v8 = vadd.f32 %v3217_v56, %v3201_v15 }
 0x4d1   :  { %3219 = vst [vmem:[#allocation11] sm:$0x1] %v3218_v8 }
 0x4d2   :  { %3739 = shalt.err (!%p3736_p10)
}
 0x4d3   :  { %s9063_s18 = sld [smem:[#allocation272_spill]] }
 0x4d9   :  { %s3740_s7 = scalar_lea.hbm %s9063_s18, 16 }
 0x4da   :  { %p3741_p11 = scmp.ne.s32.totalorder %s9063_s18, %s3740_s7  ;;  %p3744_p12 = scmp.lt.u32.totalorder %s3740_s7, %s9063_s18 }
 0x4dc   :  { %p3746_p13 = pnand %p3744_p12, %p3741_p11 }
 0x4de   :  { %3749 = shalt.err (!%p3746_p13)
}
 0x4df   :  { %3229 = dma.vmem_to_hbm [thread:$0]  %s3227_s27, 16, %s9063_s18, [#allocation4]  }
 0x4e0   :  { %3756 = dma.done.wait [#allocation4], 16  }
 0x4e1   :  { %3757 = vsyncadd [#allocation4], 4294967280 }
 0x4e2   :  { %3233 = vsyncpa [#allocation4], 1 }
 0x4e3   :  { %3234 = vsyncpa [#allocation5], 1 }
 0x4e4   :  { %3235 = vsyncpa [#allocation7], 1 }
 0x4e5   :  { %3236 = vsyncpa [#allocation10], 1 }

</bundles_post_ra>
